<compile_context>
chip_gen: v6e
topology: v6e:2x2x1
jax: 0.10.0
libtpu: 0.0.40
codegen_flags: <defaults>
</compile_context>

<pallas_src>
import functools

import jax
import jax.numpy as jnp
import numpy as np
from jax import lax
from jax.experimental import pallas as pl
from jax.experimental.pallas import tpu as pltpu

LANE = 128


def _round_up(x, m):
    return (x + m - 1) // m * m


# ----------------------------------------------------------------------------
# Kernels (grid = (N,), one padded image per step).
# ----------------------------------------------------------------------------
def _conv1_stats_kernel(x_ref, w1_ref, t1_ref, st_ref):
    # conv1 (1x1, bias=False) + BN1 partial statistics (single-pass sum/sumsq).
    # x arrives already in bf16 (cast in the layout glue) -> no in-kernel cast.
    t1 = jnp.dot(x_ref[...], w1_ref[...], preferred_element_type=jnp.float32)
    t1_ref[...] = t1.astype(jnp.bfloat16)
    st_ref[...] = jnp.concatenate(
        [jnp.sum(t1, axis=0, keepdims=True),
         jnp.sum(t1 * t1, axis=0, keepdims=True)], axis=0)      # (2, Pp)


def _bn1_conv2_stats_kernel(t1_ref, sc_ref, sh_ref, m_ref, w2_ref,
                            t2_ref, st_ref, *, Wp):
    # BN1 (precomputed scale/shift) + ReLU, then the 3x3 / pad=1 conv as nine
    # accumulated MXU matmuls.  Instead of materializing an (R, 9*Pp) im2col
    # block (9x the activation footprint + 9 vst-slot copies), keep ONE bf16
    # copy of the activations, do one (R,Pp)@(Pp,Pp) matmul per tap and roll
    # the f32 *result* by the tap offset before accumulating:
    #   t2[r] = sum_tap h1[r + s_tap] @ W_tap = sum_tap roll(h1 @ W_tap, -s_tap)[r]
    # Zero padding is part of the layout, so no boundary masks; roll wraparound
    # only pollutes pad/alignment rows, which are masked out of the statistics
    # and sliced off by the wrapper.
    m = m_ref[...]
    h1 = jnp.maximum(
        t1_ref[...].astype(jnp.float32) * sc_ref[...] + sh_ref[...], 0.0)
    h1 = (h1 * m).astype(jnp.bfloat16)   # single cast; pad ring zeroed
    R = h1.shape[0]
    acc = None
    tap = 0
    for dy in (-1, 0, 1):
        for dx in (-1, 0, 1):
            s = dy * Wp + dx             # output row r reads input row r + s
            p = jnp.dot(h1, w2_ref[tap], preferred_element_type=jnp.float32)
            p = p if s == 0 else pltpu.roll(p, (-s) % R, 0)
            acc = p if acc is None else acc + p
            tap += 1
    t2 = acc
    t2_ref[...] = t2.astype(jnp.bfloat16)
    t2m = t2 * m                         # keep pad rows out of the statistics
    st_ref[...] = jnp.concatenate(
        [jnp.sum(t2m, axis=0, keepdims=True),
         jnp.sum(t2m * t2, axis=0, keepdims=True)], axis=0)


def _bn2_conv3_stats_kernel(t2_ref, sc_ref, sh_ref, m_ref, w3_ref,
                            t3_ref, st_ref):
    # BN2 + ReLU, conv3 (1x1) + BN3 partial statistics.  t3 goes back to HBM
    # in bf16 (pass 4 is pure elementwise / HBM-bound); the f32 accumulator
    # stays in-register for the statistics.
    m = m_ref[...]
    h2 = jnp.maximum(
        t2_ref[...].astype(jnp.float32) * sc_ref[...] + sh_ref[...], 0.0)
    t3 = jnp.dot(h2.astype(jnp.bfloat16), w3_ref[...],
                 preferred_element_type=jnp.float32)            # (R, Cp) f32
    t3_ref[...] = t3.astype(jnp.bfloat16)
    t3m = t3 * m
    st_ref[...] = jnp.concatenate(
        [jnp.sum(t3m, axis=0, keepdims=True),
         jnp.sum(t3m * t3, axis=0, keepdims=True)], axis=0)


def _bn3_residual_kernel(t3_ref, x_ref, sc_ref, sh_ref, o_ref):
    # BN3 + residual add (downsample=None) + ReLU.  bf16 streams, f32 math.
    o_ref[...] = jnp.maximum(
        t3_ref[...].astype(jnp.float32) * sc_ref[...] + sh_ref[...]
        + x_ref[...].astype(jnp.float32), 0.0)


# ----------------------------------------------------------------------------
# Wrapper-side tiny BN reduction: partial (N, 2, C) -> fused scale/shift.
# ----------------------------------------------------------------------------
def _bn_scale_shift(partials, gamma, beta, count, eps):
    s = jnp.sum(partials[:, 0, :], axis=0)
    s2 = jnp.sum(partials[:, 1, :], axis=0)
    mean = s / count
    var = jnp.maximum(s2 / count - mean * mean, 0.0)   # biased, as BN training
    scale = gamma * lax.rsqrt(var + eps)
    shift = beta - mean * scale
    return scale[None, :], shift[None, :]              # (1, Cpad) f32 each


def _vmem_limit_bytes(R, Cp, Pp):
    """Derive the VMEM request from the worst pass (double-buffered IO blocks,
    VMEM-resident weights, in-kernel f32 temporaries) instead of a blanket
    constant, clamped to [16 MiB, 48 MiB] so it stays inside v7x's 64 MiB per
    TensorCore with headroom (and trivially inside 128 MiB on v5e/v6e)."""
    bf, f = 2, 4
    blk_p, blk_c = R * Pp, R * Cp
    p1 = 2 * blk_c * bf + 2 * blk_p * bf + 2 * Cp * Pp * bf + 2 * blk_p * f
    p2 = 2 * blk_p * bf + 2 * blk_p * bf + 2 * 9 * Pp * Pp * bf + 6 * blk_p * f
    p3 = (2 * blk_p * bf + 2 * blk_c * bf + 2 * Pp * Cp * bf
          + 2 * blk_p * f + 2 * blk_c * f)
    p4 = 2 * blk_c * bf * 2 + 2 * blk_c * f + 2 * blk_c * f
    need = max(p1, p2, p3, p4)
    return int(min(max(2 * need + (4 << 20), 16 << 20), 48 << 20))


# ----------------------------------------------------------------------------
# Forward.
# ----------------------------------------------------------------------------
def bottleneck_forward(x_nchw, params, *, eps=1e-5):
    w1, g1, b1, w2, g2, b2, w3, g3, b3 = params
    N, Cin, H, W = x_nchw.shape
    P = w1.shape[1]
    Cout = w3.shape[1]
    assert Cout == Cin, "downsample=None requires inplanes == planes * expansion"

    Cp = _round_up(Cin, LANE)
    Pp = _round_up(P, LANE)
    Hp, Wp = H + 2, W + 2
    R = _round_up(Hp * Wp, 16)           # bf16/f32 sublane-tile aligned
    count = float(N * H * W)             # BN stats are over valid pixels only
    f32, bf16 = jnp.float32, jnp.bfloat16

    # ---- layout glue (plain JAX): NCHW -> padded channels-last bf16 rows ----
    x_nhwc = jnp.transpose(x_nchw, (0, 2, 3, 1)).astype(f32)
    xp = jnp.pad(x_nhwc, ((0, 0), (1, 1), (1, 1), (0, Cp - Cin)))
    xp = jnp.pad(xp.reshape(N, Hp * Wp, Cp), ((0, 0), (0, R - Hp * Wp), (0, 0)))
    xp = xp.astype(bf16)                 # halves x DMA in passes 1 and 4

    w1p = jnp.pad(w1, ((0, Cp - Cin), (0, Pp - P))).astype(bf16)       # (Cp,Pp)
    w2r = jnp.pad(w2, ((0, 0), (0, 0), (0, Pp - P), (0, Pp - P)))
    w2r = w2r.reshape(9, Pp, Pp).astype(bf16)                          # per-tap
    w3p = jnp.pad(w3, ((0, Pp - P), (0, Cp - Cout))).astype(bf16)      # (Pp,Cp)

    def pad_vec(v, cpad):
        return jnp.pad(v.reshape(-1).astype(f32), (0, cpad - v.size))
    g1p, b1p = pad_vec(g1, Pp), pad_vec(b1, Pp)
    g2p, b2p = pad_vec(g2, Pp), pad_vec(b2, Pp)
    g3p, b3p = pad_vec(g3, Cp), pad_vec(b3, Cp)

    mask = jnp.zeros((Hp, Wp), f32).at[1:H + 1, 1:W + 1].set(1.0)
    mask = jnp.pad(mask.reshape(Hp * Wp, 1), ((0, R - Hp * Wp), (0, 0)))  # (R,1)

    # ---- BlockSpecs ----------------------------------------------------------
    def img_spec(c):                        # one padded image per grid step
        return pl.BlockSpec((None, R, c), lambda n: (n, 0, 0))

    def stat_spec(c):                       # per-image partial statistics
        return pl.BlockSpec((None, 2, c), lambda n: (n, 0, 0))

    def const_spec(shape):                  # weights / BN vectors: VMEM-resident
        nd = len(shape)
        return pl.BlockSpec(shape, lambda n, nd=nd: (0,) * nd)
    # TODO(synk): single-buffer the constant weight specs (pl.Buffered(1)) and
    # add a parallel R-chunk grid axis (with a Wp+1 halo for pass 2) once
    # feature maps / batch make it worthwhile on v7x.

    cparams = pltpu.CompilerParams(
        dimension_semantics=("parallel",),  # megacore split over images (v7x)
        vmem_limit_bytes=_vmem_limit_bytes(R, Cp, Pp),
    )

    # ---- pass 1: conv1 (1x1) + BN1 partial stats -----------------------------
    t1, st1 = pl.pallas_call(
        _conv1_stats_kernel,
        grid=(N,),
        in_specs=[img_spec(Cp), const_spec((Cp, Pp))],
        out_specs=[img_spec(Pp), stat_spec(Pp)],
        out_shape=[jax.ShapeDtypeStruct((N, R, Pp), bf16),
                   jax.ShapeDtypeStruct((N, 2, Pp), f32)],
        compiler_params=cparams,
    )(xp, w1p)
    sc1, sh1 = _bn_scale_shift(st1, g1p, b1p, count, eps)

    # ---- pass 2: BN1+ReLU, conv2 (3x3 as 9 accumulated matmuls) + BN2 stats --
    t2, st2 = pl.pallas_call(
        functools.partial(_bn1_conv2_stats_kernel, Wp=Wp),
        grid=(N,),
        in_specs=[img_spec(Pp), const_spec((1, Pp)), const_spec((1, Pp)),
                  const_spec((R, 1)), const_spec((9, Pp, Pp))],
        out_specs=[img_spec(Pp), stat_spec(Pp)],
        out_shape=[jax.ShapeDtypeStruct((N, R, Pp), bf16),
                   jax.ShapeDtypeStruct((N, 2, Pp), f32)],
        compiler_params=cparams,
    )(t1, sc1, sh1, mask, w2r)
    sc2, sh2 = _bn_scale_shift(st2, g2p, b2p, count, eps)

    # ---- pass 3: BN2+ReLU, conv3 (1x1) + BN3 stats (bf16 writeback) ----------
    t3, st3 = pl.pallas_call(
        _bn2_conv3_stats_kernel,
        grid=(N,),
        in_specs=[img_spec(Pp), const_spec((1, Pp)), const_spec((1, Pp)),
                  const_spec((R, 1)), const_spec((Pp, Cp))],
        out_specs=[img_spec(Cp), stat_spec(Cp)],
        out_shape=[jax.ShapeDtypeStruct((N, R, Cp), bf16),
                   jax.ShapeDtypeStruct((N, 2, Cp), f32)],
        compiler_params=cparams,
    )(t2, sc2, sh2, mask, w3p)
    sc3, sh3 = _bn_scale_shift(st3, g3p, b3p, count, eps)

    # ---- pass 4: BN3 + residual add + ReLU (bf16 reads, f32 math/out) --------
    outp = pl.pallas_call(
        _bn3_residual_kernel,
        grid=(N,),
        in_specs=[img_spec(Cp), img_spec(Cp),
                  const_spec((1, Cp)), const_spec((1, Cp))],
        out_specs=img_spec(Cp),
        out_shape=jax.ShapeDtypeStruct((N, R, Cp), f32),
        compiler_params=cparams,
    )(t3, xp, sc3, sh3)

    # ---- un-pad: rows -> NHWC -> NCHW ----------------------------------------
    out = outp[:, :Hp * Wp, :].reshape(N, Hp, Wp, Cp)
    out = out[:, 1:H + 1, 1:W + 1, :Cout]
    return jnp.transpose(out, (0, 3, 1, 2))


# ----------------------------------------------------------------------------
# Parameters and pure-JAX reference.
# ----------------------------------------------------------------------------
def init_params(key, inplanes, planes, expansion=4):
    """Deterministic stand-in for the module's __init__ (shapes match)."""
    ks = jax.random.split(key, 9)

    def conv_w(k, shape, fan_in):
        return jax.random.normal(k, shape, jnp.float32) * (2.0 / fan_in) ** 0.5

    w1 = conv_w(ks[0], (inplanes, planes), inplanes)              # conv1x1 (Cin,P)
    w2 = conv_w(ks[1], (3, 3, planes, planes), 9 * planes)        # conv3x3 HWIO
    w3 = conv_w(ks[2], (planes, planes * expansion), planes)      # conv1x1 (P,4P)

    def bn_params(kg, kb, c):
        gamma = 1.0 + 0.1 * jax.random.normal(kg, (1, c), jnp.float32)
        beta = 0.1 * jax.random.normal(kb, (1, c), jnp.float32)
        return gamma, beta

    g1, b1 = bn_params(ks[3], ks[4], planes)
    g2, b2 = bn_params(ks[5], ks[6], planes)
    g3, b3 = bn_params(ks[7], ks[8], planes * expansion)
    return (w1, g1, b1, w2, g2, b2, w3, g3, b3)


def bottleneck_reference(x_nchw, params, *, eps=1e-5):
    """Pure-JAX f32 reference (lax convs) for correctness checking."""
    w1, g1, b1, w2, g2, b2, w3, g3, b3 = params
    x = jnp.transpose(x_nchw, (0, 2, 3, 1))                       # NHWC
    dn = ('NHWC', 'HWIO', 'NHWC')

    def bn(h, g, b, relu=True):
        mu = jnp.mean(h, axis=(0, 1, 2), keepdims=True)
        var = jnp.mean(jnp.square(h - mu), axis=(0, 1, 2), keepdims=True)
        y = (h - mu) * lax.rsqrt(var + eps) * g.reshape(1, 1, 1, -1) \
            + b.reshape(1, 1, 1, -1)
        return jnp.maximum(y, 0.0) if relu else y

    h = lax.conv_general_dilated(x, w1[None, None], (1, 1), 'VALID',
                                 dimension_numbers=dn)
    h = bn(h, g1, b1)
    h = lax.conv_general_dilated(h, w2, (1, 1), ((1, 1), (1, 1)),
                                 dimension_numbers=dn)
    h = bn(h, g2, b2)
    h = lax.conv_general_dilated(h, w3[None, None], (1, 1), 'VALID',
                                 dimension_numbers=dn)
    h = bn(h, g3, b3, relu=False)
    out = jnp.maximum(h + x, 0.0)
    return jnp.transpose(out, (0, 3, 1, 2))


if __name__ == "__main__":
    key = jax.random.PRNGKey(0)
    kx, kp = jax.random.split(key)

    N, H, W = 2, 16, 16
    planes = 4
    inplanes = planes * 4   # = 16; required so the residual add is well-formed

    x = jax.random.normal(kx, (N, inplanes, H, W), jnp.float32)   # NCHW
    params = init_params(kp, inplanes, planes)

    fwd = jax.jit(bottleneck_forward)
    out = jax.block_until_ready(fwd(x, params))

    ref = bottleneck_reference(x, params)
    assert out.shape == (N, inplanes, H, W)
    # bf16 activation streams (f32 accumulation, f32 BN statistics) -> widened tol.
    np.testing.assert_allclose(np.asarray(out), np.asarray(ref),
                               rtol=5e-2, atol=5e-2)
    print("KERNEL_OK")
</pallas_src>

<mosaic_0001>
module attributes {stable_mosaic.version = 11 : i64} {
  func.func @_conv1_stats_kernel(%arg0: i32, %arg1: memref<1x336x128xbf16, #tpu.memory_space<vmem>>, %arg2: memref<128x128xbf16, #tpu.memory_space<vmem>>, %arg3: memref<1x336x128xbf16, #tpu.memory_space<vmem>>, %arg4: memref<1x2x128xf32, #tpu.memory_space<vmem>>) attributes {dimension_semantics = [#tpu.dimension_semantics<parallel>], iteration_bounds = array<i64: 2>, scalar_prefetch = 0 : i64, scratch_operands = 0 : i64, tpu.core_type = #tpu.core_type<tc>, window_params = [{transform_indices = @transform_0, window_bounds = array<i64: 1, 336, 128>}, {pipeline_mode = #tpu.pipeline_mode<synchronous>, transform_indices = @transform_1, window_bounds = array<i64: 128, 128>}, {transform_indices = @transform_2, window_bounds = array<i64: 1, 336, 128>}, {transform_indices = @transform_3, window_bounds = array<i64: 1, 2, 128>}]} {
    %c0 = arith.constant 0 : index
    %c0_0 = arith.constant 0 : index
    %c0_1 = arith.constant 0 : index
    %0 = vector.load %arg1[%c0, %c0_0, %c0_1] : memref<1x336x128xbf16, #tpu.memory_space<vmem>>, vector<1x336x128xbf16>
    %1 = vector.shape_cast %0 : vector<1x336x128xbf16> to vector<336x128xbf16>
    %c0_2 = arith.constant 0 : index
    %c0_3 = arith.constant 0 : index
    %2 = vector.load %arg2[%c0_2, %c0_3] : memref<128x128xbf16, #tpu.memory_space<vmem>>, vector<128x128xbf16>
    %cst = arith.constant dense<0.000000e+00> : vector<336x128xf32>
    %3 = tpu.matmul %1, %2, %cst {dimension_numbers = #tpu.dot_dimension_numbers<[1], [0], [0], [1], [0, 0, 1, 1], [], []>} : vector<336x128xbf16>, vector<128x128xbf16>, vector<336x128xf32> -> vector<336x128xf32>
    %4 = arith.truncf %3 : vector<336x128xf32> to vector<336x128xbf16>
    %c0_4 = arith.constant 0 : index
    %c0_5 = arith.constant 0 : index
    %c0_6 = arith.constant 0 : index
    %5 = vector.load %arg3[%c0_4, %c0_5, %c0_6] : memref<1x336x128xbf16, #tpu.memory_space<vmem>>, vector<1x336x128xbf16>
    %6 = vector.shape_cast %5 : vector<1x336x128xbf16> to vector<336x128xbf16>
    %7 = vector.shape_cast %4 : vector<336x128xbf16> to vector<1x336x128xbf16>
    tpu.vector_store %arg3[%c0_4, %c0_5, %c0_6], %7 {strides = array<i32>} : memref<1x336x128xbf16, #tpu.memory_space<vmem>>, vector<1x336x128xbf16>,
    %cst_7 = arith.constant dense<0.000000e+00> : vector<128xf32>
    %8 = vector.multi_reduction <add>, %3, %cst_7 [0] : vector<336x128xf32> to vector<128xf32>
    %9 = vector.shape_cast %8 : vector<128xf32> to vector<1x128xf32>
    %10 = arith.mulf %3, %3 : vector<336x128xf32>
    %cst_8 = arith.constant dense<0.000000e+00> : vector<128xf32>
    %11 = vector.multi_reduction <add>, %10, %cst_8 [0] : vector<336x128xf32> to vector<128xf32>
    %12 = vector.shape_cast %11 : vector<128xf32> to vector<1x128xf32>
    %13 = tpu.concatenate %9, %12 in 0 : vector<1x128xf32>, vector<1x128xf32> -> vector<2x128xf32>
    %c0_9 = arith.constant 0 : index
    %c0_10 = arith.constant 0 : index
    %c0_11 = arith.constant 0 : index
    %14 = vector.load %arg4[%c0_9, %c0_10, %c0_11] : memref<1x2x128xf32, #tpu.memory_space<vmem>>, vector<1x2x128xf32>
    %15 = vector.shape_cast %14 : vector<1x2x128xf32> to vector<2x128xf32>
    %16 = vector.shape_cast %13 : vector<2x128xf32> to vector<1x2x128xf32>
    tpu.vector_store %arg4[%c0_9, %c0_10, %c0_11], %16 {strides = array<i32>} : memref<1x2x128xf32, #tpu.memory_space<vmem>>, vector<1x2x128xf32>,
    return
  }
  func.func @transform_0(%arg0: i32) -> (i32, i32, i32) {
    %c0_i32 = arith.constant 0 : i32
    %c0_i32_0 = arith.constant 0 : i32
    %c0_i32_1 = arith.constant 0 : i32
    return %arg0, %c0_i32, %c0_i32_0 : i32, i32, i32
  }
  func.func @transform_1(%arg0: i32) -> (i32, i32) {
    %c0_i32 = arith.constant 0 : i32
    %c0_i32_0 = arith.constant 0 : i32
    %c0_i32_1 = arith.constant 0 : i32
    return %c0_i32, %c0_i32_0 : i32, i32
  }
  func.func @transform_2(%arg0: i32) -> (i32, i32, i32) {
    %c0_i32 = arith.constant 0 : i32
    %c0_i32_0 = arith.constant 0 : i32
    %c0_i32_1 = arith.constant 0 : i32
    return %arg0, %c0_i32, %c0_i32_0 : i32, i32, i32
  }
  func.func @transform_3(%arg0: i32) -> (i32, i32, i32) {
    %c0_i32 = arith.constant 0 : i32
    %c0_i32_0 = arith.constant 0 : i32
    %c0_i32_1 = arith.constant 0 : i32
    return %arg0, %c0_i32, %c0_i32_0 : i32, i32, i32
  }
}

module attributes {stable_mosaic.version = 11 : i64} {
  func.func @_bn1_conv2_stats_kernel(%arg0: i32, %arg1: memref<1x336x128xbf16, #tpu.memory_space<vmem>>, %arg2: memref<1x128xf32, #tpu.memory_space<vmem>>, %arg3: memref<1x128xf32, #tpu.memory_space<vmem>>, %arg4: memref<336x1xf32, #tpu.memory_space<vmem>>, %arg5: memref<9x128x128xbf16, #tpu.memory_space<vmem>>, %arg6: memref<1x336x128xbf16, #tpu.memory_space<vmem>>, %arg7: memref<1x2x128xf32, #tpu.memory_space<vmem>>) attributes {dimension_semantics = [#tpu.dimension_semantics<parallel>], iteration_bounds = array<i64: 2>, scalar_prefetch = 0 : i64, scratch_operands = 0 : i64, tpu.core_type = #tpu.core_type<tc>, window_params = [{transform_indices = @transform_0, window_bounds = array<i64: 1, 336, 128>}, {pipeline_mode = #tpu.pipeline_mode<synchronous>, transform_indices = @transform_1, window_bounds = array<i64: 1, 128>}, {pipeline_mode = #tpu.pipeline_mode<synchronous>, transform_indices = @transform_2, window_bounds = array<i64: 1, 128>}, {pipeline_mode = #tpu.pipeline_mode<synchronous>, transform_indices = @transform_3, window_bounds = array<i64: 336, 1>}, {pipeline_mode = #tpu.pipeline_mode<synchronous>, transform_indices = @transform_4, window_bounds = array<i64: 9, 128, 128>}, {transform_indices = @transform_5, window_bounds = array<i64: 1, 336, 128>}, {transform_indices = @transform_6, window_bounds = array<i64: 1, 2, 128>}]} {
    %c0 = arith.constant 0 : index
    %c0_0 = arith.constant 0 : index
    %0 = vector.load %arg4[%c0, %c0_0] : memref<336x1xf32, #tpu.memory_space<vmem>>, vector<336x1xf32>
    %c0_1 = arith.constant 0 : index
    %c0_2 = arith.constant 0 : index
    %c0_3 = arith.constant 0 : index
    %1 = vector.load %arg1[%c0_1, %c0_2, %c0_3] : memref<1x336x128xbf16, #tpu.memory_space<vmem>>, vector<1x336x128xbf16>
    %2 = vector.shape_cast %1 : vector<1x336x128xbf16> to vector<336x128xbf16>
    %3 = arith.extf %2 : vector<336x128xbf16> to vector<336x128xf32>
    %c0_4 = arith.constant 0 : index
    %c0_5 = arith.constant 0 : index
    %4 = vector.load %arg2[%c0_4, %c0_5] : memref<1x128xf32, #tpu.memory_space<vmem>>, vector<1x128xf32>
    %5 = vector.broadcast %4 : vector<1x128xf32> to vector<336x128xf32>
    %6 = arith.mulf %3, %5 : vector<336x128xf32>
    %c0_6 = arith.constant 0 : index
    %c0_7 = arith.constant 0 : index
    %7 = vector.load %arg3[%c0_6, %c0_7] : memref<1x128xf32, #tpu.memory_space<vmem>>, vector<1x128xf32>
    %8 = vector.broadcast %7 : vector<1x128xf32> to vector<336x128xf32>
    %9 = arith.addf %6, %8 : vector<336x128xf32>
    %cst = arith.constant 0.000000e+00 : f32
    %10 = vector.broadcast %cst : f32 to vector<336x128xf32>
    %11 = arith.maximumf %9, %10 : vector<336x128xf32>
    %12 = vector.broadcast %0 : vector<336x1xf32> to vector<336x128xf32>
    %13 = arith.mulf %11, %12 : vector<336x128xf32>
    %14 = arith.truncf %13 : vector<336x128xf32> to vector<336x128xbf16>
    %c0_8 = arith.constant 0 : index
    %c0_9 = arith.constant 0 : index
    %c0_10 = arith.constant 0 : index
    %15 = vector.load %arg5[%c0_8, %c0_9, %c0_10] : memref<9x128x128xbf16, #tpu.memory_space<vmem>>, vector<1x128x128xbf16>
    %16 = vector.shape_cast %15 : vector<1x128x128xbf16> to vector<128x128xbf16>
    %cst_11 = arith.constant dense<0.000000e+00> : vector<336x128xf32>
    %17 = tpu.matmul %14, %16, %cst_11 {dimension_numbers = #tpu.dot_dimension_numbers<[1], [0], [0], [1], [0, 0, 1, 1], [], []>} : vector<336x128xbf16>, vector<128x128xbf16>, vector<336x128xf32> -> vector<336x128xf32>
    %c19_i32 = arith.constant 19 : i32
    %18 = tpu.dynamic_rotate %17 by %c19_i32 dim 0 : vector<336x128xf32>, i32 -> vector<336x128xf32>
    %c1 = arith.constant 1 : index
    %c0_12 = arith.constant 0 : index
    %c0_13 = arith.constant 0 : index
    %19 = vector.load %arg5[%c1, %c0_12, %c0_13] : memref<9x128x128xbf16, #tpu.memory_space<vmem>>, vector<1x128x128xbf16>
    %20 = vector.shape_cast %19 : vector<1x128x128xbf16> to vector<128x128xbf16>
    %cst_14 = arith.constant dense<0.000000e+00> : vector<336x128xf32>
    %21 = tpu.matmul %14, %20, %cst_14 {dimension_numbers = #tpu.dot_dimension_numbers<[1], [0], [0], [1], [0, 0, 1, 1], [], []>} : vector<336x128xbf16>, vector<128x128xbf16>, vector<336x128xf32> -> vector<336x128xf32>
    %c18_i32 = arith.constant 18 : i32
    %22 = tpu.dynamic_rotate %21 by %c18_i32 dim 0 : vector<336x128xf32>, i32 -> vector<336x128xf32>
    %23 = arith.addf %18, %22 : vector<336x128xf32>
    %c2 = arith.constant 2 : index
    %c0_15 = arith.constant 0 : index
    %c0_16 = arith.constant 0 : index
    %24 = vector.load %arg5[%c2, %c0_15, %c0_16] : memref<9x128x128xbf16, #tpu.memory_space<vmem>>, vector<1x128x128xbf16>
    %25 = vector.shape_cast %24 : vector<1x128x128xbf16> to vector<128x128xbf16>
    %cst_17 = arith.constant dense<0.000000e+00> : vector<336x128xf32>
    %26 = tpu.matmul %14, %25, %cst_17 {dimension_numbers = #tpu.dot_dimension_numbers<[1], [0], [0], [1], [0, 0, 1, 1], [], []>} : vector<336x128xbf16>, vector<128x128xbf16>, vector<336x128xf32> -> vector<336x128xf32>
    %c17_i32 = arith.constant 17 : i32
    %27 = tpu.dynamic_rotate %26 by %c17_i32 dim 0 : vector<336x128xf32>, i32 -> vector<336x128xf32>
    %28 = arith.addf %23, %27 : vector<336x128xf32>
    %c3 = arith.constant 3 : index
    %c0_18 = arith.constant 0 : index
    %c0_19 = arith.constant 0 : index
    %29 = vector.load %arg5[%c3, %c0_18, %c0_19] : memref<9x128x128xbf16, #tpu.memory_space<vmem>>, vector<1x128x128xbf16>
    %30 = vector.shape_cast %29 : vector<1x128x128xbf16> to vector<128x128xbf16>
    %cst_20 = arith.constant dense<0.000000e+00> : vector<336x128xf32>
    %31 = tpu.matmul %14, %30, %cst_20 {dimension_numbers = #tpu.dot_dimension_numbers<[1], [0], [0], [1], [0, 0, 1, 1], [], []>} : vector<336x128xbf16>, vector<128x128xbf16>, vector<336x128xf32> -> vector<336x128xf32>
    %c1_i32 = arith.constant 1 : i32
    %32 = tpu.dynamic_rotate %31 by %c1_i32 dim 0 : vector<336x128xf32>, i32 -> vector<336x128xf32>
    %33 = arith.addf %28, %32 : vector<336x128xf32>
    %c4 = arith.constant 4 : index
    %c0_21 = arith.constant 0 : index
    %c0_22 = arith.constant 0 : index
    %34 = vector.load %arg5[%c4, %c0_21, %c0_22] : memref<9x128x128xbf16, #tpu.memory_space<vmem>>, vector<1x128x128xbf16>
    %35 = vector.shape_cast %34 : vector<1x128x128xbf16> to vector<128x128xbf16>
    %cst_23 = arith.constant dense<0.000000e+00> : vector<336x128xf32>
    %36 = tpu.matmul %14, %35, %cst_23 {dimension_numbers = #tpu.dot_dimension_numbers<[1], [0], [0], [1], [0, 0, 1, 1], [], []>} : vector<336x128xbf16>, vector<128x128xbf16>, vector<336x128xf32> -> vector<336x128xf32>
    %37 = arith.addf %33, %36 : vector<336x128xf32>
    %c5 = arith.constant 5 : index
    %c0_24 = arith.constant 0 : index
    %c0_25 = arith.constant 0 : index
    %38 = vector.load %arg5[%c5, %c0_24, %c0_25] : memref<9x128x128xbf16, #tpu.memory_space<vmem>>, vector<1x128x128xbf16>
    %39 = vector.shape_cast %38 : vector<1x128x128xbf16> to vector<128x128xbf16>
    %cst_26 = arith.constant dense<0.000000e+00> : vector<336x128xf32>
    %40 = tpu.matmul %14, %39, %cst_26 {dimension_numbers = #tpu.dot_dimension_numbers<[1], [0], [0], [1], [0, 0, 1, 1], [], []>} : vector<336x128xbf16>, vector<128x128xbf16>, vector<336x128xf32> -> vector<336x128xf32>
    %c335_i32 = arith.constant 335 : i32
    %41 = tpu.dynamic_rotate %40 by %c335_i32 dim 0 : vector<336x128xf32>, i32 -> vector<336x128xf32>
    %42 = arith.addf %37, %41 : vector<336x128xf32>
    %c6 = arith.constant 6 : index
    %c0_27 = arith.constant 0 : index
    %c0_28 = arith.constant 0 : index
    %43 = vector.load %arg5[%c6, %c0_27, %c0_28] : memref<9x128x128xbf16, #tpu.memory_space<vmem>>, vector<1x128x128xbf16>
    %44 = vector.shape_cast %43 : vector<1x128x128xbf16> to vector<128x128xbf16>
    %cst_29 = arith.constant dense<0.000000e+00> : vector<336x128xf32>
    %45 = tpu.matmul %14, %44, %cst_29 {dimension_numbers = #tpu.dot_dimension_numbers<[1], [0], [0], [1], [0, 0, 1, 1], [], []>} : vector<336x128xbf16>, vector<128x128xbf16>, vector<336x128xf32> -> vector<336x128xf32>
    %c319_i32 = arith.constant 319 : i32
    %46 = tpu.dynamic_rotate %45 by %c319_i32 dim 0 : vector<336x128xf32>, i32 -> vector<336x128xf32>
    %47 = arith.addf %42, %46 : vector<336x128xf32>
    %c7 = arith.constant 7 : index
    %c0_30 = arith.constant 0 : index
    %c0_31 = arith.constant 0 : index
    %48 = vector.load %arg5[%c7, %c0_30, %c0_31] : memref<9x128x128xbf16, #tpu.memory_space<vmem>>, vector<1x128x128xbf16>
    %49 = vector.shape_cast %48 : vector<1x128x128xbf16> to vector<128x128xbf16>
    %cst_32 = arith.constant dense<0.000000e+00> : vector<336x128xf32>
    %50 = tpu.matmul %14, %49, %cst_32 {dimension_numbers = #tpu.dot_dimension_numbers<[1], [0], [0], [1], [0, 0, 1, 1], [], []>} : vector<336x128xbf16>, vector<128x128xbf16>, vector<336x128xf32> -> vector<336x128xf32>
    %c318_i32 = arith.constant 318 : i32
    %51 = tpu.dynamic_rotate %50 by %c318_i32 dim 0 : vector<336x128xf32>, i32 -> vector<336x128xf32>
    %52 = arith.addf %47, %51 : vector<336x128xf32>
    %c8 = arith.constant 8 : index
    %c0_33 = arith.constant 0 : index
    %c0_34 = arith.constant 0 : index
    %53 = vector.load %arg5[%c8, %c0_33, %c0_34] : memref<9x128x128xbf16, #tpu.memory_space<vmem>>, vector<1x128x128xbf16>
    %54 = vector.shape_cast %53 : vector<1x128x128xbf16> to vector<128x128xbf16>
    %cst_35 = arith.constant dense<0.000000e+00> : vector<336x128xf32>
    %55 = tpu.matmul %14, %54, %cst_35 {dimension_numbers = #tpu.dot_dimension_numbers<[1], [0], [0], [1], [0, 0, 1, 1], [], []>} : vector<336x128xbf16>, vector<128x128xbf16>, vector<336x128xf32> -> vector<336x128xf32>
    %c317_i32 = arith.constant 317 : i32
    %56 = tpu.dynamic_rotate %55 by %c317_i32 dim 0 : vector<336x128xf32>, i32 -> vector<336x128xf32>
    %57 = arith.addf %52, %56 : vector<336x128xf32>
    %58 = arith.truncf %57 : vector<336x128xf32> to vector<336x128xbf16>
    %c0_36 = arith.constant 0 : index
    %c0_37 = arith.constant 0 : index
    %c0_38 = arith.constant 0 : index
    %59 = vector.load %arg6[%c0_36, %c0_37, %c0_38] : memref<1x336x128xbf16, #tpu.memory_space<vmem>>, vector<1x336x128xbf16>
    %60 = vector.shape_cast %59 : vector<1x336x128xbf16> to vector<336x128xbf16>
    %61 = vector.shape_cast %58 : vector<336x128xbf16> to vector<1x336x128xbf16>
    tpu.vector_store %arg6[%c0_36, %c0_37, %c0_38], %61 {strides = array<i32>} : memref<1x336x128xbf16, #tpu.memory_space<vmem>>, vector<1x336x128xbf16>,
    %62 = vector.broadcast %0 : vector<336x1xf32> to vector<336x128xf32>
    %63 = arith.mulf %57, %62 : vector<336x128xf32>
    %cst_39 = arith.constant dense<0.000000e+00> : vector<128xf32>
    %64 = vector.multi_reduction <add>, %63, %cst_39 [0] : vector<336x128xf32> to vector<128xf32>
    %65 = vector.shape_cast %64 : vector<128xf32> to vector<1x128xf32>
    %66 = arith.mulf %63, %57 : vector<336x128xf32>
    %cst_40 = arith.constant dense<0.000000e+00> : vector<128xf32>
    %67 = vector.multi_reduction <add>, %66, %cst_40 [0] : vector<336x128xf32> to vector<128xf32>
    %68 = vector.shape_cast %67 : vector<128xf32> to vector<1x128xf32>
    %69 = tpu.concatenate %65, %68 in 0 : vector<1x128xf32>, vector<1x128xf32> -> vector<2x128xf32>
    %c0_41 = arith.constant 0 : index
    %c0_42 = arith.constant 0 : index
    %c0_43 = arith.constant 0 : index
    %70 = vector.load %arg7[%c0_41, %c0_42, %c0_43] : memref<1x2x128xf32, #tpu.memory_space<vmem>>, vector<1x2x128xf32>
    %71 = vector.shape_cast %70 : vector<1x2x128xf32> to vector<2x128xf32>
    %72 = vector.shape_cast %69 : vector<2x128xf32> to vector<1x2x128xf32>
    tpu.vector_store %arg7[%c0_41, %c0_42, %c0_43], %72 {strides = array<i32>} : memref<1x2x128xf32, #tpu.memory_space<vmem>>, vector<1x2x128xf32>,
    return
  }
  func.func @transform_0(%arg0: i32) -> (i32, i32, i32) {
    %c0_i32 = arith.constant 0 : i32
    %c0_i32_0 = arith.constant 0 : i32
    %c0_i32_1 = arith.constant 0 : i32
    return %arg0, %c0_i32, %c0_i32_0 : i32, i32, i32
  }
  func.func @transform_1(%arg0: i32) -> (i32, i32) {
    %c0_i32 = arith.constant 0 : i32
    %c0_i32_0 = arith.constant 0 : i32
    %c0_i32_1 = arith.constant 0 : i32
    return %c0_i32, %c0_i32_0 : i32, i32
  }
  func.func @transform_2(%arg0: i32) -> (i32, i32) {
    %c0_i32 = arith.constant 0 : i32
    %c0_i32_0 = arith.constant 0 : i32
    %c0_i32_1 = arith.constant 0 : i32
    return %c0_i32, %c0_i32_0 : i32, i32
  }
  func.func @transform_3(%arg0: i32) -> (i32, i32) {
    %c0_i32 = arith.constant 0 : i32
    %c0_i32_0 = arith.constant 0 : i32
    %c0_i32_1 = arith.constant 0 : i32
    return %c0_i32, %c0_i32_0 : i32, i32
  }
  func.func @transform_4(%arg0: i32) -> (i32, i32, i32) {
    %c0_i32 = arith.constant 0 : i32
    %c0_i32_0 = arith.constant 0 : i32
    %c0_i32_1 = arith.constant 0 : i32
    %c0_i32_2 = arith.constant 0 : i32
    return %c0_i32, %c0_i32_0, %c0_i32_1 : i32, i32, i32
  }
  func.func @transform_5(%arg0: i32) -> (i32, i32, i32) {
    %c0_i32 = arith.constant 0 : i32
    %c0_i32_0 = arith.constant 0 : i32
    %c0_i32_1 = arith.constant 0 : i32
    return %arg0, %c0_i32, %c0_i32_0 : i32, i32, i32
  }
  func.func @transform_6(%arg0: i32) -> (i32, i32, i32) {
    %c0_i32 = arith.constant 0 : i32
    %c0_i32_0 = arith.constant 0 : i32
    %c0_i32_1 = arith.constant 0 : i32
    return %arg0, %c0_i32, %c0_i32_0 : i32, i32, i32
  }
}

module attributes {stable_mosaic.version = 11 : i64} {
  func.func @_bn2_conv3_stats_kernel(%arg0: i32, %arg1: memref<1x336x128xbf16, #tpu.memory_space<vmem>>, %arg2: memref<1x128xf32, #tpu.memory_space<vmem>>, %arg3: memref<1x128xf32, #tpu.memory_space<vmem>>, %arg4: memref<336x1xf32, #tpu.memory_space<vmem>>, %arg5: memref<128x128xbf16, #tpu.memory_space<vmem>>, %arg6: memref<1x336x128xbf16, #tpu.memory_space<vmem>>, %arg7: memref<1x2x128xf32, #tpu.memory_space<vmem>>) attributes {dimension_semantics = [#tpu.dimension_semantics<parallel>], iteration_bounds = array<i64: 2>, scalar_prefetch = 0 : i64, scratch_operands = 0 : i64, tpu.core_type = #tpu.core_type<tc>, window_params = [{transform_indices = @transform_0, window_bounds = array<i64: 1, 336, 128>}, {pipeline_mode = #tpu.pipeline_mode<synchronous>, transform_indices = @transform_1, window_bounds = array<i64: 1, 128>}, {pipeline_mode = #tpu.pipeline_mode<synchronous>, transform_indices = @transform_2, window_bounds = array<i64: 1, 128>}, {pipeline_mode = #tpu.pipeline_mode<synchronous>, transform_indices = @transform_3, window_bounds = array<i64: 336, 1>}, {pipeline_mode = #tpu.pipeline_mode<synchronous>, transform_indices = @transform_4, window_bounds = array<i64: 128, 128>}, {transform_indices = @transform_5, window_bounds = array<i64: 1, 336, 128>}, {transform_indices = @transform_6, window_bounds = array<i64: 1, 2, 128>}]} {
    %c0 = arith.constant 0 : index
    %c0_0 = arith.constant 0 : index
    %0 = vector.load %arg4[%c0, %c0_0] : memref<336x1xf32, #tpu.memory_space<vmem>>, vector<336x1xf32>
    %c0_1 = arith.constant 0 : index
    %c0_2 = arith.constant 0 : index
    %c0_3 = arith.constant 0 : index
    %1 = vector.load %arg1[%c0_1, %c0_2, %c0_3] : memref<1x336x128xbf16, #tpu.memory_space<vmem>>, vector<1x336x128xbf16>
    %2 = vector.shape_cast %1 : vector<1x336x128xbf16> to vector<336x128xbf16>
    %3 = arith.extf %2 : vector<336x128xbf16> to vector<336x128xf32>
    %c0_4 = arith.constant 0 : index
    %c0_5 = arith.constant 0 : index
    %4 = vector.load %arg2[%c0_4, %c0_5] : memref<1x128xf32, #tpu.memory_space<vmem>>, vector<1x128xf32>
    %5 = vector.broadcast %4 : vector<1x128xf32> to vector<336x128xf32>
    %6 = arith.mulf %3, %5 : vector<336x128xf32>
    %c0_6 = arith.constant 0 : index
    %c0_7 = arith.constant 0 : index
    %7 = vector.load %arg3[%c0_6, %c0_7] : memref<1x128xf32, #tpu.memory_space<vmem>>, vector<1x128xf32>
    %8 = vector.broadcast %7 : vector<1x128xf32> to vector<336x128xf32>
    %9 = arith.addf %6, %8 : vector<336x128xf32>
    %cst = arith.constant 0.000000e+00 : f32
    %10 = vector.broadcast %cst : f32 to vector<336x128xf32>
    %11 = arith.maximumf %9, %10 : vector<336x128xf32>
    %12 = arith.truncf %11 : vector<336x128xf32> to vector<336x128xbf16>
    %c0_8 = arith.constant 0 : index
    %c0_9 = arith.constant 0 : index
    %13 = vector.load %arg5[%c0_8, %c0_9] : memref<128x128xbf16, #tpu.memory_space<vmem>>, vector<128x128xbf16>
    %cst_10 = arith.constant dense<0.000000e+00> : vector<336x128xf32>
    %14 = tpu.matmul %12, %13, %cst_10 {dimension_numbers = #tpu.dot_dimension_numbers<[1], [0], [0], [1], [0, 0, 1, 1], [], []>} : vector<336x128xbf16>, vector<128x128xbf16>, vector<336x128xf32> -> vector<336x128xf32>
    %15 = arith.truncf %14 : vector<336x128xf32> to vector<336x128xbf16>
    %c0_11 = arith.constant 0 : index
    %c0_12 = arith.constant 0 : index
    %c0_13 = arith.constant 0 : index
    %16 = vector.load %arg6[%c0_11, %c0_12, %c0_13] : memref<1x336x128xbf16, #tpu.memory_space<vmem>>, vector<1x336x128xbf16>
    %17 = vector.shape_cast %16 : vector<1x336x128xbf16> to vector<336x128xbf16>
    %18 = vector.shape_cast %15 : vector<336x128xbf16> to vector<1x336x128xbf16>
    tpu.vector_store %arg6[%c0_11, %c0_12, %c0_13], %18 {strides = array<i32>} : memref<1x336x128xbf16, #tpu.memory_space<vmem>>, vector<1x336x128xbf16>,
    %19 = vector.broadcast %0 : vector<336x1xf32> to vector<336x128xf32>
    %20 = arith.mulf %14, %19 : vector<336x128xf32>
    %cst_14 = arith.constant dense<0.000000e+00> : vector<128xf32>
    %21 = vector.multi_reduction <add>, %20, %cst_14 [0] : vector<336x128xf32> to vector<128xf32>
    %22 = vector.shape_cast %21 : vector<128xf32> to vector<1x128xf32>
    %23 = arith.mulf %20, %14 : vector<336x128xf32>
    %cst_15 = arith.constant dense<0.000000e+00> : vector<128xf32>
    %24 = vector.multi_reduction <add>, %23, %cst_15 [0] : vector<336x128xf32> to vector<128xf32>
    %25 = vector.shape_cast %24 : vector<128xf32> to vector<1x128xf32>
    %26 = tpu.concatenate %22, %25 in 0 : vector<1x128xf32>, vector<1x128xf32> -> vector<2x128xf32>
    %c0_16 = arith.constant 0 : index
    %c0_17 = arith.constant 0 : index
    %c0_18 = arith.constant 0 : index
    %27 = vector.load %arg7[%c0_16, %c0_17, %c0_18] : memref<1x2x128xf32, #tpu.memory_space<vmem>>, vector<1x2x128xf32>
    %28 = vector.shape_cast %27 : vector<1x2x128xf32> to vector<2x128xf32>
    %29 = vector.shape_cast %26 : vector<2x128xf32> to vector<1x2x128xf32>
    tpu.vector_store %arg7[%c0_16, %c0_17, %c0_18], %29 {strides = array<i32>} : memref<1x2x128xf32, #tpu.memory_space<vmem>>, vector<1x2x128xf32>,
    return
  }
  func.func @transform_0(%arg0: i32) -> (i32, i32, i32) {
    %c0_i32 = arith.constant 0 : i32
    %c0_i32_0 = arith.constant 0 : i32
    %c0_i32_1 = arith.constant 0 : i32
    return %arg0, %c0_i32, %c0_i32_0 : i32, i32, i32
  }
  func.func @transform_1(%arg0: i32) -> (i32, i32) {
    %c0_i32 = arith.constant 0 : i32
    %c0_i32_0 = arith.constant 0 : i32
    %c0_i32_1 = arith.constant 0 : i32
    return %c0_i32, %c0_i32_0 : i32, i32
  }
  func.func @transform_2(%arg0: i32) -> (i32, i32) {
    %c0_i32 = arith.constant 0 : i32
    %c0_i32_0 = arith.constant 0 : i32
    %c0_i32_1 = arith.constant 0 : i32
    return %c0_i32, %c0_i32_0 : i32, i32
  }
  func.func @transform_3(%arg0: i32) -> (i32, i32) {
    %c0_i32 = arith.constant 0 : i32
    %c0_i32_0 = arith.constant 0 : i32
    %c0_i32_1 = arith.constant 0 : i32
    return %c0_i32, %c0_i32_0 : i32, i32
  }
  func.func @transform_4(%arg0: i32) -> (i32, i32) {
    %c0_i32 = arith.constant 0 : i32
    %c0_i32_0 = arith.constant 0 : i32
    %c0_i32_1 = arith.constant 0 : i32
    return %c0_i32, %c0_i32_0 : i32, i32
  }
  func.func @transform_5(%arg0: i32) -> (i32, i32, i32) {
    %c0_i32 = arith.constant 0 : i32
    %c0_i32_0 = arith.constant 0 : i32
    %c0_i32_1 = arith.constant 0 : i32
    return %arg0, %c0_i32, %c0_i32_0 : i32, i32, i32
  }
  func.func @transform_6(%arg0: i32) -> (i32, i32, i32) {
    %c0_i32 = arith.constant 0 : i32
    %c0_i32_0 = arith.constant 0 : i32
    %c0_i32_1 = arith.constant 0 : i32
    return %arg0, %c0_i32, %c0_i32_0 : i32, i32, i32
  }
}

module attributes {stable_mosaic.version = 11 : i64} {
  func.func @_bn3_residual_kernel(%arg0: i32, %arg1: memref<1x336x128xbf16, #tpu.memory_space<vmem>>, %arg2: memref<1x336x128xbf16, #tpu.memory_space<vmem>>, %arg3: memref<1x128xf32, #tpu.memory_space<vmem>>, %arg4: memref<1x128xf32, #tpu.memory_space<vmem>>, %arg5: memref<1x336x128xf32, #tpu.memory_space<vmem>>) attributes {dimension_semantics = [#tpu.dimension_semantics<parallel>], iteration_bounds = array<i64: 2>, scalar_prefetch = 0 : i64, scratch_operands = 0 : i64, tpu.core_type = #tpu.core_type<tc>, window_params = [{transform_indices = @transform_0, window_bounds = array<i64: 1, 336, 128>}, {transform_indices = @transform_1, window_bounds = array<i64: 1, 336, 128>}, {pipeline_mode = #tpu.pipeline_mode<synchronous>, transform_indices = @transform_2, window_bounds = array<i64: 1, 128>}, {pipeline_mode = #tpu.pipeline_mode<synchronous>, transform_indices = @transform_3, window_bounds = array<i64: 1, 128>}, {transform_indices = @transform_4, window_bounds = array<i64: 1, 336, 128>}]} {
    %c0 = arith.constant 0 : index
    %c0_0 = arith.constant 0 : index
    %c0_1 = arith.constant 0 : index
    %0 = vector.load %arg1[%c0, %c0_0, %c0_1] : memref<1x336x128xbf16, #tpu.memory_space<vmem>>, vector<1x336x128xbf16>
    %1 = vector.shape_cast %0 : vector<1x336x128xbf16> to vector<336x128xbf16>
    %2 = arith.extf %1 : vector<336x128xbf16> to vector<336x128xf32>
    %c0_2 = arith.constant 0 : index
    %c0_3 = arith.constant 0 : index
    %3 = vector.load %arg3[%c0_2, %c0_3] : memref<1x128xf32, #tpu.memory_space<vmem>>, vector<1x128xf32>
    %4 = vector.broadcast %3 : vector<1x128xf32> to vector<336x128xf32>
    %5 = arith.mulf %2, %4 : vector<336x128xf32>
    %c0_4 = arith.constant 0 : index
    %c0_5 = arith.constant 0 : index
    %6 = vector.load %arg4[%c0_4, %c0_5] : memref<1x128xf32, #tpu.memory_space<vmem>>, vector<1x128xf32>
    %7 = vector.broadcast %6 : vector<1x128xf32> to vector<336x128xf32>
    %8 = arith.addf %5, %7 : vector<336x128xf32>
    %c0_6 = arith.constant 0 : index
    %c0_7 = arith.constant 0 : index
    %c0_8 = arith.constant 0 : index
    %9 = vector.load %arg2[%c0_6, %c0_7, %c0_8] : memref<1x336x128xbf16, #tpu.memory_space<vmem>>, vector<1x336x128xbf16>
    %10 = vector.shape_cast %9 : vector<1x336x128xbf16> to vector<336x128xbf16>
    %11 = arith.extf %10 : vector<336x128xbf16> to vector<336x128xf32>
    %12 = arith.addf %8, %11 : vector<336x128xf32>
    %cst = arith.constant 0.000000e+00 : f32
    %13 = vector.broadcast %cst : f32 to vector<336x128xf32>
    %14 = arith.maximumf %12, %13 : vector<336x128xf32>
    %c0_9 = arith.constant 0 : index
    %c0_10 = arith.constant 0 : index
    %c0_11 = arith.constant 0 : index
    %15 = vector.load %arg5[%c0_9, %c0_10, %c0_11] : memref<1x336x128xf32, #tpu.memory_space<vmem>>, vector<1x336x128xf32>
    %16 = vector.shape_cast %15 : vector<1x336x128xf32> to vector<336x128xf32>
    %17 = vector.shape_cast %14 : vector<336x128xf32> to vector<1x336x128xf32>
    tpu.vector_store %arg5[%c0_9, %c0_10, %c0_11], %17 {strides = array<i32>} : memref<1x336x128xf32, #tpu.memory_space<vmem>>, vector<1x336x128xf32>,
    return
  }
  func.func @transform_0(%arg0: i32) -> (i32, i32, i32) {
    %c0_i32 = arith.constant 0 : i32
    %c0_i32_0 = arith.constant 0 : i32
    %c0_i32_1 = arith.constant 0 : i32
    return %arg0, %c0_i32, %c0_i32_0 : i32, i32, i32
  }
  func.func @transform_1(%arg0: i32) -> (i32, i32, i32) {
    %c0_i32 = arith.constant 0 : i32
    %c0_i32_0 = arith.constant 0 : i32
    %c0_i32_1 = arith.constant 0 : i32
    return %arg0, %c0_i32, %c0_i32_0 : i32, i32, i32
  }
  func.func @transform_2(%arg0: i32) -> (i32, i32) {
    %c0_i32 = arith.constant 0 : i32
    %c0_i32_0 = arith.constant 0 : i32
    %c0_i32_1 = arith.constant 0 : i32
    return %c0_i32, %c0_i32_0 : i32, i32
  }
  func.func @transform_3(%arg0: i32) -> (i32, i32) {
    %c0_i32 = arith.constant 0 : i32
    %c0_i32_0 = arith.constant 0 : i32
    %c0_i32_1 = arith.constant 0 : i32
    return %c0_i32, %c0_i32_0 : i32, i32
  }
  func.func @transform_4(%arg0: i32) -> (i32, i32, i32) {
    %c0_i32 = arith.constant 0 : i32
    %c0_i32_0 = arith.constant 0 : i32
    %c0_i32_1 = arith.constant 0 : i32
    return %arg0, %c0_i32, %c0_i32_0 : i32, i32, i32
  }
}

</mosaic_0001>

<bundles_post_ra>
// kernel: bottleneck_forward.4
= control target key start
LH: loop header
LB: loop body
LE: loop exit
PB: predicated region body
PF: predicated region fallthrough
CT: control target
= control target key end

     0   :  { %s1514_s12 = smov 0   ;;  %s1862_s0 = inlined_call_operand.vmem [shape: bf16[2,336,128], index: 0, kind: input, shape index: {}]   ;;  %s1863_s1 = inlined_call_operand.vmem [shape: bf16[128,128], index: 1, kind: input, shape index: {}]   ;;  %s1864_s2 = inlined_call_operand.vmem [shape: bf16[2,336,128], index: 2, kind: output, shape index: {0}]   ;;  %s1865_s3 = inlined_call_operand.vmem [shape: f32[2,2,128], index: 3, kind: output, shape index: {1}]  }
   0x1 LB: > { %s1051_s13 = sadd.s32 4294967295, %s1490_s12   ;;  %p1055_p0 = scmp.ge.s32.totalorder %s1490_s12, 1  ;;  %s1490_s12 = sphi %s1514_s12, %s14_s12  }
   0x2   : > { %p140_p1 = scmp.lt.s32.totalorder %s1490_s12, 3 }
   0x4   : > { %p141_p2 = pnand %p1055_p0, %p140_p1 }
   0x5   : > { %p168_p3 = scmp.lt.s32.totalorder (!%p141_p2), %s1051_s13, 1 }
   0x6   : > { %144 = sbr.rel (%p141_p2) target bundleno = 379 (0x17b), region = 28 }
   0xb   : > { %v1455_v0 = vld [vmem:[%s1863_s1 + $0x38] sm:$0xff]   ;;  %v1492_v1 = vmov 0.0   ;;  %v1456_v2 = vld [vmem:[%s1863_s1 + $0x30] sm:$0xff]   ;;  %vm1493_vm0 = vmmov 0   ;;  %s1867_s13 = smov (!%p168_p3, %s1051_s13), 1  ;;  %v1457_v3 = vld [vmem:[%s1863_s1 + $0x28] sm:$0xff]  }
   0xc   : > { %1328 = vmatprep.subr.bf16.mxu0 %v1492_v1  ;;  %1428 = vmatprep.subr.bf16.mxu1 %v1492_v1  ;;  %s1444_s20 = smul.u32 168, %s1867_s13  ;;  %v1458_v4 = vld [vmem:[%s1863_s1 + $0x20] sm:$0xff]   ;;  %v1459_v5 = vld [vmem:[%s1863_s1 + $0x18] sm:$0xff]   ;;  %v1460_v6 = vld [vmem:[%s1863_s1 + $0x10] sm:$0xff]   ;;  %s1058_s10 = sshll.u32 %s1867_s13, 1  ;;  %vm962_vm1 = vcmask 1040384  }
   0xd   : > { %1329 = vmatpush3.bf16.msra.mxu0 %v1455_v0  ;;  %1344 = vmatprep.mubr.msk.bf16.mxu0 %vm1493_vm0, %v1492_v1  ;;  %v1461_v7 = vld [vmem:[%s1863_s1 + $0x8] sm:$0xff]   ;;  %v1462_v8 = vld [vmem:[%s1863_s1] sm:$0xff]   ;;  %s181_s15 = scalar_lea.vmem %s1865_s3, %s1058_s10 }
   0xe   : > { %1330 = vmatprep.subr.bf16.mxu0 %v1492_v1  ;;  %1436 = vmatpush3.bf16.msra.mxu1 %v1455_v0  ;;  %s1548_s23 = scalar_lea.vmem %s1862_s0, %s1444_s20  ;;  %s1644_s9 = scalar_lea.vmem %s1864_s2, %s1444_s20 }
   0xf   : > { %1429 = vmatprep.subr.bf16.mxu1 %v1492_v1  ;;  %1388 = vmatprep.mubr.msk.bf16.mxu1 %vm1493_vm0, %v1492_v1  ;;  %v1463_v9 = vld [vmem:[%s1548_s23] sm:$0xff]   ;;  %v1469_v10 = vld [vmem:[%s1548_s23 + $0x58] sm:$0xff]   ;;  %v1464_v11 = vld [vmem:[%s1548_s23 + $0x8] sm:$0xff]  }
  0x10   : > { %v1471_v12 = vld [vmem:[%s1548_s23 + $0x60] sm:$0xff]   ;;  %v1465_v13 = vld [vmem:[%s1548_s23 + $0x10] sm:$0xff]   ;;  %v1473_v14 = vld [vmem:[%s1548_s23 + $0x68] sm:$0xff]  }
  0x11   : > { %1331 = vmatpush3.bf16.msra.mxu0 %v1456_v2  ;;  %v1466_v15 = vld [vmem:[%s1548_s23 + $0x18] sm:$0xff]   ;;  %v1475_v16 = vld [vmem:[%s1548_s23 + $0x70] sm:$0xff]   ;;  %v1467_v17 = vld [vmem:[%s1548_s23 + $0x20] sm:$0xff]  }
  0x12   : > { %1332 = vmatprep.subr.bf16.mxu0 %v1492_v1  ;;  %1437 = vmatpush3.bf16.msra.mxu1 %v1456_v2  ;;  %v1477_v18 = vld [vmem:[%s1548_s23 + $0x78] sm:$0xff]   ;;  %v1468_v19 = vld [vmem:[%s1548_s23 + $0x28] sm:$0xff]   ;;  %v1479_v20 = vld [vmem:[%s1548_s23 + $0x80] sm:$0xff]  }
  0x13   : > { %1430 = vmatprep.subr.bf16.mxu1 %v1492_v1  ;;  %v1470_v21 = vld [vmem:[%s1548_s23 + $0x30] sm:$0xff]   ;;  %v1480_v22 = vld [vmem:[%s1548_s23 + $0x88] sm:$0xff]   ;;  %v1472_v23 = vld [vmem:[%s1548_s23 + $0x38] sm:$0xff]  }
  0x14   : > { %v1481_v24 = vld [vmem:[%s1548_s23 + $0x90] sm:$0xff]   ;;  %v1474_v25 = vld [vmem:[%s1548_s23 + $0x40] sm:$0xff]   ;;  %v1482_v26 = vld [vmem:[%s1548_s23 + $0x98] sm:$0xff]  }
  0x15   : > { %1333 = vmatpush3.bf16.msra.mxu0 %v1457_v3  ;;  %v1476_v27 = vld [vmem:[%s1548_s23 + $0x48] sm:$0xff]   ;;  %v1483_v28 = vld [vmem:[%s1548_s23 + $0xa0] sm:$0xff]   ;;  %v1478_v29 = vld [vmem:[%s1548_s23 + $0x50] sm:$0xff]  }
  0x16   : > { %1334 = vmatprep.subr.bf16.mxu0 %v1492_v1  ;;  %1438 = vmatpush3.bf16.msra.mxu1 %v1457_v3 }
  0x17   : > { %1431 = vmatprep.subr.bf16.mxu1 %v1492_v1 }
  0x19   : > { %1335 = vmatpush3.bf16.msra.mxu0 %v1458_v4 }
  0x1a   : > { %1336 = vmatprep.subr.bf16.mxu0 %v1492_v1  ;;  %1439 = vmatpush3.bf16.msra.mxu1 %v1458_v4 }
  0x1b   : > { %1432 = vmatprep.subr.bf16.mxu1 %v1492_v1 }
  0x1d   : > { %1337 = vmatpush3.bf16.msra.mxu0 %v1459_v5 }
  0x1e   : > { %1338 = vmatprep.subr.bf16.mxu0 %v1492_v1  ;;  %1440 = vmatpush3.bf16.msra.mxu1 %v1459_v5 }
  0x1f   : > { %1433 = vmatprep.subr.bf16.mxu1 %v1492_v1 }
  0x21   : > { %1339 = vmatpush3.bf16.msra.mxu0 %v1460_v6 }
  0x22   : > { %1340 = vmatprep.subr.bf16.mxu0 %v1492_v1  ;;  %1441 = vmatpush3.bf16.msra.mxu1 %v1460_v6 }
  0x23   : > { %1434 = vmatprep.subr.bf16.mxu1 %v1492_v1 }
  0x25   : > { %1341 = vmatpush3.bf16.msra.mxu0 %v1461_v7 }
  0x26   : > { %1342 = vmatprep.subr.bf16.mxu0 %v1492_v1  ;;  %1442 = vmatpush3.bf16.msra.mxu1 %v1461_v7 }
  0x27   : > { %1435 = vmatprep.subr.bf16.mxu1 %v1492_v1 }
  0x29   : > { %1343 = vmatpush3.bf16.msra.mxu0 %v1462_v8 }
  0x2a   : > { %1443 = vmatpush3.bf16.msra.mxu1 %v1462_v8 }
  0x2c   : > { %1345 = vmatmul.mubr.bf16.vlgmr.msra.gmra.mxu0 %v1463_v9 }
  0x2d   : > { %1348 = vmatprep.mubr.msk.bf16.mxu0 %vm1493_vm0, %v1492_v1  ;;  %1389 = vmatmul.mubr.bf16.vlgmr.msra.gmra.mxu1 %v1469_v10 }
  0x2e   : > { %1392 = vmatprep.mubr.msk.bf16.mxu1 %vm1493_vm0, %v1492_v1 }
  0x34   : > { %1349 = vmatmul.mubr.bf16.gmra.mxu0 %v1464_v11 }
  0x35   : > { %1352 = vmatprep.mubr.msk.bf16.mxu0 %vm1493_vm0, %v1492_v1  ;;  %1393 = vmatmul.mubr.bf16.gmra.mxu1 %v1471_v12 }
  0x36   : > { %1396 = vmatprep.mubr.msk.bf16.mxu1 %vm1493_vm0, %v1492_v1 }
  0x3c   : > { %1353 = vmatmul.mubr.bf16.gmra.mxu0 %v1465_v13 }
  0x3d   : > { %1356 = vmatprep.mubr.msk.bf16.mxu0 %vm1493_vm0, %v1492_v1  ;;  %1397 = vmatmul.mubr.bf16.gmra.mxu1 %v1473_v14 }
  0x3e   : > { %1400 = vmatprep.mubr.msk.bf16.mxu1 %vm1493_vm0, %v1492_v1 }
  0x44   : > { %1357 = vmatmul.mubr.bf16.gmra.mxu0 %v1466_v15 }
  0x45   : > { %1360 = vmatprep.mubr.msk.bf16.mxu0 %vm1493_vm0, %v1492_v1  ;;  %1401 = vmatmul.mubr.bf16.gmra.mxu1 %v1475_v16 }
  0x46   : > { %1404 = vmatprep.mubr.msk.bf16.mxu1 %vm1493_vm0, %v1492_v1 }
  0x4c   : > { %1361 = vmatmul.mubr.bf16.gmra.mxu0 %v1467_v17 }
  0x4d   : > { %1364 = vmatprep.mubr.msk.bf16.mxu0 %vm1493_vm0, %v1492_v1  ;;  %1405 = vmatmul.mubr.bf16.gmra.mxu1 %v1477_v18 }
  0x4e   : > { %1408 = vmatprep.mubr.msk.bf16.mxu1 %vm1493_vm0, %v1492_v1 }
  0x54   : > { %1365 = vmatmul.mubr.bf16.gmra.mxu0 %v1468_v19 }
  0x55   : > { %1368 = vmatprep.mubr.msk.bf16.mxu0 %vm1493_vm0, %v1492_v1  ;;  %1409 = vmatmul.mubr.bf16.gmra.mxu1 %v1479_v20 }
  0x56   : > { %1412 = vmatprep.mubr.msk.bf16.mxu1 %vm1493_vm0, %v1492_v1 }
  0x5c   : > { %1369 = vmatmul.mubr.bf16.gmra.mxu0 %v1470_v21 }
  0x5d   : > { %1372 = vmatprep.mubr.msk.bf16.mxu0 %vm1493_vm0, %v1492_v1  ;;  %1413 = vmatmul.mubr.bf16.gmra.mxu1 %v1480_v22 }
  0x5e   : > { %1416 = vmatprep.mubr.msk.bf16.mxu1 %vm1493_vm0, %v1492_v1 }
  0x64   : > { %1373 = vmatmul.mubr.bf16.gmra.mxu0 %v1472_v23 }
  0x65   : > { %1376 = vmatprep.mubr.msk.bf16.mxu0 %vm1493_vm0, %v1492_v1  ;;  %1417 = vmatmul.mubr.bf16.gmra.mxu1 %v1481_v24 }
  0x66   : > { %1420 = vmatprep.mubr.msk.bf16.mxu1 %vm1493_vm0, %v1492_v1 }
  0x6c   : > { %1377 = vmatmul.mubr.bf16.gmra.mxu0 %v1474_v25 }
  0x6d   : > { %1380 = vmatprep.mubr.msk.bf16.mxu0 %vm1493_vm0, %v1492_v1  ;;  %1421 = vmatmul.mubr.bf16.gmra.mxu1 %v1482_v26 }
  0x6e   : > { %1424 = vmatprep.mubr.msk.bf16.mxu1 %vm1493_vm0, %v1492_v1 }
  0x74   : > { %1381 = vmatmul.mubr.bf16.gmra.mxu0 %v1476_v27 }
  0x75   : > { %1384 = vmatprep.mubr.msk.bf16.mxu0 %vm1493_vm0, %v1492_v1  ;;  %1425 = vmatmul.mubr.bf16.gmra.mxu1 %v1483_v28 }
  0x7c   : > { %1385 = vmatmul.mubr.bf16.gmra.mxu0 %v1478_v29 }
  0xec   : > { %v1635_v30 = vpop.f32.mrf.mxu0 }
  0xed   : > { %v1637_v31 = vpop.f32.mrf.mxu1  ;;  %v873_v22 = vmul.f32 %v1635_v30, %v1635_v30 }
  0xee   : > { %v1346_v32 = vpop.f32.mrf.mxu0 }
  0xef   : > { %v1390_v33 = vpop.f32.mrf.mxu1 }
  0xf0   : > { %v1646_v34 = vpop.f32.mrf.mxu0 }
  0xf1   : > { %v1177_v35 = vpack.c.bf16 %v1646_v34, %v1635_v30  ;;  %v1650_v36 = vpop.f32.mrf.mxu1  ;;  %v874_v19 = vmul.f32 %v1646_v34, %v1646_v34  ;;  %v826_v23 = vadd.f32 %v1646_v34, %v1635_v30 }
  0xf2   : > { %v1347_v37 = vpop.f32.mrf.mxu0  ;;  %v1232_v38 = vpack.c.bf16 %v1650_v36, %v1637_v31 }
  0xf3   : > { %1178 = vst [vmem:[%s1644_s9] sm:$0xff] %v1177_v35   ;;  %v1391_v39 = vpop.f32.mrf.mxu1  ;;  %v915_v29 = vadd.f32 %v874_v19, %v873_v22 }
  0xf4   : > { %v1655_v40 = vpop.f32.mrf.mxu0  ;;  %1289 = vst [vmem:[%s1644_s9 + $0x58] sm:$0xff] %v1232_v38  }
  0xf5   : > { %v1658_v41 = vpop.f32.mrf.mxu1  ;;  %v875_v24 = vmul.f32 %v1655_v40, %v1655_v40  ;;  %v827_v32 = vadd.f32 %v826_v23, %v1655_v40 }
  0xf6   : > { %v1350_v42 = vpop.f32.mrf.mxu0 }
  0xf7   : > { %v1394_v43 = vpop.f32.mrf.mxu1  ;;  %v916_v35 = vadd.f32 %v915_v29, %v875_v24 }
  0xf8   : > { %v1660_v44 = vpop.f32.mrf.mxu0 }
  0xf9   : > { %v1182_v45 = vpack.c.bf16 %v1660_v44, %v1655_v40  ;;  %v1664_v46 = vpop.f32.mrf.mxu1  ;;  %v876_v33 = vmul.f32 %v1660_v44, %v1660_v44  ;;  %v828_v37 = vadd.f32 %v827_v32, %v1660_v44 }
  0xfa   : > { %v1351_v47 = vpop.f32.mrf.mxu0  ;;  %v1237_v48 = vpack.c.bf16 %v1664_v46, %v1658_v41 }
  0xfb   : > { %1279 = vst [vmem:[%s1644_s9 + $0x8] sm:$0xff] %v1182_v45   ;;  %v1395_v49 = vpop.f32.mrf.mxu1  ;;  %v917_v43 = vadd.f32 %v916_v35, %v876_v33 }
  0xfc   : > { %v1669_v50 = vpop.f32.mrf.mxu0  ;;  %1290 = vst [vmem:[%s1644_s9 + $0x60] sm:$0xff] %v1237_v48  }
  0xfd   : > { %v1672_v51 = vpop.f32.mrf.mxu1  ;;  %v877_v38 = vmul.f32 %v1669_v50, %v1669_v50  ;;  %v829_v40 = vadd.f32 %v828_v37, %v1669_v50 }
  0xfe   : > { %v1354_v52 = vpop.f32.mrf.mxu0 }
  0xff   : > { %v1398_v53 = vpop.f32.mrf.mxu1  ;;  %v918_v49 = vadd.f32 %v917_v43, %v877_v38 }
 0x100   : > { %v1674_v54 = vpop.f32.mrf.mxu0 }
 0x101   : > { %v1187_v55 = vpack.c.bf16 %v1674_v54, %v1669_v50  ;;  %v1678_v56 = vpop.f32.mrf.mxu1  ;;  %v878_v45 = vmul.f32 %v1674_v54, %v1674_v54  ;;  %v830_v52 = vadd.f32 %v829_v40, %v1674_v54 }
 0x102   : > { %v1355_v57 = vpop.f32.mrf.mxu0  ;;  %v1242_v58 = vpack.c.bf16 %v1678_v56, %v1672_v51 }
 0x103   : > { %1280 = vst [vmem:[%s1644_s9 + $0x10] sm:$0xff] %v1187_v55   ;;  %v1399_v59 = vpop.f32.mrf.mxu1  ;;  %v919_v50 = vadd.f32 %v918_v49, %v878_v45 }
 0x104   : > { %v1683_v60 = vpop.f32.mrf.mxu0  ;;  %1291 = vst [vmem:[%s1644_s9 + $0x68] sm:$0xff] %v1242_v58  }
 0x105   : > { %v1686_v61 = vpop.f32.mrf.mxu1  ;;  %v879_v44 = vmul.f32 %v1683_v60, %v1683_v60  ;;  %v831_v59 = vadd.f32 %v830_v52, %v1683_v60 }
 0x106   : > { %v1358_v62 = vpop.f32.mrf.mxu0 }
 0x107   : > { %v1402_v63 = vpop.f32.mrf.mxu1  ;;  %v920_v54 = vadd.f32 %v919_v50, %v879_v44 }
 0x108   : > { %v1688_v0 = vpop.f32.mrf.mxu0 }
 0x109   : > { %v1192_v1 = vpack.c.bf16 %v1688_v0, %v1683_v60  ;;  %v1692_v2 = vpop.f32.mrf.mxu1  ;;  %v880_v62 = vmul.f32 %v1688_v0, %v1688_v0 }
 0x10a   : > { %v1359_v3 = vpop.f32.mrf.mxu0  ;;  %v1247_v4 = vpack.c.bf16 %v1692_v2, %v1686_v61 }
 0x10b   : > { %1281 = vst [vmem:[%s1644_s9 + $0x18] sm:$0xff] %v1192_v1   ;;  %v1403_v5 = vpop.f32.mrf.mxu1  ;;  %v832_v3 = vadd.f32 %v831_v59, %v1688_v0 }
 0x10c   : > { %v1697_v6 = vpop.f32.mrf.mxu0  ;;  %1292 = vst [vmem:[%s1644_s9 + $0x70] sm:$0xff] %v1247_v4  }
 0x10d   : > { %v1700_v7 = vpop.f32.mrf.mxu1  ;;  %v881_v4 = vmul.f32 %v1697_v6, %v1697_v6  ;;  %v833_v60 = vadd.f32 %v832_v3, %v1697_v6 }
 0x10e   : > { %v1362_v8 = vpop.f32.mrf.mxu0 }
 0x10f   : > { %v1406_v9 = vpop.f32.mrf.mxu1 }
 0x110   : > { %v1702_v10 = vpop.f32.mrf.mxu0  ;;  %v921_v9 = vadd.f32 %v920_v54, %v880_v62 }
 0x111   : > { %v1197_v11 = vpack.c.bf16 %v1702_v10, %v1697_v6  ;;  %v1706_v12 = vpop.f32.mrf.mxu1 }
 0x112   : > { %v1363_v13 = vpop.f32.mrf.mxu0  ;;  %v1252_v14 = vpack.c.bf16 %v1706_v12, %v1700_v7 }
 0x113   : > { %1282 = vst [vmem:[%s1644_s9 + $0x20] sm:$0xff] %v1197_v11   ;;  %v1407_v15 = vpop.f32.mrf.mxu1  ;;  %v882_v11 = vmul.f32 %v1702_v10, %v1702_v10 }
 0x114   : > { %v1711_v16 = vpop.f32.mrf.mxu0  ;;  %1293 = vst [vmem:[%s1644_s9 + $0x78] sm:$0xff] %v1252_v14   ;;  %v922_v15 = vadd.f32 %v921_v9, %v881_v4 }
 0x115   : > { %v1714_v17 = vpop.f32.mrf.mxu1  ;;  %v883_v0 = vmul.f32 %v1711_v16, %v1711_v16 }
 0x116   : > { %v1366_v18 = vpop.f32.mrf.mxu0  ;;  %v923_v6 = vadd.f32 %v922_v15, %v882_v11 }
 0x117   : > { %v1410_v20 = vpop.f32.mrf.mxu1  ;;  %v834_v18 = vadd.f32 %v833_v60, %v1702_v10 }
 0x118   : > { %v1718_v21 = vpop.f32.mrf.mxu0  ;;  %v924_v10 = vadd.f32 %v923_v6, %v883_v0 }
 0x119   : > { %v1202_v25 = vpack.c.bf16 %v1718_v21, %v1711_v16  ;;  %v1728_v26 = vpop.f32.mrf.mxu1  ;;  %v835_v24 = vadd.f32 %v834_v18, %v1711_v16 }
 0x11a   : > { %v1367_v27 = vpop.f32.mrf.mxu0  ;;  %v1257_v28 = vpack.c.bf16 %v1728_v26, %v1714_v17 }
 0x11b   : > { %1283 = vst [vmem:[%s1644_s9 + $0x28] sm:$0xff] %v1202_v25   ;;  %v1411_v30 = vpop.f32.mrf.mxu1  ;;  %v884_v25 = vmul.f32 %v1718_v21, %v1718_v21  ;;  %v836_v29 = vadd.f32 %v835_v24, %v1718_v21 }
 0x11c   : > { %v497_v34 = vpop.f32.mrf.mxu0  ;;  %1294 = vst [vmem:[%s1644_s9 + $0x80] sm:$0xff] %v1257_v28  }
 0x11d   : > { %v1740_v39 = vpop.f32.mrf.mxu1  ;;  %v885_v32 = vmul.f32 %v497_v34, %v497_v34  ;;  %v925_v35 = vadd.f32 %v924_v10, %v884_v25  ;;  %v837_v37 = vadd.f32 %v836_v29, %v497_v34 }
 0x11e   : > { %v1370_v42 = vpop.f32.mrf.mxu0 }
 0x11f   : > { %v1414_v47 = vpop.f32.mrf.mxu1  ;;  %v926_v43 = vadd.f32 %v925_v35, %v885_v32 }
 0x120   : > { %v500_v48 = vpop.f32.mrf.mxu0 }
 0x121   : > { %v1207_v53 = vpack.c.bf16 %v500_v48, %v497_v34  ;;  %v1748_v55 = vpop.f32.mrf.mxu1  ;;  %v886_v38 = vmul.f32 %v500_v48, %v500_v48  ;;  %v838_v40 = vadd.f32 %v837_v37, %v500_v48 }
 0x122   : > { %v1371_v57 = vpop.f32.mrf.mxu0  ;;  %v1262_v58 = vpack.c.bf16 %v1748_v55, %v1740_v39 }
 0x123   : > { %1284 = vst [vmem:[%s1644_s9 + $0x30] sm:$0xff] %v1207_v53   ;;  %v1415_v63 = vpop.f32.mrf.mxu1  ;;  %v927_v44 = vadd.f32 %v926_v43, %v886_v38 }
 0x124   : > { %v505_v1 = vpop.f32.mrf.mxu0  ;;  %1295 = vst [vmem:[%s1644_s9 + $0x88] sm:$0xff] %v1262_v58  }
 0x125   : > { %v1760_v5 = vpop.f32.mrf.mxu1  ;;  %v887_v45 = vmul.f32 %v505_v1, %v505_v1  ;;  %v839_v53 = vadd.f32 %v838_v40, %v505_v1 }
 0x126   : > { %v1374_v8 = vpop.f32.mrf.mxu0 }
 0x127   : > { %v1418_v13 = vpop.f32.mrf.mxu1  ;;  %v928_v50 = vadd.f32 %v927_v44, %v887_v45  ;;  %v896_v45 = vmul.f32 %v1650_v36, %v1650_v36 }
 0x128   : > { %v508_v14 = vpop.f32.mrf.mxu0 }
 0x129   : > { %v1212_v19 = vpack.c.bf16 %v508_v14, %v505_v1  ;;  %v1768_v20 = vpop.f32.mrf.mxu1  ;;  %v888_v57 = vmul.f32 %v508_v14, %v508_v14  ;;  %v840_v59 = vadd.f32 %v839_v53, %v508_v14 }
 0x12a   : > { %v1375_v22 = vpop.f32.mrf.mxu0  ;;  %v1267_v23 = vpack.c.bf16 %v1768_v20, %v1760_v5 }
 0x12b   : > { %1285 = vst [vmem:[%s1644_s9 + $0x38] sm:$0xff] %v1212_v19   ;;  %v1419_v27 = vpop.f32.mrf.mxu1  ;;  %v929_v54 = vadd.f32 %v928_v50, %v888_v57  ;;  %v898_v57 = vmul.f32 %v1664_v46, %v1664_v46 }
 0x12c   : > { %v513_v28 = vpop.f32.mrf.mxu0  ;;  %1296 = vst [vmem:[%s1644_s9 + $0x90] sm:$0xff] %v1267_v23  }
 0x12d   : > { %v1778_v33 = vpop.f32.mrf.mxu1  ;;  %v889_v62 = vmul.f32 %v513_v28, %v513_v28  ;;  %v841_v3 = vadd.f32 %v840_v59, %v513_v28 }
 0x12e   : > { %v1378_v30 = vpop.f32.mrf.mxu0 }
 0x12f   : > { %v1422_v16 = vpop.f32.mrf.mxu1  ;;  %v930_v60 = vadd.f32 %v929_v54, %v889_v62 }
 0x130   : > { %v516_v42 = vpop.f32.mrf.mxu0 }
 0x131   : > { %v1217_v47 = vpack.c.bf16 %v516_v42, %v513_v28  ;;  %v1780_v49 = vpop.f32.mrf.mxu1  ;;  %v890_v4 = vmul.f32 %v516_v42, %v516_v42  ;;  %v842_v1 = vadd.f32 %v841_v3, %v516_v42  ;;  %v895_v42 = vmul.f32 %v1637_v31, %v1637_v31 }
 0x132   : > { %v1379_v52 = vpop.f32.mrf.mxu0  ;;  %v1272_v21 = vpack.c.bf16 %v1780_v49, %v1778_v33 }
 0x133   : > { %1286 = vst [vmem:[%s1644_s9 + $0x40] sm:$0xff] %v1217_v47   ;;  %v1423_v58 = vpop.f32.mrf.mxu1  ;;  %v931_v0 = vadd.f32 %v930_v60, %v890_v4 }
 0x134   : > { %v521_v34 = vpop.f32.mrf.mxu0  ;;  %1297 = vst [vmem:[%s1644_s9 + $0x98] sm:$0xff] %v1272_v21   ;;  %v897_v21 = vmul.f32 %v1658_v41, %v1658_v41 }
 0x135   : > { %v1786_v63 = vpop.f32.mrf.mxu1  ;;  %v891_v11 = vmul.f32 %v521_v34, %v521_v34  ;;  %v843_v19 = vadd.f32 %v842_v1, %v521_v34 }
 0x136   : > { %v1382_v48 = vpop.f32.mrf.mxu0 }
 0x137   : > { %v1426_v8 = vpop.f32.mrf.mxu1  ;;  %v932_v24 = vadd.f32 %v931_v0, %v891_v11 }
 0x138   : > { %v524_v9 = vpop.f32.mrf.mxu0 }
 0x139   : > { %v1222_v13 = vpack.c.bf16 %v524_v9, %v521_v34  ;;  %v1788_v15 = vpop.f32.mrf.mxu1  ;;  %v892_v22 = vmul.f32 %v524_v9, %v524_v9  ;;  %v844_v25 = vadd.f32 %v843_v19, %v524_v9 }
 0x13a   : > { %v1383_v18 = vpop.f32.mrf.mxu0  ;;  %v1277_v14 = vpack.c.bf16 %v1788_v15, %v1786_v63 }
 0x13b   : > { %1287 = vst [vmem:[%s1644_s9 + $0x48] sm:$0xff] %v1222_v13   ;;  %v1427_v23 = vpop.f32.mrf.mxu1  ;;  %v933_v10 = vadd.f32 %v932_v24, %v892_v22  ;;  %v907_v22 = vmul.f32 %v1740_v39, %v1740_v39 }
 0x13c   : > { %v529_v6 = vpop.f32.mrf.mxu0  ;;  %1298 = vst [vmem:[%s1644_s9 + $0xa0] sm:$0xff] %v1277_v14   ;;  %v906_v14 = vmul.f32 %v1728_v26, %v1728_v26 }
 0x13d   : > { %v893_v27 = vmul.f32 %v529_v6, %v529_v6  ;;  %v845_v29 = vadd.f32 %v844_v25, %v529_v6  ;;  %v909_v25 = vmul.f32 %v1760_v5, %v1760_v5 }
 0x13e   : > { %v1386_v28 = vpop.f32.mrf.mxu0 }
 0x13f   : > { %v934_v30 = vadd.f32 %v933_v10, %v893_v27  ;;  %v910_v28 = vmul.f32 %v1768_v20, %v1768_v20 }
 0x140   : > { %v532_v32 = vpop.f32.mrf.mxu0 }
 0x141   : > { %v1227_v35 = vpack.c.bf16 %v532_v32, %v529_v6  ;;  %v846_v37 = vadd.f32 %v845_v29, %v532_v32  ;;  %v894_v38 = vmul.f32 %v532_v32, %v532_v32  ;;  %v908_v6 = vmul.f32 %v1748_v55, %v1748_v55 }
 0x142   : > { %v1387_v16 = vpop.f32.mrf.mxu0  ;;  %v911_v29 = vmul.f32 %v1778_v33, %v1778_v33 }
 0x143   : > { %1288 = vst [vmem:[%s1644_s9 + $0x50] sm:$0xff] %v1227_v35   ;;  %v847_v43 = vadd.f32 %v846_v37, %v1637_v31  ;;  %v935_v40 = vadd.f32 %v934_v30, %v894_v38  ;;  %v899_v31 = vmul.f32 %v1672_v51, %v1672_v51  ;;  %v912_v30 = vmul.f32 %v1780_v49, %v1780_v49 }
 0x144   : > { %v913_v37 = vmul.f32 %v1786_v63, %v1786_v63  ;;  %v914_v16 = vmul.f32 %v1788_v15, %v1788_v15 }
 0x145   : > { %v848_v47 = vadd.f32 %v847_v43, %v1650_v36  ;;  %v936_v52 = vadd.f32 %v935_v40, %v895_v42  ;;  %v900_v36 = vmul.f32 %v1678_v56, %v1678_v56 }
 0x147   : > { %v849_v44 = vadd.f32 %v848_v47, %v1658_v41  ;;  %v937_v53 = vadd.f32 %v936_v52, %v896_v45  ;;  %v901_v41 = vmul.f32 %v1686_v61, %v1686_v61 }
 0x149   : > { %v850_v58 = vadd.f32 %v849_v44, %v1664_v46  ;;  %v938_v34 = vadd.f32 %v937_v53, %v897_v21  ;;  %v902_v46 = vmul.f32 %v1692_v2, %v1692_v2 }
 0x14b   : > { %v851_v50 = vadd.f32 %v850_v58, %v1672_v51  ;;  %v939_v59 = vadd.f32 %v938_v34, %v898_v57  ;;  %v903_v51 = vmul.f32 %v1700_v7, %v1700_v7 }
 0x14d   : > { %v940_v62 = vadd.f32 %v939_v59, %v899_v31  ;;  %v852_v48 = vadd.f32 %v851_v50, %v1678_v56  ;;  %v904_v56 = vmul.f32 %v1706_v12, %v1706_v12 }
 0x14f   : > { %v853_v54 = vadd.f32 %v852_v48, %v1686_v61  ;;  %v941_v3 = vadd.f32 %v940_v62, %v900_v36  ;;  %v905_v61 = vmul.f32 %v1714_v17, %v1714_v17 }
 0x151   : > { %v854_v4 = vadd.f32 %v853_v54, %v1692_v2  ;;  %v942_v8 = vadd.f32 %v941_v3, %v901_v41 }
 0x153   : > { %v855_v9 = vadd.f32 %v854_v4, %v1700_v7  ;;  %v943_v60 = vadd.f32 %v942_v8, %v902_v46 }
 0x155   : > { %v856_v1 = vadd.f32 %v855_v9, %v1706_v12  ;;  %v944_v11 = vadd.f32 %v943_v60, %v903_v51 }
 0x157   : > { %v857_v13 = vadd.f32 %v856_v1, %v1714_v17  ;;  %v945_v18 = vadd.f32 %v944_v11, %v904_v56 }
 0x159   : > { %v858_v2 = vadd.f32 %v857_v13, %v1728_v26  ;;  %v946_v0 = vadd.f32 %v945_v18, %v905_v61 }
 0x15b   : > { %v947_v7 = vadd.f32 %v946_v0, %v906_v14  ;;  %v859_v19 = vadd.f32 %v858_v2, %v1740_v39 }
 0x15d   : > { %v948_v12 = vadd.f32 %v947_v7, %v907_v22  ;;  %v860_v23 = vadd.f32 %v859_v19, %v1748_v55 }
 0x15f   : > { %v949_v17 = vadd.f32 %v948_v12, %v908_v6  ;;  %v861_v24 = vadd.f32 %v860_v23, %v1760_v5 }
 0x161   : > { %v950_v26 = vadd.f32 %v949_v17, %v909_v25  ;;  %v862_v27 = vadd.f32 %v861_v24, %v1768_v20 }
 0x163   : > { %v951_v10 = vadd.f32 %v950_v26, %v910_v28  ;;  %v863_v39 = vadd.f32 %v862_v27, %v1778_v33 }
 0x165   : > { %v952_v32 = vadd.f32 %v951_v10, %v911_v29  ;;  %v864_v55 = vadd.f32 %v863_v39, %v1780_v49 }
 0x167   : > { %v953_v35 = vadd.f32 %v952_v32, %v912_v30  ;;  %v865_v5 = vadd.f32 %v864_v55, %v1786_v63 }
 0x169   : > { %v954_v20 = vadd.f32 %v953_v35, %v913_v37  ;;  %v866_v38 = vadd.f32 %v865_v5, %v1788_v15 }
 0x16b   : > { %v867_v33 = vrot.slane %v866_v38, 4  ;;  %v955_v42 = vadd.f32 %v954_v20, %v914_v16 }
 0x16d   : > { %v868_v43 = vadd.f32 %v867_v33, %v866_v38  ;;  %v956_v40 = vrot.slane %v955_v42, 4 }
 0x16f   : > { %v869_v45 = vrot.slane %v868_v43, 2  ;;  %v957_v47 = vadd.f32 %v956_v40, %v955_v42 }
 0x171   : > { %v870_v49 = vadd.f32 %v869_v45, %v868_v43  ;;  %v958_v52 = vrot.slane %v957_v47, 2 }
 0x173   : > { %v871_v21 = vrot.slane %v870_v49, 1  ;;  %v959_v44 = vadd.f32 %v958_v52, %v957_v47 }
 0x175   : > { %v960_v53 = vrot.slane %v959_v44, 1  ;;  %v872_v63 = vadd.f32 %v871_v21, %v870_v49 }
 0x177   : > { %v961_v57 = vadd.f32 %v960_v53, %v959_v44 }
 0x179   : > { %v963_v15 = vsel %vm962_vm1, %v872_v63, %v961_v57 }
 0x17a   : > { %964 = vst [vmem:[%s181_s15] sm:$0x3] %v963_v15 }
 0x17b PF: > { %s14_s12 = sadd.s32 1, %s1490_s12  }
 0x17c   : > { %p11_p4 = scmp.ge.s32.totalorder %s14_s12, 4  }
 0x17e   :  { %13 = sbr.rel (!%p11_p4) target bundleno = 1 (0x1), region = 70 }

// kernel: bottleneck_forward.7
= control target key start
LH: loop header
LB: loop body
LE: loop exit
PB: predicated region body
PF: predicated region fallthrough
CT: control target
= control target key end

     0   :  { %s940_s15 = smov 0   ;;  %s1148_s0 = inlined_call_operand.vmem [shape: bf16[2,336,128], index: 0, kind: input, shape index: {}]   ;;  %s1149_s1 = inlined_call_operand.vmem [shape: bf16[2,336,128], index: 1, kind: input, shape index: {}]   ;;  %s1150_s2 = inlined_call_operand.vmem [shape: f32[1,128], index: 2, kind: input, shape index: {}]   ;;  %s1151_s3 = inlined_call_operand.vmem [shape: f32[1,128], index: 3, kind: input, shape index: {}]   ;;  %s1152_s4 = inlined_call_operand.vmem [shape: f32[2,336,128], index: 4, kind: output, shape index: {}]  }
   0x1 LB: > { %s677_s16 = sadd.s32 4294967295, %s913_s15   ;;  %p681_p0 = scmp.ge.s32.totalorder %s913_s15, 1  ;;  %s913_s15 = sphi %s940_s15, %s14_s15  }
   0x2   : > { %p172_p1 = scmp.lt.s32.totalorder %s913_s15, 3 }
   0x4   : > { %p173_p2 = pnand %p681_p0, %p172_p1 }
   0x5   : > { %p203_p3 = scmp.lt.s32.totalorder (!%p173_p2), %s677_s16, 1 }
   0x6   : > { %176 = sbr.rel (%p173_p2) target bundleno = 86 (0x56), region = 36 }
   0xb   : > { %s1154_s16 = smov (!%p203_p3, %s677_s16), 1  ;;  %v964_v0 = vld [vmem:[%s1150_s2] ss:$0 sm:$0xff] }
   0xc   : > { %s897_s17 = smul.u32 168, %s1154_s16  ;;  %v975_v11 = vld [vmem:[%s1151_s3] ss:$0 sm:$0xff] }
   0xd   : > { %s898_s28 = smul.u32 336, %s1154_s16 }
   0xe   : > { %s954_s20 = scalar_lea.vmem %s1148_s0, %s897_s17  ;;  %s959_s23 = scalar_lea.vmem %s1149_s1, %s897_s17 }
   0xf   : > { %v690_v1 = vld [vmem:[%s954_s20] sm:$0xff]   ;;  %v857_v3 = vld [vmem:[%s954_s20 + $0x8] sm:$0xff]   ;;  %v858_v9 = vld [vmem:[%s954_s20 + $0x10] sm:$0xff]   ;;  %s995_s5 = scalar_lea.vmem %s1152_s4, %s898_s28 }
  0x10   : > { %v774_v2 = vld [vmem:[%s959_s23] sm:$0xff]   ;;  %v691_v4 = vunpack.c.l.bf16 %v690_v1  ;;  %v692_v6 = vunpack.c.h.bf16 %v690_v1  ;;  %v877_v8 = vld [vmem:[%s959_s23 + $0x8] sm:$0xff]   ;;  %v878_v10 = vld [vmem:[%s959_s23 + $0x10] sm:$0xff]   ;;  %v695_v12 = vunpack.c.l.bf16 %v857_v3  ;;  %v696_v14 = vunpack.c.h.bf16 %v857_v3 }
  0x11   : > { %v775_v5 = vunpack.c.l.bf16 %v774_v2  ;;  %v776_v7 = vunpack.c.h.bf16 %v774_v2  ;;  %v779_v13 = vunpack.c.l.bf16 %v877_v8  ;;  %v780_v15 = vunpack.c.h.bf16 %v877_v8  ;;  %v859_v16 = vld [vmem:[%s954_s20 + $0x18] sm:$0xff]   ;;  %v860_v42 = vld [vmem:[%s954_s20 + $0x20] sm:$0xff]   ;;  %v861_v52 = vld [vmem:[%s954_s20 + $0x28] sm:$0xff]  }
  0x12   : > { %v309_v17 = vmul.f32 %v691_v4, %v964_v0  ;;  %v310_v18 = vmul.f32 %v692_v6, %v964_v0  ;;  %v699_v19 = vunpack.c.l.bf16 %v858_v9  ;;  %v783_v20 = vunpack.c.l.bf16 %v878_v10  ;;  %v879_v21 = vld [vmem:[%s959_s23 + $0x18] sm:$0xff]   ;;  %v880_v47 = vld [vmem:[%s959_s23 + $0x20] sm:$0xff]   ;;  %v881_v57 = vld [vmem:[%s959_s23 + $0x28] sm:$0xff]  }
  0x13   : > { %v311_v22 = vmul.f32 %v695_v12, %v964_v0  ;;  %v312_v23 = vmul.f32 %v696_v14, %v964_v0  ;;  %v700_v24 = vunpack.c.h.bf16 %v858_v9  ;;  %v784_v25 = vunpack.c.h.bf16 %v878_v10  ;;  %v862_v62 = vld [vmem:[%s954_s20 + $0x30] sm:$0xff]   ;;  %v863_v14 = vld [vmem:[%s954_s20 + $0x38] sm:$0xff]  }
  0x14   : > { %v358_v26 = vadd.f32 %v975_v11, %v309_v17  ;;  %v359_v27 = vadd.f32 %v975_v11, %v310_v18  ;;  %v313_v28 = vmul.f32 %v699_v19, %v964_v0  ;;  %v703_v29 = vunpack.c.l.bf16 %v859_v16  ;;  %v882_v4 = vld [vmem:[%s959_s23 + $0x30] sm:$0xff]  }
  0x15   : > { %v360_v30 = vadd.f32 %v975_v11, %v311_v22  ;;  %v361_v31 = vadd.f32 %v975_v11, %v312_v23  ;;  %v314_v32 = vmul.f32 %v700_v24, %v964_v0  ;;  %v787_v33 = vunpack.c.l.bf16 %v879_v21  ;;  %v883_v23 = vld [vmem:[%s959_s23 + $0x38] sm:$0xff]  }
  0x16   : > { %v484_v34 = vadd.f32 %v775_v5, %v358_v26  ;;  %v485_v35 = vadd.f32 %v776_v7, %v359_v27  ;;  %v362_v36 = vadd.f32 %v975_v11, %v313_v28  ;;  %v315_v37 = vmul.f32 %v703_v29, %v964_v0 }
  0x17   : > { %v486_v38 = vadd.f32 %v779_v13, %v360_v30  ;;  %v487_v39 = vadd.f32 %v780_v15, %v361_v31  ;;  %v363_v40 = vadd.f32 %v975_v11, %v314_v32  ;;  %v704_v41 = vunpack.c.h.bf16 %v859_v16  ;;  %v864_v32 = vld [vmem:[%s954_s20 + $0x40] sm:$0xff]  }
  0x18   : > { %v526_v43 = vmax.f32 %v484_v34, 0.0  ;;  %v527_v44 = vmax.f32 %v485_v35, 0.0  ;;  %v488_v45 = vadd.f32 %v783_v20, %v362_v36  ;;  %v364_v46 = vadd.f32 %v975_v11, %v315_v37  ;;  %v884_v37 = vld [vmem:[%s959_s23 + $0x40] sm:$0xff]  }
  0x19   : > { %v528_v48 = vmax.f32 %v486_v38, 0.0  ;;  %v529_v49 = vmax.f32 %v487_v39, 0.0  ;;  %v489_v50 = vadd.f32 %v784_v25, %v363_v40  ;;  %v316_v51 = vmul.f32 %v704_v41, %v964_v0 }
  0x1a   : > { %568 = vst [vmem:[%s995_s5] sm:$0xff] %v526_v43  ;;  %569 = vst [vmem:[%s995_s5 + $0x8] sm:$0xff] %v527_v44  ;;  %v530_v53 = vmax.f32 %v488_v45, 0.0  ;;  %v490_v54 = vadd.f32 %v787_v33, %v364_v46  ;;  %v788_v55 = vunpack.c.h.bf16 %v879_v21  ;;  %v707_v56 = vunpack.c.l.bf16 %v860_v42  ;;  %v865_v46 = vld [vmem:[%s954_s20 + $0x48] sm:$0xff]  }
  0x1b   : > { %570 = vst [vmem:[%s995_s5 + $0x10] sm:$0xff] %v528_v48  ;;  %571 = vst [vmem:[%s995_s5 + $0x18] sm:$0xff] %v529_v49  ;;  %v531_v58 = vmax.f32 %v489_v50, 0.0  ;;  %v365_v59 = vadd.f32 %v975_v11, %v316_v51  ;;  %v791_v60 = vunpack.c.l.bf16 %v880_v47  ;;  %v708_v61 = vunpack.c.h.bf16 %v860_v42 }
  0x1c   : > { %572 = vst [vmem:[%s995_s5 + $0x20] sm:$0xff] %v530_v53  ;;  %v532_v63 = vmax.f32 %v490_v54, 0.0  ;;  %v317_v1 = vmul.f32 %v707_v56, %v964_v0  ;;  %v792_v2 = vunpack.c.h.bf16 %v880_v47  ;;  %v711_v3 = vunpack.c.l.bf16 %v861_v52  ;;  %v885_v47 = vld [vmem:[%s959_s23 + $0x48] sm:$0xff]   ;;  %v866_v56 = vld [vmem:[%s954_s20 + $0x50] sm:$0xff]  }
  0x1d   : > { %573 = vst [vmem:[%s995_s5 + $0x28] sm:$0xff] %v531_v58  ;;  %v491_v5 = vadd.f32 %v788_v55, %v365_v59  ;;  %v318_v6 = vmul.f32 %v708_v61, %v964_v0  ;;  %v795_v7 = vunpack.c.l.bf16 %v881_v57  ;;  %v712_v8 = vunpack.c.h.bf16 %v861_v52  ;;  %v886_v61 = vld [vmem:[%s959_s23 + $0x50] sm:$0xff]  }
  0x1e   : > { %574 = vst [vmem:[%s995_s5 + $0x30] sm:$0xff] %v532_v63  ;;  %v366_v9 = vadd.f32 %v975_v11, %v317_v1  ;;  %v319_v10 = vmul.f32 %v711_v3, %v964_v0  ;;  %v796_v12 = vunpack.c.h.bf16 %v881_v57  ;;  %v715_v13 = vunpack.c.l.bf16 %v862_v62 }
  0x1f   : > { %v533_v15 = vmax.f32 %v491_v5, 0.0  ;;  %v367_v16 = vadd.f32 %v975_v11, %v318_v6  ;;  %v320_v17 = vmul.f32 %v712_v8, %v964_v0  ;;  %v799_v18 = vunpack.c.l.bf16 %v882_v4 }
  0x20   : > { %v492_v19 = vadd.f32 %v791_v60, %v366_v9  ;;  %v368_v20 = vadd.f32 %v975_v11, %v319_v10  ;;  %v321_v21 = vmul.f32 %v715_v13, %v964_v0  ;;  %v716_v22 = vunpack.c.h.bf16 %v862_v62 }
  0x21   : > { %575 = vst [vmem:[%s995_s5 + $0x38] sm:$0xff] %v533_v15  ;;  %v493_v24 = vadd.f32 %v792_v2, %v367_v16  ;;  %v369_v25 = vadd.f32 %v975_v11, %v320_v17  ;;  %v800_v26 = vunpack.c.h.bf16 %v882_v4  ;;  %v719_v27 = vunpack.c.l.bf16 %v863_v14  ;;  %v887_v17 = vld [vmem:[%s959_s23 + $0x58] sm:$0xff]  }
  0x22   : > { %v534_v28 = vmax.f32 %v492_v19, 0.0  ;;  %v494_v29 = vadd.f32 %v795_v7, %v368_v20  ;;  %v370_v30 = vadd.f32 %v975_v11, %v321_v21  ;;  %v322_v31 = vmul.f32 %v716_v22, %v964_v0 }
  0x23   : > { %v535_v33 = vmax.f32 %v493_v24, 0.0  ;;  %v495_v34 = vadd.f32 %v796_v12, %v369_v25  ;;  %v323_v35 = vmul.f32 %v719_v27, %v964_v0  ;;  %v803_v36 = vunpack.c.l.bf16 %v883_v23  ;;  %v867_v12 = vld [vmem:[%s954_s20 + $0x58] sm:$0xff]  }
  0x24   : > { %576 = vst [vmem:[%s995_s5 + $0x40] sm:$0xff] %v534_v28  ;;  %v536_v38 = vmax.f32 %v494_v29, 0.0  ;;  %v496_v39 = vadd.f32 %v799_v18, %v370_v30  ;;  %v371_v40 = vadd.f32 %v975_v11, %v322_v31  ;;  %v720_v41 = vunpack.c.h.bf16 %v863_v14  ;;  %v888_v31 = vld [vmem:[%s959_s23 + $0x60] sm:$0xff]  }
  0x25   : > { %577 = vst [vmem:[%s995_s5 + $0x48] sm:$0xff] %v535_v33  ;;  %v537_v42 = vmax.f32 %v495_v34, 0.0  ;;  %v372_v43 = vadd.f32 %v975_v11, %v323_v35  ;;  %v804_v44 = vunpack.c.h.bf16 %v883_v23  ;;  %v723_v45 = vunpack.c.l.bf16 %v864_v32 }
  0x26   : > { %578 = vst [vmem:[%s995_s5 + $0x50] sm:$0xff] %v536_v38  ;;  %v538_v48 = vmax.f32 %v496_v39, 0.0  ;;  %v497_v49 = vadd.f32 %v800_v26, %v371_v40  ;;  %v324_v50 = vmul.f32 %v720_v41, %v964_v0  ;;  %v807_v51 = vunpack.c.l.bf16 %v884_v37  ;;  %v868_v26 = vld [vmem:[%s954_s20 + $0x60] sm:$0xff]   ;;  %v869_v40 = vld [vmem:[%s954_s20 + $0x68] sm:$0xff]  }
  0x27   : > { %579 = vst [vmem:[%s995_s5 + $0x58] sm:$0xff] %v537_v42  ;;  %v498_v52 = vadd.f32 %v803_v36, %v372_v43  ;;  %v325_v53 = vmul.f32 %v723_v45, %v964_v0  ;;  %v724_v54 = vunpack.c.h.bf16 %v864_v32  ;;  %v808_v55 = vunpack.c.h.bf16 %v884_v37  ;;  %v889_v41 = vld [vmem:[%s959_s23 + $0x68] sm:$0xff]  }
  0x28   : > { %580 = vst [vmem:[%s995_s5 + $0x60] sm:$0xff] %v538_v48  ;;  %v539_v57 = vmax.f32 %v497_v49, 0.0  ;;  %v373_v58 = vadd.f32 %v975_v11, %v324_v50  ;;  %v727_v59 = vunpack.c.l.bf16 %v865_v46  ;;  %v811_v60 = vunpack.c.l.bf16 %v885_v47  ;;  %v870_v50 = vld [vmem:[%s954_s20 + $0x70] sm:$0xff]  }
  0x29   : > { %v540_v62 = vmax.f32 %v498_v52, 0.0  ;;  %v374_v63 = vadd.f32 %v975_v11, %v325_v53  ;;  %v326_v1 = vmul.f32 %v724_v54, %v964_v0  ;;  %v728_v2 = vunpack.c.h.bf16 %v865_v46 }
  0x2a   : > { %581 = vst [vmem:[%s995_s5 + $0x68] sm:$0xff] %v539_v57  ;;  %v499_v3 = vadd.f32 %v804_v44, %v373_v58  ;;  %v327_v4 = vmul.f32 %v727_v59, %v964_v0  ;;  %v812_v5 = vunpack.c.h.bf16 %v885_v47  ;;  %v731_v6 = vunpack.c.l.bf16 %v866_v56  ;;  %v890_v59 = vld [vmem:[%s959_s23 + $0x70] sm:$0xff]  }
  0x2b   : > { %582 = vst [vmem:[%s995_s5 + $0x70] sm:$0xff] %v540_v62  ;;  %v500_v7 = vadd.f32 %v807_v51, %v374_v63  ;;  %v375_v8 = vadd.f32 %v975_v11, %v326_v1  ;;  %v328_v9 = vmul.f32 %v728_v2, %v964_v0  ;;  %v815_v10 = vunpack.c.l.bf16 %v886_v61 }
  0x2c   : > { %v541_v13 = vmax.f32 %v499_v3, 0.0  ;;  %v376_v14 = vadd.f32 %v975_v11, %v327_v4  ;;  %v329_v15 = vmul.f32 %v731_v6, %v964_v0  ;;  %v732_v16 = vunpack.c.h.bf16 %v866_v56 }
  0x2d   : > { %v542_v18 = vmax.f32 %v500_v7, 0.0  ;;  %v501_v19 = vadd.f32 %v808_v55, %v375_v8  ;;  %v377_v20 = vadd.f32 %v975_v11, %v328_v9  ;;  %v816_v21 = vunpack.c.h.bf16 %v886_v61 }
  0x2e   : > { %583 = vst [vmem:[%s995_s5 + $0x78] sm:$0xff] %v541_v13  ;;  %v502_v22 = vadd.f32 %v811_v60, %v376_v14  ;;  %v378_v23 = vadd.f32 %v975_v11, %v329_v15  ;;  %v330_v24 = vmul.f32 %v732_v16, %v964_v0  ;;  %v735_v25 = vunpack.c.l.bf16 %v867_v12 }
  0x2f   : > { %584 = vst [vmem:[%s995_s5 + $0x80] sm:$0xff] %v542_v18  ;;  %v543_v27 = vmax.f32 %v501_v19, 0.0  ;;  %v503_v28 = vadd.f32 %v812_v5, %v377_v20  ;;  %v819_v29 = vunpack.c.l.bf16 %v887_v17  ;;  %v736_v30 = vunpack.c.h.bf16 %v867_v12  ;;  %v871_v5 = vld [vmem:[%s954_s20 + $0x78] sm:$0xff]   ;;  %v872_v20 = vld [vmem:[%s954_s20 + $0x80] sm:$0xff]  }
  0x30   : > { %v544_v32 = vmax.f32 %v502_v22, 0.0  ;;  %v504_v33 = vadd.f32 %v815_v10, %v378_v23  ;;  %v379_v34 = vadd.f32 %v975_v11, %v330_v24  ;;  %v331_v35 = vmul.f32 %v735_v25, %v964_v0  ;;  %v891_v10 = vld [vmem:[%s959_s23 + $0x78] sm:$0xff]   ;;  %v892_v25 = vld [vmem:[%s959_s23 + $0x80] sm:$0xff]  }
  0x31   : > { %585 = vst [vmem:[%s995_s5 + $0x88] sm:$0xff] %v543_v27  ;;  %v545_v36 = vmax.f32 %v503_v28, 0.0  ;;  %v332_v37 = vmul.f32 %v736_v30, %v964_v0  ;;  %v820_v38 = vunpack.c.h.bf16 %v887_v17  ;;  %v739_v39 = vunpack.c.l.bf16 %v868_v26 }
  0x32   : > { %586 = vst [vmem:[%s995_s5 + $0x90] sm:$0xff] %v544_v32  ;;  %v546_v42 = vmax.f32 %v504_v33, 0.0  ;;  %v505_v43 = vadd.f32 %v816_v21, %v379_v34  ;;  %v380_v44 = vadd.f32 %v975_v11, %v331_v35  ;;  %v823_v45 = vunpack.c.l.bf16 %v888_v31  ;;  %v873_v34 = vld [vmem:[%s954_s20 + $0x88] sm:$0xff]  }
  0x33   : > { %587 = vst [vmem:[%s995_s5 + $0x98] sm:$0xff] %v545_v36  ;;  %v381_v46 = vadd.f32 %v975_v11, %v332_v37  ;;  %v333_v47 = vmul.f32 %v739_v39, %v964_v0  ;;  %v740_v48 = vunpack.c.h.bf16 %v868_v26  ;;  %v824_v49 = vunpack.c.h.bf16 %v888_v31  ;;  %v893_v35 = vld [vmem:[%s959_s23 + $0x88] sm:$0xff]  }
  0x34   : > { %588 = vst [vmem:[%s995_s5 + $0xa0] sm:$0xff] %v546_v42  ;;  %v547_v51 = vmax.f32 %v505_v43, 0.0  ;;  %v506_v52 = vadd.f32 %v819_v29, %v380_v44  ;;  %v743_v53 = vunpack.c.l.bf16 %v869_v40  ;;  %v827_v54 = vunpack.c.l.bf16 %v889_v41  ;;  %v874_v44 = vld [vmem:[%s954_s20 + $0x90] sm:$0xff]  }
  0x35   : > { %v507_v55 = vadd.f32 %v820_v38, %v381_v46  ;;  %v382_v56 = vadd.f32 %v975_v11, %v333_v47  ;;  %v334_v57 = vmul.f32 %v740_v48, %v964_v0  ;;  %v744_v58 = vunpack.c.h.bf16 %v869_v40 }
  0x36   : > { %589 = vst [vmem:[%s995_s5 + $0xa8] sm:$0xff] %v547_v51  ;;  %v548_v60 = vmax.f32 %v506_v52, 0.0  ;;  %v335_v61 = vmul.f32 %v743_v53, %v964_v0  ;;  %v828_v62 = vunpack.c.h.bf16 %v889_v41  ;;  %v747_v63 = vunpack.c.l.bf16 %v870_v50  ;;  %v894_v53 = vld [vmem:[%s959_s23 + $0x90] sm:$0xff]  }
  0x37   : > { %v549_v1 = vmax.f32 %v507_v55, 0.0  ;;  %v508_v2 = vadd.f32 %v823_v45, %v382_v56  ;;  %v383_v3 = vadd.f32 %v975_v11, %v334_v57  ;;  %v336_v4 = vmul.f32 %v744_v58, %v964_v0 }
  0x38   : > { %590 = vst [vmem:[%s995_s5 + $0xb0] sm:$0xff] %v548_v60  ;;  %v384_v6 = vadd.f32 %v975_v11, %v335_v61  ;;  %v337_v7 = vmul.f32 %v747_v63, %v964_v0  ;;  %v831_v8 = vunpack.c.l.bf16 %v890_v59  ;;  %v748_v9 = vunpack.c.h.bf16 %v870_v50 }
  0x39   : > { %591 = vst [vmem:[%s995_s5 + $0xb8] sm:$0xff] %v549_v1  ;;  %v550_v12 = vmax.f32 %v508_v2, 0.0  ;;  %v509_v13 = vadd.f32 %v824_v49, %v383_v3  ;;  %v385_v14 = vadd.f32 %v975_v11, %v336_v4  ;;  %v832_v15 = vunpack.c.h.bf16 %v890_v59  ;;  %v895_v4 = vld [vmem:[%s959_s23 + $0x98] sm:$0xff]  }
  0x3a   : > { %v510_v16 = vadd.f32 %v827_v54, %v384_v6  ;;  %v386_v17 = vadd.f32 %v975_v11, %v337_v7  ;;  %v338_v18 = vmul.f32 %v748_v9, %v964_v0  ;;  %v751_v19 = vunpack.c.l.bf16 %v871_v5 }
  0x3b   : > { %592 = vst [vmem:[%s995_s5 + $0xc0] sm:$0xff] %v550_v12  ;;  %v551_v21 = vmax.f32 %v509_v13, 0.0  ;;  %v511_v22 = vadd.f32 %v828_v62, %v385_v14  ;;  %v835_v23 = vunpack.c.l.bf16 %v891_v10  ;;  %v752_v24 = vunpack.c.h.bf16 %v871_v5  ;;  %v875_v62 = vld [vmem:[%s954_s20 + $0x98] sm:$0xff]   ;;  %v876_v14 = vld [vmem:[%s954_s20 + $0xa0] sm:$0xff]  }
  0x3c   : > { %v552_v26 = vmax.f32 %v510_v16, 0.0  ;;  %v512_v27 = vadd.f32 %v831_v8, %v386_v17  ;;  %v387_v28 = vadd.f32 %v975_v11, %v338_v18  ;;  %v339_v29 = vmul.f32 %v751_v19, %v964_v0 }
  0x3d   : > { %593 = vst [vmem:[%s995_s5 + $0xc8] sm:$0xff] %v551_v21  ;;  %v553_v30 = vmax.f32 %v511_v22, 0.0  ;;  %v340_v31 = vmul.f32 %v752_v24, %v964_v0  ;;  %v836_v32 = vunpack.c.h.bf16 %v891_v10  ;;  %v755_v33 = vunpack.c.l.bf16 %v872_v20 }
  0x3e   : > { %594 = vst [vmem:[%s995_s5 + $0xd0] sm:$0xff] %v552_v26  ;;  %v554_v36 = vmax.f32 %v512_v27, 0.0  ;;  %v513_v37 = vadd.f32 %v832_v15, %v387_v28  ;;  %v388_v38 = vadd.f32 %v975_v11, %v339_v29  ;;  %v839_v39 = vunpack.c.l.bf16 %v892_v25 }
  0x3f   : > { %595 = vst [vmem:[%s995_s5 + $0xd8] sm:$0xff] %v553_v30  ;;  %v389_v40 = vadd.f32 %v975_v11, %v340_v31  ;;  %v341_v41 = vmul.f32 %v755_v33, %v964_v0  ;;  %v756_v42 = vunpack.c.h.bf16 %v872_v20  ;;  %v840_v43 = vunpack.c.h.bf16 %v892_v25 }
  0x40   : > { %596 = vst [vmem:[%s995_s5 + $0xe0] sm:$0xff] %v554_v36  ;;  %v555_v45 = vmax.f32 %v513_v37, 0.0  ;;  %v514_v46 = vadd.f32 %v835_v23, %v388_v38  ;;  %v759_v47 = vunpack.c.l.bf16 %v873_v34  ;;  %v843_v48 = vunpack.c.l.bf16 %v893_v35  ;;  %v896_v23 = vld [vmem:[%s959_s23 + $0xa0] sm:$0xff]  }
  0x41   : > { %v515_v49 = vadd.f32 %v836_v32, %v389_v40  ;;  %v390_v50 = vadd.f32 %v975_v11, %v341_v41  ;;  %v342_v51 = vmul.f32 %v756_v42, %v964_v0  ;;  %v760_v52 = vunpack.c.h.bf16 %v873_v34 }
  0x42   : > { %597 = vst [vmem:[%s995_s5 + $0xe8] sm:$0xff] %v555_v45  ;;  %v556_v54 = vmax.f32 %v514_v46, 0.0  ;;  %v343_v55 = vmul.f32 %v759_v47, %v964_v0  ;;  %v844_v56 = vunpack.c.h.bf16 %v893_v35  ;;  %v763_v57 = vunpack.c.l.bf16 %v874_v44 }
  0x43   : > { %v557_v58 = vmax.f32 %v515_v49, 0.0  ;;  %v516_v59 = vadd.f32 %v839_v39, %v390_v50  ;;  %v391_v60 = vadd.f32 %v975_v11, %v342_v51  ;;  %v344_v61 = vmul.f32 %v760_v52, %v964_v0 }
  0x44   : > { %598 = vst [vmem:[%s995_s5 + $0xf0] sm:$0xff] %v556_v54  ;;  %v392_v63 = vadd.f32 %v975_v11, %v343_v55  ;;  %v345_v1 = vmul.f32 %v763_v57, %v964_v0  ;;  %v847_v2 = vunpack.c.l.bf16 %v894_v53  ;;  %v764_v3 = vunpack.c.h.bf16 %v874_v44 }
  0x45   : > { %599 = vst [vmem:[%s995_s5 + $0xf8] sm:$0xff] %v557_v58  ;;  %v558_v5 = vmax.f32 %v516_v59, 0.0  ;;  %v517_v6 = vadd.f32 %v840_v43, %v391_v60  ;;  %v393_v7 = vadd.f32 %v975_v11, %v344_v61  ;;  %v848_v8 = vunpack.c.h.bf16 %v894_v53 }
  0x46   : > { %v518_v9 = vadd.f32 %v843_v48, %v392_v63  ;;  %v394_v10 = vadd.f32 %v975_v11, %v345_v1  ;;  %v346_v12 = vmul.f32 %v764_v3, %v964_v0  ;;  %v767_v13 = vunpack.c.l.bf16 %v875_v62 }
  0x47   : > { %600 = vst [vmem:[%s995_s5 + $0x100] sm:$0xff] %v558_v5  ;;  %v559_v15 = vmax.f32 %v517_v6, 0.0  ;;  %v519_v16 = vadd.f32 %v844_v56, %v393_v7  ;;  %v851_v17 = vunpack.c.l.bf16 %v895_v4  ;;  %v768_v18 = vunpack.c.h.bf16 %v875_v62 }
  0x48   : > { %v560_v19 = vmax.f32 %v518_v9, 0.0  ;;  %v520_v20 = vadd.f32 %v847_v2, %v394_v10  ;;  %v395_v21 = vadd.f32 %v975_v11, %v346_v12  ;;  %v347_v22 = vmul.f32 %v767_v13, %v964_v0 }
  0x49   : > { %601 = vst [vmem:[%s995_s5 + $0x108] sm:$0xff] %v559_v15  ;;  %v561_v24 = vmax.f32 %v519_v16, 0.0  ;;  %v348_v25 = vmul.f32 %v768_v18, %v964_v0  ;;  %v852_v26 = vunpack.c.h.bf16 %v895_v4  ;;  %v771_v27 = vunpack.c.l.bf16 %v876_v14 }
  0x4a   : > { %602 = vst [vmem:[%s995_s5 + $0x110] sm:$0xff] %v560_v19  ;;  %v562_v28 = vmax.f32 %v520_v20, 0.0  ;;  %v521_v29 = vadd.f32 %v848_v8, %v395_v21  ;;  %v396_v30 = vadd.f32 %v975_v11, %v347_v22  ;;  %v855_v33 = vunpack.c.l.bf16 %v896_v23 }
  0x4b   : > { %603 = vst [vmem:[%s995_s5 + $0x118] sm:$0xff] %v561_v24  ;;  %v397_v31 = vadd.f32 %v975_v11, %v348_v25  ;;  %v349_v32 = vmul.f32 %v771_v27, %v964_v0  ;;  %v772_v34 = vunpack.c.h.bf16 %v876_v14  ;;  %v856_v40 = vunpack.c.h.bf16 %v896_v23 }
  0x4c   : > { %604 = vst [vmem:[%s995_s5 + $0x120] sm:$0xff] %v562_v28  ;;  %v563_v35 = vmax.f32 %v521_v29, 0.0  ;;  %v522_v36 = vadd.f32 %v851_v17, %v396_v30 }
  0x4d   : > { %v523_v37 = vadd.f32 %v852_v26, %v397_v31  ;;  %v398_v38 = vadd.f32 %v975_v11, %v349_v32  ;;  %v350_v39 = vmul.f32 %v772_v34, %v964_v0 }
  0x4e   : > { %605 = vst [vmem:[%s995_s5 + $0x128] sm:$0xff] %v563_v35  ;;  %v564_v41 = vmax.f32 %v522_v36, 0.0 }
  0x4f   : > { %v565_v42 = vmax.f32 %v523_v37, 0.0  ;;  %v524_v43 = vadd.f32 %v855_v33, %v398_v38  ;;  %v399_v44 = vadd.f32 %v975_v11, %v350_v39 }
  0x50   : > { %606 = vst [vmem:[%s995_s5 + $0x130] sm:$0xff] %v564_v41 }
  0x51   : > { %607 = vst [vmem:[%s995_s5 + $0x138] sm:$0xff] %v565_v42  ;;  %v566_v45 = vmax.f32 %v524_v43, 0.0  ;;  %v525_v46 = vadd.f32 %v856_v40, %v399_v44 }
  0x53   : > { %608 = vst [vmem:[%s995_s5 + $0x140] sm:$0xff] %v566_v45  ;;  %v567_v47 = vmax.f32 %v525_v46, 0.0 }
  0x55   : > { %609 = vst [vmem:[%s995_s5 + $0x148] sm:$0xff] %v567_v47 }
  0x56 PF: > { %s14_s15 = sadd.s32 1, %s913_s15  }
  0x57   : > { %p11_p4 = scmp.ge.s32.totalorder %s14_s15, 4  }
  0x59   :  { %13 = sbr.rel (!%p11_p4) target bundleno = 1 (0x1), region = 69 }

// kernel: bottleneck_forward.6
= control target key start
LH: loop header
LB: loop body
LE: loop exit
PB: predicated region body
PF: predicated region fallthrough
CT: control target
= control target key end

     0   :  { %s2049_s21 = smov 0   ;;  %s2708_s0 = inlined_call_operand.vmem [shape: bf16[2,336,128], index: 0, kind: input, shape index: {}]   ;;  %s2709_s1 = inlined_call_operand.vmem [shape: f32[1,128], index: 1, kind: input, shape index: {}]   ;;  %s2710_s2 = inlined_call_operand.vmem [shape: f32[1,128], index: 2, kind: input, shape index: {}]   ;;  %s2711_s3 = inlined_call_operand.vmem [shape: f32[336,1], index: 3, kind: input, shape index: {}]   ;;  %s2712_s4 = inlined_call_operand.vmem [shape: bf16[128,128], index: 4, kind: input, shape index: {}]   ;;  %s2713_s5 = inlined_call_operand.vmem [shape: bf16[2,336,128], index: 5, kind: output, shape index: {0}]   ;;  %s2714_s6 = inlined_call_operand.vmem [shape: f32[2,2,128], index: 6, kind: output, shape index: {1}]  }
   0x1 LB: > { %s1503_s22 = sadd.s32 4294967295, %s2009_s21   ;;  %p1507_p0 = scmp.ge.s32.totalorder %s2009_s21, 1  ;;  %s2009_s21 = sphi %s2049_s21, %s17_s21  }
   0x2   : > { %p215_p1 = scmp.lt.s32.totalorder %s2009_s21, 3 }
   0x4   : > { %p216_p2 = pnand %p1507_p0, %p215_p1 }
   0x5   : > { %p249_p3 = scmp.lt.s32.totalorder (!%p216_p2), %s1503_s22, 1 }
   0x6   : > { %219 = sbr.rel (%p216_p2) target bundleno = 381 (0x17d), region = 40 }
   0xb   : > { %v1995_v0 = vld [vmem:[%s2712_s4 + $0x38] sm:$0xff]   ;;  %v2011_v1 = vmov 0.0   ;;  %v1996_v2 = vld [vmem:[%s2712_s4 + $0x30] sm:$0xff]   ;;  %vm2012_vm0 = vmmov 0   ;;  %s2716_s22 = smov (!%p249_p3, %s1503_s22), 1  ;;  %v2013_v3 = vmov 0  }
   0xc   : > { %1865 = vmatprep.subr.bf16.mxu0 %v2011_v1  ;;  %1965 = vmatprep.subr.bf16.mxu1 %v2011_v1  ;;  %v1997_v4 = vld [vmem:[%s2712_s4 + $0x28] sm:$0xff]   ;;  %s1981_s29 = smul.u32 168, %s2716_s22  ;;  %v264_v5 = vld [vmem:[%s2711_s3] sm:$0xff]  ;;  %v266_v9 = vld [vmem:[%s2711_s3 + $0x10] sm:$0xff]  ;;  %vm1414_vm1 = vcmask 1040384  }
   0xd   : > { %1866 = vmatpush3.bf16.msra.mxu0 %v1995_v0  ;;  %1973 = vmatpush3.bf16.msra.mxu1 %v1995_v0  ;;  %v1998_v6 = vld [vmem:[%s2712_s4 + $0x20] sm:$0xff]   ;;  %v265_v14 = vld [vmem:[%s2711_s3 + $0x8] sm:$0xff]  ;;  %v1999_v15 = vld [vmem:[%s2712_s4 + $0x18] sm:$0xff]  }
   0xe   : > { %1867 = vmatprep.subr.bf16.mxu0 %v2011_v1  ;;  %1966 = vmatprep.subr.bf16.mxu1 %v2011_v1  ;;  %s2084_s8 = scalar_lea.vmem %s2708_s0, %s1981_s29  ;;  %v2108_v16 = vld [vmem:[%s2709_s1] ss:$0 sm:$0xff]  ;;  %v267_v17 = vld [vmem:[%s2711_s3 + $0x18] sm:$0xff]  ;;  %v2000_v25 = vld [vmem:[%s2712_s4 + $0x10] sm:$0xff]   ;;  %s2449_s30 = scalar_lea.vmem %s2713_s5, %s1981_s29 }
   0xf   : > { %1881 = vmatprep.mubr.msk.bf16.mxu0 %vm2012_vm0, %v2011_v1  ;;  %1925 = vmatprep.mubr.msk.bf16.mxu1 %vm2012_vm0, %v2011_v1  ;;  %v1608_v7 = vld [vmem:[%s2084_s8] sm:$0xff]   ;;  %v1806_v8 = vld [vmem:[%s2084_s8 + $0x58] sm:$0xff]   ;;  %v1796_v22 = vld [vmem:[%s2084_s8 + $0x8] sm:$0xff]   ;;  %s1510_s29 = sshll.u32 %s2716_s22, 1 }
  0x10   : > { %1993 = vset.pattern.permute.xlu0 %v2013_v3  ;;  %1994 = vset.pattern.permute.xlu1 %v2013_v3  ;;  %v1609_v10 = vunpack.c.l.bf16 %v1608_v7  ;;  %v1610_v11 = vunpack.c.h.bf16 %v1608_v7  ;;  %v1653_v12 = vunpack.c.l.bf16 %v1806_v8  ;;  %v1654_v13 = vunpack.c.h.bf16 %v1806_v8  ;;  %v1807_v23 = vld [vmem:[%s2084_s8 + $0x60] sm:$0xff]   ;;  %v269_v27 = vld [vmem:[%s2711_s3 + $0x28] sm:$0xff]  ;;  %v270_v36 = vld [vmem:[%s2711_s3 + $0x30] sm:$0xff]  ;;  %s262_s10 = scalar_lea.vmem %s2714_s6, %s1510_s29 }
  0x11   : > { %1868 = vmatpush3.bf16.msra.mxu0 %v1996_v2  ;;  %1974 = vmatpush3.bf16.msra.mxu1 %v1996_v2  ;;  %v268_v24 = vld [vmem:[%s2711_s3 + $0x20] sm:$0xff]  ;;  %v1613_v28 = vunpack.c.l.bf16 %v1796_v22  ;;  %v1614_v29 = vunpack.c.h.bf16 %v1796_v22  ;;  %v1657_v30 = vunpack.c.l.bf16 %v1807_v23  ;;  %v1658_v31 = vunpack.c.h.bf16 %v1807_v23  ;;  %v2001_v37 = vld [vmem:[%s2712_s4 + $0x8] sm:$0xff]   ;;  %v271_v38 = vld [vmem:[%s2711_s3 + $0x38] sm:$0xff] }
  0x12   : > { %1869 = vmatprep.subr.bf16.mxu0 %v2011_v1  ;;  %1967 = vmatprep.subr.bf16.mxu1 %v2011_v1  ;;  %v397_v18 = vmul.f32 %v1609_v10, %v2108_v16  ;;  %v398_v19 = vmul.f32 %v1610_v11, %v2108_v16  ;;  %v419_v20 = vmul.f32 %v1653_v12, %v2108_v16  ;;  %v2130_v26 = vld [vmem:[%s2710_s2] ss:$0 sm:$0xff]  ;;  %v1797_v39 = vld [vmem:[%s2084_s8 + $0x10] sm:$0xff]   ;;  %v1808_v40 = vld [vmem:[%s2084_s8 + $0x68] sm:$0xff]  }
  0x13   : > { %1028 = vperm.xlu0 %1993, %v264_v5   ;;  %1038 = vperm.xlu1 %1994, %v266_v9   ;;  %v420_v21 = vmul.f32 %v1654_v13, %v2108_v16  ;;  %v399_v41 = vmul.f32 %v1613_v28, %v2108_v16  ;;  %v400_v42 = vmul.f32 %v1614_v29, %v2108_v16  ;;  %v1798_v45 = vld [vmem:[%s2084_s8 + $0x18] sm:$0xff]   ;;  %v272_v50 = vld [vmem:[%s2711_s3 + $0x40] sm:$0xff]  ;;  %v1617_v52 = vunpack.c.l.bf16 %v1797_v39  ;;  %v1809_v55 = vld [vmem:[%s2084_s8 + $0x70] sm:$0xff]  }
  0x14   : > { %v446_v32 = vadd.f32 %v2130_v26, %v397_v18  ;;  %v447_v33 = vadd.f32 %v2130_v26, %v398_v19  ;;  %v468_v34 = vadd.f32 %v2130_v26, %v419_v20  ;;  %v421_v43 = vmul.f32 %v1657_v30, %v2108_v16  ;;  %v2002_v51 = vld [vmem:[%s2712_s4] sm:$0xff]   ;;  %v273_v56 = vld [vmem:[%s2711_s3 + $0x48] sm:$0xff] }
  0x15   : > { %1870 = vmatpush3.bf16.msra.mxu0 %v1997_v4  ;;  %1975 = vmatpush3.bf16.msra.mxu1 %v1997_v4  ;;  %v469_v35 = vadd.f32 %v2130_v26, %v420_v21  ;;  %v422_v44 = vmul.f32 %v1658_v31, %v2108_v16  ;;  %v1618_v53 = vunpack.c.h.bf16 %v1797_v39  ;;  %v1661_v54 = vunpack.c.l.bf16 %v1808_v40  ;;  %v1799_v5 = vld [vmem:[%s2084_s8 + $0x20] sm:$0xff]   ;;  %v278_v39 = vld [vmem:[%s2711_s3 + $0x70] sm:$0xff] }
  0x16   : > { %1871 = vmatprep.subr.bf16.mxu0 %v2011_v1  ;;  %1968 = vmatprep.subr.bf16.mxu1 %v2011_v1  ;;  %v488_v46 = vmax.f32 %v446_v32, 0.0  ;;  %v489_v47 = vmax.f32 %v447_v33, 0.0  ;;  %v510_v48 = vmax.f32 %v468_v34, 0.0  ;;  %v1662_v57 = vunpack.c.h.bf16 %v1808_v40  ;;  %v276_v22 = vld [vmem:[%s2711_s3 + $0x60] sm:$0xff]  ;;  %v277_v34 = vld [vmem:[%s2711_s3 + $0x68] sm:$0xff] }
  0x17   : > { %1033 = vperm.xlu0 %1993, %v265_v14   ;;  %1043 = vperm.xlu1 %1994, %v267_v17   ;;  %v511_v49 = vmax.f32 %v469_v35, 0.0  ;;  %v1621_v58 = vunpack.c.l.bf16 %v1798_v45  ;;  %v1622_v59 = vunpack.c.h.bf16 %v1798_v45  ;;  %v448_v60 = vadd.f32 %v2130_v26, %v399_v41  ;;  %v275_v17 = vld [vmem:[%s2711_s3 + $0x58] sm:$0xff] }
  0x18   : > { %v449_v61 = vadd.f32 %v2130_v26, %v400_v42  ;;  %v470_v62 = vadd.f32 %v2130_v26, %v421_v43  ;;  %v471_v63 = vadd.f32 %v2130_v26, %v422_v44  ;;  %v530_v0 = vpack.c.bf16 %v489_v47, %v488_v46  ;;  %v2214_v47 = vld [vmem:[%s2084_s8 + $0x28] sm:$0xff]  }
  0x19   : > { %1872 = vmatpush3.bf16.msra.mxu0 %v1998_v6  ;;  %1976 = vmatpush3.bf16.msra.mxu1 %v1998_v6  ;;  %v541_v2 = vpack.c.bf16 %v511_v49, %v510_v48  ;;  %v1665_v3 = vunpack.c.l.bf16 %v1809_v55  ;;  %v1666_v4 = vunpack.c.h.bf16 %v1809_v55  ;;  %v274_v6 = vld [vmem:[%s2711_s3 + $0x50] sm:$0xff]  ;;  %v401_v7 = vmul.f32 %v1617_v52, %v2108_v16  ;;  %v1803_v48 = vld [vmem:[%s2084_s8 + $0x40] sm:$0xff]  }
  0x1a   : > { %1873 = vmatprep.subr.bf16.mxu0 %v2011_v1  ;;  %1969 = vmatprep.subr.bf16.mxu1 %v2011_v1  ;;  %v402_v8 = vmul.f32 %v1618_v53, %v2108_v16  ;;  %v423_v9 = vmul.f32 %v1661_v54, %v2108_v16  ;;  %v424_v10 = vmul.f32 %v1662_v57, %v2108_v16  ;;  %v490_v13 = vmax.f32 %v448_v60, 0.0  ;;  %v280_v55 = vld [vmem:[%s2711_s3 + $0x80] sm:$0xff] }
  0x1b   : > { %1048 = vperm.xlu0 %1993, %v268_v24   ;;  %1053 = vperm.xlu1 %1994, %v269_v27   ;;  %v403_v11 = vmul.f32 %v1621_v58, %v2108_v16  ;;  %v404_v12 = vmul.f32 %v1622_v59, %v2108_v16  ;;  %v491_v14 = vmax.f32 %v449_v61, 0.0  ;;  %v512_v18 = vmax.f32 %v470_v62, 0.0  ;;  %v1810_v27 = vld [vmem:[%s2084_s8 + $0x78] sm:$0xff]  }
  0x1c   : > { %v513_v19 = vmax.f32 %v471_v63, 0.0  ;;  %v425_v20 = vmul.f32 %v1665_v3, %v2108_v16  ;;  %v426_v21 = vmul.f32 %v1666_v4, %v2108_v16  ;;  %v450_v23 = vadd.f32 %v2130_v26, %v401_v7  ;;  %v1814_v58 = vld [vmem:[%s2084_s8 + $0x98] sm:$0xff]  }
  0x1d   : > { %1874 = vmatpush3.bf16.msra.mxu0 %v1999_v15  ;;  %1977 = vmatpush3.bf16.msra.mxu1 %v1999_v15  ;;  %v1625_v15 = vunpack.c.l.bf16 %v1799_v5  ;;  %v451_v24 = vadd.f32 %v2130_v26, %v402_v8  ;;  %v473_v28 = vadd.f32 %v2130_v26, %v424_v10  ;;  %v452_v29 = vadd.f32 %v2130_v26, %v403_v11  ;;  %v282_v11 = vld [vmem:[%s2711_s3 + $0x90] sm:$0xff] }
  0x1e   : > { %1875 = vmatprep.subr.bf16.mxu0 %v2011_v1  ;;  %1970 = vmatprep.subr.bf16.mxu1 %v2011_v1  ;;  %v453_v30 = vadd.f32 %v2130_v26, %v404_v12  ;;  %v531_v31 = vpack.c.bf16 %v491_v14, %v490_v13  ;;  %v1626_v32 = vunpack.c.h.bf16 %v1799_v5  ;;  %v542_v35 = vpack.c.bf16 %v513_v19, %v512_v18  ;;  %v281_v5 = vld [vmem:[%s2711_s3 + $0x88] sm:$0xff] }
  0x1f   : > { %1058 = vperm.xlu0 %1993, %v270_v36   ;;  %1063 = vperm.xlu1 %1994, %v271_v38   ;;  %v405_v33 = vmul.f32 %v1625_v15, %v2108_v16  ;;  %v474_v36 = vadd.f32 %v2130_v26, %v425_v20  ;;  %v1669_v38 = vunpack.c.l.bf16 %v1810_v27  ;;  %v492_v40 = vmax.f32 %v450_v23, 0.0 }
  0x20   : > { %v493_v41 = vmax.f32 %v451_v24, 0.0  ;;  %v515_v43 = vmax.f32 %v473_v28, 0.0  ;;  %v494_v44 = vmax.f32 %v452_v29, 0.0  ;;  %v495_v45 = vmax.f32 %v453_v30, 0.0  ;;  %v1805_v28 = vld [vmem:[%s2084_s8 + $0x50] sm:$0xff]  }
  0x21   : > { %1876 = vmatpush3.bf16.msra.mxu0 %v2000_v25  ;;  %1978 = vmatpush3.bf16.msra.mxu1 %v2000_v25  ;;  %v472_v25 = vadd.f32 %v2130_v26, %v423_v9  ;;  %v1670_v46 = vunpack.c.h.bf16 %v1810_v27  ;;  %v406_v49 = vmul.f32 %v1626_v32, %v2108_v16  ;;  %v516_v52 = vmax.f32 %v474_v36, 0.0 }
  0x22   : > { %1877 = vmatprep.subr.bf16.mxu0 %v2011_v1  ;;  %1971 = vmatprep.subr.bf16.mxu1 %v2011_v1  ;;  %v427_v54 = vmul.f32 %v1669_v38, %v2108_v16  ;;  %v1641_v57 = vunpack.c.l.bf16 %v1803_v48  ;;  %v532_v59 = vpack.c.bf16 %v493_v41, %v492_v40  ;;  %v2234_v61 = vpack.c.bf16 %v495_v45, %v494_v44 }
  0x23   : > { %1068 = vperm.xlu0 %1993, %v272_v50   ;;  %1073 = vperm.xlu1 %1994, %v273_v56   ;;  %v514_v42 = vmax.f32 %v472_v25, 0.0  ;;  %v2219_v50 = vadd.f32 %v2130_v26, %v405_v33  ;;  %v1629_v56 = vunpack.c.l.bf16 %v2214_v47  ;;  %v428_v62 = vmul.f32 %v1670_v46, %v2108_v16  ;;  %v283_v25 = vld [vmem:[%s2711_s3 + $0x98] sm:$0xff]  ;;  %v285_v46 = vld [vmem:[%s2711_s3 + $0xa8] sm:$0xff] }
  0x24   : > { %v2238_v63 = vadd.f32 %v2130_v26, %v406_v49  ;;  %v1642_v3 = vunpack.c.h.bf16 %v1803_v48  ;;  %v413_v4 = vmul.f32 %v1641_v57, %v2108_v16  ;;  %v2252_v8 = vadd.f32 %v2130_v26, %v427_v54  ;;  %v286_v49 = vld [vmem:[%s2711_s3 + $0xb0] sm:$0xff] }
  0x25   : > { %1878 = vmatpush3.bf16.msra.mxu0 %v2001_v37  ;;  %1979 = vmatpush3.bf16.msra.mxu1 %v2001_v37  ;;  %v475_v37 = vadd.f32 %v2130_v26, %v426_v21  ;;  %v543_v60 = vpack.c.bf16 %v515_v43, %v514_v42  ;;  %v1630_v9 = vunpack.c.h.bf16 %v2214_v47  ;;  %v1685_v10 = vunpack.c.l.bf16 %v1814_v58 }
  0x26   : > { %1879 = vmatprep.subr.bf16.mxu0 %v2011_v1  ;;  %1972 = vmatprep.subr.bf16.mxu1 %v2011_v1  ;;  %v2259_v12 = vmul.f32 %v1629_v56, %v2108_v16  ;;  %v414_v13 = vmul.f32 %v1642_v3, %v2108_v16  ;;  %v462_v14 = vadd.f32 %v2130_v26, %v413_v4  ;;  %v1686_v15 = vunpack.c.h.bf16 %v1814_v58  ;;  %v1801_v3 = vld [vmem:[%s2084_s8 + $0x30] sm:$0xff]  }
  0x27   : > { %1078 = vperm.xlu0 %1993, %v274_v6   ;;  %1083 = vperm.xlu1 %1994, %v275_v17   ;;  %v517_v53 = vmax.f32 %v475_v37, 0.0  ;;  %v1804_v6 = vld [vmem:[%s2084_s8 + $0x48] sm:$0xff]   ;;  %v1815_v17 = vld [vmem:[%s2084_s8 + $0xa0] sm:$0xff]   ;;  %v2265_v18 = vadd.f32 %v2130_v26, %v428_v62  ;;  %v435_v20 = vmul.f32 %v1685_v10, %v2108_v16  ;;  %v1649_v41 = vunpack.c.l.bf16 %v1805_v28 }
  0x28   : > { %v1645_v21 = vunpack.c.l.bf16 %v1804_v6  ;;  %v504_v23 = vmax.f32 %v462_v14, 0.0  ;;  %v436_v24 = vmul.f32 %v1686_v15, %v2108_v16  ;;  %v1646_v27 = vunpack.c.h.bf16 %v1804_v6  ;;  %v288_v10 = vld [vmem:[%s2711_s3 + $0xc0] sm:$0xff] }
  0x29   : > { %1880 = vmatpush3.bf16.msra.mxu0 %v2002_v51  ;;  %1980 = vmatpush3.bf16.msra.mxu1 %v2002_v51  ;;  %v279_v51 = vld [vmem:[%s2711_s3 + $0x78] sm:$0xff]  ;;  %v2249_v7 = vpack.c.bf16 %v517_v53, %v516_v52  ;;  %v484_v30 = vadd.f32 %v2130_v26, %v435_v20  ;;  %v1689_v33 = vunpack.c.l.bf16 %v1815_v17  ;;  %v1690_v37 = vunpack.c.h.bf16 %v1815_v17 }
  0x2a   : > { %v415_v32 = vmul.f32 %v1645_v21, %v2108_v16  ;;  %v416_v36 = vmul.f32 %v1646_v27, %v2108_v16  ;;  %v417_v52 = vmul.f32 %v1649_v41, %v2108_v16  ;;  %v497_v53 = vmax.f32 %v2238_v63, 0.0 }
  0x2b   : > { %1088 = vperm.xlu0 %1993, %v276_v22   ;;  %1093 = vperm.xlu1 %1994, %v277_v34   ;;  %v463_v22 = vadd.f32 %v2130_v26, %v414_v13  ;;  %v526_v38 = vmax.f32 %v484_v30, 0.0  ;;  %v437_v40 = vmul.f32 %v1689_v33, %v2108_v16  ;;  %v438_v45 = vmul.f32 %v1690_v37, %v2108_v16  ;;  %v1813_v37 = vld [vmem:[%s2084_s8 + $0x90] sm:$0xff]  }
  0x2c   : > { %1882 = vmatmul.mubr.bf16.vlgmr.msra.gmra.mxu0 %v530_v0  ;;  %1926 = vmatmul.mubr.bf16.vlgmr.msra.gmra.mxu1 %v541_v2  ;;  %v496_v0 = vmax.f32 %v2219_v50, 0.0  ;;  %v2242_v2 = vld [vmem:[%s2084_s8 + $0x80] sm:$0xff]   ;;  %v465_v44 = vadd.f32 %v2130_v26, %v416_v36  ;;  %v408_v57 = vmul.f32 %v1630_v9, %v2108_v16  ;;  %v518_v6 = vmax.f32 %v2252_v8, 0.0  ;;  %v290_v50 = vld [vmem:[%s2711_s3 + $0xd0] sm:$0xff] }
  0x2d   : > { %1885 = vmatprep.mubr.msk.bf16.mxu0 %vm2012_vm0, %v2011_v1  ;;  %1929 = vmatprep.mubr.msk.bf16.mxu1 %vm2012_vm0, %v2011_v1  ;;  %v1673_v19 = vunpack.c.l.bf16 %v2242_v2  ;;  %v1674_v29 = vunpack.c.h.bf16 %v2242_v2  ;;  %v505_v34 = vmax.f32 %v463_v22, 0.0  ;;  %v486_v48 = vadd.f32 %v2130_v26, %v437_v40  ;;  %v289_v22 = vld [vmem:[%s2711_s3 + $0xc8] sm:$0xff]  ;;  %v292_v36 = vld [vmem:[%s2711_s3 + $0xe0] sm:$0xff] }
  0x2e   : > { %v487_v56 = vadd.f32 %v2130_v26, %v438_v45  ;;  %v519_v9 = vmax.f32 %v2265_v18, 0.0  ;;  %v457_v8 = vadd.f32 %v2130_v26, %v408_v57  ;;  %v1633_v15 = vunpack.c.l.bf16 %v1801_v3  ;;  %v293_v45 = vld [vmem:[%s2711_s3 + $0xe8] sm:$0xff]  ;;  %v295_v57 = vld [vmem:[%s2711_s3 + $0xf8] sm:$0xff] }
  0x2f   : > { %1098 = vperm.xlu0 %1993, %v278_v39   ;;  %1103 = vperm.xlu1 %1994, %v279_v51   ;;  %v464_v39 = vadd.f32 %v2130_v26, %v415_v32  ;;  %v2289_v42 = vpack.c.bf16 %v505_v34, %v504_v23  ;;  %v1650_v51 = vunpack.c.h.bf16 %v1805_v28  ;;  %v528_v58 = vmax.f32 %v486_v48, 0.0  ;;  %v291_v32 = vld [vmem:[%s2711_s3 + $0xd8] sm:$0xff] }
  0x30   : > { %v429_v62 = vmul.f32 %v1673_v19, %v2108_v16  ;;  %v430_v2 = vmul.f32 %v1674_v29, %v2108_v16  ;;  %v529_v4 = vmax.f32 %v487_v56, 0.0  ;;  %v534_v18 = vpack.c.bf16 %v497_v53, %v496_v0 }
  0x31   : > { %v506_v47 = vmax.f32 %v464_v39, 0.0  ;;  %v1634_v21 = vunpack.c.h.bf16 %v1801_v3  ;;  %v545_v23 = vpack.c.bf16 %v519_v9, %v518_v6  ;;  %v499_v27 = vmax.f32 %v457_v8, 0.0 }
  0x32   : > { %v2329_v14 = vpack.c.bf16 %v529_v4, %v528_v58  ;;  %v478_v19 = vadd.f32 %v2130_v26, %v429_v62  ;;  %v479_v20 = vadd.f32 %v2130_v26, %v430_v2  ;;  %v409_v28 = vmul.f32 %v1633_v15, %v2108_v16  ;;  %v296_v2 = vld [vmem:[%s2711_s3 + $0x100] sm:$0xff] }
  0x33   : > { %1108 = vperm.xlu0 %1993, %v280_v55   ;;  %1113 = vperm.xlu1 %1994, %v281_v5   ;;  %v507_v55 = vmax.f32 %v465_v44, 0.0  ;;  %v287_v5 = vld [vmem:[%s2711_s3 + $0xb8] sm:$0xff]  ;;  %v1681_v48 = vunpack.c.l.bf16 %v1813_v37 }
  0x34   : > { %1886 = vmatmul.mubr.bf16.gmra.mxu0 %v531_v31  ;;  %1930 = vmatmul.mubr.bf16.gmra.mxu1 %v542_v35  ;;  %v284_v31 = vld [vmem:[%s2711_s3 + $0xa0] sm:$0xff]  ;;  %v485_v35 = vadd.f32 %v2130_v26, %v436_v24  ;;  %v520_v29 = vmax.f32 %v478_v19, 0.0  ;;  %v521_v30 = vmax.f32 %v479_v20, 0.0  ;;  %v458_v39 = vadd.f32 %v2130_v26, %v409_v28  ;;  %v302_v20 = vld [vmem:[%s2711_s3 + $0x130] sm:$0xff] }
  0x35   : > { %1889 = vmatprep.mubr.msk.bf16.mxu0 %vm2012_vm0, %v2011_v1  ;;  %1933 = vmatprep.mubr.msk.bf16.mxu1 %vm2012_vm0, %v2011_v1  ;;  %v2311_v63 = vpack.c.bf16 %v507_v55, %v506_v47 }
  0x36   : > { %v527_v43 = vmax.f32 %v485_v35, 0.0  ;;  %v1802_v35 = vld [vmem:[%s2084_s8 + $0x38] sm:$0xff]   ;;  %v546_v40 = vpack.c.bf16 %v521_v30, %v520_v29 }
  0x37   : > { %1118 = vperm.xlu0 %1993, %v282_v11   ;;  %1123 = vperm.xlu1 %1994, %v283_v25   ;;  %v1638_v44 = vunpack.c.h.bf16 %v1802_v35 }
  0x38   : > { %v2302_v54 = vpack.c.bf16 %v527_v43, %v526_v38  ;;  %v1637_v43 = vunpack.c.l.bf16 %v1802_v35 }
  0x39   : > { %v412_v56 = vmul.f32 %v1638_v44, %v2108_v16 }
  0x3a   : > { %v411_v55 = vmul.f32 %v1637_v43, %v2108_v16 }
  0x3b   : > { %1128 = vperm.xlu0 %1993, %v284_v31   ;;  %1133 = vperm.xlu1 %1994, %v285_v46   ;;  %v410_v31 = vmul.f32 %v1634_v21, %v2108_v16  ;;  %v461_v6 = vadd.f32 %v2130_v26, %v412_v56  ;;  %v303_v21 = vld [vmem:[%s2711_s3 + $0x138] sm:$0xff] }
  0x3c   : > { %1890 = vmatmul.mubr.bf16.gmra.mxu0 %v532_v59  ;;  %1934 = vmatmul.mubr.bf16.gmra.mxu1 %v543_v60  ;;  %v418_v59 = vmul.f32 %v1650_v51, %v2108_v16  ;;  %v466_v60 = vadd.f32 %v2130_v26, %v417_v52  ;;  %v294_v51 = vld [vmem:[%s2711_s3 + $0xf0] sm:$0xff]  ;;  %v500_v52 = vmax.f32 %v458_v39, 0.0  ;;  %v460_v4 = vadd.f32 %v2130_v26, %v411_v55 }
  0x3d   : > { %1893 = vmatprep.mubr.msk.bf16.mxu0 %vm2012_vm0, %v2011_v1  ;;  %1937 = vmatprep.mubr.msk.bf16.mxu1 %vm2012_vm0, %v2011_v1  ;;  %v459_v41 = vadd.f32 %v2130_v26, %v410_v31 }
  0x3e   : > { %v467_v11 = vadd.f32 %v2130_v26, %v418_v59  ;;  %v508_v13 = vmax.f32 %v466_v60, 0.0  ;;  %v433_v60 = vmul.f32 %v1681_v48, %v2108_v16 }
  0x3f   : > { %1138 = vperm.xlu0 %1993, %v286_v49   ;;  %1143 = vperm.xlu1 %1994, %v287_v5   ;;  %v1682_v49 = vunpack.c.h.bf16 %v1813_v37  ;;  %v501_v53 = vmax.f32 %v459_v41, 0.0  ;;  %v297_v5 = vld [vmem:[%s2711_s3 + $0x108] sm:$0xff] }
  0x40   : > { %v509_v17 = vmax.f32 %v467_v11, 0.0  ;;  %v482_v9 = vadd.f32 %v2130_v26, %v433_v60  ;;  %v298_v11 = vld [vmem:[%s2711_s3 + $0x110] sm:$0xff] }
  0x41   : > { %v434_v62 = vmul.f32 %v1682_v49, %v2108_v16  ;;  %v536_v3 = vpack.c.bf16 %v501_v53, %v500_v52 }
  0x42   : > { %v2341_v25 = vpack.c.bf16 %v509_v17, %v508_v13  ;;  %v299_v13 = vld [vmem:[%s2711_s3 + $0x118] sm:$0xff]  ;;  %v524_v8 = vmax.f32 %v482_v9, 0.0  ;;  %v301_v17 = vld [vmem:[%s2711_s3 + $0x128] sm:$0xff] }
  0x43   : > { %1148 = vperm.xlu0 %1993, %v288_v10   ;;  %1153 = vperm.xlu1 %1994, %v289_v22   ;;  %v483_v10 = vadd.f32 %v2130_v26, %v434_v62  ;;  %v304_v22 = vld [vmem:[%s2711_s3 + $0x140] sm:$0xff] }
  0x44   : > { %1894 = vmatmul.mubr.bf16.gmra.mxu0 %v2234_v61  ;;  %1938 = vmatmul.mubr.bf16.gmra.mxu1 %v2249_v7  ;;  %v1812_v61 = vld [vmem:[%s2084_s8 + $0x88] sm:$0xff]   ;;  %v456_v7 = vadd.f32 %v2130_v26, %v2259_v12 }
  0x45   : > { %1897 = vmatprep.mubr.msk.bf16.mxu0 %vm2012_vm0, %v2011_v1  ;;  %1941 = vmatprep.mubr.msk.bf16.mxu1 %vm2012_vm0, %v2011_v1  ;;  %v1677_v12 = vunpack.c.l.bf16 %v1812_v61  ;;  %v1678_v24 = vunpack.c.h.bf16 %v1812_v61  ;;  %v502_v61 = vmax.f32 %v460_v4, 0.0  ;;  %v525_v15 = vmax.f32 %v483_v10, 0.0 }
  0x46   : > { %v498_v0 = vmax.f32 %v456_v7, 0.0  ;;  %v503_v7 = vmax.f32 %v461_v6, 0.0 }
  0x47   : > { %1158 = vperm.xlu0 %1993, %v290_v50   ;;  %v431_v33 = vmul.f32 %v1677_v12, %v2108_v16  ;;  %v432_v34 = vmul.f32 %v1678_v24, %v2108_v16  ;;  %1163 = vperm.xlu1 %1994, %v291_v32   ;;  %v548_v19 = vpack.c.bf16 %v525_v15, %v524_v8 }
  0x48   : > { %v535_v38 = vpack.c.bf16 %v499_v27, %v498_v0 }
  0x49   : > { %v480_v46 = vadd.f32 %v2130_v26, %v431_v33  ;;  %v481_v47 = vadd.f32 %v2130_v26, %v432_v34  ;;  %v300_v26 = vld [vmem:[%s2711_s3 + $0x120] sm:$0xff] }
  0x4b   : > { %1168 = vperm.xlu0 %1993, %v292_v36   ;;  %1173 = vperm.xlu1 %1994, %v293_v45   ;;  %v522_v58 = vmax.f32 %v480_v46, 0.0  ;;  %v523_v59 = vmax.f32 %v481_v47, 0.0 }
  0x4c   : > { %1898 = vmatmul.mubr.bf16.gmra.mxu0 %v534_v18  ;;  %1942 = vmatmul.mubr.bf16.gmra.mxu1 %v545_v23  ;;  %v537_v18 = vpack.c.bf16 %v503_v7, %v502_v61  ;;  %v305_v23 = vld [vmem:[%s2711_s3 + $0x148] sm:$0xff] }
  0x4d   : > { %1901 = vmatprep.mubr.msk.bf16.mxu0 %vm2012_vm0, %v2011_v1  ;;  %1945 = vmatprep.mubr.msk.bf16.mxu1 %vm2012_vm0, %v2011_v1  ;;  %v547_v16 = vpack.c.bf16 %v523_v59, %v522_v58 }
  0x4f   : > { %1178 = vperm.xlu0 %1993, %v294_v51   ;;  %1183 = vperm.xlu1 %1994, %v295_v57  }
  0x53   : > { %1188 = vperm.xlu0 %1993, %v296_v2   ;;  %1193 = vperm.xlu1 %1994, %v297_v5  }
  0x54   : > { %1902 = vmatmul.mubr.bf16.gmra.mxu0 %v535_v38  ;;  %1946 = vmatmul.mubr.bf16.gmra.mxu1 %v546_v40 }
  0x55   : > { %1905 = vmatprep.mubr.msk.bf16.mxu0 %vm2012_vm0, %v2011_v1  ;;  %1949 = vmatprep.mubr.msk.bf16.mxu1 %vm2012_vm0, %v2011_v1 }
  0x57   : > { %1198 = vperm.xlu0 %1993, %v298_v11   ;;  %1203 = vperm.xlu1 %1994, %v299_v13  }
  0x5b   : > { %1208 = vperm.xlu0 %1993, %v300_v26   ;;  %1213 = vperm.xlu1 %1994, %v301_v17  }
  0x5c   : > { %1906 = vmatmul.mubr.bf16.gmra.mxu0 %v536_v3  ;;  %1950 = vmatmul.mubr.bf16.gmra.mxu1 %v547_v16 }
  0x5d   : > { %1909 = vmatprep.mubr.msk.bf16.mxu0 %vm2012_vm0, %v2011_v1  ;;  %1953 = vmatprep.mubr.msk.bf16.mxu1 %vm2012_vm0, %v2011_v1 }
  0x5f   : > { %1218 = vperm.xlu0 %1993, %v302_v20   ;;  %1223 = vperm.xlu1 %1994, %v303_v21  }
  0x63   : > { %1228 = vperm.xlu0 %1993, %v304_v22   ;;  %1233 = vperm.xlu1 %1994, %v305_v23  }
  0x64   : > { %1910 = vmatmul.mubr.bf16.gmra.mxu0 %v537_v18  ;;  %1954 = vmatmul.mubr.bf16.gmra.mxu1 %v548_v19 }
  0x65   : > { %1913 = vmatprep.mubr.msk.bf16.mxu0 %vm2012_vm0, %v2011_v1  ;;  %1957 = vmatprep.mubr.msk.bf16.mxu1 %vm2012_vm0, %v2011_v1 }
  0x6c   : > { %1914 = vmatmul.mubr.bf16.gmra.mxu0 %v2289_v42  ;;  %1958 = vmatmul.mubr.bf16.gmra.mxu1 %v2302_v54 }
  0x6d   : > { %1917 = vmatprep.mubr.msk.bf16.mxu0 %vm2012_vm0, %v2011_v1  ;;  %1961 = vmatprep.mubr.msk.bf16.mxu1 %vm2012_vm0, %v2011_v1 }
  0x74   : > { %1918 = vmatmul.mubr.bf16.gmra.mxu0 %v2311_v63  ;;  %1962 = vmatmul.mubr.bf16.gmra.mxu1 %v2329_v14 }
  0x75   : > { %1921 = vmatprep.mubr.msk.bf16.mxu0 %vm2012_vm0, %v2011_v1 }
  0x7c   : > { %1922 = vmatmul.mubr.bf16.gmra.mxu0 %v2341_v25 }
  0x8e   : > { %v2436_v12 = vpop.permute.xlu0 %1028  ;;  %v2442_v24 = vpop.permute.xlu1 %1038 }
  0x92   : > { %v2455_v14 = vpop.permute.xlu0 %1033  ;;  %v2461_v30 = vpop.permute.xlu1 %1043 }
  0x96   : > { %v2469_v35 = vpop.permute.xlu0 %1048  ;;  %v2475_v38 = vpop.permute.xlu1 %1053 }
  0x9a   : > { %v2487_v46 = vpop.permute.xlu0 %1058  ;;  %v2489_v49 = vpop.permute.xlu1 %1063 }
  0x9e   : > { %v2499_v58 = vpop.permute.xlu0 %1068  ;;  %v2507_v62 = vpop.permute.xlu1 %1073 }
  0xa2   : > { %v2513_v16 = vpop.permute.xlu0 %1078  ;;  %v2519_v13 = vpop.permute.xlu1 %1083 }
  0xa6   : > { %v2527_v26 = vpop.permute.xlu0 %1088  ;;  %v2533_v19 = vpop.permute.xlu1 %1093 }
  0xec   : > { %v2438_v42 = vpop.f32.mrf.mxu0  ;;  %v2440_v54 = vpop.f32.mrf.mxu1 }
  0xee   : > { %v1883_v50 = vpop.f32.mrf.mxu0  ;;  %v1927_v0 = vpop.f32.mrf.mxu1 }
  0xf0   : > { %v2451_v1 = vpop.f32.mrf.mxu0  ;;  %v2453_v63 = vpop.f32.mrf.mxu1 }
  0xf1   : > { %v1694_v25 = vpack.c.bf16 %v2451_v1, %v2438_v42  ;;  %v1749_v27 = vpack.c.bf16 %v2453_v63, %v2440_v54  ;;  %v1237_v50 = vmul.f32 %v2455_v14, %v2451_v1 }
  0xf2   : > { %v1884_v28 = vpop.f32.mrf.mxu0  ;;  %v1928_v29 = vpop.f32.mrf.mxu1 }
  0xf3   : > { %1695 = vst [vmem:[%s2449_s30] sm:$0xff] %v1694_v25   ;;  %1826 = vst [vmem:[%s2449_s30 + $0x58] sm:$0xff] %v1749_v27   ;;  %v2547_v27 = vpop.permute.xlu0 %1098  ;;  %v1236_v28 = vmul.f32 %v2436_v12, %v2438_v42  ;;  %v1326_v14 = vmul.f32 %v1237_v50, %v2451_v1 }
  0xf4   : > { %v2465_v31 = vpop.f32.mrf.mxu0  ;;  %v2467_v32 = vpop.f32.mrf.mxu1 }
  0xf5   : > { %v1238_v29 = vmul.f32 %v2442_v24, %v2465_v31 }
  0xf6   : > { %v1887_v33 = vpop.f32.mrf.mxu0  ;;  %v1931_v34 = vpop.f32.mrf.mxu1 }
  0xf8   : > { %v2471_v36 = vpop.f32.mrf.mxu0  ;;  %v2473_v37 = vpop.f32.mrf.mxu1 }
  0xf9   : > { %v1699_v39 = vpack.c.bf16 %v2471_v36, %v2465_v31  ;;  %v1754_v40 = vpack.c.bf16 %v2473_v37, %v2467_v32 }
  0xfa   : > { %v1888_v41 = vpop.f32.mrf.mxu0  ;;  %v1932_v43 = vpop.f32.mrf.mxu1 }
  0xfb   : > { %1816 = vst [vmem:[%s2449_s30 + $0x8] sm:$0xff] %v1699_v39   ;;  %1827 = vst [vmem:[%s2449_s30 + $0x60] sm:$0xff] %v1754_v40   ;;  %v2553_v39 = vpop.permute.xlu1 %1103  ;;  %v1239_v40 = vmul.f32 %v2461_v30, %v2471_v36 }
  0xfc   : > { %v2483_v44 = vpop.f32.mrf.mxu0  ;;  %v2485_v45 = vpop.f32.mrf.mxu1 }
  0xfd   : > { %v1240_v1 = vmul.f32 %v2469_v35, %v2483_v44 }
  0xfe   : > { %v1891_v47 = vpop.f32.mrf.mxu0  ;;  %v1935_v48 = vpop.f32.mrf.mxu1 }
  0xff   : > { %v1325_v47 = vmul.f32 %v1236_v28, %v2438_v42  ;;  %v1278_v48 = vadd.f32 %v1237_v50, %v1236_v28 }
 0x100   : > { %v2491_v51 = vpop.f32.mrf.mxu0  ;;  %v2493_v52 = vpop.f32.mrf.mxu1 }
 0x101   : > { %v1704_v53 = vpack.c.bf16 %v2491_v51, %v2483_v44  ;;  %v1759_v55 = vpack.c.bf16 %v2493_v52, %v2485_v45 }
 0x102   : > { %v1892_v56 = vpop.f32.mrf.mxu0  ;;  %v1936_v57 = vpop.f32.mrf.mxu1 }
 0x103   : > { %1817 = vst [vmem:[%s2449_s30 + $0x10] sm:$0xff] %v1704_v53   ;;  %1828 = vst [vmem:[%s2449_s30 + $0x68] sm:$0xff] %v1759_v55   ;;  %v1327_v53 = vmul.f32 %v1238_v29, %v2465_v31  ;;  %v2570_v56 = vpop.permute.xlu0 %1108  ;;  %v1367_v57 = vadd.f32 %v1326_v14, %v1325_v47  ;;  %v2581_v31 = vpop.permute.xlu1 %1113 }
 0x104   : > { %v2503_v59 = vpop.f32.mrf.mxu0  ;;  %v2505_v60 = vpop.f32.mrf.mxu1 }
 0x105   : > { %v1368_v35 = vadd.f32 %v1367_v57, %v1327_v53 }
 0x106   : > { %v1895_v2 = vpop.f32.mrf.mxu0  ;;  %v1939_v3 = vpop.f32.mrf.mxu1 }
 0x107   : > { %v1279_v2 = vadd.f32 %v1278_v48, %v1238_v29  ;;  %v1328_v3 = vmul.f32 %v1239_v40, %v2471_v36  ;;  %v2591_v28 = vpop.permute.xlu0 %1118 }
 0x108   : > { %v2509_v4 = vpop.f32.mrf.mxu0  ;;  %v2511_v5 = vpop.f32.mrf.mxu1 }
 0x109   : > { %v1709_v6 = vpack.c.bf16 %v2509_v4, %v2503_v59  ;;  %v1764_v9 = vpack.c.bf16 %v2511_v5, %v2505_v60 }
 0x10a   : > { %v1896_v10 = vpop.f32.mrf.mxu0  ;;  %v1940_v11 = vpop.f32.mrf.mxu1 }
 0x10b   : > { %1818 = vst [vmem:[%s2449_s30 + $0x18] sm:$0xff] %v1709_v6   ;;  %1829 = vst [vmem:[%s2449_s30 + $0x70] sm:$0xff] %v1764_v9   ;;  %v1241_v6 = vmul.f32 %v2475_v38, %v2491_v51  ;;  %v1280_v10 = vadd.f32 %v1279_v2, %v1239_v40  ;;  %v1329_v11 = vmul.f32 %v1240_v1, %v2483_v44 }
 0x10c   : > { %v2523_v61 = vpop.f32.mrf.mxu0  ;;  %v2525_v7 = vpop.f32.mrf.mxu1 }
 0x10d   : > { %v1281_v36 = vadd.f32 %v1280_v10, %v1240_v1  ;;  %v1330_v38 = vmul.f32 %v1241_v6, %v2491_v51  ;;  %v1244_v51 = vmul.f32 %v2499_v58, %v2523_v61 }
 0x10e   : > { %v1899_v8 = vpop.f32.mrf.mxu0  ;;  %v1943_v15 = vpop.f32.mrf.mxu1 }
 0x10f   : > { %v1242_v8 = vmul.f32 %v2487_v46, %v2503_v59  ;;  %v1333_v58 = vmul.f32 %v1244_v51, %v2523_v61 }
 0x110   : > { %v2529_v17 = vpop.f32.mrf.mxu0  ;;  %v2531_v18 = vpop.f32.mrf.mxu1 }
 0x111   : > { %v1714_v20 = vpack.c.bf16 %v2529_v17, %v2523_v61  ;;  %v1769_v21 = vpack.c.bf16 %v2531_v18, %v2525_v7  ;;  %v1245_v48 = vmul.f32 %v2507_v62, %v2529_v17 }
 0x112   : > { %v1900_v22 = vpop.f32.mrf.mxu0  ;;  %v1944_v23 = vpop.f32.mrf.mxu1 }
 0x113   : > { %1819 = vst [vmem:[%s2449_s30 + $0x20] sm:$0xff] %v1714_v20   ;;  %1830 = vst [vmem:[%s2449_s30 + $0x78] sm:$0xff] %v1769_v21   ;;  %v1369_v21 = vadd.f32 %v1368_v35, %v1328_v3  ;;  %v1243_v22 = vmul.f32 %v2489_v49, %v2509_v4  ;;  %v2599_v49 = vpop.permute.xlu1 %1123  ;;  %v2611_v3 = vpop.permute.xlu0 %1128  ;;  %v1334_v62 = vmul.f32 %v1245_v48, %v2529_v17 }
 0x114   : > { %v2543_v0 = vpop.f32.mrf.mxu0  ;;  %v2545_v25 = vpop.f32.mrf.mxu1 }
 0x115   : > { %v1370_v29 = vadd.f32 %v1369_v21, %v1329_v11  ;;  %v1332_v47 = vmul.f32 %v1243_v22, %v2509_v4 }
 0x116   : > { %v1903_v33 = vpop.f32.mrf.mxu0  ;;  %v1947_v34 = vpop.f32.mrf.mxu1 }
 0x117   : > { %v1282_v33 = vadd.f32 %v1281_v36, %v1241_v6  ;;  %v1331_v34 = vmul.f32 %v1242_v8, %v2503_v59  ;;  %v2618_v61 = vpop.permute.xlu1 %1133 }
 0x118   : > { %v2558_v41 = vpop.f32.mrf.mxu0  ;;  %v2560_v43 = vpop.f32.mrf.mxu1 }
 0x119   : > { %v1719_v12 = vpack.c.bf16 %v2558_v41, %v2543_v0  ;;  %v1774_v24 = vpack.c.bf16 %v2560_v43, %v2545_v25  ;;  %v1247_v35 = vmul.f32 %v2519_v13, %v2558_v41 }
 0x11a   : > { %v1904_v55 = vpop.f32.mrf.mxu0  ;;  %v1948_v30 = vpop.f32.mrf.mxu1 }
 0x11b   : > { %1820 = vst [vmem:[%s2449_s30 + $0x28] sm:$0xff] %v1719_v12   ;;  %1831 = vst [vmem:[%s2449_s30 + $0x80] sm:$0xff] %v1774_v24   ;;  %v1371_v12 = vadd.f32 %v1370_v29, %v1330_v38  ;;  %v1283_v24 = vadd.f32 %v1282_v33, %v1242_v8  ;;  %v1246_v30 = vmul.f32 %v2513_v16, %v2543_v0 }
 0x11c   : > { %v2577_v42 = vpop.f32.mrf.mxu0  ;;  %v2579_v9 = vpop.f32.mrf.mxu1 }
 0x11d   : > { %v1372_v59 = vadd.f32 %v1371_v12, %v1331_v34  ;;  %v1284_v55 = vadd.f32 %v1283_v24, %v1243_v22  ;;  %v1335_v21 = vmul.f32 %v1246_v30, %v2543_v0  ;;  %v1248_v36 = vmul.f32 %v2527_v26, %v2577_v42  ;;  %v2631_v34 = vpop.permute.xlu0 %1138  ;;  %v2635_v24 = vpop.permute.xlu1 %1143 }
 0x11e   : > { %v1907_v15 = vpop.f32.mrf.mxu0  ;;  %v1951_v20 = vpop.f32.mrf.mxu1 }
 0x11f   : > { %v1373_v6 = vadd.f32 %v1372_v59, %v1332_v47  ;;  %v1285_v4 = vadd.f32 %v1284_v55, %v1244_v51 }
 0x120   : > { %v700_v23 = vpop.f32.mrf.mxu0  ;;  %v2589_v50 = vpop.f32.mrf.mxu1 }
 0x121   : > { %v1724_v44 = vpack.c.bf16 %v700_v23, %v2577_v42  ;;  %v1779_v46 = vpack.c.bf16 %v2589_v50, %v2579_v9  ;;  %v1374_v15 = vadd.f32 %v1373_v6, %v1333_v58  ;;  %v1286_v20 = vadd.f32 %v1285_v4, %v1245_v48  ;;  %v1149_v4 = vpop.permute.xlu0 %1148 }
 0x122   : > { %v1908_v14 = vpop.f32.mrf.mxu0  ;;  %v1952_v40 = vpop.f32.mrf.mxu1 }
 0x123   : > { %1821 = vst [vmem:[%s2449_s30 + $0x30] sm:$0xff] %v1724_v44   ;;  %1832 = vst [vmem:[%s2449_s30 + $0x88] sm:$0xff] %v1779_v46   ;;  %v1375_v13 = vadd.f32 %v1374_v15, %v1334_v62  ;;  %v1287_v22 = vadd.f32 %v1286_v20, %v1246_v30  ;;  %v1336_v44 = vmul.f32 %v1247_v35, %v2558_v41  ;;  %v1154_v15 = vpop.permute.xlu1 %1153 }
 0x124   : > { %v705_v53 = vpop.f32.mrf.mxu0  ;;  %v2606_v1 = vpop.f32.mrf.mxu1  ;;  %v1249_v46 = vmul.f32 %v2533_v19, %v700_v23  ;;  %v1337_v14 = vmul.f32 %v1248_v36, %v2577_v42 }
 0x125   : > { %v1376_v51 = vadd.f32 %v1375_v13, %v1335_v21  ;;  %v1288_v0 = vadd.f32 %v1287_v22, %v1247_v35  ;;  %v1250_v26 = vmul.f32 %v2547_v27, %v705_v53 }
 0x126   : > { %v1911_v57 = vpop.f32.mrf.mxu0  ;;  %v1955_v2 = vpop.f32.mrf.mxu1  ;;  %v1338_v19 = vmul.f32 %v1249_v46, %v700_v23 }
 0x127   : > { %v1377_v47 = vadd.f32 %v1376_v51, %v1336_v44  ;;  %v1289_v41 = vadd.f32 %v1288_v0, %v1248_v36  ;;  %v1339_v57 = vmul.f32 %v1250_v26, %v705_v53 }
 0x128   : > { %v708_v10 = vpop.f32.mrf.mxu0  ;;  %v2616_v11 = vpop.f32.mrf.mxu1 }
 0x129   : > { %v1729_v8 = vpack.c.bf16 %v708_v10, %v705_v53  ;;  %v1784_v16 = vpack.c.bf16 %v2616_v11, %v2606_v1  ;;  %v1251_v48 = vmul.f32 %v2553_v39, %v708_v10  ;;  %v1378_v30 = vadd.f32 %v1377_v47, %v1337_v14 }
 0x12a   : > { %v1912_v17 = vpop.f32.mrf.mxu0  ;;  %v1956_v38 = vpop.f32.mrf.mxu1  ;;  %v1290_v27 = vadd.f32 %v1289_v41, %v1249_v46 }
 0x12b   : > { %1822 = vst [vmem:[%s2449_s30 + $0x38] sm:$0xff] %v1729_v8   ;;  %1833 = vst [vmem:[%s2449_s30 + $0x90] sm:$0xff] %v1784_v16   ;;  %v1379_v23 = vadd.f32 %v1378_v30, %v1338_v19  ;;  %v1340_v39 = vmul.f32 %v1251_v48, %v708_v10  ;;  %v1159_v10 = vpop.permute.xlu0 %1158 }
 0x12c   : > { %v713_v29 = vpop.f32.mrf.mxu0  ;;  %v2629_v33 = vpop.f32.mrf.mxu1  ;;  %v1291_v35 = vadd.f32 %v1290_v27, %v1250_v26 }
 0x12d   : > { %v1252_v62 = vmul.f32 %v2570_v56, %v713_v29  ;;  %v1380_v21 = vadd.f32 %v1379_v23, %v1339_v57  ;;  %v1258_v57 = vmul.f32 %v2631_v34, %v2440_v54  ;;  %v1260_v34 = vmul.f32 %v1149_v4, %v2467_v32 }
 0x12e   : > { %v1915_v40 = vpop.f32.mrf.mxu0  ;;  %v1959_v12 = vpop.f32.mrf.mxu1  ;;  %v1292_v36 = vadd.f32 %v1291_v35, %v1251_v48 }
 0x12f   : > { %v1341_v38 = vmul.f32 %v1252_v62, %v713_v29  ;;  %v1381_v56 = vadd.f32 %v1380_v21, %v1340_v39 }
 0x130   : > { %v716_v59 = vpop.f32.mrf.mxu0  ;;  %v2638_v55 = vpop.f32.mrf.mxu1  ;;  %v1293_v22 = vadd.f32 %v1292_v36, %v1252_v62 }
 0x131   : > { %v1734_v58 = vpack.c.bf16 %v716_v59, %v713_v29  ;;  %v1789_v42 = vpack.c.bf16 %v2638_v55, %v2629_v33  ;;  %v1253_v20 = vmul.f32 %v2581_v31, %v716_v59  ;;  %v1382_v29 = vadd.f32 %v1381_v56, %v1341_v38 }
 0x132   : > { %v1916_v2 = vpop.f32.mrf.mxu0  ;;  %v1960_v6 = vpop.f32.mrf.mxu1 }
 0x133   : > { %1823 = vst [vmem:[%s2449_s30 + $0x40] sm:$0xff] %v1734_v58   ;;  %1834 = vst [vmem:[%s2449_s30 + $0x98] sm:$0xff] %v1789_v42   ;;  %v1342_v51 = vmul.f32 %v1253_v20, %v716_v59  ;;  %v1294_v12 = vadd.f32 %v1293_v22, %v1253_v20  ;;  %v1169_v2 = vpop.permute.xlu0 %1168 }
 0x134   : > { %v721_v8 = vpop.f32.mrf.mxu0  ;;  %v2645_v16 = vpop.f32.mrf.mxu1 }
 0x135   : > { %v1254_v13 = vmul.f32 %v2591_v28, %v721_v8  ;;  %v1164_v28 = vpop.permute.xlu1 %1163  ;;  %v1383_v19 = vadd.f32 %v1382_v29, %v1342_v51 }
 0x136   : > { %v1919_v17 = vpop.f32.mrf.mxu0  ;;  %v1963_v53 = vpop.f32.mrf.mxu1  ;;  %v1263_v4 = vmul.f32 %v1164_v28, %v2493_v52 }
 0x137   : > { %v1343_v47 = vmul.f32 %v1254_v13, %v721_v8  ;;  %v1295_v48 = vadd.f32 %v1294_v12, %v1254_v13  ;;  %v1347_v53 = vmul.f32 %v1258_v57, %v2440_v54  ;;  %v1179_v56 = vpop.permute.xlu0 %1178 }
 0x138   : > { %v724_v44 = vpop.f32.mrf.mxu0  ;;  %v2649_v46 = vpop.f32.mrf.mxu1  ;;  %v1266_v28 = vmul.f32 %v1179_v56, %v2525_v7 }
 0x139   : > { %v1739_v0 = vpack.c.bf16 %v724_v44, %v721_v8  ;;  %v1255_v14 = vmul.f32 %v2599_v49, %v724_v44  ;;  %v1794_v31 = vpack.c.bf16 %v2649_v46, %v2645_v16  ;;  %v1384_v49 = vadd.f32 %v1383_v19, %v1343_v47  ;;  %v1174_v8 = vpop.permute.xlu1 %1173 }
 0x13a   : > { %v1920_v26 = vpop.f32.mrf.mxu0  ;;  %v1964_v40 = vpop.f32.mrf.mxu1 }
 0x13b   : > { %1824 = vst [vmem:[%s2449_s30 + $0x48] sm:$0xff] %v1739_v0   ;;  %1835 = vst [vmem:[%s2449_s30 + $0xa0] sm:$0xff] %v1794_v31   ;;  %v1344_v58 = vmul.f32 %v1255_v14, %v724_v44  ;;  %v1296_v30 = vadd.f32 %v1295_v48, %v1255_v14  ;;  %v1262_v14 = vmul.f32 %v1159_v10, %v2485_v45  ;;  %v1189_v12 = vpop.permute.xlu0 %1188 }
 0x13c   : > { %v729_v41 = vpop.f32.mrf.mxu0  ;;  %v1265_v10 = vmul.f32 %v1174_v8, %v2511_v5 }
 0x13d   : > { %v1256_v59 = vmul.f32 %v2611_v3, %v729_v41  ;;  %v1385_v62 = vadd.f32 %v1384_v49, %v1344_v58  ;;  %v1259_v3 = vmul.f32 %v2635_v24, %v2453_v63  ;;  %v1184_v0 = vpop.permute.xlu1 %1183  ;;  %v1349_v24 = vmul.f32 %v1260_v34, %v2467_v32 }
 0x13e   : > { %v1923_v42 = vpop.f32.mrf.mxu0  ;;  %v1352_v32 = vmul.f32 %v1263_v4, %v2493_v52  ;;  %v1355_v52 = vmul.f32 %v1266_v28, %v2525_v7 }
 0x13f   : > { %v1345_v27 = vmul.f32 %v1256_v59, %v729_v41  ;;  %v1297_v23 = vadd.f32 %v1296_v30, %v1256_v59  ;;  %v1348_v22 = vmul.f32 %v1259_v3, %v2453_v63  ;;  %v1351_v63 = vmul.f32 %v1262_v14, %v2485_v45  ;;  %v1199_v49 = vpop.permute.xlu0 %1198 }
 0x140   : > { %v732_v6 = vpop.f32.mrf.mxu0  ;;  %v1354_v45 = vmul.f32 %v1265_v10, %v2511_v5  ;;  %v1267_v30 = vmul.f32 %v1184_v0, %v2531_v18 }
 0x141   : > { %v1744_v35 = vpack.c.bf16 %v732_v6, %v729_v41  ;;  %v1257_v39 = vmul.f32 %v2618_v61, %v732_v6  ;;  %v1386_v21 = vadd.f32 %v1385_v62, %v1345_v27  ;;  %v1261_v61 = vmul.f32 %v1154_v15, %v2473_v37  ;;  %v1194_v19 = vpop.permute.xlu1 %1193 }
 0x142   : > { %v1924_v20 = vpop.f32.mrf.mxu0  ;;  %v1264_v15 = vmul.f32 %v1169_v2, %v2505_v60 }
 0x143   : > { %1825 = vst [vmem:[%s2449_s30 + $0x50] sm:$0xff] %v1744_v35   ;;  %v1298_v36 = vadd.f32 %v1297_v23, %v1257_v39  ;;  %v1346_v17 = vmul.f32 %v1257_v39, %v732_v6  ;;  %v1350_v54 = vmul.f32 %v1261_v61, %v2473_v37  ;;  %v1268_v6 = vmul.f32 %v1189_v12, %v2545_v25  ;;  %v1209_v20 = vpop.permute.xlu0 %1208 }
 0x144   : > { %v1353_v37 = vmul.f32 %v1264_v15, %v2505_v60  ;;  %v1356_v60 = vmul.f32 %v1267_v30, %v2531_v18  ;;  %v1269_v35 = vmul.f32 %v1194_v19, %v2560_v43 }
 0x145   : > { %v1299_v38 = vadd.f32 %v1298_v36, %v1258_v57  ;;  %v1387_v13 = vadd.f32 %v1386_v21, %v1346_v17  ;;  %v1204_v2 = vpop.permute.xlu1 %1203  ;;  %v1357_v5 = vmul.f32 %v1268_v6, %v2545_v25 }
 0x146   : > { %v1358_v7 = vmul.f32 %v1269_v35, %v2560_v43 }
 0x147   : > { %v1300_v44 = vadd.f32 %v1299_v38, %v1259_v3  ;;  %v1388_v51 = vadd.f32 %v1387_v13, %v1347_v53  ;;  %v1270_v3 = vmul.f32 %v1199_v49, %v2579_v9  ;;  %v1271_v53 = vmul.f32 %v1204_v2, %v2589_v50 }
 0x148   : > { %v1272_v13 = vmul.f32 %v1209_v20, %v2606_v1 }
 0x149   : > { %v1301_v31 = vadd.f32 %v1300_v44, %v1260_v34  ;;  %v1389_v26 = vadd.f32 %v1388_v51, %v1348_v22  ;;  %v1214_v17 = vpop.permute.xlu1 %1213  ;;  %v1359_v18 = vmul.f32 %v1270_v3, %v2579_v9  ;;  %v1360_v25 = vmul.f32 %v1271_v53, %v2589_v50 }
 0x14a   : > { %v1273_v44 = vmul.f32 %v1214_v17, %v2616_v11  ;;  %v1361_v43 = vmul.f32 %v1272_v13, %v2606_v1 }
 0x14b   : > { %v1302_v40 = vadd.f32 %v1301_v31, %v1261_v61  ;;  %v1390_v29 = vadd.f32 %v1389_v26, %v1349_v24  ;;  %v1219_v61 = vpop.permute.xlu0 %1218 }
 0x14c   : > { %v1362_v9 = vmul.f32 %v1273_v44, %v2616_v11 }
 0x14d   : > { %v1303_v47 = vadd.f32 %v1302_v40, %v1262_v14  ;;  %v1391_v41 = vadd.f32 %v1390_v29, %v1350_v54  ;;  %v1224_v24 = vpop.permute.xlu1 %1223  ;;  %v1274_v14 = vmul.f32 %v1219_v61, %v2629_v33 }
 0x14e   : > { %v1275_v54 = vmul.f32 %v1224_v24, %v2638_v55 }
 0x14f   : > { %v1304_v48 = vadd.f32 %v1303_v47, %v1263_v4  ;;  %v1392_v58 = vadd.f32 %v1391_v41, %v1351_v63  ;;  %v1229_v29 = vpop.permute.xlu0 %1228  ;;  %v1363_v50 = vmul.f32 %v1274_v14, %v2629_v33 }
 0x150   : > { %v1276_v12 = vmul.f32 %v1229_v29, %v2645_v16  ;;  %v1364_v1 = vmul.f32 %v1275_v54, %v2638_v55 }
 0x151   : > { %v1305_v59 = vadd.f32 %v1304_v48, %v1264_v15  ;;  %v1393_v42 = vadd.f32 %v1392_v58, %v1352_v32  ;;  %v1234_v47 = vpop.permute.xlu1 %1233 }
 0x152   : > { %v1277_v41 = vmul.f32 %v1234_v47, %v2649_v46  ;;  %v1365_v11 = vmul.f32 %v1276_v12, %v2645_v16 }
 0x153   : > { %v1306_v27 = vadd.f32 %v1305_v59, %v1265_v10  ;;  %v1394_v57 = vadd.f32 %v1393_v42, %v1353_v37 }
 0x154   : > { %v1366_v58 = vmul.f32 %v1277_v41, %v2649_v46 }
 0x155   : > { %v1307_v62 = vadd.f32 %v1306_v27, %v1266_v28  ;;  %v1395_v23 = vadd.f32 %v1394_v57, %v1354_v45 }
 0x157   : > { %v1308_v39 = vadd.f32 %v1307_v62, %v1267_v30  ;;  %v1396_v8 = vadd.f32 %v1395_v23, %v1355_v52 }
 0x159   : > { %v1309_v21 = vadd.f32 %v1308_v39, %v1268_v6  ;;  %v1397_v36 = vadd.f32 %v1396_v8, %v1356_v60 }
 0x15b   : > { %v1310_v34 = vadd.f32 %v1309_v21, %v1269_v35  ;;  %v1398_v38 = vadd.f32 %v1397_v36, %v1357_v5 }
 0x15d   : > { %v1311_v56 = vadd.f32 %v1310_v34, %v1270_v3  ;;  %v1399_v22 = vadd.f32 %v1398_v38, %v1358_v7 }
 0x15f   : > { %v1312_v51 = vadd.f32 %v1311_v56, %v1271_v53  ;;  %v1400_v0 = vadd.f32 %v1399_v22, %v1359_v18 }
 0x161   : > { %v1313_v31 = vadd.f32 %v1312_v51, %v1272_v13  ;;  %v1401_v26 = vadd.f32 %v1400_v0, %v1360_v25 }
 0x163   : > { %v1314_v4 = vadd.f32 %v1313_v31, %v1273_v44  ;;  %v1402_v40 = vadd.f32 %v1401_v26, %v1361_v43 }
 0x165   : > { %v1315_v63 = vadd.f32 %v1314_v4, %v1274_v14  ;;  %v1403_v15 = vadd.f32 %v1402_v40, %v1362_v9 }
 0x167   : > { %v1316_v19 = vadd.f32 %v1315_v63, %v1275_v54  ;;  %v1404_v32 = vadd.f32 %v1403_v15, %v1363_v50 }
 0x169   : > { %v1317_v10 = vadd.f32 %v1316_v19, %v1276_v12  ;;  %v1405_v48 = vadd.f32 %v1404_v32, %v1364_v1 }
 0x16b   : > { %v1318_v37 = vadd.f32 %v1317_v10, %v1277_v41  ;;  %v1406_v33 = vadd.f32 %v1405_v48, %v1365_v11 }
 0x16d   : > { %v1319_v28 = vrot.slane %v1318_v37, 4  ;;  %v1407_v59 = vadd.f32 %v1406_v33, %v1366_v58 }
 0x16f   : > { %v1320_v42 = vadd.f32 %v1319_v28, %v1318_v37  ;;  %v1408_v49 = vrot.slane %v1407_v59, 4 }
 0x171   : > { %v1321_v45 = vrot.slane %v1320_v42, 2  ;;  %v1409_v30 = vadd.f32 %v1408_v49, %v1407_v59 }
 0x173   : > { %v1322_v55 = vadd.f32 %v1321_v45, %v1320_v42  ;;  %v1410_v27 = vrot.slane %v1409_v30, 2 }
 0x175   : > { %v1323_v57 = vrot.slane %v1322_v55, 1  ;;  %v1411_v2 = vadd.f32 %v1410_v27, %v1409_v30 }
 0x177   : > { %v1412_v52 = vrot.slane %v1411_v2, 1  ;;  %v1324_v16 = vadd.f32 %v1323_v57, %v1322_v55 }
 0x179   : > { %v1413_v46 = vadd.f32 %v1412_v52, %v1411_v2 }
 0x17b   : > { %v1415_v6 = vsel %vm1414_vm1, %v1324_v16, %v1413_v46 }
 0x17c   : > { %1416 = vst [vmem:[%s262_s10] sm:$0x3] %v1415_v6 }
 0x17d PF: > { %s17_s21 = sadd.s32 1, %s2009_s21  }
 0x17e   : > { %p14_p4 = scmp.ge.s32.totalorder %s17_s21, 4  }
 0x180   :  { %16 = sbr.rel (!%p14_p4) target bundleno = 1 (0x1), region = 82 }

// kernel: bottleneck_forward.5
= control target key start
LH: loop header
LB: loop body
LE: loop exit
PB: predicated region body
PF: predicated region fallthrough
CT: control target
= control target key end

     0   :  { %s6523_s21 = smov 0   ;;  %s9175_s0 = inlined_call_operand.vmem [shape: bf16[2,336,128], index: 0, kind: input, shape index: {}]   ;;  %s9176_s1 = inlined_call_operand.vmem [shape: f32[1,128], index: 1, kind: input, shape index: {}]   ;;  %s9177_s2 = inlined_call_operand.vmem [shape: f32[1,128], index: 2, kind: input, shape index: {}]   ;;  %s9178_s3 = inlined_call_operand.vmem [shape: f32[336,1], index: 3, kind: input, shape index: {}]   ;;  %s9179_s4 = inlined_call_operand.vmem [shape: bf16[9,128,128], index: 4, kind: input, shape index: {}]   ;;  %s9180_s5 = inlined_call_operand.vmem [shape: bf16[2,336,128], index: 5, kind: output, shape index: {0}]   ;;  %s9181_s6 = inlined_call_operand.vmem [shape: f32[2,2,128], index: 6, kind: output, shape index: {1}]  }
   0x1 LB: > { %s4689_s22 = sadd.s32 4294967295, %s6483_s21   ;;  %p4693_p0 = scmp.ge.s32.totalorder %s6483_s21, 1  ;;  %s6483_s21 = sphi %s6523_s21, %s17_s21  }
   0x2   : > { %p215_p1 = scmp.lt.s32.totalorder %s6483_s21, 3 }
   0x4   : > { %p216_p2 = pnand %p4693_p0, %p215_p1 }
   0x6   : > { %219 = sbr.rel (%p216_p2) target bundleno = 1125 (0x465), region = 40 }
   0xb   : > { %v286_v0 = vld [vmem:[%s9178_s3 + $0xb0] sm:$0xff]  ;;  %v264_v1 = vld [vmem:[%s9178_s3] sm:$0xff]  ;;  %v6485_v2 = vmov 0   ;;  %v287_v3 = vld [vmem:[%s9178_s3 + $0xb8] sm:$0xff]  ;;  %v9184_v5 = vmov 0.0   ;;  %vm6487_vm0 = vmmov 0  }
   0xc   : > { %6404 = vset.pattern.permute.xlu1 %v6485_v2  ;;  %6403 = vset.pattern.permute.xlu0 %v6485_v2  ;;  %v265_v4 = vld [vmem:[%s9178_s3 + $0x8] sm:$0xff]  ;;  %v267_v6 = vld [vmem:[%s9178_s3 + $0x18] sm:$0xff]  ;;  %v266_v7 = vld [vmem:[%s9178_s3 + $0x10] sm:$0xff]  ;;  %p249_p3 = scmp.lt.s32.totalorder %s4689_s22, 1  ;;  %vm4600_vm7 = vcmask 1040384  }
   0xd   : > { %642 = vperm.xlu1 %6404, %v286_v0   ;;  %532 = vperm.xlu0 %6403, %v264_v1   ;;  %v289_v8 = vld [vmem:[%s9178_s3 + $0xc8] sm:$0xff]  ;;  %v288_v9 = vld [vmem:[%s9178_s3 + $0xc0] sm:$0xff]  ;;  %v6405_v11 = vld [vmem:[%s9179_s4 + $0x38] sm:$0xff]  }
   0xe   : > { %5475 = vmatprep.subr.bf16.mxu0 %v9184_v5  ;;  %6375 = vmatprep.subr.bf16.mxu1 %v9184_v5  ;;  %v269_v10 = vld [vmem:[%s9178_s3 + $0x28] sm:$0xff]  ;;  %v268_v12 = vld [vmem:[%s9178_s3 + $0x20] sm:$0xff]  ;;  %v6406_v13 = vld [vmem:[%s9179_s4 + $0x30] sm:$0xff]   ;;  %s9473_s22 = smov (!%p249_p3, %s4689_s22), 1 }
   0xf   : > { %5491 = vmatprep.mubr.msk.bf16.mxu0 %vm6487_vm0, %v9184_v5  ;;  %5535 = vmatprep.mubr.msk.bf16.mxu1 %vm6487_vm0, %v9184_v5  ;;  %v291_v14 = vld [vmem:[%s9178_s3 + $0xd8] sm:$0xff]  ;;  %v290_v15 = vld [vmem:[%s9178_s3 + $0xd0] sm:$0xff]  ;;  %v6407_v16 = vld [vmem:[%s9179_s4 + $0x28] sm:$0xff]   ;;  %s6391_s25 = smul.u32 168, %s9473_s22 }
  0x10   : > { %5476 = vmatpush3.bf16.msra.mxu0 %v6405_v11  ;;  %6383 = vmatpush3.bf16.msra.mxu1 %v6405_v11  ;;  %v271_v17 = vld [vmem:[%s9178_s3 + $0x38] sm:$0xff]  ;;  %v270_v18 = vld [vmem:[%s9178_s3 + $0x30] sm:$0xff]  ;;  %v6408_v19 = vld [vmem:[%s9179_s4 + $0x20] sm:$0xff]  }
  0x11   : > { %647 = vperm.xlu1 %6404, %v287_v3   ;;  %537 = vperm.xlu0 %6403, %v265_v4   ;;  %v293_v20 = vld [vmem:[%s9178_s3 + $0xe8] sm:$0xff]  ;;  %v292_v21 = vld [vmem:[%s9178_s3 + $0xe0] sm:$0xff]  ;;  %v6409_v22 = vld [vmem:[%s9179_s4 + $0x18] sm:$0xff]   ;;  %s6673_s8 = scalar_lea.vmem %s9175_s0, %s6391_s25  ;;  %s8895_s29 = scalar_lea.vmem %s9180_s5, %s6391_s25 }
  0x12   : > { %5477 = vmatprep.subr.bf16.mxu0 %v9184_v5  ;;  %6376 = vmatprep.subr.bf16.mxu1 %v9184_v5  ;;  %v273_v23 = vld [vmem:[%s9178_s3 + $0x48] sm:$0xff]  ;;  %v272_v24 = vld [vmem:[%s9178_s3 + $0x40] sm:$0xff]  ;;  %v6410_v25 = vld [vmem:[%s9179_s4 + $0x10] sm:$0xff]   ;;  %s4696_s25 = sshll.u32 %s9473_s22, 1 }
  0x13   : > { %v295_v26 = vld [vmem:[%s9178_s3 + $0xf8] sm:$0xff]  ;;  %v294_v27 = vld [vmem:[%s9178_s3 + $0xf0] sm:$0xff]  ;;  %v6411_v28 = vld [vmem:[%s9179_s4 + $0x8] sm:$0xff]   ;;  %s262_s9 = scalar_lea.vmem %s9181_s6, %s4696_s25 }
  0x14   : > { %5478 = vmatpush3.bf16.msra.mxu0 %v6406_v13  ;;  %6384 = vmatpush3.bf16.msra.mxu1 %v6406_v13  ;;  %v275_v29 = vld [vmem:[%s9178_s3 + $0x58] sm:$0xff]  ;;  %v274_v30 = vld [vmem:[%s9178_s3 + $0x50] sm:$0xff]  ;;  %v6412_v31 = vld [vmem:[%s9179_s4] sm:$0xff]  }
  0x15   : > { %547 = vperm.xlu1 %6404, %v267_v6   ;;  %542 = vperm.xlu0 %6403, %v266_v7   ;;  %v297_v32 = vld [vmem:[%s9178_s3 + $0x108] sm:$0xff]  ;;  %v296_v33 = vld [vmem:[%s9178_s3 + $0x100] sm:$0xff]  ;;  %v299_v36 = vld [vmem:[%s9178_s3 + $0x118] sm:$0xff] }
  0x16   : > { %5479 = vmatprep.subr.bf16.mxu0 %v9184_v5  ;;  %6377 = vmatprep.subr.bf16.mxu1 %v9184_v5  ;;  %v277_v34 = vld [vmem:[%s9178_s3 + $0x68] sm:$0xff]  ;;  %v276_v35 = vld [vmem:[%s9178_s3 + $0x60] sm:$0xff]  ;;  %v298_v37 = vld [vmem:[%s9178_s3 + $0x110] sm:$0xff] }
  0x17   : > { %v279_v38 = vld [vmem:[%s9178_s3 + $0x78] sm:$0xff]  ;;  %v5181_v39 = vld [vmem:[%s6673_s8 + $0x40] sm:$0xff]   ;;  %v278_v40 = vld [vmem:[%s9178_s3 + $0x70] sm:$0xff] }
  0x18   : > { %5480 = vmatpush3.bf16.msra.mxu0 %v6407_v16  ;;  %6385 = vmatpush3.bf16.msra.mxu1 %v6407_v16  ;;  %v5020_v41 = vunpack.c.h.bf16 %v5181_v39  ;;  %v5019_v42 = vunpack.c.l.bf16 %v5181_v39  ;;  %v6685_v43 = vld [vmem:[%s9176_s1] ss:$0 sm:$0xff]  ;;  %v301_v47 = vld [vmem:[%s9178_s3 + $0x128] sm:$0xff]  ;;  %v5192_v49 = vld [vmem:[%s6673_s8 + $0x98] sm:$0xff]  }
  0x19   : > { %657 = vperm.xlu1 %6404, %v289_v8   ;;  %652 = vperm.xlu0 %6403, %v288_v9   ;;  %v6690_v44 = vld [vmem:[%s9177_s2] ss:$0 sm:$0xff]  ;;  %v5064_v52 = vunpack.c.h.bf16 %v5192_v49  ;;  %v5063_v53 = vunpack.c.l.bf16 %v5192_v49  ;;  %v281_v56 = vld [vmem:[%s9178_s3 + $0x88] sm:$0xff]  ;;  %v303_v1 = vld [vmem:[%s9178_s3 + $0x138] sm:$0xff] }
  0x1a   : > { %5481 = vmatprep.subr.bf16.mxu0 %v9184_v5  ;;  %6378 = vmatprep.subr.bf16.mxu1 %v9184_v5  ;;  %v414_v45 = vmul.f32 %v5020_v41, %v6685_v43  ;;  %v413_v46 = vmul.f32 %v5019_v42, %v6685_v43  ;;  %v300_v48 = vld [vmem:[%s9178_s3 + $0x120] sm:$0xff]  ;;  %v5182_v58 = vld [vmem:[%s6673_s8 + $0x48] sm:$0xff]   ;;  %v302_v2 = vld [vmem:[%s9178_s3 + $0x130] sm:$0xff] }
  0x1b   : > { %v436_v54 = vmul.f32 %v5064_v52, %v6685_v43  ;;  %v435_v55 = vmul.f32 %v5063_v53, %v6685_v43  ;;  %v280_v57 = vld [vmem:[%s9178_s3 + $0x80] sm:$0xff]  ;;  %v5024_v61 = vunpack.c.h.bf16 %v5182_v58  ;;  %v5023_v62 = vunpack.c.l.bf16 %v5182_v58  ;;  %v283_v11 = vld [vmem:[%s9178_s3 + $0x98] sm:$0xff]  ;;  %v5183_v13 = vld [vmem:[%s6673_s8 + $0x50] sm:$0xff]  }
  0x1c   : > { %5482 = vmatpush3.bf16.msra.mxu0 %v6408_v19  ;;  %6386 = vmatpush3.bf16.msra.mxu1 %v6408_v19  ;;  %v6702_v50 = vadd.f32 %v6690_v44, %v414_v45  ;;  %v6705_v51 = vadd.f32 %v6690_v44, %v413_v46  ;;  %v5193_v3 = vld [vmem:[%s6673_s8 + $0xa0] sm:$0xff]   ;;  %v5028_v16 = vunpack.c.h.bf16 %v5183_v13  ;;  %v5175_v53 = vld [vmem:[%s6673_s8 + $0x10] sm:$0xff]  }
  0x1d   : > { %557 = vperm.xlu1 %6404, %v269_v10   ;;  %552 = vperm.xlu0 %6403, %v268_v12   ;;  %v6717_v59 = vadd.f32 %v6690_v44, %v436_v54  ;;  %v6720_v60 = vadd.f32 %v6690_v44, %v435_v55  ;;  %v416_v63 = vmul.f32 %v5024_v61, %v6685_v43  ;;  %v5068_v7 = vunpack.c.h.bf16 %v5193_v3  ;;  %v282_v12 = vld [vmem:[%s9178_s3 + $0x90] sm:$0xff] }
  0x1e   : > { %5483 = vmatprep.subr.bf16.mxu0 %v9184_v5  ;;  %6379 = vmatprep.subr.bf16.mxu1 %v9184_v5  ;;  %v415_v0 = vmul.f32 %v5023_v62, %v6685_v43  ;;  %v5067_v8 = vunpack.c.l.bf16 %v5193_v3 }
  0x1f   : > { %v6732_v4 = vadd.f32 %v6690_v44, %v416_v63  ;;  %v438_v9 = vmul.f32 %v5068_v7, %v6685_v43  ;;  %v5186_v63 = vld [vmem:[%s6673_s8 + $0x68] sm:$0xff]   ;;  %v4995_v7 = vunpack.c.l.bf16 %v5175_v53 }
  0x20   : > { %5484 = vmatpush3.bf16.msra.mxu0 %v6409_v22  ;;  %6387 = vmatpush3.bf16.msra.mxu1 %v6409_v22  ;;  %v6735_v6 = vadd.f32 %v6690_v44, %v415_v0  ;;  %v437_v10 = vmul.f32 %v5067_v8, %v6685_v43 }
  0x21   : > { %667 = vperm.xlu1 %6404, %v291_v14   ;;  %662 = vperm.xlu0 %6403, %v290_v15   ;;  %v6747_v14 = vadd.f32 %v6690_v44, %v438_v9 }
  0x22   : > { %5485 = vmatprep.subr.bf16.mxu0 %v9184_v5  ;;  %6380 = vmatprep.subr.bf16.mxu1 %v9184_v5  ;;  %v6750_v15 = vadd.f32 %v6690_v44, %v437_v10 }
  0x24   : > { %5486 = vmatpush3.bf16.msra.mxu0 %v6410_v25  ;;  %6388 = vmatpush3.bf16.msra.mxu1 %v6410_v25  ;;  %v284_v25 = vld [vmem:[%s9178_s3 + $0xa0] sm:$0xff] }
  0x25   : > { %567 = vperm.xlu1 %6404, %v271_v17   ;;  %562 = vperm.xlu0 %6403, %v270_v18   ;;  %v5027_v17 = vunpack.c.l.bf16 %v5183_v13  ;;  %v418_v18 = vmul.f32 %v5028_v16, %v6685_v43 }
  0x26   : > { %5487 = vmatprep.subr.bf16.mxu0 %v9184_v5  ;;  %6381 = vmatprep.subr.bf16.mxu1 %v9184_v5 }
  0x27   : > { %v417_v19 = vmul.f32 %v5027_v17, %v6685_v43  ;;  %v6761_v22 = vadd.f32 %v6690_v44, %v418_v18  ;;  %v5039_v18 = vunpack.c.l.bf16 %v5186_v63 }
  0x28   : > { %5488 = vmatpush3.bf16.msra.mxu0 %v6411_v28  ;;  %6389 = vmatpush3.bf16.msra.mxu1 %v6411_v28 }
  0x29   : > { %677 = vperm.xlu1 %6404, %v293_v20   ;;  %672 = vperm.xlu0 %6403, %v292_v21   ;;  %v305_v20 = vld [vmem:[%s9178_s3 + $0x148] sm:$0xff]  ;;  %v304_v21 = vld [vmem:[%s9178_s3 + $0x140] sm:$0xff] }
  0x2a   : > { %5489 = vmatprep.subr.bf16.mxu0 %v9184_v5  ;;  %6382 = vmatprep.subr.bf16.mxu1 %v9184_v5 }
  0x2c   : > { %5490 = vmatpush3.bf16.msra.mxu0 %v6412_v31  ;;  %6390 = vmatpush3.bf16.msra.mxu1 %v6412_v31 }
  0x2d   : > { %577 = vperm.xlu1 %6404, %v273_v23   ;;  %572 = vperm.xlu0 %6403, %v272_v24   ;;  %v6764_v23 = vadd.f32 %v6690_v44, %v417_v19  ;;  %v285_v24 = vld [vmem:[%s9178_s3 + $0xa8] sm:$0xff] }
  0x2e   : > { %5675 = vmatprep.subr.bf16.mxu0 %v9184_v5  ;;  %5575 = vmatprep.subr.bf16.mxu1 %v9184_v5 }
  0x31   : > { %687 = vperm.xlu1 %6404, %v295_v26   ;;  %682 = vperm.xlu0 %6403, %v294_v27   ;;  %v5184_v26 = vld [vmem:[%s6673_s8 + $0x58] sm:$0xff]   ;;  %v4986_v27 = vld [vmem:[%s6673_s8] sm:$0xff]  }
  0x32   : > { %v5031_v28 = vunpack.c.l.bf16 %v5184_v26  ;;  %v4988_v31 = vunpack.c.h.bf16 %v4986_v27 }
  0x35   : > { %587 = vperm.xlu1 %6404, %v275_v29   ;;  %582 = vperm.xlu0 %6403, %v274_v30   ;;  %v4987_v29 = vunpack.c.l.bf16 %v4986_v27  ;;  %v5032_v30 = vunpack.c.h.bf16 %v5184_v26 }
  0x39   : > { %697 = vperm.xlu1 %6404, %v297_v32   ;;  %692 = vperm.xlu0 %6403, %v296_v33   ;;  %v419_v32 = vmul.f32 %v5031_v28, %v6685_v43  ;;  %v5174_v33 = vld [vmem:[%s6673_s8 + $0x8] sm:$0xff]   ;;  %v401_v28 = vmul.f32 %v4995_v7, %v6685_v43  ;;  %v5177_v7 = vld [vmem:[%s6673_s8 + $0x20] sm:$0xff]  }
  0x3b   : > { %v468_v39 = vadd.f32 %v6690_v44, %v419_v32 }
  0x3d   : > { %597 = vperm.xlu1 %6404, %v277_v34   ;;  %592 = vperm.xlu0 %6403, %v276_v35   ;;  %v397_v34 = vmul.f32 %v4987_v29, %v6685_v43  ;;  %v420_v35 = vmul.f32 %v5032_v30, %v6685_v43  ;;  %v510_v49 = vmax.f32 %v468_v39, 0.0  ;;  %v5176_v29 = vld [vmem:[%s6673_s8 + $0x18] sm:$0xff]  }
  0x3e   : > { %v5000_v39 = vunpack.c.h.bf16 %v5176_v29 }
  0x3f   : > { %v446_v45 = vadd.f32 %v6690_v44, %v397_v34  ;;  %v469_v46 = vadd.f32 %v6690_v44, %v420_v35  ;;  %v423_v35 = vmul.f32 %v5039_v18, %v6685_v43 }
  0x41   : > { %707 = vperm.xlu1 %6404, %v299_v36   ;;  %702 = vperm.xlu0 %6403, %v298_v37   ;;  %v398_v36 = vmul.f32 %v4988_v31, %v6685_v43  ;;  %v5185_v37 = vld [vmem:[%s6673_s8 + $0x60] sm:$0xff]   ;;  %v488_v58 = vmax.f32 %v446_v45, 0.0  ;;  %v511_v61 = vmax.f32 %v469_v46, 0.0  ;;  %v450_v45 = vadd.f32 %v6690_v44, %v401_v28 }
  0x42   : > { %v5036_v41 = vunpack.c.h.bf16 %v5185_v37  ;;  %v5035_v42 = vunpack.c.l.bf16 %v5185_v37  ;;  %v4999_v46 = vunpack.c.l.bf16 %v5176_v29  ;;  %v5003_v29 = vunpack.c.l.bf16 %v5177_v7 }
  0x45   : > { %607 = vperm.xlu1 %6404, %v279_v38   ;;  %602 = vperm.xlu0 %6403, %v278_v40   ;;  %v4992_v38 = vunpack.c.h.bf16 %v5174_v33  ;;  %v4991_v40 = vunpack.c.l.bf16 %v5174_v33 }
  0x47   : > { %v399_v52 = vmul.f32 %v4991_v40, %v6685_v43  ;;  %v6416_v40 = vld [vmem:[%s9179_s4 + $0x70] sm:$0xff]  }
  0x49   : > { %717 = vperm.xlu1 %6404, %v301_v47   ;;  %712 = vperm.xlu0 %6403, %v300_v48   ;;  %v447_v47 = vadd.f32 %v6690_v44, %v398_v36  ;;  %v400_v48 = vmul.f32 %v4992_v38, %v6685_v43  ;;  %v448_v3 = vadd.f32 %v6690_v44, %v399_v52  ;;  %v5187_v36 = vld [vmem:[%s6673_s8 + $0x70] sm:$0xff]  }
  0x4a   : > { %v6415_v38 = vld [vmem:[%s9179_s4 + $0xb0] sm:$0xff]   ;;  %v5044_v52 = vunpack.c.h.bf16 %v5187_v36 }
  0x4b   : > { %v489_v62 = vmax.f32 %v447_v47, 0.0  ;;  %v449_v0 = vadd.f32 %v6690_v44, %v400_v48  ;;  %v490_v27 = vmax.f32 %v448_v3, 0.0  ;;  %v6417_v3 = vld [vmem:[%s9179_s4 + $0xa8] sm:$0xff]  }
  0x4d   : > { %617 = vperm.xlu1 %6404, %v281_v56   ;;  %612 = vperm.xlu0 %6403, %v280_v57   ;;  %v422_v56 = vmul.f32 %v5036_v41, %v6685_v43  ;;  %v421_v57 = vmul.f32 %v5035_v42, %v6685_v43  ;;  %v491_v19 = vmax.f32 %v449_v0, 0.0 }
  0x4f   : > { %v471_v10 = vadd.f32 %v6690_v44, %v422_v56 }
  0x51   : > { %727 = vperm.xlu1 %6404, %v303_v1   ;;  %722 = vperm.xlu0 %6403, %v302_v2   ;;  %v4996_v1 = vunpack.c.h.bf16 %v5175_v53  ;;  %v513_v33 = vmax.f32 %v471_v10, 0.0  ;;  %v6418_v10 = vld [vmem:[%s9179_s4 + $0x68] sm:$0xff]  }
  0x55   : > { %627 = vperm.xlu1 %6404, %v283_v11   ;;  %622 = vperm.xlu0 %6403, %v282_v12   ;;  %v470_v11 = vadd.f32 %v6690_v44, %v421_v57  ;;  %v5040_v12 = vunpack.c.h.bf16 %v5186_v63  ;;  %v472_v57 = vadd.f32 %v6690_v44, %v423_v35 }
  0x57   : > { %v424_v32 = vmul.f32 %v5040_v12, %v6685_v43  ;;  %v512_v34 = vmax.f32 %v470_v11, 0.0 }
  0x59   : > { %737 = vperm.xlu1 %6404, %v305_v20   ;;  %732 = vperm.xlu0 %6403, %v304_v21   ;;  %v6413_v20 = vld [vmem:[%s9179_s4 + $0xb8] sm:$0xff]  }
  0x5a   : > { %v6414_v21 = vld [vmem:[%s9179_s4 + $0x78] sm:$0xff]  }
  0x5d   : > { %637 = vperm.xlu1 %6404, %v285_v24   ;;  %632 = vperm.xlu0 %6403, %v284_v25   ;;  %v402_v24 = vmul.f32 %v4996_v1, %v6685_v43  ;;  %v492_v1 = vmax.f32 %v450_v45, 0.0 }
  0x5f   : > { %v451_v37 = vadd.f32 %v6690_v44, %v402_v24 }
  0x88   : > { %v6787_v54 = vpop.permute.xlu1 %642  ;;  %v6789_v55 = vpop.permute.xlu0 %532 }
  0x89   : > { %9263 = vst [vmem:[#allocation2_spill] sm:$0xff] %v6787_v54  ;;  %9264 = vst [vmem:[#allocation3_spill] sm:$0xff] %v6789_v55  ;;  %v762_v2 = vmul.f32 %v6787_v54, %v510_v49  ;;  %v740_v13 = vmul.f32 %v6789_v55, %v488_v58  ;;  %v473_v49 = vadd.f32 %v6690_v44, %v424_v32  ;;  %v5043_v58 = vunpack.c.l.bf16 %v5187_v36  ;;  %v6419_v32 = vld [vmem:[%s9179_s4 + $0xa0] sm:$0xff]  }
  0x8b   : > { %v425_v18 = vmul.f32 %v5043_v58, %v6685_v43  ;;  %v6422_v58 = vld [vmem:[%s9179_s4 + $0x58] sm:$0xff]  }
  0x8c   : > { %v6797_v8 = vpop.permute.xlu1 %647  ;;  %v6799_v9 = vpop.permute.xlu0 %537 }
  0x8d   : > { %9265 = vst [vmem:[#allocation4_spill] sm:$0xff] %v6797_v8  ;;  %9266 = vst [vmem:[#allocation5_spill] sm:$0xff] %v6799_v9  ;;  %v763_v16 = vmul.f32 %v6797_v8, %v511_v61  ;;  %v741_v17 = vmul.f32 %v6799_v9, %v489_v62  ;;  %v493_v61 = vmax.f32 %v451_v37, 0.0  ;;  %v404_v62 = vmul.f32 %v5000_v39, %v6685_v43 }
  0x8f   : > { %v6813_v25 = vpack.c.bf16 %v763_v16, %v762_v2  ;;  %v6815_v26 = vpack.c.bf16 %v741_v17, %v740_v13  ;;  %v403_v2 = vmul.f32 %v4999_v46, %v6685_v43  ;;  %v426_v13 = vmul.f32 %v5044_v52, %v6685_v43 }
  0x90   : > { %v6819_v30 = vpop.permute.xlu1 %547  ;;  %v6821_v31 = vpop.permute.xlu0 %542  ;;  %v515_v16 = vmax.f32 %v473_v49, 0.0  ;;  %v514_v17 = vmax.f32 %v472_v57, 0.0  ;;  %v6421_v57 = vld [vmem:[%s9179_s4 + $0x98] sm:$0xff]  }
  0x91   : > { %9267 = vst [vmem:[#allocation6_spill] sm:$0xff] %v6815_v26  ;;  %9268 = vst [vmem:[#allocation7_spill] sm:$0xff] %v6819_v30  ;;  %5492 = vmatmul.mubr.bf16.vlgmr.msra.gmra.mxu0 %v6815_v26  ;;  %5536 = vmatmul.mubr.bf16.vlgmr.msra.gmra.mxu1 %v6813_v25  ;;  %v743_v41 = vmul.f32 %v6819_v30, %v491_v19  ;;  %v742_v42 = vmul.f32 %v6821_v31, %v490_v27  ;;  %v5188_v19 = vld [vmem:[%s6673_s8 + $0x78] sm:$0xff]  }
  0x92   : > { %9269 = vst [vmem:[#allocation8_spill] sm:$0xff] %v6821_v31  ;;  %5676 = vmatpush3.bf16.msra.mxu0 %v6413_v20  ;;  %5576 = vmatpush3.bf16.msra.mxu1 %v6414_v21  ;;  %v453_v20 = vadd.f32 %v6690_v44, %v404_v62  ;;  %v5004_v21 = vunpack.c.h.bf16 %v5177_v7  ;;  %v452_v28 = vadd.f32 %v6690_v44, %v403_v2  ;;  %v5048_v37 = vunpack.c.h.bf16 %v5188_v19 }
  0x93   : > { %5495 = vmatprep.mubr.msk.bf16.mxu0 %vm6487_vm0, %v9184_v5  ;;  %5539 = vmatprep.mubr.msk.bf16.mxu1 %vm6487_vm0, %v9184_v5  ;;  %v6853_v63 = vpack.c.bf16 %v743_v41, %v742_v42  ;;  %v475_v36 = vadd.f32 %v6690_v44, %v426_v13  ;;  %v5047_v41 = vunpack.c.l.bf16 %v5188_v19 }
  0x94   : > { %v6842_v47 = vpop.permute.xlu1 %657  ;;  %v6844_v48 = vpop.permute.xlu0 %652  ;;  %5677 = vmatprep.subr.bf16.mxu0 %v9184_v5  ;;  %5577 = vmatprep.subr.bf16.mxu1 %v9184_v5  ;;  %v495_v42 = vmax.f32 %v453_v20, 0.0  ;;  %v406_v45 = vmul.f32 %v5004_v21, %v6685_v43  ;;  %v494_v52 = vmax.f32 %v452_v28, 0.0  ;;  %v6423_v21 = vld [vmem:[%s9179_s4 + $0x90] sm:$0xff]  }
  0x95   : > { %9270 = vst [vmem:[#allocation9_spill] sm:$0xff] %v6842_v47  ;;  %9271 = vst [vmem:[#allocation10_spill] sm:$0xff] %v6844_v48  ;;  %v765_v53 = vmul.f32 %v6842_v47, %v513_v33  ;;  %v764_v56 = vmul.f32 %v6844_v48, %v512_v34  ;;  %v6420_v33 = vld [vmem:[%s9179_s4 + $0x60] sm:$0xff]   ;;  %v517_v2 = vmax.f32 %v475_v36, 0.0  ;;  %v427_v7 = vmul.f32 %v5047_v41, %v6685_v43 }
  0x96   : > { %5678 = vmatpush3.bf16.msra.mxu0 %v6415_v38  ;;  %5578 = vmatpush3.bf16.msra.mxu1 %v6416_v40  ;;  %9272 = vst [vmem:[#allocation11_spill] sm:$0xff] %v6853_v63  ;;  %v474_v40 = vadd.f32 %v6690_v44, %v425_v18  ;;  %v455_v13 = vadd.f32 %v6690_v44, %v406_v45 }
  0x97   : > { %v6855_v0 = vpack.c.bf16 %v765_v53, %v764_v56  ;;  %5679 = vmatprep.subr.bf16.mxu0 %v9184_v5  ;;  %5579 = vmatprep.subr.bf16.mxu1 %v9184_v5  ;;  %v405_v53 = vmul.f32 %v5003_v29, %v6685_v43  ;;  %v5178_v56 = vld [vmem:[%s6673_s8 + $0x28] sm:$0xff]  }
  0x98   : > { %v6867_v11 = vpop.permute.xlu1 %557  ;;  %v6869_v12 = vpop.permute.xlu0 %552  ;;  %v5007_v20 = vunpack.c.l.bf16 %v5178_v56 }
  0x99   : > { %9273 = vst [vmem:[#allocation12_spill] sm:$0xff] %v6867_v11  ;;  %9274 = vst [vmem:[#allocation13_spill] sm:$0xff] %v6869_v12  ;;  %5496 = vmatmul.mubr.bf16.gmra.mxu0 %v6853_v63  ;;  %5540 = vmatmul.mubr.bf16.gmra.mxu1 %v6855_v0  ;;  %v745_v24 = vmul.f32 %v6867_v11, %v493_v61  ;;  %v744_v27 = vmul.f32 %v6869_v12, %v492_v1  ;;  %v6445_v12 = vld [vmem:[%s9179_s4 + $0x178] sm:$0xff]  }
  0x9a   : > { %5499 = vmatprep.mubr.msk.bf16.mxu0 %vm6487_vm0, %v9184_v5  ;;  %5543 = vmatprep.mubr.msk.bf16.mxu1 %vm6487_vm0, %v9184_v5  ;;  %v428_v1 = vmul.f32 %v5048_v37, %v6685_v43  ;;  %v454_v19 = vadd.f32 %v6690_v44, %v405_v53  ;;  %v476_v37 = vadd.f32 %v6690_v44, %v427_v7  ;;  %v5179_v53 = vld [vmem:[%s6673_s8 + $0x30] sm:$0xff]  }
  0x9b   : > { %5680 = vmatpush3.bf16.msra.mxu0 %v6417_v3  ;;  %5580 = vmatpush3.bf16.msra.mxu1 %v6418_v10  ;;  %v6901_v46 = vpack.c.bf16 %v745_v24, %v744_v27  ;;  %v516_v3 = vmax.f32 %v474_v40, 0.0  ;;  %v5189_v10 = vld [vmem:[%s6673_s8 + $0x80] sm:$0xff]   ;;  %v6424_v24 = vld [vmem:[%s9179_s4 + $0x50] sm:$0xff]  }
  0x9c   : > { %v6890_v34 = vpop.permute.xlu1 %667  ;;  %v6892_v35 = vpop.permute.xlu0 %662  ;;  %5681 = vmatprep.subr.bf16.mxu0 %v9184_v5  ;;  %5581 = vmatprep.subr.bf16.mxu1 %v9184_v5  ;;  %v477_v29 = vadd.f32 %v6690_v44, %v428_v1  ;;  %v496_v45 = vmax.f32 %v454_v19, 0.0 }
  0x9d   : > { %9275 = vst [vmem:[#allocation14_spill] sm:$0xff] %v6890_v34  ;;  %9276 = vst [vmem:[#allocation15_spill] sm:$0xff] %v6892_v35  ;;  %v767_v38 = vmul.f32 %v6890_v34, %v515_v16  ;;  %v766_v39 = vmul.f32 %v6892_v35, %v514_v17  ;;  %v5008_v16 = vunpack.c.h.bf16 %v5178_v56  ;;  %v6425_v56 = vld [vmem:[%s9179_s4 + $0x48] sm:$0xff]  }
  0x9e   : > { %9277 = vst [vmem:[#allocation16_spill] sm:$0xff] %v6901_v46 }
  0x9f   : > { %v6903_v49 = vpack.c.bf16 %v767_v38, %v766_v39  ;;  %5682 = vmatpush3.bf16.msra.mxu0 %v6419_v32  ;;  %5582 = vmatpush3.bf16.msra.mxu1 %v6420_v33  ;;  %v5052_v32 = vunpack.c.h.bf16 %v5189_v10  ;;  %v5051_v38 = vunpack.c.l.bf16 %v5189_v10  ;;  %v497_v39 = vmax.f32 %v455_v13, 0.0  ;;  %v5190_v13 = vld [vmem:[%s6673_s8 + $0x88] sm:$0xff]  }
  0xa0   : > { %v6913_v61 = vpop.permute.xlu1 %567  ;;  %v6915_v62 = vpop.permute.xlu0 %562  ;;  %5683 = vmatprep.subr.bf16.mxu0 %v9184_v5  ;;  %5583 = vmatprep.subr.bf16.mxu1 %v9184_v5  ;;  %v408_v40 = vmul.f32 %v5008_v16, %v6685_v43 }
  0xa1   : > { %9278 = vst [vmem:[#allocation17_spill] sm:$0xff] %v6913_v61  ;;  %9279 = vst [vmem:[#allocation18_spill] sm:$0xff] %v6915_v62  ;;  %5500 = vmatmul.mubr.bf16.gmra.mxu0 %v6901_v46  ;;  %5544 = vmatmul.mubr.bf16.gmra.mxu1 %v6903_v49  ;;  %v747_v17 = vmul.f32 %v6913_v61, %v495_v42  ;;  %v746_v18 = vmul.f32 %v6915_v62, %v494_v52 }
  0xa2   : > { %5503 = vmatprep.mubr.msk.bf16.mxu0 %vm6487_vm0, %v9184_v5  ;;  %5547 = vmatprep.mubr.msk.bf16.mxu1 %vm6487_vm0, %v9184_v5  ;;  %v407_v52 = vmul.f32 %v5007_v20, %v6685_v43  ;;  %v430_v7 = vmul.f32 %v5052_v32, %v6685_v43  ;;  %v429_v10 = vmul.f32 %v5051_v38, %v6685_v43 }
  0xa3   : > { %5684 = vmatpush3.bf16.msra.mxu0 %v6421_v57  ;;  %5584 = vmatpush3.bf16.msra.mxu1 %v6422_v58  ;;  %v6949_v41 = vpack.c.bf16 %v747_v17, %v746_v18  ;;  %v6426_v57 = vld [vmem:[%s9179_s4 + $0x88] sm:$0xff]   ;;  %v457_v16 = vadd.f32 %v6690_v44, %v408_v40  ;;  %v5012_v17 = vunpack.c.h.bf16 %v5179_v53 }
  0xa4   : > { %v6938_v27 = vpop.permute.xlu1 %677  ;;  %v6940_v28 = vpop.permute.xlu0 %672  ;;  %5685 = vmatprep.subr.bf16.mxu0 %v9184_v5  ;;  %5585 = vmatprep.subr.bf16.mxu1 %v9184_v5  ;;  %v456_v20 = vadd.f32 %v6690_v44, %v407_v52  ;;  %v479_v40 = vadd.f32 %v6690_v44, %v430_v7 }
  0xa5   : > { %9280 = vst [vmem:[#allocation19_spill] sm:$0xff] %v6938_v27  ;;  %9281 = vst [vmem:[#allocation20_spill] sm:$0xff] %v6940_v28  ;;  %v769_v33 = vmul.f32 %v6938_v27, %v517_v2  ;;  %v768_v36 = vmul.f32 %v6940_v28, %v516_v3  ;;  %v519_v2 = vmax.f32 %v477_v29, 0.0  ;;  %v518_v3 = vmax.f32 %v476_v37, 0.0  ;;  %v6428_v29 = vld [vmem:[%s9179_s4 + $0x80] sm:$0xff]   ;;  %v5180_v28 = vld [vmem:[%s6673_s8 + $0x38] sm:$0xff]  }
  0xa6   : > { %9282 = vst [vmem:[#allocation21_spill] sm:$0xff] %v6949_v41  ;;  %v5055_v37 = vunpack.c.l.bf16 %v5190_v13  ;;  %v499_v52 = vmax.f32 %v457_v16, 0.0  ;;  %v521_v16 = vmax.f32 %v479_v40, 0.0 }
  0xa7   : > { %v6951_v42 = vpack.c.bf16 %v769_v33, %v768_v36  ;;  %5686 = vmatpush3.bf16.msra.mxu0 %v6423_v21  ;;  %5586 = vmatpush3.bf16.msra.mxu1 %v6424_v24  ;;  %v5011_v21 = vunpack.c.l.bf16 %v5179_v53  ;;  %v6427_v24 = vld [vmem:[%s9179_s4 + $0x40] sm:$0xff]   ;;  %v5056_v36 = vunpack.c.h.bf16 %v5190_v13  ;;  %v410_v53 = vmul.f32 %v5012_v17, %v6685_v43 }
  0xa8   : > { %v6961_v58 = vpop.permute.xlu1 %577  ;;  %v6963_v1 = vpop.permute.xlu0 %572  ;;  %5587 = vmatprep.subr.bf16.mxu1 %v9184_v5  ;;  %5687 = vmatprep.subr.bf16.mxu0 %v9184_v5  ;;  %v498_v13 = vmax.f32 %v456_v20, 0.0  ;;  %v5191_v20 = vld [vmem:[%s6673_s8 + $0x90] sm:$0xff]  }
  0xa9   : > { %9283 = vst [vmem:[#allocation22_spill] sm:$0xff] %v6961_v58  ;;  %9284 = vst [vmem:[#allocation23_spill] sm:$0xff] %v6963_v1  ;;  %5504 = vmatmul.mubr.bf16.gmra.mxu0 %v6949_v41  ;;  %5548 = vmatmul.mubr.bf16.gmra.mxu1 %v6951_v42  ;;  %v749_v18 = vmul.f32 %v6961_v58, %v497_v39  ;;  %v748_v19 = vmul.f32 %v6963_v1, %v496_v45 }
  0xaa   : > { %5507 = vmatprep.mubr.msk.bf16.mxu0 %vm6487_vm0, %v9184_v5  ;;  %5551 = vmatprep.mubr.msk.bf16.mxu1 %vm6487_vm0, %v9184_v5  ;;  %v478_v45 = vadd.f32 %v6690_v44, %v429_v10  ;;  %v409_v27 = vmul.f32 %v5011_v21, %v6685_v43  ;;  %v432_v7 = vmul.f32 %v5056_v36, %v6685_v43  ;;  %v5015_v36 = vunpack.c.l.bf16 %v5180_v28 }
  0xab   : > { %5588 = vmatpush3.bf16.msra.mxu1 %v6425_v56  ;;  %5688 = vmatpush3.bf16.msra.mxu0 %v6426_v57  ;;  %v6997_v56 = vpack.c.bf16 %v749_v18, %v748_v19  ;;  %v431_v10 = vmul.f32 %v5055_v37, %v6685_v43  ;;  %v459_v18 = vadd.f32 %v6690_v44, %v410_v53  ;;  %v5016_v19 = vunpack.c.h.bf16 %v5180_v28 }
  0xac   : > { %v6986_v32 = vpop.permute.xlu1 %687  ;;  %v6988_v33 = vpop.permute.xlu0 %682  ;;  %5589 = vmatprep.subr.bf16.mxu1 %v9184_v5  ;;  %5689 = vmatprep.subr.bf16.mxu0 %v9184_v5  ;;  %v520_v17 = vmax.f32 %v478_v45, 0.0  ;;  %v411_v34 = vmul.f32 %v5015_v36, %v6685_v43 }
  0xad   : > { %9285 = vst [vmem:[#allocation24_spill] sm:$0xff] %v6986_v32  ;;  %9286 = vst [vmem:[#allocation25_spill] sm:$0xff] %v6988_v33  ;;  %v771_v38 = vmul.f32 %v6986_v32, %v519_v2  ;;  %v770_v39 = vmul.f32 %v6988_v33, %v518_v3  ;;  %v480_v40 = vadd.f32 %v6690_v44, %v431_v10  ;;  %v5059_v32 = vunpack.c.l.bf16 %v5191_v20 }
  0xae   : > { %9287 = vst [vmem:[#allocation26_spill] sm:$0xff] %v6997_v56 }
  0xaf   : > { %v6999_v57 = vpack.c.bf16 %v771_v38, %v770_v39  ;;  %5590 = vmatpush3.bf16.msra.mxu1 %v6427_v24  ;;  %5690 = vmatpush3.bf16.msra.mxu0 %v6428_v29  ;;  %v458_v29 = vadd.f32 %v6690_v44, %v409_v27  ;;  %v481_v39 = vadd.f32 %v6690_v44, %v432_v7 }
  0xb0   : > { %v7003_v2 = vpop.permute.xlu1 %587  ;;  %v7005_v3 = vpop.permute.xlu0 %582  ;;  %5775 = vmatprep.subr.bf16.mxu1 %v9184_v5  ;;  %5875 = vmatprep.subr.bf16.mxu0 %v9184_v5 }
  0xb1   : > { %9288 = vst [vmem:[#allocation27_spill] sm:$0xff] %v7003_v2  ;;  %9289 = vst [vmem:[#allocation28_spill] sm:$0xff] %v7005_v3  ;;  %5508 = vmatmul.mubr.bf16.gmra.mxu0 %v6997_v56  ;;  %5552 = vmatmul.mubr.bf16.gmra.mxu1 %v6999_v57  ;;  %v751_v21 = vmul.f32 %v7003_v2, %v499_v52  ;;  %v750_v24 = vmul.f32 %v7005_v3, %v498_v13  ;;  %v501_v52 = vmax.f32 %v459_v18, 0.0 }
  0xb2   : > { %5511 = vmatprep.mubr.msk.bf16.mxu0 %vm6487_vm0, %v9184_v5  ;;  %5555 = vmatprep.mubr.msk.bf16.mxu1 %vm6487_vm0, %v9184_v5  ;;  %v5060_v5 = vunpack.c.h.bf16 %v5191_v20  ;;  %v412_v13 = vmul.f32 %v5016_v19, %v6685_v43  ;;  %v500_v28 = vmax.f32 %v458_v29, 0.0  ;;  %v523_v10 = vmax.f32 %v481_v39, 0.0 }
  0xb3   : > { %v7031_v33 = vpack.c.bf16 %v751_v21, %v750_v24  ;;  %v433_v18 = vmul.f32 %v5059_v32, %v6685_v43  ;;  %v9294_v19 = vmov 0.0   ;;  %v460_v29 = vadd.f32 %v6690_v44, %v411_v34 }
  0xb4   : > { %v7022_v37 = vpop.permute.xlu1 %697  ;;  %v7024_v38 = vpop.permute.xlu0 %692  ;;  %v461_v24 = vadd.f32 %v6690_v44, %v412_v13 }
  0xb5   : > { %9290 = vst [vmem:[#allocation29_spill] sm:$0xff] %v7022_v37  ;;  %9291 = vst [vmem:[#allocation30_spill] sm:$0xff] %v7024_v38  ;;  %v773_v45 = vmul.f32 %v7022_v37, %v521_v16  ;;  %v772_v53 = vmul.f32 %v7024_v38, %v520_v17  ;;  %v522_v16 = vmax.f32 %v480_v40, 0.0  ;;  %v434_v17 = vmul.f32 %v5060_v5, %v6685_v43 }
  0xb6   : > { %v482_v40 = vadd.f32 %v6690_v44, %v433_v18  ;;  %v502_v13 = vmax.f32 %v460_v29, 0.0  ;;  %v505_v29 = vmax.f32 %v6702_v50, 0.0  ;;  %v527_v50 = vmax.f32 %v6717_v59, 0.0 }
  0xb7   : > { %v7033_v27 = vpack.c.bf16 %v773_v45, %v772_v53  ;;  %v483_v32 = vadd.f32 %v6690_v44, %v434_v17  ;;  %v507_v59 = vmax.f32 %v6732_v4, 0.0  ;;  %v528_v4 = vmax.f32 %v6750_v15, 0.0 }
  0xb8   : > { %v7036_v35 = vpop.permute.xlu1 %597  ;;  %v7038_v7 = vpop.permute.xlu0 %592  ;;  %v508_v15 = vmax.f32 %v6764_v23, 0.0  ;;  %v6429_v23 = vld [vmem:[%s9179_s4 + $0xf8] sm:$0xff]  }
  0xb9   : > { %9292 = vst [vmem:[#allocation31_spill] sm:$0xff] %v7036_v35  ;;  %9293 = vst [vmem:[#allocation32_spill] sm:$0xff] %v7038_v7  ;;  %5512 = vmatmul.mubr.bf16.gmra.mxu0 %v7031_v33  ;;  %5556 = vmatmul.mubr.bf16.gmra.mxu1 %v7033_v27  ;;  %v753_v20 = vmul.f32 %v7036_v35, %v501_v52  ;;  %v752_v21 = vmul.f32 %v7038_v7, %v500_v28  ;;  %v503_v52 = vmax.f32 %v461_v24, 0.0 }
  0xba   : > { %5515 = vmatprep.mubr.msk.bf16.mxu0 %vm6487_vm0, %v9294_v19  ;;  %5559 = vmatprep.mubr.msk.bf16.mxu1 %vm6487_vm0, %v9294_v19 }
  0xbb   : > { %v7060_v45 = vpack.c.bf16 %v753_v20, %v752_v21 }
  0xbc   : > { %v7052_v36 = vpop.permute.xlu1 %707  ;;  %v7054_v39 = vpop.permute.xlu0 %702 }
  0xbd   : > { %9295 = vst [vmem:[#allocation33_spill] sm:$0xff] %v7052_v36  ;;  %9296 = vst [vmem:[#allocation34_spill] sm:$0xff] %v7054_v39  ;;  %v775_v5 = vmul.f32 %v7052_v36, %v523_v10  ;;  %v774_v43 = vmul.f32 %v7054_v39, %v522_v16  ;;  %v525_v10 = vmax.f32 %v483_v32, 0.0  ;;  %v524_v16 = vmax.f32 %v482_v40, 0.0 }
  0xbf   : > { %v7062_v53 = vpack.c.bf16 %v775_v5, %v774_v43  ;;  %v504_v5 = vmax.f32 %v6705_v51, 0.0  ;;  %v526_v51 = vmax.f32 %v6720_v60, 0.0  ;;  %v506_v60 = vmax.f32 %v6735_v6, 0.0 }
  0xc0   : > { %v7064_v28 = vpop.permute.xlu1 %607  ;;  %v7066_v34 = vpop.permute.xlu0 %602 }
  0xc1   : > { %9297 = vst [vmem:[#allocation35_spill] sm:$0xff] %v7064_v28  ;;  %9298 = vst [vmem:[#allocation36_spill] sm:$0xff] %v7066_v34  ;;  %5516 = vmatmul.mubr.bf16.gmra.mxu0 %v7060_v45  ;;  %5560 = vmatmul.mubr.bf16.gmra.mxu1 %v7062_v53  ;;  %v755_v44 = vmul.f32 %v7064_v28, %v503_v52  ;;  %v754_v17 = vmul.f32 %v7066_v34, %v502_v13 }
  0xc2   : > { %5519 = vmatprep.mubr.msk.bf16.mxu0 %vm6487_vm0, %v9294_v19  ;;  %5563 = vmatprep.mubr.msk.bf16.mxu1 %vm6487_vm0, %v9294_v19 }
  0xc3   : > { %v7084_v43 = vpack.c.bf16 %v755_v44, %v754_v17 }
  0xc4   : > { %v7076_v18 = vpop.permute.xlu1 %717  ;;  %v7078_v20 = vpop.permute.xlu0 %712 }
  0xc5   : > { %9299 = vst [vmem:[#allocation37_spill] sm:$0xff] %v7076_v18  ;;  %9300 = vst [vmem:[#allocation38_spill] sm:$0xff] %v7078_v20  ;;  %v777_v21 = vmul.f32 %v7076_v18, %v525_v10  ;;  %v776_v24 = vmul.f32 %v7078_v20, %v524_v16 }
  0xc7   : > { %v7086_v32 = vpack.c.bf16 %v777_v21, %v776_v24 }
  0xc8   : > { %v7088_v40 = vpop.permute.xlu1 %617  ;;  %v7090_v52 = vpop.permute.xlu0 %612 }
  0xc9   : > { %9301 = vst [vmem:[#allocation39_spill] sm:$0xff] %v7088_v40  ;;  %9302 = vst [vmem:[#allocation40_spill] sm:$0xff] %v7090_v52  ;;  %v757_v13 = vmul.f32 %v7088_v40, %v505_v29  ;;  %v756_v36 = vmul.f32 %v7090_v52, %v504_v5  ;;  %5520 = vmatmul.mubr.bf16.gmra.mxu0 %v7084_v43  ;;  %5564 = vmatmul.mubr.bf16.gmra.mxu1 %v7086_v32 }
  0xca   : > { %5523 = vmatprep.mubr.msk.bf16.mxu0 %vm6487_vm0, %v9294_v19  ;;  %5567 = vmatprep.mubr.msk.bf16.mxu1 %vm6487_vm0, %v9294_v19 }
  0xcb   : > { %v7102_v10 = vpack.c.bf16 %v757_v13, %v756_v36 }
  0xcc   : > { %v7104_v16 = vpop.permute.xlu1 %727  ;;  %v7106_v44 = vpop.permute.xlu0 %722 }
  0xcd   : > { %9303 = vst [vmem:[#allocation41_spill] sm:$0xff] %v7104_v16  ;;  %9304 = vst [vmem:[#allocation42_spill] sm:$0xff] %v7106_v44  ;;  %v779_v17 = vmul.f32 %v7104_v16, %v527_v50  ;;  %v778_v21 = vmul.f32 %v7106_v44, %v526_v51  ;;  %v529_v50 = vmax.f32 %v6747_v14, 0.0  ;;  %v509_v14 = vmax.f32 %v6761_v22, 0.0 }
  0xcf   : > { %v7112_v24 = vpack.c.bf16 %v779_v17, %v778_v21 }
  0xd0   : > { %v7114_v29 = vpop.permute.xlu1 %627  ;;  %v7116_v5 = vpop.permute.xlu0 %622 }
  0xd1   : > { %9305 = vst [vmem:[#allocation43_spill] sm:$0xff] %v7112_v24  ;;  %9306 = vst [vmem:[#allocation44_spill] sm:$0xff] %v7114_v29  ;;  %v759_v36 = vmul.f32 %v7114_v29, %v507_v59  ;;  %v758_v13 = vmul.f32 %v7116_v5, %v506_v60  ;;  %5524 = vmatmul.mubr.bf16.gmra.mxu0 %v7102_v10  ;;  %5568 = vmatmul.mubr.bf16.gmra.mxu1 %v7112_v24 }
  0xd2   : > { %9307 = vst [vmem:[#allocation45_spill] sm:$0xff] %v7116_v5  ;;  %5527 = vmatprep.mubr.msk.bf16.mxu0 %vm6487_vm0, %v9294_v19  ;;  %5571 = vmatprep.mubr.msk.bf16.mxu1 %vm6487_vm0, %v9294_v19 }
  0xd3   : > { %v7128_v6 = vpack.c.bf16 %v759_v36, %v758_v13 }
  0xd4   : > { %v7130_v51 = vpop.permute.xlu1 %737  ;;  %v7132_v17 = vpop.permute.xlu0 %732 }
  0xd5   : > { %9308 = vst [vmem:[#allocation46_spill] sm:$0xff] %v7130_v51  ;;  %9309 = vst [vmem:[#allocation47_spill] sm:$0xff] %v7132_v17  ;;  %v781_v21 = vmul.f32 %v7130_v51, %v529_v50  ;;  %v780_v59 = vmul.f32 %v7132_v17, %v528_v4  ;;  %v6431_v50 = vld [vmem:[%s9179_s4 + $0xf0] sm:$0xff]   ;;  %v6430_v4 = vld [vmem:[%s9179_s4 + $0x138] sm:$0xff]  }
  0xd7   : > { %v7138_v60 = vpack.c.bf16 %v781_v21, %v780_v59  ;;  %v6433_v21 = vld [vmem:[%s9179_s4 + $0xe8] sm:$0xff]   ;;  %v6432_v59 = vld [vmem:[%s9179_s4 + $0x130] sm:$0xff]  }
  0xd8   : > { %v7140_v16 = vpop.permute.xlu1 %637  ;;  %v7142_v44 = vpop.permute.xlu0 %632 }
  0xd9   : > { %9310 = vst [vmem:[#allocation48_spill] sm:$0xff] %v7138_v60  ;;  %9311 = vst [vmem:[#allocation49_spill] sm:$0xff] %v7140_v16  ;;  %v761_v36 = vmul.f32 %v7140_v16, %v509_v14  ;;  %v760_v13 = vmul.f32 %v7142_v44, %v508_v15  ;;  %5528 = vmatmul.mubr.bf16.gmra.mxu0 %v7128_v6  ;;  %5572 = vmatmul.mubr.bf16.gmra.mxu1 %v7138_v60  ;;  %v6435_v14 = vld [vmem:[%s9179_s4 + $0xe0] sm:$0xff]   ;;  %v6434_v15 = vld [vmem:[%s9179_s4 + $0x128] sm:$0xff]  }
  0xda   : > { %9312 = vst [vmem:[#allocation50_spill] sm:$0xff] %v7142_v44  ;;  %5531 = vmatprep.mubr.msk.bf16.mxu0 %vm6487_vm0, %v9294_v19  ;;  %5591 = vmatprep.mubr.msk.bf16.mxu1 %vm6487_vm0, %v9294_v19 }
  0xdb   : > { %v7152_v22 = vpack.c.bf16 %v761_v36, %v760_v13  ;;  %v6437_v36 = vld [vmem:[%s9179_s4 + $0xd8] sm:$0xff]   ;;  %v6436_v13 = vld [vmem:[%s9179_s4 + $0x120] sm:$0xff]  }
  0xe1   : > { %5532 = vmatmul.mubr.bf16.gmra.mxu0 %v7152_v22  ;;  %5592 = vmatmul.mubr.bf16.vlgmr.msra.gmra.mxu1 %v6815_v26 }
  0xe2   : > { %5776 = vmatpush3.bf16.msra.mxu1 %v6429_v23  ;;  %5595 = vmatprep.mubr.msk.bf16.mxu1 %vm6487_vm0, %v9294_v19  ;;  %v6439_v23 = vld [vmem:[%s9179_s4 + $0xd0] sm:$0xff]  }
  0xe3   : > { %5691 = vmatprep.mubr.msk.bf16.mxu0 %vm6487_vm0, %v9294_v19  ;;  %5777 = vmatprep.subr.bf16.mxu1 %v9294_v19 }
  0xe6   : > { %5778 = vmatpush3.bf16.msra.mxu1 %v6431_v50  ;;  %v6438_v50 = vld [vmem:[%s9179_s4 + $0x118] sm:$0xff]  }
  0xe7   : > { %5779 = vmatprep.subr.bf16.mxu1 %v9294_v19 }
  0xe9   : > { %5596 = vmatmul.mubr.bf16.gmra.mxu1 %v6853_v63  ;;  %5692 = vmatmul.mubr.bf16.vlgmr.msra.gmra.mxu0 %v6815_v26 }
  0xea   : > { %5876 = vmatpush3.bf16.msra.mxu0 %v6430_v4  ;;  %5599 = vmatprep.mubr.msk.bf16.mxu1 %vm6487_vm0, %v9294_v19  ;;  %v6441_v4 = vld [vmem:[%s9179_s4 + $0xc8] sm:$0xff]  }
  0xeb   : > { %5695 = vmatprep.mubr.msk.bf16.mxu0 %vm6487_vm0, %v9294_v19  ;;  %5877 = vmatprep.subr.bf16.mxu0 %v9294_v19 }
  0xec   : > { %5780 = vmatpush3.bf16.msra.mxu1 %v6433_v21  ;;  %v6440_v21 = vld [vmem:[%s9179_s4 + $0x110] sm:$0xff]  }
  0xed   : > { %5781 = vmatprep.subr.bf16.mxu1 %v9294_v19 }
  0xee   : > { %5878 = vmatpush3.bf16.msra.mxu0 %v6432_v59  ;;  %v6443_v59 = vld [vmem:[%s9179_s4 + $0xc0] sm:$0xff]  }
  0xef   : > { %5879 = vmatprep.subr.bf16.mxu0 %v9294_v19 }
  0xf0   : > { %5782 = vmatpush3.bf16.msra.mxu1 %v6435_v14  ;;  %v6442_v14 = vld [vmem:[%s9179_s4 + $0x108] sm:$0xff]  }
  0xf1   : > { %5600 = vmatmul.mubr.bf16.gmra.mxu1 %v6901_v46  ;;  %5696 = vmatmul.mubr.bf16.gmra.mxu0 %v6853_v63 }
  0xf2   : > { %5603 = vmatprep.mubr.msk.bf16.mxu1 %vm6487_vm0, %v9294_v19  ;;  %5699 = vmatprep.mubr.msk.bf16.mxu0 %vm6487_vm0, %v9294_v19 }
  0xf3   : > { %5880 = vmatpush3.bf16.msra.mxu0 %v6434_v15  ;;  %5783 = vmatprep.subr.bf16.mxu1 %v9294_v19  ;;  %v6444_v15 = vld [vmem:[%s9179_s4 + $0x100] sm:$0xff]  }
  0xf4   : > { %5881 = vmatprep.subr.bf16.mxu0 %v9294_v19  ;;  %5784 = vmatpush3.bf16.msra.mxu1 %v6437_v36  ;;  %v1110_v36 = vlaneseq }
  0xf5   : > { %5785 = vmatprep.subr.bf16.mxu1 %v9294_v19 }
  0xf7   : > { %5882 = vmatpush3.bf16.msra.mxu0 %v6436_v13 }
  0xf8   : > { %5883 = vmatprep.subr.bf16.mxu0 %v9294_v19  ;;  %5786 = vmatpush3.bf16.msra.mxu1 %v6439_v23 }
  0xf9   : > { %5604 = vmatmul.mubr.bf16.gmra.mxu1 %v6949_v41  ;;  %5700 = vmatmul.mubr.bf16.gmra.mxu0 %v6901_v46 }
  0xfa   : > { %5607 = vmatprep.mubr.msk.bf16.mxu1 %vm6487_vm0, %v9294_v19  ;;  %5703 = vmatprep.mubr.msk.bf16.mxu0 %vm6487_vm0, %v9294_v19 }
  0xfb   : > { %5884 = vmatpush3.bf16.msra.mxu0 %v6438_v50  ;;  %5787 = vmatprep.subr.bf16.mxu1 %v9294_v19  ;;  %v7308_v50 = vshrl.u32 %v1110_v36, 7 }
  0xfc   : > { %5885 = vmatprep.subr.bf16.mxu0 %v9294_v19  ;;  %5788 = vmatpush3.bf16.msra.mxu1 %v6441_v4 }
  0xfd   : > { %5789 = vmatprep.subr.bf16.mxu1 %v9294_v19  ;;  %vm1112_vm1 = vcmp.lt.s32.totalorder %v7308_v50, 3  ;;  %vm1463_vm2 = vcmp.lt.s32.totalorder %v7308_v50, 2  ;;  %vm1856_vm3 = vcmp.lt.s32.totalorder %v7308_v50, 1  ;;  %vm2949_vm4 = vcmp.lt.s32.totalorder %v7308_v50, 7 }
  0xfe   : > { %vm3734_vm5 = vcmp.lt.s32.totalorder %v7308_v50, 6  ;;  %vm4127_vm6 = vcmp.lt.s32.totalorder %v7308_v50, 5 }
  0xff   : > { %5886 = vmatpush3.bf16.msra.mxu0 %v6440_v21 }
 0x100   : > { %5887 = vmatprep.subr.bf16.mxu0 %v9294_v19  ;;  %5790 = vmatpush3.bf16.msra.mxu1 %v6443_v59 }
 0x101   : > { %5608 = vmatmul.mubr.bf16.gmra.mxu1 %v6997_v56  ;;  %5704 = vmatmul.mubr.bf16.gmra.mxu0 %v6949_v41 }
 0x102   : > { %5611 = vmatprep.mubr.msk.bf16.mxu1 %vm6487_vm0, %v9294_v19  ;;  %5707 = vmatprep.mubr.msk.bf16.mxu0 %vm6487_vm0, %v9294_v19 }
 0x103   : > { %5888 = vmatpush3.bf16.msra.mxu0 %v6442_v14  ;;  %5975 = vmatprep.subr.bf16.mxu1 %v9294_v19 }
 0x104   : > { %5889 = vmatprep.subr.bf16.mxu0 %v9294_v19 }
 0x107   : > { %5890 = vmatpush3.bf16.msra.mxu0 %v6444_v15 }
 0x108   : > { %6075 = vmatprep.subr.bf16.mxu0 %v9294_v19 }
 0x109   : > { %5612 = vmatmul.mubr.bf16.gmra.mxu1 %v7031_v33  ;;  %5708 = vmatmul.mubr.bf16.gmra.mxu0 %v6997_v56 }
 0x10a   : > { %5615 = vmatprep.mubr.msk.bf16.mxu1 %vm6487_vm0, %v9294_v19  ;;  %5711 = vmatprep.mubr.msk.bf16.mxu0 %vm6487_vm0, %v9294_v19 }
 0x111   : > { %5616 = vmatmul.mubr.bf16.gmra.mxu1 %v7060_v45  ;;  %5712 = vmatmul.mubr.bf16.gmra.mxu0 %v7031_v33 }
 0x112   : > { %5619 = vmatprep.mubr.msk.bf16.mxu1 %vm6487_vm0, %v9294_v19  ;;  %5715 = vmatprep.mubr.msk.bf16.mxu0 %vm6487_vm0, %v9294_v19 }
 0x119   : > { %5620 = vmatmul.mubr.bf16.gmra.mxu1 %v7084_v43  ;;  %5716 = vmatmul.mubr.bf16.gmra.mxu0 %v7060_v45 }
 0x11a   : > { %5623 = vmatprep.mubr.msk.bf16.mxu1 %vm6487_vm0, %v9294_v19  ;;  %5719 = vmatprep.mubr.msk.bf16.mxu0 %vm6487_vm0, %v9294_v19 }
 0x121   : > { %5624 = vmatmul.mubr.bf16.gmra.mxu1 %v7102_v10  ;;  %5720 = vmatmul.mubr.bf16.gmra.mxu0 %v7084_v43 }
 0x122   : > { %5627 = vmatprep.mubr.msk.bf16.mxu1 %vm6487_vm0, %v9294_v19  ;;  %5723 = vmatprep.mubr.msk.bf16.mxu0 %vm6487_vm0, %v9294_v19 }
 0x129   : > { %5628 = vmatmul.mubr.bf16.gmra.mxu1 %v7128_v6  ;;  %5724 = vmatmul.mubr.bf16.gmra.mxu0 %v7102_v10 }
 0x12a   : > { %5631 = vmatprep.mubr.msk.bf16.mxu1 %vm6487_vm0, %v9294_v19  ;;  %5727 = vmatprep.mubr.msk.bf16.mxu0 %vm6487_vm0, %v9294_v19 }
 0x131   : > { %5632 = vmatmul.mubr.bf16.gmra.mxu1 %v7152_v22  ;;  %5728 = vmatmul.mubr.bf16.gmra.mxu0 %v7128_v6 }
 0x132   : > { %5635 = vmatprep.mubr.msk.bf16.mxu1 %vm6487_vm0, %v9294_v19  ;;  %5731 = vmatprep.mubr.msk.bf16.mxu0 %vm6487_vm0, %v9294_v19 }
 0x139   : > { %5636 = vmatmul.mubr.bf16.gmra.mxu1 %v6813_v25  ;;  %5732 = vmatmul.mubr.bf16.gmra.mxu0 %v7152_v22 }
 0x13a   : > { %5639 = vmatprep.mubr.msk.bf16.mxu1 %vm6487_vm0, %v9294_v19  ;;  %5735 = vmatprep.mubr.msk.bf16.mxu0 %vm6487_vm0, %v9294_v19 }
 0x141   : > { %5640 = vmatmul.mubr.bf16.gmra.mxu1 %v6855_v0  ;;  %5736 = vmatmul.mubr.bf16.gmra.mxu0 %v6813_v25 }
 0x142   : > { %5643 = vmatprep.mubr.msk.bf16.mxu1 %vm6487_vm0, %v9294_v19  ;;  %5739 = vmatprep.mubr.msk.bf16.mxu0 %vm6487_vm0, %v9294_v19 }
 0x149   : > { %5644 = vmatmul.mubr.bf16.gmra.mxu1 %v6903_v49  ;;  %5740 = vmatmul.mubr.bf16.gmra.mxu0 %v6855_v0 }
 0x14a   : > { %5647 = vmatprep.mubr.msk.bf16.mxu1 %vm6487_vm0, %v9294_v19  ;;  %5743 = vmatprep.mubr.msk.bf16.mxu0 %vm6487_vm0, %v9294_v19 }
 0x151   : > { %v7302_v13 = vpop.f32.mrf.mxu0  ;;  %v7304_v23 = vpop.f32.mrf.mxu1  ;;  %5648 = vmatmul.mubr.bf16.gmra.mxu1 %v6951_v42  ;;  %5744 = vmatmul.mubr.bf16.gmra.mxu0 %v6903_v49 }
 0x152   : > { %5651 = vmatprep.mubr.msk.bf16.mxu1 %vm6487_vm0, %v9294_v19  ;;  %5747 = vmatprep.mubr.msk.bf16.mxu0 %vm6487_vm0, %v9294_v19  ;;  %v9200_v15 = vrot.slane %v7302_v13, 5  ;;  %v9199_v51 = vrot.slane %v7304_v23, 5 }
 0x153   : > { %v5493_v4 = vpop.f32.mrf.mxu0  ;;  %v5537_v21 = vpop.f32.mrf.mxu1 }
 0x155   : > { %v904_v59 = vpop.f32.mrf.mxu0  ;;  %v992_v14 = vpop.f32.mrf.mxu1 }
 0x156   : > { %v1069_v17 = vrot.slane %v904_v59, 5  ;;  %v1091_v18 = vrot.slane %v992_v14, 5 }
 0x157   : > { %v5494_v36 = vpop.f32.mrf.mxu0  ;;  %v5538_v20 = vpop.f32.mrf.mxu1 }
 0x158   : > { %v7321_v39 = vsel %vm1112_vm1, %v9200_v15, %v1069_v17  ;;  %v7327_v4 = vsel %vm1112_vm1, %v9199_v51, %v1091_v18 }
 0x159   : > { %v909_v21 = vpop.f32.mrf.mxu0  ;;  %v997_v37 = vpop.f32.mrf.mxu1  ;;  %5652 = vmatmul.mubr.bf16.gmra.mxu1 %v6999_v57  ;;  %5748 = vmatmul.mubr.bf16.gmra.mxu0 %v6951_v42 }
 0x15a   : > { %v1070_v59 = vrot.slane %v909_v21, 5  ;;  %v1092_v20 = vrot.slane %v997_v37, 5  ;;  %5655 = vmatprep.mubr.msk.bf16.mxu1 %vm6487_vm0, %v9294_v19  ;;  %5751 = vmatprep.mubr.msk.bf16.mxu0 %vm6487_vm0, %v9294_v19 }
 0x15b   : > { %v5497_v14 = vpop.f32.mrf.mxu0  ;;  %v5541_v36 = vpop.f32.mrf.mxu1 }
 0x15c   : > { %v7337_v51 = vsel %vm1112_vm1, %v1069_v17, %v1070_v59  ;;  %v7341_v15 = vsel %vm1112_vm1, %v1091_v18, %v1092_v20 }
 0x15d   : > { %v912_v38 = vpop.f32.mrf.mxu0  ;;  %v1000_v47 = vpop.f32.mrf.mxu1 }
 0x15e   : > { %v1071_v21 = vrot.slane %v912_v38, 5  ;;  %v1093_v37 = vrot.slane %v1000_v47, 5 }
 0x15f   : > { %v5498_v48 = vpop.f32.mrf.mxu0  ;;  %v5542_v8 = vpop.f32.mrf.mxu1 }
 0x160   : > { %v7345_v54 = vsel %vm1112_vm1, %v1070_v59, %v1071_v21  ;;  %v7349_v14 = vsel %vm1112_vm1, %v1092_v20, %v1093_v37 }
 0x161   : > { %v917_v17 = vpop.f32.mrf.mxu0  ;;  %v1005_v36 = vpop.f32.mrf.mxu1  ;;  %5656 = vmatmul.mubr.bf16.gmra.mxu1 %v7033_v27  ;;  %5752 = vmatmul.mubr.bf16.gmra.mxu0 %v6999_v57 }
 0x162   : > { %v1072_v18 = vrot.slane %v917_v17, 5  ;;  %v1094_v16 = vrot.slane %v1005_v36, 5  ;;  %5659 = vmatprep.mubr.msk.bf16.mxu1 %vm6487_vm0, %v9294_v19  ;;  %5755 = vmatprep.mubr.msk.bf16.mxu0 %vm6487_vm0, %v9294_v19 }
 0x163   : > { %v5501_v8 = vpop.f32.mrf.mxu0  ;;  %v5545_v47 = vpop.f32.mrf.mxu1 }
 0x164   : > { %v7359_v48 = vsel %vm1112_vm1, %v1071_v21, %v1072_v18  ;;  %v7363_v38 = vsel %vm1112_vm1, %v1093_v37, %v1094_v16 }
 0x165   : > { %v920_v59 = vpop.f32.mrf.mxu0  ;;  %v1008_v20 = vpop.f32.mrf.mxu1 }
 0x166   : > { %v1073_v17 = vrot.slane %v920_v59, 5  ;;  %v1095_v36 = vrot.slane %v1008_v20, 5 }
 0x167   : > { %v5502_v44 = vpop.f32.mrf.mxu0  ;;  %v5546_v29 = vpop.f32.mrf.mxu1 }
 0x168   : > { %v7367_v5 = vsel %vm1112_vm1, %v1072_v18, %v1073_v17  ;;  %v7371_v8 = vsel %vm1112_vm1, %v1094_v16, %v1095_v36 }
 0x169   : > { %v925_v21 = vpop.f32.mrf.mxu0  ;;  %v1013_v47 = vpop.f32.mrf.mxu1  ;;  %5660 = vmatmul.mubr.bf16.gmra.mxu1 %v7062_v53  ;;  %5756 = vmatmul.mubr.bf16.gmra.mxu0 %v7033_v27 }
 0x16a   : > { %v1074_v37 = vrot.slane %v925_v21, 5  ;;  %v1096_v40 = vrot.slane %v1013_v47, 5  ;;  %5663 = vmatprep.mubr.msk.bf16.mxu1 %vm6487_vm0, %v9294_v19  ;;  %5759 = vmatprep.mubr.msk.bf16.mxu0 %vm6487_vm0, %v9294_v19 }
 0x16b   : > { %v5505_v44 = vpop.f32.mrf.mxu0  ;;  %v5549_v29 = vpop.f32.mrf.mxu1 }
 0x16c   : > { %v7381_v16 = vsel %vm1112_vm1, %v1073_v17, %v1074_v37  ;;  %v7385_v18 = vsel %vm1112_vm1, %v1095_v36, %v1096_v40 }
 0x16d   : > { %v928_v59 = vpop.f32.mrf.mxu0  ;;  %v1016_v20 = vpop.f32.mrf.mxu1 }
 0x16e   : > { %v1075_v21 = vrot.slane %v928_v59, 5  ;;  %v1097_v47 = vrot.slane %v1016_v20, 5 }
 0x16f   : > { %v5506_v52 = vpop.f32.mrf.mxu0  ;;  %v5550_v28 = vpop.f32.mrf.mxu1 }
 0x170   : > { %v7389_v34 = vsel %vm1112_vm1, %v1074_v37, %v1075_v21  ;;  %v7393_v44 = vsel %vm1112_vm1, %v1096_v40, %v1097_v47 }
 0x171   : > { %v933_v17 = vpop.f32.mrf.mxu0  ;;  %v1021_v29 = vpop.f32.mrf.mxu1  ;;  %5664 = vmatmul.mubr.bf16.gmra.mxu1 %v7086_v32  ;;  %5760 = vmatmul.mubr.bf16.gmra.mxu0 %v7062_v53 }
 0x172   : > { %v1076_v36 = vrot.slane %v933_v17, 5  ;;  %v1098_v35 = vrot.slane %v1021_v29, 5  ;;  %5667 = vmatprep.mubr.msk.bf16.mxu1 %vm6487_vm0, %v9294_v19  ;;  %5763 = vmatprep.mubr.msk.bf16.mxu0 %vm6487_vm0, %v9294_v19 }
 0x173   : > { %v5509_v28 = vpop.f32.mrf.mxu0  ;;  %v5553_v52 = vpop.f32.mrf.mxu1 }
 0x174   : > { %v7403_v40 = vsel %vm1112_vm1, %v1075_v21, %v1076_v36  ;;  %v7407_v37 = vsel %vm1112_vm1, %v1097_v47, %v1098_v35 }
 0x175   : > { %v936_v59 = vpop.f32.mrf.mxu0  ;;  %v1024_v20 = vpop.f32.mrf.mxu1 }
 0x176   : > { %v1077_v17 = vrot.slane %v936_v59, 5  ;;  %v1099_v29 = vrot.slane %v1024_v20, 5 }
 0x177   : > { %v5510_v7 = vpop.f32.mrf.mxu0  ;;  %v5554_v2 = vpop.f32.mrf.mxu1 }
 0x178   : > { %v7411_v3 = vsel %vm1112_vm1, %v1076_v36, %v1077_v17  ;;  %v7415_v28 = vsel %vm1112_vm1, %v1098_v35, %v1099_v29 }
 0x179   : > { %v941_v21 = vpop.f32.mrf.mxu0  ;;  %v1029_v52 = vpop.f32.mrf.mxu1  ;;  %5668 = vmatmul.mubr.bf16.gmra.mxu1 %v7112_v24  ;;  %5764 = vmatmul.mubr.bf16.gmra.mxu0 %v7086_v32 }
 0x17a   : > { %v1078_v47 = vrot.slane %v941_v21, 5  ;;  %v1100_v58 = vrot.slane %v1029_v52, 5  ;;  %5671 = vmatprep.mubr.msk.bf16.mxu1 %vm6487_vm0, %v9294_v19  ;;  %5767 = vmatprep.mubr.msk.bf16.mxu0 %vm6487_vm0, %v9294_v19 }
 0x17b   : > { %v5513_v2 = vpop.f32.mrf.mxu0  ;;  %v5557_v7 = vpop.f32.mrf.mxu1 }
 0x17c   : > { %v7425_v35 = vsel %vm1112_vm1, %v1077_v17, %v1078_v47  ;;  %v7429_v36 = vsel %vm1112_vm1, %v1099_v29, %v1100_v58 }
 0x17d   : > { %9313 = vst [vmem:[#allocation51_spill] sm:$0xff] %v7429_v36  ;;  %v944_v59 = vpop.f32.mrf.mxu0  ;;  %v1032_v20 = vpop.f32.mrf.mxu1 }
 0x17e   : > { %v1079_v21 = vrot.slane %v944_v59, 5  ;;  %v1101_v52 = vrot.slane %v1032_v20, 5 }
 0x17f   : > { %v5514_v1 = vpop.f32.mrf.mxu0  ;;  %v5558_v61 = vpop.f32.mrf.mxu1 }
 0x180   : > { %v7433_v62 = vsel %vm1112_vm1, %v1078_v47, %v1079_v21  ;;  %v7437_v2 = vsel %vm1112_vm1, %v1100_v58, %v1101_v52 }
 0x181   : > { %9314 = vst [vmem:[#allocation52_spill] sm:$0xff] %v7437_v2  ;;  %v949_v17 = vpop.f32.mrf.mxu0  ;;  %v1037_v7 = vpop.f32.mrf.mxu1  ;;  %5672 = vmatmul.mubr.bf16.gmra.mxu1 %v7138_v60  ;;  %5768 = vmatmul.mubr.bf16.gmra.mxu0 %v7112_v24  ;;  %v9323_v2 = vrot.slane %v7302_v13, 5 }
 0x182   : > { %v1080_v29 = vrot.slane %v949_v17, 5  ;;  %v1102_v11 = vrot.slane %v1037_v7, 5  ;;  %5771 = vmatprep.mubr.msk.bf16.mxu0 %vm6487_vm0, %v9294_v19  ;;  %5791 = vmatprep.mubr.msk.bf16.mxu1 %vm6487_vm0, %v9294_v19 }
 0x183   : > { %v5517_v61 = vpop.f32.mrf.mxu0  ;;  %v5561_v1 = vpop.f32.mrf.mxu1 }
 0x184   : > { %v7447_v58 = vsel %vm1112_vm1, %v1079_v21, %v1080_v29  ;;  %v7451_v47 = vsel %vm1112_vm1, %v1101_v52, %v1102_v11 }
 0x185   : > { %9315 = vst [vmem:[#allocation53_spill] sm:$0xff] %v7451_v47  ;;  %v952_v59 = vpop.f32.mrf.mxu0  ;;  %v1040_v20 = vpop.f32.mrf.mxu1 }
 0x186   : > { %v1081_v17 = vrot.slane %v952_v59, 5  ;;  %v1103_v7 = vrot.slane %v1040_v20, 5 }
 0x187   : > { %v5518_v30 = vpop.f32.mrf.mxu0  ;;  %v5562_v31 = vpop.f32.mrf.mxu1 }
 0x188   : > { %v7458_v61 = vsel %vm1112_vm1, %v1080_v29, %v1081_v17  ;;  %v7462_v21 = vsel %vm1112_vm1, %v1102_v11, %v1103_v7  ;;  %v6447_v30 = vld [vmem:[%s9179_s4 + $0x170] sm:$0xff]  }
 0x189   : > { %9316 = vst [vmem:[#allocation54_spill] sm:$0xff] %v7462_v21  ;;  %v957_v52 = vpop.f32.mrf.mxu0  ;;  %v1045_v1 = vpop.f32.mrf.mxu1  ;;  %5772 = vmatmul.mubr.bf16.gmra.mxu0 %v7138_v60  ;;  %5792 = vmatmul.mubr.bf16.vlgmr.msra.gmra.mxu1 %v6815_v26 }
 0x18a   : > { %v1082_v59 = vrot.slane %v957_v52, 5  ;;  %v1104_v20 = vrot.slane %v1045_v1, 5  ;;  %5976 = vmatpush3.bf16.msra.mxu1 %v6445_v12  ;;  %5795 = vmatprep.mubr.msk.bf16.mxu1 %vm6487_vm0, %v9294_v19 }
 0x18b   : > { %v5521_v31 = vpop.f32.mrf.mxu0  ;;  %v5565_v29 = vpop.f32.mrf.mxu1  ;;  %5891 = vmatprep.mubr.msk.bf16.mxu0 %vm6487_vm0, %v9294_v19  ;;  %5977 = vmatprep.subr.bf16.mxu1 %v9294_v19 }
 0x18c   : > { %v7476_v11 = vsel %vm1112_vm1, %v1081_v17, %v1082_v59  ;;  %v7480_v12 = vsel %vm1112_vm1, %v1103_v7, %v1104_v20  ;;  %v6446_v31 = vld [vmem:[%s9179_s4 + $0x1b8] sm:$0xff]  }
 0x18d   : > { %9317 = vst [vmem:[#allocation55_spill] sm:$0xff] %v7480_v12  ;;  %v960_v52 = vpop.f32.mrf.mxu0  ;;  %v1048_v1 = vpop.f32.mrf.mxu1 }
 0x18e   : > { %v1083_v9 = vrot.slane %v960_v52, 5  ;;  %v1105_v55 = vrot.slane %v1048_v1, 5  ;;  %5978 = vmatpush3.bf16.msra.mxu1 %v6447_v30  ;;  %v6449_v52 = vld [vmem:[%s9179_s4 + $0x168] sm:$0xff]  }
 0x18f   : > { %v5522_v29 = vpop.f32.mrf.mxu0  ;;  %v5566_v21 = vpop.f32.mrf.mxu1  ;;  %5979 = vmatprep.subr.bf16.mxu1 %v9294_v19 }
 0x190   : > { %v7488_v17 = vsel %vm1112_vm1, %v1082_v59, %v1083_v9  ;;  %v7492_v7 = vsel %vm1112_vm1, %v1104_v20, %v1105_v55  ;;  %v6448_v59 = vld [vmem:[%s9179_s4 + $0x1b0] sm:$0xff]  }
 0x191   : > { %9318 = vst [vmem:[#allocation56_spill] sm:$0xff] %v7492_v7  ;;  %v965_v1 = vpop.f32.mrf.mxu0  ;;  %v1053_v12 = vpop.f32.mrf.mxu1  ;;  %5796 = vmatmul.mubr.bf16.gmra.mxu1 %v6853_v63  ;;  %5892 = vmatmul.mubr.bf16.vlgmr.msra.gmra.mxu0 %v6815_v26 }
 0x192   : > { %v1084_v21 = vrot.slane %v965_v1, 5  ;;  %v1106_v30 = vrot.slane %v1053_v12, 5  ;;  %6076 = vmatpush3.bf16.msra.mxu0 %v6446_v31  ;;  %5799 = vmatprep.mubr.msk.bf16.mxu1 %vm6487_vm0, %v9294_v19  ;;  %v6451_v31 = vld [vmem:[%s9179_s4 + $0x160] sm:$0xff]  }
 0x193   : > { %v5525_v20 = vpop.f32.mrf.mxu0  ;;  %v5569_v29 = vpop.f32.mrf.mxu1  ;;  %5895 = vmatprep.mubr.msk.bf16.mxu0 %vm6487_vm0, %v9294_v19  ;;  %6077 = vmatprep.subr.bf16.mxu0 %v9294_v19 }
 0x194   : > { %v7509_v7 = vsel %vm1112_vm1, %v1083_v9, %v1084_v21  ;;  %v7513_v12 = vsel %vm1112_vm1, %v1105_v55, %v1106_v30  ;;  %5980 = vmatpush3.bf16.msra.mxu1 %v6449_v52  ;;  %v6450_v55 = vld [vmem:[%s9179_s4 + $0x1a8] sm:$0xff]  }
 0x195   : > { %9319 = vst [vmem:[#allocation57_spill] sm:$0xff] %v7513_v12  ;;  %v968_v1 = vpop.f32.mrf.mxu0  ;;  %v1056_v20 = vpop.f32.mrf.mxu1  ;;  %5981 = vmatprep.subr.bf16.mxu1 %v9294_v19 }
 0x196   : > { %v1085_v29 = vrot.slane %v968_v1, 5  ;;  %v1107_v26 = vrot.slane %v1056_v20, 5  ;;  %6078 = vmatpush3.bf16.msra.mxu0 %v6448_v59 }
 0x197   : > { %v5526_v47 = vpop.f32.mrf.mxu0  ;;  %v5570_v60 = vpop.f32.mrf.mxu1  ;;  %6079 = vmatprep.subr.bf16.mxu0 %v9294_v19 }
 0x198   : > { %v7525_v9 = vsel %vm1112_vm1, %v1084_v21, %v1085_v29  ;;  %v7529_v52 = vsel %vm1112_vm1, %v1106_v30, %v1107_v26  ;;  %5982 = vmatpush3.bf16.msra.mxu1 %v6451_v31  ;;  %v6453_v47 = vld [vmem:[%s9179_s4 + $0x158] sm:$0xff]   ;;  %v6452_v31 = vld [vmem:[%s9179_s4 + $0x1a0] sm:$0xff]  }
 0x199   : > { %9320 = vst [vmem:[#allocation58_spill] sm:$0xff] %v7529_v52  ;;  %v973_v60 = vpop.f32.mrf.mxu0  ;;  %v1061_v59 = vpop.f32.mrf.mxu1  ;;  %5800 = vmatmul.mubr.bf16.gmra.mxu1 %v6901_v46  ;;  %5896 = vmatmul.mubr.bf16.gmra.mxu0 %v6853_v63 }
 0x19a   : > { %v1086_v1 = vrot.slane %v973_v60, 5  ;;  %v1108_v20 = vrot.slane %v1061_v59, 5  ;;  %5803 = vmatprep.mubr.msk.bf16.mxu1 %vm6487_vm0, %v9294_v19  ;;  %5899 = vmatprep.mubr.msk.bf16.mxu0 %vm6487_vm0, %v9294_v19 }
 0x19b   : > { %v5529_v21 = vpop.f32.mrf.mxu0  ;;  %v5573_v30 = vpop.f32.mrf.mxu1  ;;  %6080 = vmatpush3.bf16.msra.mxu0 %v6450_v55  ;;  %5983 = vmatprep.subr.bf16.mxu1 %v9294_v19  ;;  %v6455_v55 = vld [vmem:[%s9179_s4 + $0x150] sm:$0xff]  }
 0x19c   : > { %v7546_v52 = vsel %vm1112_vm1, %v1085_v29, %v1086_v1  ;;  %v7550_v60 = vsel %vm1112_vm1, %v1107_v26, %v1108_v20  ;;  %6081 = vmatprep.subr.bf16.mxu0 %v9294_v19  ;;  %5984 = vmatpush3.bf16.msra.mxu1 %v6453_v47  ;;  %v6454_v26 = vld [vmem:[%s9179_s4 + $0x198] sm:$0xff]  }
 0x19d   : > { %9321 = vst [vmem:[#allocation59_spill] sm:$0xff] %v7550_v60  ;;  %v976_v59 = vpop.f32.mrf.mxu0  ;;  %v1064_v21 = vpop.f32.mrf.mxu1  ;;  %5985 = vmatprep.subr.bf16.mxu1 %v9294_v19 }
 0x19e   : > { %v1087_v30 = vrot.slane %v976_v59, 5  ;;  %v1109_v12 = vrot.slane %v1064_v21, 5 }
 0x19f   : > { %v5530_v63 = vpop.f32.mrf.mxu0  ;;  %v5574_v29 = vpop.f32.mrf.mxu1  ;;  %6082 = vmatpush3.bf16.msra.mxu0 %v6452_v31 }
 0x1a0   : > { %v7562_v47 = vsel %vm1112_vm1, %v1086_v1, %v1087_v30  ;;  %v7566_v60 = vsel %vm1112_vm1, %v1108_v20, %v1109_v12  ;;  %v7572_v59 = vsel %vm1112_vm1, %v1109_v12, %v9323_v2  ;;  %6083 = vmatprep.subr.bf16.mxu0 %v9294_v19  ;;  %5986 = vmatpush3.bf16.msra.mxu1 %v6455_v55  ;;  %v6457_v63 = vld [vmem:[%s9179_s4 + $0x148] sm:$0xff]   ;;  %v6456_v12 = vld [vmem:[%s9179_s4 + $0x190] sm:$0xff]  }
 0x1a1   : > { %9322 = vst [vmem:[#allocation60_spill] sm:$0xff] %v7566_v60  ;;  %9324 = vst [vmem:[#allocation61_spill] sm:$0xff] %v7572_v59  ;;  %v981_v31 = vpop.f32.mrf.mxu0  ;;  %v7578_v1 = vpop.f32.mrf.mxu1  ;;  %5804 = vmatmul.mubr.bf16.gmra.mxu1 %v6949_v41  ;;  %5900 = vmatmul.mubr.bf16.gmra.mxu0 %v6901_v46  ;;  %v9326_v60 = vrot.slane %v7304_v23, 5 }
 0x1a2   : > { %9325 = vst [vmem:[#allocation62_spill] sm:$0xff] %v7578_v1  ;;  %v1088_v20 = vrot.slane %v981_v31, 5  ;;  %5807 = vmatprep.mubr.msk.bf16.mxu1 %vm6487_vm0, %v9294_v19  ;;  %5903 = vmatprep.mubr.msk.bf16.mxu0 %vm6487_vm0, %v9294_v19  ;;  %v9236_v31 = vrot.slane %v7578_v1, 6 }
 0x1a3   : > { %v5533_v13 = vpop.f32.mrf.mxu0  ;;  %v5593_v2 = vpop.f32.mrf.mxu1  ;;  %6084 = vmatpush3.bf16.msra.mxu0 %v6454_v26  ;;  %5987 = vmatprep.subr.bf16.mxu1 %v9294_v19  ;;  %v6459_v26 = vld [vmem:[%s9179_s4 + $0x140] sm:$0xff]  }
 0x1a4   : > { %v7592_v55 = vsel %vm1112_vm1, %v1087_v30, %v1088_v20  ;;  %6085 = vmatprep.subr.bf16.mxu0 %v9294_v19  ;;  %5988 = vmatpush3.bf16.msra.mxu1 %v6457_v63  ;;  %v6458_v63 = vld [vmem:[%s9179_s4 + $0x188] sm:$0xff]  }
 0x1a5   : > { %v984_v21 = vpop.f32.mrf.mxu0  ;;  %v1257_v29 = vpop.f32.mrf.mxu1  ;;  %5989 = vmatprep.subr.bf16.mxu1 %v9294_v19 }
 0x1a6   : > { %v1089_v13 = vrot.slane %v984_v21, 5  ;;  %v1422_v2 = vrot.slane %v1257_v29, 6 }
 0x1a7   : > { %v5534_v59 = vpop.f32.mrf.mxu0  ;;  %v5594_v30 = vpop.f32.mrf.mxu1  ;;  %6086 = vmatpush3.bf16.msra.mxu0 %v6456_v12 }
 0x1a8   : > { %v7608_v46 = vsel %vm1112_vm1, %v1089_v13, %v9326_v60  ;;  %v7612_v36 = vsel %vm1112_vm1, %v1088_v20, %v1089_v13  ;;  %v1504_v59 = vsel %vm1463_vm2, %v9236_v31, %v1422_v2  ;;  %6087 = vmatprep.subr.bf16.mxu0 %v9294_v19  ;;  %5990 = vmatpush3.bf16.msra.mxu1 %v6459_v26 }
 0x1a9   : > { %v1509_v12 = vadd.f32 %v1504_v59, %v7321_v39  ;;  %v1262_v21 = vpop.f32.mrf.mxu1  ;;  %v7620_v23 = vpop.f32.mrf.mxu0  ;;  %5808 = vmatmul.mubr.bf16.gmra.mxu1 %v6997_v56  ;;  %5904 = vmatmul.mubr.bf16.gmra.mxu0 %v6949_v41  ;;  %v6460_v39 = vld [vmem:[%s9179_s4 + $0x180] sm:$0xff]  }
 0x1aa   : > { %9327 = vst [vmem:[#allocation63_spill] sm:$0xff] %v7620_v23  ;;  %v1423_v60 = vrot.slane %v1262_v21, 6  ;;  %5811 = vmatprep.mubr.msk.bf16.mxu1 %vm6487_vm0, %v9294_v19  ;;  %5907 = vmatprep.mubr.msk.bf16.mxu0 %vm6487_vm0, %v9294_v19  ;;  %v9240_v21 = vrot.slane %v7620_v23, 7 }
 0x1ab   : > { %v5597_v20 = vpop.f32.mrf.mxu1  ;;  %v5693_v29 = vpop.f32.mrf.mxu0  ;;  %6088 = vmatpush3.bf16.msra.mxu0 %v6458_v63  ;;  %6175 = vmatprep.subr.bf16.mxu1 %v9294_v19 }
 0x1ac   : > { %v1503_v26 = vsel %vm1463_vm2, %v1422_v2, %v1423_v60  ;;  %6089 = vmatprep.subr.bf16.mxu0 %v9294_v19 }
 0x1ad   : > { %v1510_v13 = vadd.f32 %v1503_v26, %v7337_v51  ;;  %v1265_v30 = vpop.f32.mrf.mxu1  ;;  %v1650_v59 = vpop.f32.mrf.mxu0 }
 0x1ae   : > { %v1424_v63 = vrot.slane %v1265_v30, 6  ;;  %v1815_v20 = vrot.slane %v1650_v59, 7 }
 0x1af   : > { %v5598_v29 = vpop.f32.mrf.mxu1  ;;  %v5694_v31 = vpop.f32.mrf.mxu0  ;;  %6090 = vmatpush3.bf16.msra.mxu0 %v6460_v39 }
 0x1b0   : > { %v1502_v41 = vsel %vm1463_vm2, %v1423_v60, %v1424_v63  ;;  %v1897_v2 = vsel %vm1856_vm3, %v9240_v21, %v1815_v20  ;;  %6275 = vmatprep.subr.bf16.mxu0 %v9294_v19 }
 0x1b1   : > { %v1511_v51 = vadd.f32 %v1502_v41, %v7345_v54  ;;  %v1270_v26 = vpop.f32.mrf.mxu1  ;;  %v1655_v1 = vpop.f32.mrf.mxu0  ;;  %5812 = vmatmul.mubr.bf16.gmra.mxu1 %v7031_v33  ;;  %5908 = vmatmul.mubr.bf16.gmra.mxu0 %v6997_v56  ;;  %v7648_v31 = vadd.f32 %v1897_v2, %v1509_v12 }
 0x1b2   : > { %v1425_v39 = vrot.slane %v1270_v26, 6  ;;  %v1816_v30 = vrot.slane %v1655_v1, 7  ;;  %5815 = vmatprep.mubr.msk.bf16.mxu1 %vm6487_vm0, %v9294_v19  ;;  %5911 = vmatprep.mubr.msk.bf16.mxu0 %vm6487_vm0, %v9294_v19 }
 0x1b3   : > { %9328 = vst [vmem:[#allocation64_spill] sm:$0xff] %v7648_v31  ;;  %v5601_v60 = vpop.f32.mrf.mxu1  ;;  %v5697_v59 = vpop.f32.mrf.mxu0 }
 0x1b4   : > { %v1501_v54 = vsel %vm1463_vm2, %v1424_v63, %v1425_v39  ;;  %v1896_v41 = vsel %vm1856_vm3, %v1815_v20, %v1816_v30 }
 0x1b5   : > { %v1512_v29 = vadd.f32 %v1501_v54, %v7359_v48  ;;  %v1273_v12 = vpop.f32.mrf.mxu1  ;;  %v1658_v2 = vpop.f32.mrf.mxu0  ;;  %v7659_v26 = vadd.f32 %v1896_v41, %v1510_v13 }
 0x1b6   : > { %v1426_v1 = vrot.slane %v1273_v12, 6  ;;  %v1817_v21 = vrot.slane %v1658_v2, 7 }
 0x1b7   : > { %v5602_v31 = vpop.f32.mrf.mxu1  ;;  %v5698_v56 = vpop.f32.mrf.mxu0 }
 0x1b8   : > { %v1500_v60 = vsel %vm1463_vm2, %v1425_v39, %v1426_v1  ;;  %v1895_v59 = vsel %vm1856_vm3, %v1816_v30, %v1817_v21 }
 0x1b9   : > { %v1513_v63 = vadd.f32 %v1500_v60, %v7367_v5  ;;  %v1278_v23 = vpop.f32.mrf.mxu1  ;;  %v1663_v20 = vpop.f32.mrf.mxu0  ;;  %5816 = vmatmul.mubr.bf16.gmra.mxu1 %v7060_v45  ;;  %5912 = vmatmul.mubr.bf16.gmra.mxu0 %v7031_v33  ;;  %v7668_v48 = vadd.f32 %v1895_v59, %v1511_v51 }
 0x1ba   : > { %v1427_v13 = vrot.slane %v1278_v23, 6  ;;  %v1818_v54 = vrot.slane %v1663_v20, 7  ;;  %5819 = vmatprep.mubr.msk.bf16.mxu1 %vm6487_vm0, %v9294_v19  ;;  %5915 = vmatprep.mubr.msk.bf16.mxu0 %vm6487_vm0, %v9294_v19 }
 0x1bb   : > { %v5605_v56 = vpop.f32.mrf.mxu1  ;;  %v5701_v31 = vpop.f32.mrf.mxu0 }
 0x1bc   : > { %v1499_v5 = vsel %vm1463_vm2, %v1426_v1, %v1427_v13  ;;  %v1894_v39 = vsel %vm1856_vm3, %v1817_v21, %v1818_v54 }
 0x1bd   : > { %v1514_v30 = vadd.f32 %v1499_v5, %v7381_v16  ;;  %v1281_v51 = vpop.f32.mrf.mxu1  ;;  %v1666_v41 = vpop.f32.mrf.mxu0  ;;  %v7679_v23 = vadd.f32 %v1894_v39, %v1512_v29 }
 0x1be   : > { %v1428_v12 = vrot.slane %v1281_v51, 6  ;;  %v1819_v2 = vrot.slane %v1666_v41, 7 }
 0x1bf   : > { %v5606_v60 = vpop.f32.mrf.mxu1  ;;  %v5702_v59 = vpop.f32.mrf.mxu0 }
 0x1c0   : > { %v1498_v20 = vsel %vm1463_vm2, %v1427_v13, %v1428_v12  ;;  %v1893_v56 = vsel %vm1856_vm3, %v1818_v54, %v1819_v2 }
 0x1c1   : > { %v1515_v1 = vadd.f32 %v1498_v20, %v7389_v34  ;;  %v1286_v31 = vpop.f32.mrf.mxu1  ;;  %v1671_v21 = vpop.f32.mrf.mxu0  ;;  %5820 = vmatmul.mubr.bf16.gmra.mxu1 %v7084_v43  ;;  %5916 = vmatmul.mubr.bf16.gmra.mxu0 %v7060_v45  ;;  %v7688_v16 = vadd.f32 %v1893_v56, %v1513_v63 }
 0x1c2   : > { %v1429_v29 = vrot.slane %v1286_v31, 6  ;;  %v1820_v5 = vrot.slane %v1671_v21, 7  ;;  %5823 = vmatprep.mubr.msk.bf16.mxu1 %vm6487_vm0, %v9294_v19  ;;  %5919 = vmatprep.mubr.msk.bf16.mxu0 %vm6487_vm0, %v9294_v19 }
 0x1c3   : > { %v5609_v13 = vpop.f32.mrf.mxu1  ;;  %v5705_v54 = vpop.f32.mrf.mxu0 }
 0x1c4   : > { %v1497_v34 = vsel %vm1463_vm2, %v1428_v12, %v1429_v29  ;;  %v1892_v39 = vsel %vm1856_vm3, %v1819_v2, %v1820_v5 }
 0x1c5   : > { %v1516_v51 = vadd.f32 %v1497_v34, %v7403_v40  ;;  %v1289_v63 = vpop.f32.mrf.mxu1  ;;  %v1674_v41 = vpop.f32.mrf.mxu0  ;;  %v7699_v60 = vadd.f32 %v1892_v39, %v1514_v30 }
 0x1c6   : > { %v1430_v59 = vrot.slane %v1289_v63, 6  ;;  %v1821_v20 = vrot.slane %v1674_v41, 7 }
 0x1c7   : > { %v5610_v56 = vpop.f32.mrf.mxu1  ;;  %v5706_v31 = vpop.f32.mrf.mxu0 }
 0x1c8   : > { %v1496_v21 = vsel %vm1463_vm2, %v1429_v29, %v1430_v59  ;;  %v1891_v13 = vsel %vm1856_vm3, %v1820_v5, %v1821_v20 }
 0x1c9   : > { %v1517_v12 = vadd.f32 %v1496_v21, %v7411_v3  ;;  %v1294_v54 = vpop.f32.mrf.mxu1  ;;  %v1679_v2 = vpop.f32.mrf.mxu0  ;;  %5824 = vmatmul.mubr.bf16.gmra.mxu1 %v7102_v10  ;;  %5920 = vmatmul.mubr.bf16.gmra.mxu0 %v7084_v43  ;;  %v7708_v40 = vadd.f32 %v1891_v13, %v1515_v1 }
 0x1ca   : > { %v1431_v30 = vrot.slane %v1294_v54, 6  ;;  %v1822_v34 = vrot.slane %v1679_v2, 7  ;;  %5827 = vmatprep.mubr.msk.bf16.mxu1 %vm6487_vm0, %v9294_v19  ;;  %5923 = vmatprep.mubr.msk.bf16.mxu0 %vm6487_vm0, %v9294_v19 }
 0x1cb   : > { %v5613_v29 = vpop.f32.mrf.mxu1  ;;  %v5709_v5 = vpop.f32.mrf.mxu0 }
 0x1cc   : > { %v1495_v3 = vsel %vm1463_vm2, %v1430_v59, %v1431_v30  ;;  %v1890_v39 = vsel %vm1856_vm3, %v1821_v20, %v1822_v34 }
 0x1cd   : > { %v1518_v63 = vadd.f32 %v1495_v3, %v7425_v35  ;;  %v1297_v1 = vpop.f32.mrf.mxu1  ;;  %v1682_v41 = vpop.f32.mrf.mxu0  ;;  %v7719_v56 = vadd.f32 %v1890_v39, %v1516_v51 }
 0x1ce   : > { %v1432_v31 = vrot.slane %v1297_v1, 6  ;;  %v1823_v21 = vrot.slane %v1682_v41, 7 }
 0x1cf   : > { %v5614_v13 = vpop.f32.mrf.mxu1  ;;  %v5710_v54 = vpop.f32.mrf.mxu0 }
 0x1d0   : > { %v1494_v2 = vsel %vm1463_vm2, %v1431_v30, %v1432_v31  ;;  %v1889_v29 = vsel %vm1856_vm3, %v1822_v34, %v1823_v21 }
 0x1d1   : > { %v1519_v59 = vadd.f32 %v1494_v2, %v7433_v62  ;;  %v1302_v5 = vpop.f32.mrf.mxu1  ;;  %v1687_v20 = vpop.f32.mrf.mxu0  ;;  %5828 = vmatmul.mubr.bf16.gmra.mxu1 %v7128_v6  ;;  %5924 = vmatmul.mubr.bf16.gmra.mxu0 %v7102_v10  ;;  %v7728_v35 = vadd.f32 %v1889_v29, %v1517_v12 }
 0x1d2   : > { %v1433_v51 = vrot.slane %v1302_v5, 6  ;;  %v1824_v3 = vrot.slane %v1687_v20, 7  ;;  %5831 = vmatprep.mubr.msk.bf16.mxu1 %vm6487_vm0, %v9294_v19  ;;  %5927 = vmatprep.mubr.msk.bf16.mxu0 %vm6487_vm0, %v9294_v19 }
 0x1d3   : > { %v5617_v30 = vpop.f32.mrf.mxu1  ;;  %v5713_v34 = vpop.f32.mrf.mxu0 }
 0x1d4   : > { %v1493_v62 = vsel %vm1463_vm2, %v1432_v31, %v1433_v51  ;;  %v1888_v39 = vsel %vm1856_vm3, %v1823_v21, %v1824_v3 }
 0x1d5   : > { %v1520_v1 = vadd.f32 %v1493_v62, %v7447_v58  ;;  %v1305_v12 = vpop.f32.mrf.mxu1  ;;  %v1690_v41 = vpop.f32.mrf.mxu0  ;;  %v7739_v13 = vadd.f32 %v1888_v39, %v1518_v63 }
 0x1d6   : > { %v1434_v54 = vrot.slane %v1305_v12, 6  ;;  %v1825_v2 = vrot.slane %v1690_v41, 7 }
 0x1d7   : > { %v5618_v29 = vpop.f32.mrf.mxu1  ;;  %v5714_v5 = vpop.f32.mrf.mxu0 }
 0x1d8   : > { %v1492_v20 = vsel %vm1463_vm2, %v1433_v51, %v1434_v54  ;;  %v1887_v30 = vsel %vm1856_vm3, %v1824_v3, %v1825_v2 }
 0x1d9   : > { %v1521_v31 = vadd.f32 %v1492_v20, %v7458_v61  ;;  %v1310_v34 = vpop.f32.mrf.mxu1  ;;  %v1695_v21 = vpop.f32.mrf.mxu0  ;;  %5832 = vmatmul.mubr.bf16.gmra.mxu1 %v7152_v22  ;;  %5928 = vmatmul.mubr.bf16.gmra.mxu0 %v7128_v6  ;;  %v7748_v58 = vadd.f32 %v1887_v30, %v1519_v59 }
 0x1da   : > { %v1435_v63 = vrot.slane %v1310_v34, 6  ;;  %v1826_v62 = vrot.slane %v1695_v21, 7  ;;  %5835 = vmatprep.mubr.msk.bf16.mxu1 %vm6487_vm0, %v9294_v19  ;;  %5931 = vmatprep.mubr.msk.bf16.mxu0 %vm6487_vm0, %v9294_v19 }
 0x1db   : > { %v5621_v51 = vpop.f32.mrf.mxu1  ;;  %v5717_v3 = vpop.f32.mrf.mxu0 }
 0x1dc   : > { %v1491_v61 = vsel %vm1463_vm2, %v1434_v54, %v1435_v63  ;;  %v1886_v39 = vsel %vm1856_vm3, %v1825_v2, %v1826_v62 }
 0x1dd   : > { %v1522_v12 = vadd.f32 %v1491_v61, %v7476_v11  ;;  %v1313_v59 = vpop.f32.mrf.mxu1  ;;  %v1698_v41 = vpop.f32.mrf.mxu0  ;;  %v7759_v29 = vadd.f32 %v1886_v39, %v1520_v1 }
 0x1de   : > { %v1436_v5 = vrot.slane %v1313_v59, 6  ;;  %v1827_v20 = vrot.slane %v1698_v41, 7 }
 0x1df   : > { %v5622_v30 = vpop.f32.mrf.mxu1  ;;  %v5718_v34 = vpop.f32.mrf.mxu0 }
 0x1e0   : > { %v1490_v21 = vsel %vm1463_vm2, %v1435_v63, %v1436_v5  ;;  %v1885_v51 = vsel %vm1856_vm3, %v1826_v62, %v1827_v20 }
 0x1e1   : > { %v1523_v54 = vadd.f32 %v1490_v21, %v7488_v17  ;;  %v1318_v3 = vpop.f32.mrf.mxu1  ;;  %v1703_v2 = vpop.f32.mrf.mxu0  ;;  %5836 = vmatmul.mubr.bf16.gmra.mxu1 %v6813_v25  ;;  %5932 = vmatmul.mubr.bf16.gmra.mxu0 %v7152_v22  ;;  %v7768_v11 = vadd.f32 %v1885_v51, %v1521_v31 }
 0x1e2   : > { %v1437_v1 = vrot.slane %v1318_v3, 6  ;;  %v1828_v61 = vrot.slane %v1703_v2, 7  ;;  %5839 = vmatprep.mubr.msk.bf16.mxu1 %vm6487_vm0, %v9294_v19  ;;  %5935 = vmatprep.mubr.msk.bf16.mxu0 %vm6487_vm0, %v9294_v19 }
 0x1e3   : > { %v5625_v63 = vpop.f32.mrf.mxu1  ;;  %v5721_v62 = vpop.f32.mrf.mxu0 }
 0x1e4   : > { %v1489_v17 = vsel %vm1463_vm2, %v1436_v5, %v1437_v1  ;;  %v1884_v39 = vsel %vm1856_vm3, %v1827_v20, %v1828_v61 }
 0x1e5   : > { %v1524_v59 = vadd.f32 %v1489_v17, %v7509_v7  ;;  %v1321_v31 = vpop.f32.mrf.mxu1  ;;  %v1706_v41 = vpop.f32.mrf.mxu0  ;;  %v7779_v30 = vadd.f32 %v1884_v39, %v1522_v12 }
 0x1e6   : > { %v1438_v34 = vrot.slane %v1321_v31, 6  ;;  %v1829_v21 = vrot.slane %v1706_v41, 7 }
 0x1e7   : > { %v5626_v51 = vpop.f32.mrf.mxu1  ;;  %v5722_v3 = vpop.f32.mrf.mxu0 }
 0x1e8   : > { %v1488_v2 = vsel %vm1463_vm2, %v1437_v1, %v1438_v34  ;;  %v1883_v63 = vsel %vm1856_vm3, %v1828_v61, %v1829_v21 }
 0x1e9   : > { %v1525_v5 = vadd.f32 %v1488_v2, %v7525_v9  ;;  %v1326_v62 = vpop.f32.mrf.mxu1  ;;  %v1711_v20 = vpop.f32.mrf.mxu0  ;;  %5840 = vmatmul.mubr.bf16.gmra.mxu1 %v6855_v0  ;;  %5936 = vmatmul.mubr.bf16.gmra.mxu0 %v6813_v25  ;;  %v7788_v7 = vadd.f32 %v1883_v63, %v1523_v54 }
 0x1ea   : > { %v1439_v12 = vrot.slane %v1326_v62, 6  ;;  %v1830_v17 = vrot.slane %v1711_v20, 7  ;;  %5843 = vmatprep.mubr.msk.bf16.mxu1 %vm6487_vm0, %v9294_v19  ;;  %5939 = vmatprep.mubr.msk.bf16.mxu0 %vm6487_vm0, %v9294_v19 }
 0x1eb   : > { %v5629_v1 = vpop.f32.mrf.mxu1  ;;  %v5725_v61 = vpop.f32.mrf.mxu0 }
 0x1ec   : > { %v1487_v9 = vsel %vm1463_vm2, %v1438_v34, %v1439_v12  ;;  %v1882_v39 = vsel %vm1856_vm3, %v1829_v21, %v1830_v17 }
 0x1ed   : > { %v1526_v31 = vadd.f32 %v1487_v9, %v7546_v52  ;;  %v1329_v54 = vpop.f32.mrf.mxu1  ;;  %v1714_v41 = vpop.f32.mrf.mxu0  ;;  %v7799_v51 = vadd.f32 %v1882_v39, %v1524_v59 }
 0x1ee   : > { %v1440_v3 = vrot.slane %v1329_v54, 6  ;;  %v1831_v2 = vrot.slane %v1714_v41, 7 }
 0x1ef   : > { %v5630_v63 = vpop.f32.mrf.mxu1  ;;  %v5726_v62 = vpop.f32.mrf.mxu0 }
 0x1f0   : > { %v1486_v20 = vsel %vm1463_vm2, %v1439_v12, %v1440_v3  ;;  %v1881_v1 = vsel %vm1856_vm3, %v1830_v17, %v1831_v2 }
 0x1f1   : > { %v1527_v34 = vadd.f32 %v1486_v20, %v7562_v47  ;;  %v1334_v61 = vpop.f32.mrf.mxu1  ;;  %v1719_v21 = vpop.f32.mrf.mxu0  ;;  %5844 = vmatmul.mubr.bf16.gmra.mxu1 %v6903_v49  ;;  %5940 = vmatmul.mubr.bf16.gmra.mxu0 %v6855_v0  ;;  %v7808_v52 = vadd.f32 %v1881_v1, %v1525_v5 }
 0x1f2   : > { %v1441_v59 = vrot.slane %v1334_v61, 6  ;;  %v1832_v9 = vrot.slane %v1719_v21, 7  ;;  %5847 = vmatprep.mubr.msk.bf16.mxu1 %vm6487_vm0, %v9294_v19  ;;  %5943 = vmatprep.mubr.msk.bf16.mxu0 %vm6487_vm0, %v9294_v19 }
 0x1f3   : > { %v5633_v12 = vpop.f32.mrf.mxu1  ;;  %v5729_v17 = vpop.f32.mrf.mxu0 }
 0x1f4   : > { %v1485_v47 = vsel %vm1463_vm2, %v1440_v3, %v1441_v59  ;;  %v1880_v39 = vsel %vm1856_vm3, %v1831_v2, %v1832_v9 }
 0x1f5   : > { %v1528_v54 = vadd.f32 %v1485_v47, %v7592_v55  ;;  %v1337_v5 = vpop.f32.mrf.mxu1  ;;  %v1722_v41 = vpop.f32.mrf.mxu0  ;;  %v7819_v63 = vadd.f32 %v1880_v39, %v1526_v31 }
 0x1f6   : > { %v1442_v62 = vrot.slane %v1337_v5, 6  ;;  %v1833_v20 = vrot.slane %v1722_v41, 7 }
 0x1f7   : > { %v5634_v1 = vpop.f32.mrf.mxu1  ;;  %v5730_v61 = vpop.f32.mrf.mxu0 }
 0x1f8   : > { %v1484_v21 = vsel %vm1463_vm2, %v1441_v59, %v1442_v62  ;;  %v1879_v12 = vsel %vm1856_vm3, %v1832_v9, %v1833_v20 }
 0x1f9   : > { %v1529_v3 = vadd.f32 %v1484_v21, %v7612_v36  ;;  %v1342_v17 = vpop.f32.mrf.mxu1  ;;  %v1727_v2 = vpop.f32.mrf.mxu0  ;;  %5848 = vmatmul.mubr.bf16.gmra.mxu1 %v6951_v42  ;;  %5944 = vmatmul.mubr.bf16.gmra.mxu0 %v6903_v49  ;;  %v7828_v55 = vadd.f32 %v1879_v12, %v1527_v34 }
 0x1fa   : > { %v1443_v31 = vrot.slane %v1342_v17, 6  ;;  %v1834_v47 = vrot.slane %v1727_v2, 7  ;;  %5851 = vmatprep.mubr.msk.bf16.mxu1 %vm6487_vm0, %v9294_v19  ;;  %5947 = vmatprep.mubr.msk.bf16.mxu0 %vm6487_vm0, %v9294_v19 }
 0x1fb   : > { %v5637_v59 = vpop.f32.mrf.mxu1  ;;  %v5733_v9 = vpop.f32.mrf.mxu0 }
 0x1fc   : > { %v1483_v36 = vsel %vm1463_vm2, %v1442_v62, %v1443_v31  ;;  %v1878_v39 = vsel %vm1856_vm3, %v1833_v20, %v1834_v47 }
 0x1fd   : > { %v1530_v5 = vadd.f32 %v1483_v36, %v7608_v46  ;;  %v1345_v34 = vpop.f32.mrf.mxu1  ;;  %v1730_v41 = vpop.f32.mrf.mxu0  ;;  %v7839_v1 = vadd.f32 %v1878_v39, %v1528_v54 }
 0x1fe   : > { %v1444_v61 = vrot.slane %v1345_v34, 6  ;;  %v1835_v21 = vrot.slane %v1730_v41, 7 }
 0x1ff   : > { %v5638_v12 = vpop.f32.mrf.mxu1  ;;  %v5734_v17 = vpop.f32.mrf.mxu0 }
 0x200   : > { %v1482_v2 = vsel %vm1463_vm2, %v1443_v31, %v1444_v61  ;;  %v1877_v59 = vsel %vm1856_vm3, %v1834_v47, %v1835_v21 }
 0x201   : > { %v1531_v62 = vadd.f32 %v1482_v2, %v7327_v4  ;;  %v1350_v9 = vpop.f32.mrf.mxu1  ;;  %v1735_v20 = vpop.f32.mrf.mxu0  ;;  %5852 = vmatmul.mubr.bf16.gmra.mxu1 %v6999_v57  ;;  %5948 = vmatmul.mubr.bf16.gmra.mxu0 %v6951_v42  ;;  %v7848_v46 = vadd.f32 %v1877_v59, %v1529_v3 }
 0x202   : > { %v1445_v54 = vrot.slane %v1350_v9, 6  ;;  %v1836_v36 = vrot.slane %v1735_v20, 7  ;;  %5855 = vmatprep.mubr.msk.bf16.mxu1 %vm6487_vm0, %v9294_v19  ;;  %5951 = vmatprep.mubr.msk.bf16.mxu0 %vm6487_vm0, %v9294_v19 }
 0x203   : > { %v5641_v31 = vpop.f32.mrf.mxu1  ;;  %v5737_v47 = vpop.f32.mrf.mxu0 }
 0x204   : > { %v1481_v4 = vsel %vm1463_vm2, %v1444_v61, %v1445_v54  ;;  %v1876_v39 = vsel %vm1856_vm3, %v1835_v21, %v1836_v36 }
 0x205   : > { %v1532_v34 = vadd.f32 %v1481_v4, %v7341_v15  ;;  %v1353_v3 = vpop.f32.mrf.mxu1  ;;  %v1738_v41 = vpop.f32.mrf.mxu0  ;;  %v7859_v12 = vadd.f32 %v1876_v39, %v1530_v5 }
 0x206   : > { %v1446_v17 = vrot.slane %v1353_v3, 6  ;;  %v1837_v2 = vrot.slane %v1738_v41, 7 }
 0x207   : > { %v5642_v59 = vpop.f32.mrf.mxu1  ;;  %v5738_v9 = vpop.f32.mrf.mxu0 }
 0x208   : > { %v1480_v20 = vsel %vm1463_vm2, %v1445_v54, %v1446_v17  ;;  %v1875_v31 = vsel %vm1856_vm3, %v1836_v36, %v1837_v2 }
 0x209   : > { %v1533_v61 = vadd.f32 %v1480_v20, %v7349_v14  ;;  %v1358_v47 = vpop.f32.mrf.mxu1  ;;  %v1743_v21 = vpop.f32.mrf.mxu0  ;;  %5856 = vmatmul.mubr.bf16.gmra.mxu1 %v7033_v27  ;;  %5952 = vmatmul.mubr.bf16.gmra.mxu0 %v6999_v57  ;;  %v7868_v15 = vadd.f32 %v1875_v31, %v1531_v62 }
 0x20a   : > { %v1447_v5 = vrot.slane %v1358_v47, 6  ;;  %v1838_v4 = vrot.slane %v1743_v21, 7  ;;  %5859 = vmatprep.mubr.msk.bf16.mxu1 %vm6487_vm0, %v9294_v19  ;;  %5955 = vmatprep.mubr.msk.bf16.mxu0 %vm6487_vm0, %v9294_v19 }
 0x20b   : > { %v5645_v54 = vpop.f32.mrf.mxu1  ;;  %v5741_v36 = vpop.f32.mrf.mxu0 }
 0x20c   : > { %v1479_v14 = vsel %vm1463_vm2, %v1446_v17, %v1447_v5  ;;  %v1874_v39 = vsel %vm1856_vm3, %v1837_v2, %v1838_v4 }
 0x20d   : > { %v1534_v3 = vadd.f32 %v1479_v14, %v7363_v38  ;;  %v1361_v62 = vpop.f32.mrf.mxu1  ;;  %v1746_v41 = vpop.f32.mrf.mxu0  ;;  %v7879_v59 = vadd.f32 %v1874_v39, %v1532_v34 }
 0x20e   : > { %v1448_v9 = vrot.slane %v1361_v62, 6  ;;  %v1839_v20 = vrot.slane %v1746_v41, 7 }
 0x20f   : > { %v5646_v31 = vpop.f32.mrf.mxu1  ;;  %v5742_v47 = vpop.f32.mrf.mxu0 }
 0x210   : > { %v1478_v21 = vsel %vm1463_vm2, %v1447_v5, %v1448_v9  ;;  %v1873_v54 = vsel %vm1856_vm3, %v1838_v4, %v1839_v20 }
 0x211   : > { %v1535_v17 = vadd.f32 %v1478_v21, %v7371_v8  ;;  %v1366_v36 = vpop.f32.mrf.mxu1  ;;  %v1751_v2 = vpop.f32.mrf.mxu0  ;;  %5860 = vmatmul.mubr.bf16.gmra.mxu1 %v7062_v53  ;;  %5956 = vmatmul.mubr.bf16.gmra.mxu0 %v7033_v27  ;;  %v7888_v38 = vadd.f32 %v1873_v54, %v1533_v61 }
 0x212   : > { %v1449_v34 = vrot.slane %v1366_v36, 6  ;;  %v1840_v14 = vrot.slane %v1751_v2, 7  ;;  %5863 = vmatprep.mubr.msk.bf16.mxu1 %vm6487_vm0, %v9294_v19  ;;  %5959 = vmatprep.mubr.msk.bf16.mxu0 %vm6487_vm0, %v9294_v19 }
 0x213   : > { %v5649_v5 = vpop.f32.mrf.mxu1  ;;  %v5745_v4 = vpop.f32.mrf.mxu0 }
 0x214   : > { %v1477_v8 = vsel %vm1463_vm2, %v1448_v9, %v1449_v34  ;;  %v1872_v39 = vsel %vm1856_vm3, %v1839_v20, %v1840_v14 }
 0x215   : > { %v1536_v62 = vadd.f32 %v1477_v8, %v7385_v18  ;;  %v1369_v61 = vpop.f32.mrf.mxu1  ;;  %v1754_v41 = vpop.f32.mrf.mxu0  ;;  %v7899_v31 = vadd.f32 %v1872_v39, %v1534_v3 }
 0x216   : > { %v1450_v47 = vrot.slane %v1369_v61, 6  ;;  %v1841_v21 = vrot.slane %v1754_v41, 7 }
 0x217   : > { %v5650_v54 = vpop.f32.mrf.mxu1  ;;  %v5746_v36 = vpop.f32.mrf.mxu0 }
 0x218   : > { %v1476_v2 = vsel %vm1463_vm2, %v1449_v34, %v1450_v47  ;;  %v1871_v5 = vsel %vm1856_vm3, %v1840_v14, %v1841_v21 }
 0x219   : > { %v1537_v9 = vadd.f32 %v1476_v2, %v7393_v44  ;;  %v1374_v4 = vpop.f32.mrf.mxu1  ;;  %v1759_v20 = vpop.f32.mrf.mxu0  ;;  %5864 = vmatmul.mubr.bf16.gmra.mxu1 %v7086_v32  ;;  %5960 = vmatmul.mubr.bf16.gmra.mxu0 %v7062_v53  ;;  %v7908_v18 = vadd.f32 %v1871_v5, %v1535_v17 }
 0x21a   : > { %v1451_v3 = vrot.slane %v1374_v4, 6  ;;  %v1842_v8 = vrot.slane %v1759_v20, 7  ;;  %5867 = vmatprep.mubr.msk.bf16.mxu1 %vm6487_vm0, %v9294_v19  ;;  %5963 = vmatprep.mubr.msk.bf16.mxu0 %vm6487_vm0, %v9294_v19 }
 0x21b   : > { %9329 = vst [vmem:[#allocation65_spill] sm:$0xff] %v7908_v18  ;;  %v5653_v34 = vpop.f32.mrf.mxu1  ;;  %v5749_v14 = vpop.f32.mrf.mxu0  ;;  %v9334_v18 = vld [vmem:[#allocation48_spill] sm:$0xff] }
 0x21c   : > { %v1475_v44 = vsel %vm1463_vm2, %v1450_v47, %v1451_v3  ;;  %v1870_v39 = vsel %vm1856_vm3, %v1841_v21, %v1842_v8 }
 0x21d   : > { %v1538_v61 = vadd.f32 %v1475_v44, %v7407_v37  ;;  %v1377_v17 = vpop.f32.mrf.mxu1  ;;  %v1762_v41 = vpop.f32.mrf.mxu0  ;;  %v7919_v54 = vadd.f32 %v1870_v39, %v1536_v62 }
 0x21e   : > { %v1452_v36 = vrot.slane %v1377_v17, 6  ;;  %v1843_v2 = vrot.slane %v1762_v41, 7  ;;  %v9332_v17 = vld [vmem:[#allocation51_spill] sm:$0xff] }
 0x21f   : > { %9330 = vst [vmem:[#allocation66_spill] sm:$0xff] %v7919_v54  ;;  %v5654_v5 = vpop.f32.mrf.mxu1  ;;  %v5750_v4 = vpop.f32.mrf.mxu0 }
 0x220   : > { %v1474_v20 = vsel %vm1463_vm2, %v1451_v3, %v1452_v36  ;;  %v1869_v34 = vsel %vm1856_vm3, %v1842_v8, %v1843_v2 }
 0x221   : > { %v1539_v47 = vadd.f32 %v1474_v20, %v7415_v28  ;;  %v1382_v14 = vpop.f32.mrf.mxu1  ;;  %v1767_v21 = vpop.f32.mrf.mxu0  ;;  %5868 = vmatmul.mubr.bf16.gmra.mxu1 %v7112_v24  ;;  %5964 = vmatmul.mubr.bf16.gmra.mxu0 %v7086_v32  ;;  %v7928_v37 = vadd.f32 %v1869_v34, %v1537_v9 }
 0x222   : > { %v1453_v62 = vrot.slane %v1382_v14, 6  ;;  %v1844_v44 = vrot.slane %v1767_v21, 7  ;;  %5871 = vmatprep.mubr.msk.bf16.mxu1 %vm6487_vm0, %v9294_v19  ;;  %5967 = vmatprep.mubr.msk.bf16.mxu0 %vm6487_vm0, %v9294_v19 }
 0x223   : > { %9331 = vst [vmem:[#allocation67_spill] sm:$0xff] %v7928_v37  ;;  %v5657_v3 = vpop.f32.mrf.mxu1  ;;  %v5753_v8 = vpop.f32.mrf.mxu0 }
 0x224   : > { %v1473_v28 = vsel %vm1463_vm2, %v1452_v36, %v1453_v62  ;;  %v1868_v39 = vsel %vm1856_vm3, %v1843_v2, %v1844_v44  ;;  %v9333_v36 = vld [vmem:[#allocation52_spill] sm:$0xff] }
 0x225   : > { %v1540_v41 = vadd.f32 %v1473_v28, %v9332_v17  ;;  %v1385_v9 = vpop.f32.mrf.mxu1  ;;  %v1770_v5 = vpop.f32.mrf.mxu0  ;;  %v7939_v4 = vadd.f32 %v1868_v39, %v1538_v61 }
 0x226   : > { %v1454_v20 = vrot.slane %v1385_v9, 6  ;;  %v1845_v34 = vrot.slane %v1770_v5, 7  ;;  %v9336_v5 = vld [vmem:[#allocation53_spill] sm:$0xff] }
 0x227   : > { %v5658_v14 = vpop.f32.mrf.mxu1  ;;  %v5754_v21 = vpop.f32.mrf.mxu0 }
 0x228   : > { %v1472_v3 = vsel %vm1463_vm2, %v1453_v62, %v1454_v20  ;;  %v1867_v8 = vsel %vm1856_vm3, %v1844_v44, %v1845_v34 }
 0x229   : > { %v1541_v37 = vadd.f32 %v1472_v3, %v9333_v36  ;;  %v1390_v54 = vpop.f32.mrf.mxu1  ;;  %v1775_v2 = vpop.f32.mrf.mxu0  ;;  %5872 = vmatmul.mubr.bf16.gmra.mxu1 %v9334_v18  ;;  %5968 = vmatmul.mubr.bf16.gmra.mxu0 %v7112_v24  ;;  %v7948_v61 = vadd.f32 %v1867_v8, %v1539_v47  ;;  %v6461_v36 = vld [vmem:[%s9179_s4 + $0x1f8] sm:$0xff]  }
 0x22a   : > { %v1455_v28 = vrot.slane %v1390_v54, 6  ;;  %v1846_v39 = vrot.slane %v1775_v2, 7  ;;  %5971 = vmatprep.mubr.msk.bf16.mxu0 %vm6487_vm0, %v9294_v19  ;;  %5991 = vmatprep.mubr.msk.bf16.mxu1 %vm6487_vm0, %v9294_v19 }
 0x22b   : > { %9335 = vst [vmem:[#allocation51_spill] sm:$0xff] %v7948_v61  ;;  %v5661_v62 = vpop.f32.mrf.mxu1  ;;  %v5757_v44 = vpop.f32.mrf.mxu0 }
 0x22c   : > { %v1471_v17 = vsel %vm1463_vm2, %v1454_v20, %v1455_v28  ;;  %v1866_v9 = vsel %vm1856_vm3, %v1845_v34, %v1846_v39  ;;  %v9338_v44 = vld [vmem:[#allocation54_spill] sm:$0xff] }
 0x22d   : > { %v1542_v14 = vadd.f32 %v1471_v17, %v9336_v5  ;;  %v1393_v47 = vpop.f32.mrf.mxu1  ;;  %v1778_v21 = vpop.f32.mrf.mxu0  ;;  %v7959_v54 = vadd.f32 %v1866_v9, %v1540_v41  ;;  %v9339_v41 = vld [vmem:[#allocation6_spill] sm:$0xff] }
 0x22e   : > { %v1456_v3 = vrot.slane %v1393_v47, 6  ;;  %v1847_v8 = vrot.slane %v1778_v21, 7 }
 0x22f   : > { %9337 = vst [vmem:[#allocation52_spill] sm:$0xff] %v7959_v54  ;;  %v5662_v2 = vpop.f32.mrf.mxu1  ;;  %v5758_v62 = vpop.f32.mrf.mxu0 }
 0x230   : > { %v1470_v20 = vsel %vm1463_vm2, %v1455_v28, %v1456_v3  ;;  %v1865_v34 = vsel %vm1856_vm3, %v1846_v39, %v1847_v8  ;;  %v6463_v28 = vld [vmem:[%s9179_s4 + $0x1f0] sm:$0xff]  }
 0x231   : > { %v1543_v17 = vadd.f32 %v1470_v20, %v9338_v44  ;;  %v1398_v5 = vpop.f32.mrf.mxu1  ;;  %v1783_v61 = vpop.f32.mrf.mxu0  ;;  %5972 = vmatmul.mubr.bf16.gmra.mxu0 %v9334_v18  ;;  %5992 = vmatmul.mubr.bf16.vlgmr.msra.gmra.mxu1 %v9339_v41  ;;  %v7971_v9 = vadd.f32 %v1865_v34, %v1541_v37  ;;  %v9353_v18 = vld [vmem:[#allocation62_spill] sm:$0xff] }
 0x232   : > { %v1457_v47 = vrot.slane %v1398_v5, 6  ;;  %v1848_v21 = vrot.slane %v1783_v61, 7  ;;  %6176 = vmatpush3.bf16.msra.mxu1 %v6461_v36  ;;  %5995 = vmatprep.mubr.msk.bf16.mxu1 %vm6487_vm0, %v9294_v19  ;;  %v9341_v36 = vld [vmem:[#allocation55_spill] sm:$0xff] }
 0x233   : > { %9340 = vst [vmem:[#allocation53_spill] sm:$0xff] %v7971_v9  ;;  %v5665_v39 = vpop.f32.mrf.mxu1  ;;  %v5761_v2 = vpop.f32.mrf.mxu0  ;;  %6091 = vmatprep.mubr.msk.bf16.mxu0 %vm6487_vm0, %v9294_v19  ;;  %6177 = vmatprep.subr.bf16.mxu1 %v9294_v19 }
 0x234   : > { %v1469_v37 = vsel %vm1463_vm2, %v1456_v3, %v1457_v47  ;;  %v1864_v61 = vsel %vm1856_vm3, %v1847_v8, %v1848_v21  ;;  %v6462_v2 = vld [vmem:[%s9179_s4 + $0x238] sm:$0xff]  }
 0x235   : > { %v1544_v62 = vadd.f32 %v1469_v37, %v9341_v36  ;;  %v1401_v20 = vpop.f32.mrf.mxu1  ;;  %v1786_v34 = vpop.f32.mrf.mxu0  ;;  %v7986_v44 = vadd.f32 %v1864_v61, %v1542_v14  ;;  %v6465_v14 = vld [vmem:[%s9179_s4 + $0x1e8] sm:$0xff]   ;;  %v9343_v37 = vld [vmem:[#allocation56_spill] sm:$0xff] }
 0x236   : > { %v1458_v5 = vrot.slane %v1401_v20, 6  ;;  %v1849_v39 = vrot.slane %v1786_v34, 7  ;;  %6178 = vmatpush3.bf16.msra.mxu1 %v6463_v28  ;;  %v9344_v34 = vld [vmem:[#allocation11_spill] sm:$0xff] }
 0x237   : > { %9342 = vst [vmem:[#allocation54_spill] sm:$0xff] %v7986_v44  ;;  %v5666_v9 = vpop.f32.mrf.mxu1  ;;  %v5762_v54 = vpop.f32.mrf.mxu0  ;;  %6179 = vmatprep.subr.bf16.mxu1 %v9294_v19 }
 0x238   : > { %v1468_v3 = vsel %vm1463_vm2, %v1457_v47, %v1458_v5  ;;  %v1863_v8 = vsel %vm1856_vm3, %v1848_v21, %v1849_v39  ;;  %v6464_v47 = vld [vmem:[%s9179_s4 + $0x230] sm:$0xff]  }
 0x239   : > { %v1545_v61 = vadd.f32 %v1468_v3, %v9343_v37  ;;  %v1406_v36 = vpop.f32.mrf.mxu1  ;;  %v1791_v20 = vpop.f32.mrf.mxu0  ;;  %5996 = vmatmul.mubr.bf16.gmra.mxu1 %v9344_v34  ;;  %6092 = vmatmul.mubr.bf16.vlgmr.msra.gmra.mxu0 %v9339_v41  ;;  %v8002_v54 = vadd.f32 %v1863_v8, %v1543_v17  ;;  %v6467_v8 = vld [vmem:[%s9179_s4 + $0x1e0] sm:$0xff]   ;;  %v9346_v37 = vld [vmem:[#allocation57_spill] sm:$0xff] }
 0x23a   : > { %v1459_v9 = vrot.slane %v1406_v36, 6  ;;  %v1850_v28 = vrot.slane %v1791_v20, 7  ;;  %6276 = vmatpush3.bf16.msra.mxu0 %v6462_v2  ;;  %5999 = vmatprep.mubr.msk.bf16.mxu1 %vm6487_vm0, %v9294_v19 }
 0x23b   : > { %9345 = vst [vmem:[#allocation55_spill] sm:$0xff] %v8002_v54  ;;  %v5669_v21 = vpop.f32.mrf.mxu1  ;;  %v5765_v3 = vpop.f32.mrf.mxu0  ;;  %6095 = vmatprep.mubr.msk.bf16.mxu0 %vm6487_vm0, %v9294_v19  ;;  %6277 = vmatprep.subr.bf16.mxu0 %v9294_v19 }
 0x23c   : > { %v1467_v17 = vsel %vm1463_vm2, %v1458_v5, %v1459_v9  ;;  %v1862_v2 = vsel %vm1856_vm3, %v1849_v39, %v1850_v28  ;;  %6180 = vmatpush3.bf16.msra.mxu1 %v6465_v14  ;;  %v6466_v39 = vld [vmem:[%s9179_s4 + $0x228] sm:$0xff]  }
 0x23d   : > { %v1546_v36 = vadd.f32 %v1467_v17, %v9346_v37  ;;  %v1409_v20 = vpop.f32.mrf.mxu1  ;;  %v1794_v21 = vpop.f32.mrf.mxu0  ;;  %6181 = vmatprep.subr.bf16.mxu1 %v9294_v19  ;;  %v8021_v3 = vadd.f32 %v1862_v2, %v1544_v62  ;;  %v6469_v62 = vld [vmem:[%s9179_s4 + $0x1d8] sm:$0xff]  }
 0x23e   : > { %v1460_v54 = vrot.slane %v1409_v20, 6  ;;  %v1851_v44 = vrot.slane %v1794_v21, 7  ;;  %6278 = vmatpush3.bf16.msra.mxu0 %v6464_v47  ;;  %v9348_v47 = vld [vmem:[#allocation58_spill] sm:$0xff]  ;;  %v9349_v20 = vld [vmem:[#allocation16_spill] sm:$0xff] }
 0x23f   : > { %9347 = vst [vmem:[#allocation56_spill] sm:$0xff] %v8021_v3  ;;  %v5670_v5 = vpop.f32.mrf.mxu1  ;;  %v5766_v41 = vpop.f32.mrf.mxu0  ;;  %6279 = vmatprep.subr.bf16.mxu0 %v9294_v19 }
 0x240   : > { %v1466_v14 = vsel %vm1463_vm2, %v1459_v9, %v1460_v54  ;;  %v1861_v17 = vsel %vm1856_vm3, %v1850_v28, %v1851_v44  ;;  %6182 = vmatpush3.bf16.msra.mxu1 %v6467_v8 }
 0x241   : > { %v1547_v2 = vadd.f32 %v1466_v14, %v9348_v47  ;;  %v1414_v41 = vpop.f32.mrf.mxu1  ;;  %v1799_v37 = vpop.f32.mrf.mxu0  ;;  %6000 = vmatmul.mubr.bf16.gmra.mxu1 %v9349_v20  ;;  %6096 = vmatmul.mubr.bf16.gmra.mxu0 %v9344_v34  ;;  %v8037_v21 = vadd.f32 %v1861_v17, %v1545_v61  ;;  %v6468_v14 = vld [vmem:[%s9179_s4 + $0x220] sm:$0xff]   ;;  %v6471_v47 = vld [vmem:[%s9179_s4 + $0x1d0] sm:$0xff]  }
 0x242   : > { %v1461_v5 = vrot.slane %v1414_v41, 6  ;;  %v1852_v9 = vrot.slane %v1799_v37, 7  ;;  %6003 = vmatprep.mubr.msk.bf16.mxu1 %vm6487_vm0, %v9294_v19  ;;  %6099 = vmatprep.mubr.msk.bf16.mxu0 %vm6487_vm0, %v9294_v19 }
 0x243   : > { %9350 = vst [vmem:[#allocation57_spill] sm:$0xff] %v8037_v21  ;;  %v5673_v28 = vpop.f32.mrf.mxu1  ;;  %v5769_v8 = vpop.f32.mrf.mxu0  ;;  %6280 = vmatpush3.bf16.msra.mxu0 %v6466_v39  ;;  %6183 = vmatprep.subr.bf16.mxu1 %v9294_v19  ;;  %v9351_v39 = vld [vmem:[#allocation59_spill] sm:$0xff] }
 0x244   : > { %v1465_v61 = vsel %vm1463_vm2, %v1460_v54, %v1461_v5  ;;  %v1860_v17 = vsel %vm1856_vm3, %v1851_v44, %v1852_v9  ;;  %6281 = vmatprep.subr.bf16.mxu0 %v9294_v19  ;;  %6184 = vmatpush3.bf16.msra.mxu1 %v6469_v62  ;;  %v6470_v44 = vld [vmem:[%s9179_s4 + $0x218] sm:$0xff]  }
 0x245   : > { %v1506_v41 = vadd.f32 %v1465_v61, %v9351_v39  ;;  %v1417_v37 = vpop.f32.mrf.mxu1  ;;  %v1802_v28 = vpop.f32.mrf.mxu0  ;;  %6185 = vmatprep.subr.bf16.mxu1 %v9294_v19  ;;  %v8057_v8 = vadd.f32 %v1860_v17, %v1546_v36  ;;  %v9354_v61 = vrot.slane %v9353_v18, 6  ;;  %v9356_v17 = vld [vmem:[#allocation61_spill] sm:$0xff] }
 0x246   : > { %v1462_v21 = vrot.slane %v1417_v37, 6  ;;  %v1853_v54 = vrot.slane %v1802_v28, 7  ;;  %v9358_v18 = vld [vmem:[#allocation21_spill] sm:$0xff] }
 0x247   : > { %9352 = vst [vmem:[#allocation58_spill] sm:$0xff] %v8057_v8  ;;  %v5674_v3 = vpop.f32.mrf.mxu1  ;;  %v5770_v34 = vpop.f32.mrf.mxu0  ;;  %6282 = vmatpush3.bf16.msra.mxu0 %v6468_v14 }
 0x248   : > { %v1464_v62 = vsel %vm1463_vm2, %v1461_v5, %v1462_v21  ;;  %v1505_v39 = vsel %vm1463_vm2, %v1462_v21, %v9354_v61  ;;  %v1859_v36 = vsel %vm1856_vm3, %v1852_v9, %v1853_v54  ;;  %6283 = vmatprep.subr.bf16.mxu0 %v9294_v19  ;;  %6186 = vmatpush3.bf16.msra.mxu1 %v6471_v47  ;;  %v6473_v34 = vld [vmem:[%s9179_s4 + $0x1c8] sm:$0xff]   ;;  %v9355_v3 = vld [vmem:[#allocation60_spill] sm:$0xff] }
 0x249   : > { %v1507_v14 = vadd.f32 %v1464_v62, %v9355_v3  ;;  %v1508_v37 = vadd.f32 %v1505_v39, %v9356_v17  ;;  %v1807_v5 = vpop.f32.mrf.mxu0  ;;  %v8076_v28 = vpop.f32.mrf.mxu1  ;;  %6004 = vmatmul.mubr.bf16.gmra.mxu1 %v9358_v18  ;;  %6100 = vmatmul.mubr.bf16.gmra.mxu0 %v9349_v20  ;;  %v8080_v21 = vadd.f32 %v1859_v36, %v1547_v2  ;;  %v6472_v61 = vld [vmem:[%s9179_s4 + $0x210] sm:$0xff]   ;;  %v6475_v39 = vld [vmem:[%s9179_s4 + $0x1c0] sm:$0xff]  }
 0x24a   : > { %9357 = vst [vmem:[#allocation16_spill] sm:$0xff] %v8076_v28  ;;  %v1854_v9 = vrot.slane %v1807_v5, 7  ;;  %6007 = vmatprep.mubr.msk.bf16.mxu1 %vm6487_vm0, %v9294_v19  ;;  %6103 = vmatprep.mubr.msk.bf16.mxu0 %vm6487_vm0, %v9294_v19  ;;  %v9247_v17 = vrot.slane %v8076_v28, 7 }
 0x24b   : > { %9359 = vst [vmem:[#allocation59_spill] sm:$0xff] %v8080_v21  ;;  %v5773_v47 = vpop.f32.mrf.mxu0  ;;  %v5793_v62 = vpop.f32.mrf.mxu1  ;;  %6284 = vmatpush3.bf16.msra.mxu0 %v6470_v44  ;;  %6187 = vmatprep.subr.bf16.mxu1 %v9294_v19 }
 0x24c   : > { %v1858_v2 = vsel %vm1856_vm3, %v1853_v54, %v1854_v9  ;;  %6285 = vmatprep.subr.bf16.mxu0 %v9294_v19  ;;  %6188 = vmatpush3.bf16.msra.mxu1 %v6473_v34  ;;  %v6474_v54 = vld [vmem:[%s9179_s4 + $0x208] sm:$0xff]  }
 0x24d   : > { %v8096_v36 = vadd.f32 %v1858_v2, %v1506_v41  ;;  %v1810_v3 = vpop.f32.mrf.mxu0  ;;  %v2043_v44 = vpop.f32.mrf.mxu1  ;;  %6189 = vmatprep.subr.bf16.mxu1 %v9294_v19  ;;  %v9361_v41 = vld [vmem:[#allocation63_spill] sm:$0xff] }
 0x24e   : > { %v1855_v5 = vrot.slane %v1810_v3, 7  ;;  %v2208_v47 = vrot.slane %v2043_v44, 7  ;;  %v9362_v2 = vrot.slane %v9361_v41, 7  ;;  %v9364_v44 = vld [vmem:[#allocation26_spill] sm:$0xff] }
 0x24f   : > { %9360 = vst [vmem:[#allocation62_spill] sm:$0xff] %v8096_v36  ;;  %v5774_v62 = vpop.f32.mrf.mxu0  ;;  %v5794_v21 = vpop.f32.mrf.mxu1  ;;  %6286 = vmatpush3.bf16.msra.mxu0 %v6472_v61 }
 0x250   : > { %v1857_v34 = vsel %vm1856_vm3, %v1854_v9, %v1855_v5  ;;  %v1898_v36 = vsel %vm1856_vm3, %v1855_v5, %v9362_v2  ;;  %v2289_v3 = vsel %vm1856_vm3, %v9247_v17, %v2208_v47  ;;  %6287 = vmatprep.subr.bf16.mxu0 %v9294_v19  ;;  %6190 = vmatpush3.bf16.msra.mxu1 %v6475_v39  ;;  %v6476_v39 = vld [vmem:[%s9179_s4 + $0x200] sm:$0xff]  }
 0x251   : > { %v2048_v21 = vpop.f32.mrf.mxu1  ;;  %v8114_v61 = vpop.f32.mrf.mxu0  ;;  %6008 = vmatmul.mubr.bf16.gmra.mxu1 %v9364_v44  ;;  %6104 = vmatmul.mubr.bf16.gmra.mxu0 %v9358_v18  ;;  %v1900_v9 = vadd.f32 %v1857_v34, %v1507_v14  ;;  %v1901_v62 = vadd.f32 %v1898_v36, %v1508_v37 }
 0x252   : > { %9363 = vst [vmem:[#allocation60_spill] sm:$0xff] %v8114_v61  ;;  %v2209_v41 = vrot.slane %v2048_v21, 7  ;;  %6011 = vmatprep.mubr.msk.bf16.mxu1 %vm6487_vm0, %v9294_v19  ;;  %6107 = vmatprep.mubr.msk.bf16.mxu0 %vm6487_vm0, %v9294_v19 }
 0x253   : > { %v5797_v5 = vpop.f32.mrf.mxu1  ;;  %v5893_v2 = vpop.f32.mrf.mxu0  ;;  %v2292_v17 = vadd.f32 %v2289_v3, %v1900_v9  ;;  %6288 = vmatpush3.bf16.msra.mxu0 %v6474_v54 }
 0x254   : > { %v2288_v61 = vsel %vm1856_vm3, %v2208_v47, %v2209_v41  ;;  %6289 = vmatprep.subr.bf16.mxu0 %v9294_v19  ;;  %v9365_v47 = vld [vmem:[#allocation64_spill] sm:$0xff] }
 0x255   : > { %v2051_v14 = vpop.f32.mrf.mxu1  ;;  %v2435_v37 = vpop.f32.mrf.mxu0  ;;  %v2293_v36 = vadd.f32 %v2288_v61, %v1901_v62 }
 0x256   : > { %v2210_v34 = vrot.slane %v2051_v14, 7  ;;  %v8128_v21 = vadd.f32 %v2435_v37, %v2292_v17 }
 0x257   : > { %v5798_v18 = vpop.f32.mrf.mxu1  ;;  %v5894_v5 = vpop.f32.mrf.mxu0  ;;  %6290 = vmatpush3.bf16.msra.mxu0 %v6476_v39 }
 0x258   : > { %v2287_v54 = vsel %vm1856_vm3, %v2209_v41, %v2210_v34 }
 0x259   : > { %v2056_v3 = vpop.f32.mrf.mxu1  ;;  %v2440_v9 = vpop.f32.mrf.mxu0  ;;  %6012 = vmatmul.mubr.bf16.gmra.mxu1 %v7031_v33  ;;  %6108 = vmatmul.mubr.bf16.gmra.mxu0 %v9364_v44  ;;  %v2294_v2 = vadd.f32 %v2287_v54, %v9365_v47 }
 0x25a   : > { %v2211_v28 = vrot.slane %v2056_v3, 7  ;;  %v8135_v8 = vadd.f32 %v2440_v9, %v2293_v36  ;;  %6015 = vmatprep.mubr.msk.bf16.mxu1 %vm6487_vm0, %v9294_v19  ;;  %6111 = vmatprep.mubr.msk.bf16.mxu0 %vm6487_vm0, %v9294_v19 }
 0x25b   : > { %v5801_v18 = vpop.f32.mrf.mxu1  ;;  %v5897_v17 = vpop.f32.mrf.mxu0 }
 0x25c   : > { %v2286_v61 = vsel %vm1856_vm3, %v2210_v34, %v2211_v28 }
 0x25d   : > { %v2059_v62 = vpop.f32.mrf.mxu1  ;;  %v2443_v41 = vpop.f32.mrf.mxu0  ;;  %v2295_v39 = vadd.f32 %v2286_v61, %v7659_v26 }
 0x25e   : > { %v2212_v14 = vrot.slane %v2059_v62, 7  ;;  %v8144_v37 = vadd.f32 %v2443_v41, %v2294_v2 }
 0x25f   : > { %v5802_v36 = vpop.f32.mrf.mxu1  ;;  %v5898_v5 = vpop.f32.mrf.mxu0 }
 0x260   : > { %v2285_v54 = vsel %vm1856_vm3, %v2211_v28, %v2212_v14 }
 0x261   : > { %v2064_v3 = vpop.f32.mrf.mxu1  ;;  %v2448_v9 = vpop.f32.mrf.mxu0  ;;  %6016 = vmatmul.mubr.bf16.gmra.mxu1 %v7060_v45  ;;  %6112 = vmatmul.mubr.bf16.gmra.mxu0 %v7031_v33  ;;  %v2296_v34 = vadd.f32 %v2285_v54, %v7668_v48 }
 0x262   : > { %v2213_v47 = vrot.slane %v2064_v3, 7  ;;  %v8151_v18 = vadd.f32 %v2448_v9, %v2295_v39  ;;  %6019 = vmatprep.mubr.msk.bf16.mxu1 %vm6487_vm0, %v9294_v19  ;;  %6115 = vmatprep.mubr.msk.bf16.mxu0 %vm6487_vm0, %v9294_v19 }
 0x263   : > { %v5805_v26 = vpop.f32.mrf.mxu1  ;;  %v5901_v2 = vpop.f32.mrf.mxu0 }
 0x264   : > { %v2284_v28 = vsel %vm1856_vm3, %v2212_v14, %v2213_v47 }
 0x265   : > { %v2067_v17 = vpop.f32.mrf.mxu1  ;;  %v2451_v61 = vpop.f32.mrf.mxu0  ;;  %v2297_v62 = vadd.f32 %v2284_v28, %v7679_v23 }
 0x266   : > { %v2214_v41 = vrot.slane %v2067_v17, 7  ;;  %v8160_v48 = vadd.f32 %v2451_v61, %v2296_v34 }
 0x267   : > { %v5806_v39 = vpop.f32.mrf.mxu1  ;;  %v5902_v36 = vpop.f32.mrf.mxu0 }
 0x268   : > { %v2283_v5 = vsel %vm1856_vm3, %v2213_v47, %v2214_v41 }
 0x269   : > { %v2072_v54 = vpop.f32.mrf.mxu1  ;;  %v2456_v3 = vpop.f32.mrf.mxu0  ;;  %6020 = vmatmul.mubr.bf16.gmra.mxu1 %v7084_v43  ;;  %6116 = vmatmul.mubr.bf16.gmra.mxu0 %v7060_v45  ;;  %v2298_v14 = vadd.f32 %v2283_v5, %v7688_v16 }
 0x26a   : > { %v2215_v9 = vrot.slane %v2072_v54, 7  ;;  %v8167_v26 = vadd.f32 %v2456_v3, %v2297_v62  ;;  %6023 = vmatprep.mubr.msk.bf16.mxu1 %vm6487_vm0, %v9294_v19  ;;  %6119 = vmatprep.mubr.msk.bf16.mxu0 %vm6487_vm0, %v9294_v19 }
 0x26b   : > { %v5809_v23 = vpop.f32.mrf.mxu1  ;;  %v5905_v34 = vpop.f32.mrf.mxu0 }
 0x26c   : > { %v2282_v47 = vsel %vm1856_vm3, %v2214_v41, %v2215_v9 }
 0x26d   : > { %v2075_v2 = vpop.f32.mrf.mxu1  ;;  %v2459_v28 = vpop.f32.mrf.mxu0  ;;  %v2299_v17 = vadd.f32 %v2282_v47, %v7699_v60 }
 0x26e   : > { %v2216_v61 = vrot.slane %v2075_v2, 7  ;;  %v8176_v16 = vadd.f32 %v2459_v28, %v2298_v14 }
 0x26f   : > { %v5810_v62 = vpop.f32.mrf.mxu1  ;;  %v5906_v39 = vpop.f32.mrf.mxu0 }
 0x270   : > { %v2281_v36 = vsel %vm1856_vm3, %v2215_v9, %v2216_v61 }
 0x271   : > { %v2080_v5 = vpop.f32.mrf.mxu1  ;;  %v2464_v54 = vpop.f32.mrf.mxu0  ;;  %6024 = vmatmul.mubr.bf16.gmra.mxu1 %v7102_v10  ;;  %6120 = vmatmul.mubr.bf16.gmra.mxu0 %v7084_v43  ;;  %v2300_v41 = vadd.f32 %v2281_v36, %v7708_v40 }
 0x272   : > { %v2217_v3 = vrot.slane %v2080_v5, 7  ;;  %v8183_v23 = vadd.f32 %v2464_v54, %v2299_v17  ;;  %6027 = vmatprep.mubr.msk.bf16.mxu1 %vm6487_vm0, %v9294_v19  ;;  %6123 = vmatprep.mubr.msk.bf16.mxu0 %vm6487_vm0, %v9294_v19 }
 0x273   : > { %v5813_v60 = vpop.f32.mrf.mxu1  ;;  %v5909_v14 = vpop.f32.mrf.mxu0 }
 0x274   : > { %v2280_v9 = vsel %vm1856_vm3, %v2216_v61, %v2217_v3 }
 0x275   : > { %v2083_v34 = vpop.f32.mrf.mxu1  ;;  %v2467_v47 = vpop.f32.mrf.mxu0  ;;  %v2301_v2 = vadd.f32 %v2280_v9, %v7719_v56 }
 0x276   : > { %v2218_v28 = vrot.slane %v2083_v34, 7  ;;  %v8192_v40 = vadd.f32 %v2467_v47, %v2300_v41 }
 0x277   : > { %v5814_v17 = vpop.f32.mrf.mxu1  ;;  %v5910_v62 = vpop.f32.mrf.mxu0 }
 0x278   : > { %v2279_v39 = vsel %vm1856_vm3, %v2217_v3, %v2218_v28 }
 0x279   : > { %v2088_v36 = vpop.f32.mrf.mxu1  ;;  %v2472_v5 = vpop.f32.mrf.mxu0  ;;  %6028 = vmatmul.mubr.bf16.gmra.mxu1 %v7128_v6  ;;  %6124 = vmatmul.mubr.bf16.gmra.mxu0 %v7102_v10  ;;  %v2302_v61 = vadd.f32 %v2279_v39, %v7728_v35 }
 0x27a   : > { %v2219_v54 = vrot.slane %v2088_v36, 7  ;;  %v8199_v60 = vadd.f32 %v2472_v5, %v2301_v2  ;;  %6031 = vmatprep.mubr.msk.bf16.mxu1 %vm6487_vm0, %v9294_v19  ;;  %6127 = vmatprep.mubr.msk.bf16.mxu0 %vm6487_vm0, %v9294_v19 }
 0x27b   : > { %v5817_v56 = vpop.f32.mrf.mxu1  ;;  %v5913_v41 = vpop.f32.mrf.mxu0 }
 0x27c   : > { %v2278_v3 = vsel %vm1856_vm3, %v2218_v28, %v2219_v54 }
 0x27d   : > { %v2091_v14 = vpop.f32.mrf.mxu1  ;;  %v2475_v9 = vpop.f32.mrf.mxu0  ;;  %v2303_v34 = vadd.f32 %v2278_v3, %v7739_v13 }
 0x27e   : > { %v2220_v47 = vrot.slane %v2091_v14, 7  ;;  %v8208_v35 = vadd.f32 %v2475_v9, %v2302_v61 }
 0x27f   : > { %v5818_v2 = vpop.f32.mrf.mxu1  ;;  %v5914_v17 = vpop.f32.mrf.mxu0 }
 0x280   : > { %v2277_v62 = vsel %vm1856_vm3, %v2219_v54, %v2220_v47 }
 0x281   : > { %v2096_v39 = vpop.f32.mrf.mxu1  ;;  %v2480_v36 = vpop.f32.mrf.mxu0  ;;  %6032 = vmatmul.mubr.bf16.gmra.mxu1 %v7152_v22  ;;  %6128 = vmatmul.mubr.bf16.gmra.mxu0 %v7128_v6  ;;  %v2304_v28 = vadd.f32 %v2277_v62, %v7748_v58 }
 0x282   : > { %v2221_v5 = vrot.slane %v2096_v39, 7  ;;  %v8215_v56 = vadd.f32 %v2480_v36, %v2303_v34  ;;  %6035 = vmatprep.mubr.msk.bf16.mxu1 %vm6487_vm0, %v9294_v19  ;;  %6131 = vmatprep.mubr.msk.bf16.mxu0 %vm6487_vm0, %v9294_v19 }
 0x283   : > { %v5821_v13 = vpop.f32.mrf.mxu1  ;;  %v5917_v61 = vpop.f32.mrf.mxu0 }
 0x284   : > { %v2276_v54 = vsel %vm1856_vm3, %v2220_v47, %v2221_v5 }
 0x285   : > { %v2099_v41 = vpop.f32.mrf.mxu1  ;;  %v2483_v3 = vpop.f32.mrf.mxu0  ;;  %v2305_v14 = vadd.f32 %v2276_v54, %v7759_v29 }
 0x286   : > { %v2222_v9 = vrot.slane %v2099_v41, 7  ;;  %v8224_v58 = vadd.f32 %v2483_v3, %v2304_v28 }
 0x287   : > { %v5822_v34 = vpop.f32.mrf.mxu1  ;;  %v5918_v2 = vpop.f32.mrf.mxu0 }
 0x288   : > { %v2275_v17 = vsel %vm1856_vm3, %v2221_v5, %v2222_v9 }
 0x289   : > { %v2104_v62 = vpop.f32.mrf.mxu1  ;;  %v2488_v39 = vpop.f32.mrf.mxu0  ;;  %6036 = vmatmul.mubr.bf16.gmra.mxu1 %v6813_v25  ;;  %6132 = vmatmul.mubr.bf16.gmra.mxu0 %v7152_v22  ;;  %v2306_v47 = vadd.f32 %v2275_v17, %v7768_v11 }
 0x28a   : > { %v2223_v36 = vrot.slane %v2104_v62, 7  ;;  %v8231_v13 = vadd.f32 %v2488_v39, %v2305_v14  ;;  %6039 = vmatprep.mubr.msk.bf16.mxu1 %vm6487_vm0, %v9294_v19  ;;  %6135 = vmatprep.mubr.msk.bf16.mxu0 %vm6487_vm0, %v9294_v19 }
 0x28b   : > { %v5825_v29 = vpop.f32.mrf.mxu1  ;;  %v5921_v28 = vpop.f32.mrf.mxu0 }
 0x28c   : > { %v2274_v5 = vsel %vm1856_vm3, %v2222_v9, %v2223_v36 }
 0x28d   : > { %v2107_v61 = vpop.f32.mrf.mxu1  ;;  %v2491_v54 = vpop.f32.mrf.mxu0  ;;  %v2307_v41 = vadd.f32 %v2274_v5, %v7779_v30 }
 0x28e   : > { %v2224_v3 = vrot.slane %v2107_v61, 7  ;;  %v8240_v11 = vadd.f32 %v2491_v54, %v2306_v47 }
 0x28f   : > { %v5826_v14 = vpop.f32.mrf.mxu1  ;;  %v5922_v34 = vpop.f32.mrf.mxu0 }
 0x290   : > { %v2273_v2 = vsel %vm1856_vm3, %v2223_v36, %v2224_v3 }
 0x291   : > { %v2112_v17 = vpop.f32.mrf.mxu1  ;;  %v2496_v62 = vpop.f32.mrf.mxu0  ;;  %6040 = vmatmul.mubr.bf16.gmra.mxu1 %v6855_v0  ;;  %6136 = vmatmul.mubr.bf16.gmra.mxu0 %v6813_v25  ;;  %v2308_v9 = vadd.f32 %v2273_v2, %v7788_v7 }
 0x292   : > { %v2225_v39 = vrot.slane %v2112_v17, 7  ;;  %v8247_v29 = vadd.f32 %v2496_v62, %v2307_v41  ;;  %6043 = vmatprep.mubr.msk.bf16.mxu1 %vm6487_vm0, %v9294_v19  ;;  %6139 = vmatprep.mubr.msk.bf16.mxu0 %vm6487_vm0, %v9294_v19 }
 0x293   : > { %v5829_v30 = vpop.f32.mrf.mxu1  ;;  %v5925_v47 = vpop.f32.mrf.mxu0 }
 0x294   : > { %v2272_v36 = vsel %vm1856_vm3, %v2224_v3, %v2225_v39 }
 0x295   : > { %v2115_v28 = vpop.f32.mrf.mxu1  ;;  %v2499_v5 = vpop.f32.mrf.mxu0  ;;  %v2309_v61 = vadd.f32 %v2272_v36, %v7799_v51 }
 0x296   : > { %v2226_v54 = vrot.slane %v2115_v28, 7  ;;  %v8256_v7 = vadd.f32 %v2499_v5, %v2308_v9 }
 0x297   : > { %v5830_v41 = vpop.f32.mrf.mxu1  ;;  %v5926_v14 = vpop.f32.mrf.mxu0 }
 0x298   : > { %v2271_v34 = vsel %vm1856_vm3, %v2225_v39, %v2226_v54 }
 0x299   : > { %v2120_v2 = vpop.f32.mrf.mxu1  ;;  %v2504_v17 = vpop.f32.mrf.mxu0  ;;  %6044 = vmatmul.mubr.bf16.gmra.mxu1 %v6903_v49  ;;  %6140 = vmatmul.mubr.bf16.gmra.mxu0 %v6855_v0  ;;  %v2310_v3 = vadd.f32 %v2271_v34, %v7808_v52 }
 0x29a   : > { %v2227_v62 = vrot.slane %v2120_v2, 7  ;;  %v8263_v30 = vadd.f32 %v2504_v17, %v2309_v61  ;;  %6047 = vmatprep.mubr.msk.bf16.mxu1 %vm6487_vm0, %v9294_v19  ;;  %6143 = vmatprep.mubr.msk.bf16.mxu0 %vm6487_vm0, %v9294_v19 }
 0x29b   : > { %v5833_v51 = vpop.f32.mrf.mxu1  ;;  %v5929_v9 = vpop.f32.mrf.mxu0 }
 0x29c   : > { %v2270_v39 = vsel %vm1856_vm3, %v2226_v54, %v2227_v62 }
 0x29d   : > { %v2123_v47 = vpop.f32.mrf.mxu1  ;;  %v2507_v36 = vpop.f32.mrf.mxu0  ;;  %v2311_v28 = vadd.f32 %v2270_v39, %v7819_v63 }
 0x29e   : > { %v2228_v5 = vrot.slane %v2123_v47, 7  ;;  %v8272_v52 = vadd.f32 %v2507_v36, %v2310_v3 }
 0x29f   : > { %v5834_v61 = vpop.f32.mrf.mxu1  ;;  %v5930_v41 = vpop.f32.mrf.mxu0 }
 0x2a0   : > { %v2269_v14 = vsel %vm1856_vm3, %v2227_v62, %v2228_v5 }
 0x2a1   : > { %v2128_v34 = vpop.f32.mrf.mxu1  ;;  %v2512_v2 = vpop.f32.mrf.mxu0  ;;  %6048 = vmatmul.mubr.bf16.gmra.mxu1 %v6951_v42  ;;  %6144 = vmatmul.mubr.bf16.gmra.mxu0 %v6903_v49  ;;  %v2312_v54 = vadd.f32 %v2269_v14, %v7828_v55 }
 0x2a2   : > { %v2229_v17 = vrot.slane %v2128_v34, 7  ;;  %v8279_v51 = vadd.f32 %v2512_v2, %v2311_v28  ;;  %6051 = vmatprep.mubr.msk.bf16.mxu1 %vm6487_vm0, %v9294_v19  ;;  %6147 = vmatprep.mubr.msk.bf16.mxu0 %vm6487_vm0, %v9294_v19 }
 0x2a3   : > { %v5837_v63 = vpop.f32.mrf.mxu1  ;;  %v5933_v3 = vpop.f32.mrf.mxu0 }
 0x2a4   : > { %v2268_v62 = vsel %vm1856_vm3, %v2228_v5, %v2229_v17 }
 0x2a5   : > { %v2131_v9 = vpop.f32.mrf.mxu1  ;;  %v2515_v39 = vpop.f32.mrf.mxu0  ;;  %v2313_v47 = vadd.f32 %v2268_v62, %v7839_v1 }
 0x2a6   : > { %v2230_v36 = vrot.slane %v2131_v9, 7  ;;  %v8288_v55 = vadd.f32 %v2515_v39, %v2312_v54 }
 0x2a7   : > { %v5838_v28 = vpop.f32.mrf.mxu1  ;;  %v5934_v61 = vpop.f32.mrf.mxu0 }
 0x2a8   : > { %v2267_v41 = vsel %vm1856_vm3, %v2229_v17, %v2230_v36 }
 0x2a9   : > { %v2136_v14 = vpop.f32.mrf.mxu1  ;;  %v2520_v34 = vpop.f32.mrf.mxu0  ;;  %6052 = vmatmul.mubr.bf16.gmra.mxu1 %v6999_v57  ;;  %6148 = vmatmul.mubr.bf16.gmra.mxu0 %v6951_v42  ;;  %v2314_v5 = vadd.f32 %v2267_v41, %v7848_v46 }
 0x2aa   : > { %v2231_v2 = vrot.slane %v2136_v14, 7  ;;  %v8295_v63 = vadd.f32 %v2520_v34, %v2313_v47  ;;  %6055 = vmatprep.mubr.msk.bf16.mxu1 %vm6487_vm0, %v9294_v19  ;;  %6151 = vmatprep.mubr.msk.bf16.mxu0 %vm6487_vm0, %v9294_v19 }
 0x2ab   : > { %v5841_v1 = vpop.f32.mrf.mxu1  ;;  %v5937_v54 = vpop.f32.mrf.mxu0 }
 0x2ac   : > { %v2266_v17 = vsel %vm1856_vm3, %v2230_v36, %v2231_v2 }
 0x2ad   : > { %v2139_v3 = vpop.f32.mrf.mxu1  ;;  %v2523_v62 = vpop.f32.mrf.mxu0  ;;  %v2315_v9 = vadd.f32 %v2266_v17, %v7859_v12 }
 0x2ae   : > { %v2232_v39 = vrot.slane %v2139_v3, 7  ;;  %v8304_v46 = vadd.f32 %v2523_v62, %v2314_v5 }
 0x2af   : > { %v5842_v47 = vpop.f32.mrf.mxu1  ;;  %v5938_v28 = vpop.f32.mrf.mxu0 }
 0x2b0   : > { %v2265_v61 = vsel %vm1856_vm3, %v2231_v2, %v2232_v39 }
 0x2b1   : > { %v2144_v41 = vpop.f32.mrf.mxu1  ;;  %v2528_v14 = vpop.f32.mrf.mxu0  ;;  %6056 = vmatmul.mubr.bf16.gmra.mxu1 %v7033_v27  ;;  %6152 = vmatmul.mubr.bf16.gmra.mxu0 %v6999_v57  ;;  %v2316_v36 = vadd.f32 %v2265_v61, %v7868_v15 }
 0x2b2   : > { %v2233_v34 = vrot.slane %v2144_v41, 7  ;;  %v8311_v1 = vadd.f32 %v2528_v14, %v2315_v9  ;;  %6059 = vmatprep.mubr.msk.bf16.mxu1 %vm6487_vm0, %v9294_v19  ;;  %6155 = vmatprep.mubr.msk.bf16.mxu0 %vm6487_vm0, %v9294_v19 }
 0x2b3   : > { %v5845_v12 = vpop.f32.mrf.mxu1  ;;  %v5941_v5 = vpop.f32.mrf.mxu0 }
 0x2b4   : > { %v2264_v2 = vsel %vm1856_vm3, %v2232_v39, %v2233_v34 }
 0x2b5   : > { %v2147_v54 = vpop.f32.mrf.mxu1  ;;  %v2531_v17 = vpop.f32.mrf.mxu0  ;;  %v2317_v3 = vadd.f32 %v2264_v2, %v7879_v59 }
 0x2b6   : > { %v2234_v62 = vrot.slane %v2147_v54, 7  ;;  %v8320_v15 = vadd.f32 %v2531_v17, %v2316_v36 }
 0x2b7   : > { %v5846_v9 = vpop.f32.mrf.mxu1  ;;  %v5942_v47 = vpop.f32.mrf.mxu0 }
 0x2b8   : > { %v2263_v28 = vsel %vm1856_vm3, %v2233_v34, %v2234_v62 }
 0x2b9   : > { %v2152_v61 = vpop.f32.mrf.mxu1  ;;  %v2536_v41 = vpop.f32.mrf.mxu0  ;;  %6060 = vmatmul.mubr.bf16.gmra.mxu1 %v7062_v53  ;;  %6156 = vmatmul.mubr.bf16.gmra.mxu0 %v7033_v27  ;;  %v2318_v39 = vadd.f32 %v2263_v28, %v7888_v38 }
 0x2ba   : > { %v2235_v14 = vrot.slane %v2152_v61, 7  ;;  %v8327_v12 = vadd.f32 %v2536_v41, %v2317_v3  ;;  %6063 = vmatprep.mubr.msk.bf16.mxu1 %vm6487_vm0, %v9294_v19  ;;  %6159 = vmatprep.mubr.msk.bf16.mxu0 %vm6487_vm0, %v9294_v19  ;;  %v9367_v41 = vld [vmem:[#allocation65_spill] sm:$0xff] }
 0x2bb   : > { %v5849_v59 = vpop.f32.mrf.mxu1  ;;  %v5945_v36 = vpop.f32.mrf.mxu0 }
 0x2bc   : > { %v2262_v34 = vsel %vm1856_vm3, %v2234_v62, %v2235_v14 }
 0x2bd   : > { %v2155_v5 = vpop.f32.mrf.mxu1  ;;  %v2539_v2 = vpop.f32.mrf.mxu0  ;;  %v2319_v54 = vadd.f32 %v2262_v34, %v7899_v31 }
 0x2be   : > { %v2236_v17 = vrot.slane %v2155_v5, 7  ;;  %v8336_v38 = vadd.f32 %v2539_v2, %v2318_v39  ;;  %v9369_v2 = vld [vmem:[#allocation66_spill] sm:$0xff] }
 0x2bf   : > { %v5850_v3 = vpop.f32.mrf.mxu1  ;;  %v5946_v9 = vpop.f32.mrf.mxu0 }
 0x2c0   : > { %9366 = vst [vmem:[#allocation61_spill] sm:$0xff] %v8336_v38  ;;  %v2261_v47 = vsel %vm1856_vm3, %v2235_v14, %v2236_v17 }
 0x2c1   : > { %v2160_v28 = vpop.f32.mrf.mxu1  ;;  %v2544_v61 = vpop.f32.mrf.mxu0  ;;  %6064 = vmatmul.mubr.bf16.gmra.mxu1 %v7086_v32  ;;  %6160 = vmatmul.mubr.bf16.gmra.mxu0 %v7062_v53  ;;  %v2320_v62 = vadd.f32 %v2261_v47, %v9367_v41 }
 0x2c2   : > { %v2237_v59 = vrot.slane %v2160_v28, 7  ;;  %v8343_v36 = vadd.f32 %v2544_v61, %v2319_v54  ;;  %6067 = vmatprep.mubr.msk.bf16.mxu1 %vm6487_vm0, %v9294_v19  ;;  %6163 = vmatprep.mubr.msk.bf16.mxu0 %vm6487_vm0, %v9294_v19 }
 0x2c3   : > { %v5853_v31 = vpop.f32.mrf.mxu1  ;;  %v5949_v39 = vpop.f32.mrf.mxu0 }
 0x2c4   : > { %9368 = vst [vmem:[#allocation63_spill] sm:$0xff] %v8343_v36  ;;  %v2260_v14 = vsel %vm1856_vm3, %v2236_v17, %v2237_v59  ;;  %v9371_v31 = vld [vmem:[#allocation67_spill] sm:$0xff] }
 0x2c5   : > { %v2163_v34 = vpop.f32.mrf.mxu1  ;;  %v2547_v5 = vpop.f32.mrf.mxu0  ;;  %v2321_v3 = vadd.f32 %v2260_v14, %v9369_v2 }
 0x2c6   : > { %v2238_v9 = vrot.slane %v2163_v34, 7  ;;  %v8352_v47 = vadd.f32 %v2547_v5, %v2320_v62 }
 0x2c7   : > { %v5854_v54 = vpop.f32.mrf.mxu1  ;;  %v5950_v28 = vpop.f32.mrf.mxu0 }
 0x2c8   : > { %9370 = vst [vmem:[#allocation26_spill] sm:$0xff] %v8352_v47  ;;  %v2259_v61 = vsel %vm1856_vm3, %v2237_v59, %v2238_v9 }
 0x2c9   : > { %v2168_v41 = vpop.f32.mrf.mxu1  ;;  %v2552_v36 = vpop.f32.mrf.mxu0  ;;  %6068 = vmatmul.mubr.bf16.gmra.mxu1 %v7112_v24  ;;  %6164 = vmatmul.mubr.bf16.gmra.mxu0 %v7086_v32  ;;  %v2322_v17 = vadd.f32 %v2259_v61, %v9371_v31 }
 0x2ca   : > { %v2239_v39 = vrot.slane %v2168_v41, 7  ;;  %v8359_v38 = vadd.f32 %v2552_v36, %v2321_v3  ;;  %6071 = vmatprep.mubr.msk.bf16.mxu1 %vm6487_vm0, %v9294_v19  ;;  %6167 = vmatprep.mubr.msk.bf16.mxu0 %vm6487_vm0, %v9294_v19 }
 0x2cb   : > { %v5857_v62 = vpop.f32.mrf.mxu1  ;;  %v5953_v14 = vpop.f32.mrf.mxu0 }
 0x2cc   : > { %9372 = vst [vmem:[#allocation64_spill] sm:$0xff] %v8359_v38  ;;  %v2258_v59 = vsel %vm1856_vm3, %v2238_v9, %v2239_v39  ;;  %v9374_v38 = vld [vmem:[#allocation48_spill] sm:$0xff]  ;;  %v9375_v62 = vld [vmem:[#allocation51_spill] sm:$0xff] }
 0x2cd   : > { %v2171_v34 = vpop.f32.mrf.mxu1  ;;  %v2555_v5 = vpop.f32.mrf.mxu0  ;;  %v2323_v2 = vadd.f32 %v2258_v59, %v7939_v4 }
 0x2ce   : > { %v2240_v54 = vrot.slane %v2171_v34, 7  ;;  %v8368_v28 = vadd.f32 %v2555_v5, %v2322_v17  ;;  %v9377_v5 = vld [vmem:[#allocation52_spill] sm:$0xff] }
 0x2cf   : > { %v5858_v36 = vpop.f32.mrf.mxu1  ;;  %v5954_v3 = vpop.f32.mrf.mxu0 }
 0x2d0   : > { %9373 = vst [vmem:[#allocation65_spill] sm:$0xff] %v8368_v28  ;;  %v2257_v61 = vsel %vm1856_vm3, %v2239_v39, %v2240_v54 }
 0x2d1   : > { %v2176_v41 = vpop.f32.mrf.mxu1  ;;  %v2560_v31 = vpop.f32.mrf.mxu0  ;;  %6072 = vmatmul.mubr.bf16.gmra.mxu1 %v9374_v38  ;;  %6168 = vmatmul.mubr.bf16.gmra.mxu0 %v7112_v24  ;;  %v2324_v9 = vadd.f32 %v2257_v61, %v9375_v62 }
 0x2d2   : > { %v2241_v14 = vrot.slane %v2176_v41, 7  ;;  %v8375_v47 = vadd.f32 %v2560_v31, %v2323_v2  ;;  %6171 = vmatprep.mubr.msk.bf16.mxu0 %vm6487_vm0, %v9294_v19  ;;  %6191 = vmatprep.mubr.msk.bf16.mxu1 %vm6487_vm0, %v9294_v19 }
 0x2d3   : > { %v5861_v4 = vpop.f32.mrf.mxu1  ;;  %v5957_v17 = vpop.f32.mrf.mxu0 }
 0x2d4   : > { %9376 = vst [vmem:[#allocation66_spill] sm:$0xff] %v8375_v47  ;;  %v2256_v39 = vsel %vm1856_vm3, %v2240_v54, %v2241_v14  ;;  %v9379_v4 = vld [vmem:[#allocation6_spill] sm:$0xff]  ;;  %v9380_v17 = vld [vmem:[#allocation53_spill] sm:$0xff] }
 0x2d5   : > { %v2179_v59 = vpop.f32.mrf.mxu1  ;;  %v2563_v34 = vpop.f32.mrf.mxu0  ;;  %v2325_v36 = vadd.f32 %v2256_v39, %v9377_v5  ;;  %v9382_v5 = vld [vmem:[#allocation54_spill] sm:$0xff] }
 0x2d6   : > { %v2242_v3 = vrot.slane %v2179_v59, 7  ;;  %v8384_v61 = vadd.f32 %v2563_v34, %v2324_v9 }
 0x2d7   : > { %v5862_v2 = vpop.f32.mrf.mxu1  ;;  %v5958_v41 = vpop.f32.mrf.mxu0 }
 0x2d8   : > { %9378 = vst [vmem:[#allocation67_spill] sm:$0xff] %v8384_v61  ;;  %v2255_v31 = vsel %vm1856_vm3, %v2241_v14, %v2242_v3  ;;  %v9384_v61 = vld [vmem:[#allocation11_spill] sm:$0xff] }
 0x2d9   : > { %v2184_v62 = vpop.f32.mrf.mxu1  ;;  %v2568_v47 = vpop.f32.mrf.mxu0  ;;  %6172 = vmatmul.mubr.bf16.gmra.mxu0 %v9374_v38  ;;  %6192 = vmatmul.mubr.bf16.vlgmr.msra.gmra.mxu1 %v9379_v4  ;;  %v2326_v54 = vadd.f32 %v2255_v31, %v9380_v17 }
 0x2da   : > { %v2243_v28 = vrot.slane %v2184_v62, 7  ;;  %v8391_v24 = vadd.f32 %v2568_v47, %v2325_v36  ;;  %6195 = vmatprep.mubr.msk.bf16.mxu1 %vm6487_vm0, %v9294_v19  ;;  %6291 = vmatprep.mubr.msk.bf16.mxu0 %vm6487_vm0, %v9294_v19 }
 0x2db   : > { %v5865_v9 = vpop.f32.mrf.mxu1  ;;  %v5961_v39 = vpop.f32.mrf.mxu0 }
 0x2dc   : > { %9381 = vst [vmem:[#allocation51_spill] sm:$0xff] %v8391_v24  ;;  %v2254_v14 = vsel %vm1856_vm3, %v2242_v3, %v2243_v28  ;;  %v9385_v9 = vld [vmem:[#allocation55_spill] sm:$0xff] }
 0x2dd   : > { %v2187_v59 = vpop.f32.mrf.mxu1  ;;  %v2571_v34 = vpop.f32.mrf.mxu0  ;;  %v2327_v2 = vadd.f32 %v2254_v14, %v9382_v5  ;;  %v9387_v5 = vld [vmem:[#allocation56_spill] sm:$0xff] }
 0x2de   : > { %v2244_v41 = vrot.slane %v2187_v59, 7  ;;  %v8400_v31 = vadd.f32 %v2571_v34, %v2326_v54 }
 0x2df   : > { %v5866_v47 = vpop.f32.mrf.mxu1  ;;  %v5962_v36 = vpop.f32.mrf.mxu0 }
 0x2e0   : > { %9383 = vst [vmem:[#allocation52_spill] sm:$0xff] %v8400_v31  ;;  %v2253_v62 = vsel %vm1856_vm3, %v2243_v28, %v2244_v41  ;;  %v9395_v31 = vld [vmem:[#allocation21_spill] sm:$0xff] }
 0x2e1   : > { %v2192_v17 = vpop.f32.mrf.mxu1  ;;  %v2576_v24 = vpop.f32.mrf.mxu0  ;;  %6196 = vmatmul.mubr.bf16.gmra.mxu1 %v9384_v61  ;;  %6292 = vmatmul.mubr.bf16.vlgmr.msra.gmra.mxu0 %v9379_v4  ;;  %v2328_v3 = vadd.f32 %v2253_v62, %v9385_v9 }
 0x2e2   : > { %v2245_v39 = vrot.slane %v2192_v17, 7  ;;  %v8407_v38 = vadd.f32 %v2576_v24, %v2327_v2  ;;  %6199 = vmatprep.mubr.msk.bf16.mxu1 %vm6487_vm0, %v9294_v19  ;;  %6295 = vmatprep.mubr.msk.bf16.mxu0 %vm6487_vm0, %v9294_v19 }
 0x2e3   : > { %v5869_v54 = vpop.f32.mrf.mxu1  ;;  %v5965_v14 = vpop.f32.mrf.mxu0 }
 0x2e4   : > { %9386 = vst [vmem:[#allocation6_spill] sm:$0xff] %v8407_v38  ;;  %v2252_v28 = vsel %vm1856_vm3, %v2244_v41, %v2245_v39  ;;  %v9389_v54 = vld [vmem:[#allocation57_spill] sm:$0xff] }
 0x2e5   : > { %v2195_v59 = vpop.f32.mrf.mxu1  ;;  %v2579_v34 = vpop.f32.mrf.mxu0  ;;  %v2329_v4 = vadd.f32 %v2252_v28, %v9387_v5  ;;  %v9391_v5 = vld [vmem:[#allocation58_spill] sm:$0xff] }
 0x2e6   : > { %v2246_v47 = vrot.slane %v2195_v59, 7  ;;  %v8416_v36 = vadd.f32 %v2579_v34, %v2328_v3 }
 0x2e7   : > { %v5870_v24 = vpop.f32.mrf.mxu1  ;;  %v5966_v2 = vpop.f32.mrf.mxu0 }
 0x2e8   : > { %9388 = vst [vmem:[#allocation53_spill] sm:$0xff] %v8416_v36  ;;  %v2251_v62 = vsel %vm1856_vm3, %v2245_v39, %v2246_v47 }
 0x2e9   : > { %v2200_v17 = vpop.f32.mrf.mxu1  ;;  %v2584_v9 = vpop.f32.mrf.mxu0  ;;  %6200 = vmatmul.mubr.bf16.gmra.mxu1 %v9349_v20  ;;  %6296 = vmatmul.mubr.bf16.gmra.mxu0 %v9384_v61  ;;  %v2330_v41 = vadd.f32 %v2251_v62, %v9389_v54 }
 0x2ea   : > { %v2247_v14 = vrot.slane %v2200_v17, 7  ;;  %v8423_v38 = vadd.f32 %v2584_v9, %v2329_v4  ;;  %6203 = vmatprep.mubr.msk.bf16.mxu1 %vm6487_vm0, %v9294_v19  ;;  %6299 = vmatprep.mubr.msk.bf16.mxu0 %vm6487_vm0, %v9294_v19  ;;  %v9392_v17 = vld [vmem:[#allocation16_spill] sm:$0xff] }
 0x2eb   : > { %v5873_v3 = vpop.f32.mrf.mxu1  ;;  %v5969_v28 = vpop.f32.mrf.mxu0  ;;  %v9393_v9 = vrot.slane %v9392_v17, 7  ;;  %v9397_v17 = vld [vmem:[#allocation60_spill] sm:$0xff] }
 0x2ec   : > { %9390 = vst [vmem:[#allocation54_spill] sm:$0xff] %v8423_v38  ;;  %v2250_v39 = vsel %vm1856_vm3, %v2246_v47, %v2247_v14  ;;  %v9394_v28 = vld [vmem:[#allocation62_spill] sm:$0xff] }
 0x2ed   : > { %v2203_v59 = vpop.f32.mrf.mxu1  ;;  %v2587_v34 = vpop.f32.mrf.mxu0  ;;  %v2331_v61 = vadd.f32 %v2250_v39, %v9391_v5 }
 0x2ee   : > { %v2248_v24 = vrot.slane %v2203_v59, 7  ;;  %v8432_v2 = vadd.f32 %v2587_v34, %v2330_v41  ;;  %v9396_v41 = vld [vmem:[#allocation59_spill] sm:$0xff] }
 0x2ef   : > { %v5874_v4 = vpop.f32.mrf.mxu1  ;;  %v5970_v62 = vpop.f32.mrf.mxu0 }
 0x2f0   : > { %v2290_v54 = vsel %vm1856_vm3, %v2248_v24, %v9393_v9  ;;  %v2249_v3 = vsel %vm1856_vm3, %v2247_v14, %v2248_v24 }
 0x2f1   : > { %v2291_v38 = vadd.f32 %v2290_v54, %v9394_v28  ;;  %v2592_v47 = vpop.f32.mrf.mxu0  ;;  %v8441_v36 = vpop.f32.mrf.mxu1  ;;  %6204 = vmatmul.mubr.bf16.gmra.mxu1 %v9395_v31  ;;  %6300 = vmatmul.mubr.bf16.gmra.mxu0 %v9349_v20  ;;  %v2332_v39 = vadd.f32 %v2249_v3, %v9396_v41 }
 0x2f2   : > { %v8446_v59 = vadd.f32 %v2592_v47, %v2331_v61  ;;  %6207 = vmatprep.mubr.msk.bf16.mxu1 %vm6487_vm0, %v9294_v19  ;;  %6303 = vmatprep.mubr.msk.bf16.mxu0 %vm6487_vm0, %v9294_v19  ;;  %v9253_v4 = vrot.slane %v8441_v36, 1 }
 0x2f3   : > { %v5973_v14 = vpop.f32.mrf.mxu0  ;;  %v5993_v34 = vpop.f32.mrf.mxu1  ;;  %v2599_v61 = vadd.f32 %v9397_v17, %v2291_v38 }
 0x2f5   : > { %v2595_v5 = vpop.f32.mrf.mxu0  ;;  %v2743_v24 = vpop.f32.mrf.mxu1 }
 0x2f6   : > { %v8454_v62 = vadd.f32 %v2595_v5, %v2332_v39  ;;  %v2908_v20 = vrot.slane %v2743_v24, 1 }
 0x2f7   : > { %v5974_v9 = vpop.f32.mrf.mxu0  ;;  %v5994_v54 = vpop.f32.mrf.mxu1 }
 0x2f8   : > { %v2990_v3 = vsel %vm2949_vm4, %v9253_v4, %v2908_v20 }
 0x2f9   : > { %v2992_v28 = vadd.f32 %v2990_v3, %v2599_v61  ;;  %v2748_v47 = vpop.f32.mrf.mxu1  ;;  %v8461_v41 = vpop.f32.mrf.mxu0  ;;  %6208 = vmatmul.mubr.bf16.gmra.mxu1 %v9364_v44  ;;  %6304 = vmatmul.mubr.bf16.gmra.mxu0 %v9395_v31 }
 0x2fa   : > { %v2909_v39 = vrot.slane %v2748_v47, 1  ;;  %6211 = vmatprep.mubr.msk.bf16.mxu1 %vm6487_vm0, %v9294_v19  ;;  %6307 = vmatprep.mubr.msk.bf16.mxu0 %vm6487_vm0, %v9294_v19 }
 0x2fb   : > { %v5997_v38 = vpop.f32.mrf.mxu1  ;;  %v6093_v14 = vpop.f32.mrf.mxu0 }
 0x2fc   : > { %v2989_v34 = vsel %vm2949_vm4, %v2908_v20, %v2909_v39 }
 0x2fd   : > { %v2993_v5 = vadd.f32 %v2989_v34, %v8128_v21  ;;  %v2751_v24 = vpop.f32.mrf.mxu1  ;;  %v8472_v17 = vpop.f32.mrf.mxu0 }
 0x2fe   : > { %9398 = vst [vmem:[#allocation11_spill] sm:$0xff] %v8472_v17  ;;  %v2910_v61 = vrot.slane %v2751_v24, 1  ;;  %v9255_v20 = vrot.slane %v8472_v17, 1 }
 0x2ff   : > { %v5998_v9 = vpop.f32.mrf.mxu1  ;;  %v6094_v31 = vpop.f32.mrf.mxu0 }
 0x300   : > { %v2988_v54 = vsel %vm2949_vm4, %v2909_v39, %v2910_v61 }
 0x301   : > { %v2994_v3 = vadd.f32 %v2988_v54, %v8135_v8  ;;  %v2756_v47 = vpop.f32.mrf.mxu1  ;;  %v3141_v4 = vpop.f32.mrf.mxu0  ;;  %6212 = vmatmul.mubr.bf16.gmra.mxu1 %v7031_v33  ;;  %6308 = vmatmul.mubr.bf16.gmra.mxu0 %v9364_v44 }
 0x302   : > { %v2911_v21 = vrot.slane %v2756_v47, 1  ;;  %v3302_v38 = vrot.slane %v3141_v4, 1  ;;  %6215 = vmatprep.mubr.msk.bf16.mxu1 %vm6487_vm0, %v9294_v19  ;;  %6311 = vmatprep.mubr.msk.bf16.mxu0 %vm6487_vm0, %v9294_v19 }
 0x303   : > { %v6001_v14 = vpop.f32.mrf.mxu1  ;;  %v6097_v39 = vpop.f32.mrf.mxu0 }
 0x304   : > { %v2987_v8 = vsel %vm2949_vm4, %v2910_v61, %v2911_v21  ;;  %v8490_v44 = vsel %vm2949_vm4, %v9255_v20, %v3302_v38 }
 0x305   : > { %9399 = vst [vmem:[#allocation55_spill] sm:$0xff] %v8490_v44  ;;  %v2995_v34 = vadd.f32 %v2987_v8, %v8144_v37  ;;  %v2759_v4 = vpop.f32.mrf.mxu1  ;;  %v3144_v24 = vpop.f32.mrf.mxu0 }
 0x306   : > { %v2912_v9 = vrot.slane %v2759_v4, 1  ;;  %v3303_v31 = vrot.slane %v3144_v24, 1 }
 0x307   : > { %v6002_v54 = vpop.f32.mrf.mxu1  ;;  %v6098_v47 = vpop.f32.mrf.mxu0 }
 0x308   : > { %v2986_v14 = vsel %vm2949_vm4, %v2911_v21, %v2912_v9  ;;  %v3380_v61 = vsel %vm2949_vm4, %v3302_v38, %v3303_v31 }
 0x309   : > { %v2996_v39 = vadd.f32 %v2986_v14, %v8151_v18  ;;  %v8498_v17 = vadd.f32 %v3380_v61, %v2992_v28  ;;  %v2764_v20 = vpop.f32.mrf.mxu1  ;;  %v3149_v44 = vpop.f32.mrf.mxu0  ;;  %6216 = vmatmul.mubr.bf16.gmra.mxu1 %v7060_v45  ;;  %6312 = vmatmul.mubr.bf16.gmra.mxu0 %v7031_v33 }
 0x30a   : > { %v2913_v37 = vrot.slane %v2764_v20, 1  ;;  %v3304_v8 = vrot.slane %v3149_v44, 1  ;;  %6219 = vmatprep.mubr.msk.bf16.mxu1 %vm6487_vm0, %v9294_v19  ;;  %6315 = vmatprep.mubr.msk.bf16.mxu0 %vm6487_vm0, %v9294_v19 }
 0x30b   : > { %v6005_v21 = vpop.f32.mrf.mxu1  ;;  %v6101_v38 = vpop.f32.mrf.mxu0 }
 0x30c   : > { %v2985_v18 = vsel %vm2949_vm4, %v2912_v9, %v2913_v37  ;;  %v3379_v28 = vsel %vm2949_vm4, %v3303_v31, %v3304_v8 }
 0x30d   : > { %v2997_v4 = vadd.f32 %v2985_v18, %v8160_v48  ;;  %v8511_v24 = vadd.f32 %v3379_v28, %v2993_v5  ;;  %v2767_v33 = vpop.f32.mrf.mxu1  ;;  %v3152_v20 = vpop.f32.mrf.mxu0 }
 0x30e   : > { %v2914_v44 = vrot.slane %v2767_v33, 1  ;;  %v3305_v54 = vrot.slane %v3152_v20, 1 }
 0x30f   : > { %v6006_v47 = vpop.f32.mrf.mxu1  ;;  %v6102_v14 = vpop.f32.mrf.mxu0 }
 0x310   : > { %v2984_v61 = vsel %vm2949_vm4, %v2913_v37, %v2914_v44  ;;  %v3378_v21 = vsel %vm2949_vm4, %v3304_v8, %v3305_v54 }
 0x311   : > { %v2998_v9 = vadd.f32 %v2984_v61, %v8167_v26  ;;  %v8518_v38 = vadd.f32 %v3378_v21, %v2994_v3  ;;  %v2772_v31 = vpop.f32.mrf.mxu1  ;;  %v3157_v48 = vpop.f32.mrf.mxu0  ;;  %6220 = vmatmul.mubr.bf16.gmra.mxu1 %v7084_v43  ;;  %6316 = vmatmul.mubr.bf16.gmra.mxu0 %v7060_v45 }
 0x312   : > { %v2915_v5 = vrot.slane %v2772_v31, 1  ;;  %v3306_v18 = vrot.slane %v3157_v48, 1  ;;  %6223 = vmatprep.mubr.msk.bf16.mxu1 %vm6487_vm0, %v9294_v19  ;;  %6319 = vmatprep.mubr.msk.bf16.mxu0 %vm6487_vm0, %v9294_v19 }
 0x313   : > { %v6009_v37 = vpop.f32.mrf.mxu1  ;;  %v6105_v8 = vpop.f32.mrf.mxu0 }
 0x314   : > { %v2983_v26 = vsel %vm2949_vm4, %v2914_v44, %v2915_v5  ;;  %v3377_v3 = vsel %vm2949_vm4, %v3305_v54, %v3306_v18 }
 0x315   : > { %v2999_v28 = vadd.f32 %v2983_v26, %v8176_v16  ;;  %v8531_v33 = vadd.f32 %v3377_v3, %v2995_v34  ;;  %v2775_v45 = vpop.f32.mrf.mxu1  ;;  %v3160_v20 = vpop.f32.mrf.mxu0 }
 0x316   : > { %v2916_v47 = vrot.slane %v2775_v45, 1  ;;  %v3307_v14 = vrot.slane %v3160_v20, 1 }
 0x317   : > { %v6010_v61 = vpop.f32.mrf.mxu1  ;;  %v6106_v21 = vpop.f32.mrf.mxu0 }
 0x318   : > { %v2982_v31 = vsel %vm2949_vm4, %v2915_v5, %v2916_v47  ;;  %v3376_v48 = vsel %vm2949_vm4, %v3306_v18, %v3307_v14 }
 0x319   : > { %v3000_v44 = vadd.f32 %v2982_v31, %v8183_v23  ;;  %v8538_v37 = vadd.f32 %v3376_v48, %v2996_v39  ;;  %v2780_v54 = vpop.f32.mrf.mxu1  ;;  %v3165_v16 = vpop.f32.mrf.mxu0  ;;  %6224 = vmatmul.mubr.bf16.gmra.mxu1 %v7102_v10  ;;  %6320 = vmatmul.mubr.bf16.gmra.mxu0 %v7084_v43 }
 0x31a   : > { %v2917_v34 = vrot.slane %v2780_v54, 1  ;;  %v3308_v8 = vrot.slane %v3165_v16, 1  ;;  %6227 = vmatprep.mubr.msk.bf16.mxu1 %vm6487_vm0, %v9294_v19  ;;  %6323 = vmatprep.mubr.msk.bf16.mxu0 %vm6487_vm0, %v9294_v19 }
 0x31b   : > { %v6013_v5 = vpop.f32.mrf.mxu1  ;;  %v6109_v18 = vpop.f32.mrf.mxu0 }
 0x31c   : > { %v2981_v23 = vsel %vm2949_vm4, %v2916_v47, %v2917_v34  ;;  %v3375_v39 = vsel %vm2949_vm4, %v3307_v14, %v3308_v8 }
 0x31d   : > { %v3001_v26 = vadd.f32 %v2981_v23, %v8192_v40  ;;  %v8551_v3 = vadd.f32 %v3375_v39, %v2997_v4  ;;  %v2783_v43 = vpop.f32.mrf.mxu1  ;;  %v3168_v45 = vpop.f32.mrf.mxu0 }
 0x31e   : > { %v2918_v20 = vrot.slane %v2783_v43, 1  ;;  %v3309_v61 = vrot.slane %v3168_v45, 1 }
 0x31f   : > { %v6014_v21 = vpop.f32.mrf.mxu1  ;;  %v6110_v31 = vpop.f32.mrf.mxu0 }
 0x320   : > { %v2980_v48 = vsel %vm2949_vm4, %v2917_v34, %v2918_v20  ;;  %v3374_v54 = vsel %vm2949_vm4, %v3308_v8, %v3309_v61 }
 0x321   : > { %v3002_v47 = vadd.f32 %v2980_v48, %v8199_v60  ;;  %v8558_v16 = vadd.f32 %v3374_v54, %v2998_v9  ;;  %v2788_v14 = vpop.f32.mrf.mxu1  ;;  %v3173_v40 = vpop.f32.mrf.mxu0  ;;  %6228 = vmatmul.mubr.bf16.gmra.mxu1 %v7128_v6  ;;  %6324 = vmatmul.mubr.bf16.gmra.mxu0 %v7102_v10 }
 0x322   : > { %v2919_v4 = vrot.slane %v2788_v14, 1  ;;  %v3310_v5 = vrot.slane %v3173_v40, 1  ;;  %6231 = vmatprep.mubr.msk.bf16.mxu1 %vm6487_vm0, %v9294_v19  ;;  %6327 = vmatprep.mubr.msk.bf16.mxu0 %vm6487_vm0, %v9294_v19 }
 0x323   : > { %v6017_v34 = vpop.f32.mrf.mxu1  ;;  %v6113_v8 = vpop.f32.mrf.mxu0 }
 0x324   : > { %v2979_v60 = vsel %vm2949_vm4, %v2918_v20, %v2919_v4  ;;  %v3373_v9 = vsel %vm2949_vm4, %v3309_v61, %v3310_v5 }
 0x325   : > { %v3003_v18 = vadd.f32 %v2979_v60, %v8208_v35  ;;  %v8571_v23 = vadd.f32 %v3373_v9, %v2999_v28  ;;  %v2791_v10 = vpop.f32.mrf.mxu1  ;;  %v3176_v39 = vpop.f32.mrf.mxu0 }
 0x326   : > { %v2920_v43 = vrot.slane %v2791_v10, 1  ;;  %v3311_v45 = vrot.slane %v3176_v39, 1 }
 0x327   : > { %v6018_v21 = vpop.f32.mrf.mxu1  ;;  %v6114_v31 = vpop.f32.mrf.mxu0 }
 0x328   : > { %v2978_v48 = vsel %vm2949_vm4, %v2919_v4, %v2920_v43  ;;  %v3372_v54 = vsel %vm2949_vm4, %v3310_v5, %v3311_v45 }
 0x329   : > { %v3004_v20 = vadd.f32 %v2978_v48, %v8215_v56  ;;  %v8578_v14 = vadd.f32 %v3372_v54, %v3000_v44  ;;  %v2796_v61 = vpop.f32.mrf.mxu1  ;;  %v3181_v35 = vpop.f32.mrf.mxu0  ;;  %6232 = vmatmul.mubr.bf16.gmra.mxu1 %v7152_v22  ;;  %6328 = vmatmul.mubr.bf16.gmra.mxu0 %v7128_v6 }
 0x32a   : > { %v2921_v28 = vrot.slane %v2796_v61, 1  ;;  %v3312_v40 = vrot.slane %v3181_v35, 1  ;;  %6235 = vmatprep.mubr.msk.bf16.mxu1 %vm6487_vm0, %v9294_v19  ;;  %6331 = vmatprep.mubr.msk.bf16.mxu0 %vm6487_vm0, %v9294_v19 }
 0x32b   : > { %v6021_v4 = vpop.f32.mrf.mxu1  ;;  %v6117_v5 = vpop.f32.mrf.mxu0 }
 0x32c   : > { %v2977_v56 = vsel %vm2949_vm4, %v2920_v43, %v2921_v28  ;;  %v3371_v44 = vsel %vm2949_vm4, %v3311_v45, %v3312_v40 }
 0x32d   : > { %v3005_v34 = vadd.f32 %v2977_v56, %v8224_v58  ;;  %v8591_v8 = vadd.f32 %v3371_v44, %v3001_v26  ;;  %v2799_v6 = vpop.f32.mrf.mxu1  ;;  %v3184_v60 = vpop.f32.mrf.mxu0 }
 0x32e   : > { %v2922_v9 = vrot.slane %v2799_v6, 1  ;;  %v3313_v10 = vrot.slane %v3184_v60, 1 }
 0x32f   : > { %v6022_v39 = vpop.f32.mrf.mxu1  ;;  %v6118_v21 = vpop.f32.mrf.mxu0 }
 0x330   : > { %v2976_v31 = vsel %vm2949_vm4, %v2921_v28, %v2922_v9  ;;  %v3370_v48 = vsel %vm2949_vm4, %v3312_v40, %v3313_v10 }
 0x331   : > { %v3006_v43 = vadd.f32 %v2976_v31, %v8231_v13  ;;  %v8598_v54 = vadd.f32 %v3370_v48, %v3002_v47  ;;  %v2804_v45 = vpop.f32.mrf.mxu1  ;;  %v3189_v58 = vpop.f32.mrf.mxu0  ;;  %6236 = vmatmul.mubr.bf16.gmra.mxu1 %v6813_v25  ;;  %6332 = vmatmul.mubr.bf16.gmra.mxu0 %v7152_v22 }
 0x332   : > { %v2923_v26 = vrot.slane %v2804_v45, 1  ;;  %v3314_v61 = vrot.slane %v3189_v58, 1  ;;  %6239 = vmatprep.mubr.msk.bf16.mxu1 %vm6487_vm0, %v9294_v19  ;;  %6335 = vmatprep.mubr.msk.bf16.mxu0 %vm6487_vm0, %v9294_v19 }
 0x333   : > { %v6025_v35 = vpop.f32.mrf.mxu1  ;;  %v6121_v28 = vpop.f32.mrf.mxu0 }
 0x334   : > { %v2975_v13 = vsel %vm2949_vm4, %v2922_v9, %v2923_v26  ;;  %v3369_v47 = vsel %vm2949_vm4, %v3313_v10, %v3314_v61 }
 0x335   : > { %v3007_v40 = vadd.f32 %v2975_v13, %v8240_v11  ;;  %v8611_v4 = vadd.f32 %v3369_v47, %v3003_v18  ;;  %v2807_v22 = vpop.f32.mrf.mxu1  ;;  %v3192_v5 = vpop.f32.mrf.mxu0 }
 0x336   : > { %v2924_v56 = vrot.slane %v2807_v22, 1  ;;  %v3315_v44 = vrot.slane %v3192_v5, 1 }
 0x337   : > { %v6026_v6 = vpop.f32.mrf.mxu1  ;;  %v6122_v60 = vpop.f32.mrf.mxu0 }
 0x338   : > { %v2974_v39 = vsel %vm2949_vm4, %v2923_v26, %v2924_v56  ;;  %v3368_v21 = vsel %vm2949_vm4, %v3314_v61, %v3315_v44 }
 0x339   : > { %v3008_v9 = vadd.f32 %v2974_v39, %v8247_v29  ;;  %v8618_v31 = vadd.f32 %v3368_v21, %v3004_v20  ;;  %v2812_v10 = vpop.f32.mrf.mxu1  ;;  %v3197_v11 = vpop.f32.mrf.mxu0  ;;  %6240 = vmatmul.mubr.bf16.gmra.mxu1 %v6855_v0  ;;  %6336 = vmatmul.mubr.bf16.gmra.mxu0 %v6813_v25 }
 0x33a   : > { %v2925_v18 = vrot.slane %v2812_v10, 1  ;;  %v3316_v48 = vrot.slane %v3197_v11, 1  ;;  %6243 = vmatprep.mubr.msk.bf16.mxu1 %vm6487_vm0, %v9294_v19  ;;  %6339 = vmatprep.mubr.msk.bf16.mxu0 %vm6487_vm0, %v9294_v19 }
 0x33b   : > { %v6029_v45 = vpop.f32.mrf.mxu1  ;;  %v6125_v58 = vpop.f32.mrf.mxu0 }
 0x33c   : > { %v2973_v29 = vsel %vm2949_vm4, %v2924_v56, %v2925_v18  ;;  %v3367_v20 = vsel %vm2949_vm4, %v3315_v44, %v3316_v48 }
 0x33d   : > { %v3009_v26 = vadd.f32 %v2973_v29, %v8256_v7  ;;  %v8631_v61 = vadd.f32 %v3367_v20, %v3005_v34  ;;  %v2815_v25 = vpop.f32.mrf.mxu1  ;;  %v3200_v35 = vpop.f32.mrf.mxu0 }
 0x33e   : > { %v2926_v28 = vrot.slane %v2815_v25, 1  ;;  %v3317_v13 = vrot.slane %v3200_v35, 1 }
 0x33f   : > { %v6030_v47 = vpop.f32.mrf.mxu1  ;;  %v6126_v22 = vpop.f32.mrf.mxu0 }
 0x340   : > { %v2972_v5 = vsel %vm2949_vm4, %v2925_v18, %v2926_v28  ;;  %v3366_v6 = vsel %vm2949_vm4, %v3316_v48, %v3317_v13 }
 0x341   : > { %v3010_v56 = vadd.f32 %v2972_v5, %v8263_v30  ;;  %v8638_v60 = vadd.f32 %v3366_v6, %v3006_v43  ;;  %v2820_v44 = vpop.f32.mrf.mxu1  ;;  %v3205_v7 = vpop.f32.mrf.mxu0  ;;  %6244 = vmatmul.mubr.bf16.gmra.mxu1 %v6903_v49  ;;  %6340 = vmatmul.mubr.bf16.gmra.mxu0 %v6855_v0 }
 0x342   : > { %v2927_v34 = vrot.slane %v2820_v44, 1  ;;  %v3318_v39 = vrot.slane %v3205_v7, 1  ;;  %6247 = vmatprep.mubr.msk.bf16.mxu1 %vm6487_vm0, %v9294_v19  ;;  %6343 = vmatprep.mubr.msk.bf16.mxu0 %vm6487_vm0, %v9294_v19 }
 0x343   : > { %v6033_v21 = vpop.f32.mrf.mxu1  ;;  %v6129_v10 = vpop.f32.mrf.mxu0 }
 0x344   : > { %v2971_v30 = vsel %vm2949_vm4, %v2926_v28, %v2927_v34  ;;  %v3365_v43 = vsel %vm2949_vm4, %v3317_v13, %v3318_v39 }
 0x345   : > { %v3011_v11 = vadd.f32 %v2971_v30, %v8272_v52  ;;  %v8651_v18 = vadd.f32 %v3365_v43, %v3007_v40  ;;  %v2823_v0 = vpop.f32.mrf.mxu1  ;;  %v3208_v48 = vpop.f32.mrf.mxu0 }
 0x346   : > { %v2928_v45 = vrot.slane %v2823_v0, 1  ;;  %v3319_v58 = vrot.slane %v3208_v48, 1 }
 0x347   : > { %v6034_v29 = vpop.f32.mrf.mxu1  ;;  %v6130_v20 = vpop.f32.mrf.mxu0 }
 0x348   : > { %v2970_v25 = vsel %vm2949_vm4, %v2927_v34, %v2928_v45  ;;  %v3364_v35 = vsel %vm2949_vm4, %v3318_v39, %v3319_v58 }
 0x349   : > { %v3012_v28 = vadd.f32 %v2970_v25, %v8279_v51  ;;  %v8658_v47 = vadd.f32 %v3364_v35, %v3008_v9  ;;  %v2828_v13 = vpop.f32.mrf.mxu1  ;;  %v3213_v52 = vpop.f32.mrf.mxu0  ;;  %6248 = vmatmul.mubr.bf16.gmra.mxu1 %v6951_v42  ;;  %6344 = vmatmul.mubr.bf16.gmra.mxu0 %v6903_v49 }
 0x34a   : > { %v2929_v40 = vrot.slane %v2828_v13, 1  ;;  %v3320_v22 = vrot.slane %v3213_v52, 1  ;;  %6251 = vmatprep.mubr.msk.bf16.mxu1 %vm6487_vm0, %v9294_v19  ;;  %6347 = vmatprep.mubr.msk.bf16.mxu0 %vm6487_vm0, %v9294_v19 }
 0x34b   : > { %v6037_v5 = vpop.f32.mrf.mxu1  ;;  %v6133_v6 = vpop.f32.mrf.mxu0 }
 0x34c   : > { %v2969_v51 = vsel %vm2949_vm4, %v2928_v45, %v2929_v40  ;;  %v3363_v9 = vsel %vm2949_vm4, %v3319_v58, %v3320_v22 }
 0x34d   : > { %v3013_v44 = vadd.f32 %v2969_v51, %v8288_v55  ;;  %v8671_v7 = vadd.f32 %v3363_v9, %v3009_v26  ;;  %v2831_v49 = vpop.f32.mrf.mxu1  ;;  %v3216_v34 = vpop.f32.mrf.mxu0 }
 0x34e   : > { %v2930_v39 = vrot.slane %v2831_v49, 1  ;;  %v3321_v21 = vrot.slane %v3216_v34, 1 }
 0x34f   : > { %v6038_v10 = vpop.f32.mrf.mxu1  ;;  %v6134_v30 = vpop.f32.mrf.mxu0 }
 0x350   : > { %v2968_v43 = vsel %vm2949_vm4, %v2929_v40, %v2930_v39  ;;  %v3362_v0 = vsel %vm2949_vm4, %v3320_v22, %v3321_v21 }
 0x351   : > { %v3014_v48 = vadd.f32 %v2968_v43, %v8295_v63  ;;  %v8678_v45 = vadd.f32 %v3362_v0, %v3010_v56  ;;  %v2836_v58 = vpop.f32.mrf.mxu1  ;;  %v3221_v55 = vpop.f32.mrf.mxu0  ;;  %6252 = vmatmul.mubr.bf16.gmra.mxu1 %v6999_v57  ;;  %6348 = vmatmul.mubr.bf16.gmra.mxu0 %v6951_v42 }
 0x352   : > { %v2931_v26 = vrot.slane %v2836_v58, 1  ;;  %v3322_v29 = vrot.slane %v3221_v55, 1  ;;  %6255 = vmatprep.mubr.msk.bf16.mxu1 %vm6487_vm0, %v9294_v19  ;;  %6351 = vmatprep.mubr.msk.bf16.mxu0 %vm6487_vm0, %v9294_v19 }
 0x353   : > { %v6041_v20 = vpop.f32.mrf.mxu1  ;;  %v6137_v25 = vpop.f32.mrf.mxu0 }
 0x354   : > { %v2967_v63 = vsel %vm2949_vm4, %v2930_v39, %v2931_v26  ;;  %v3361_v56 = vsel %vm2949_vm4, %v3321_v21, %v3322_v29 }
 0x355   : > { %v3015_v35 = vadd.f32 %v2967_v63, %v8304_v46  ;;  %v8691_v13 = vadd.f32 %v3361_v56, %v3011_v11  ;;  %v2839_v42 = vpop.f32.mrf.mxu1  ;;  %v3224_v52 = vpop.f32.mrf.mxu0 }
 0x356   : > { %v2932_v40 = vrot.slane %v2839_v42, 1  ;;  %v3323_v22 = vrot.slane %v3224_v52, 1 }
 0x357   : > { %v6042_v5 = vpop.f32.mrf.mxu1  ;;  %v6138_v6 = vpop.f32.mrf.mxu0 }
 0x358   : > { %v2966_v51 = vsel %vm2949_vm4, %v2931_v26, %v2932_v40  ;;  %v3360_v9 = vsel %vm2949_vm4, %v3322_v29, %v3323_v22  ;;  %v9400_v6 = vld [vmem:[#allocation61_spill] sm:$0xff] }
 0x359   : > { %v3016_v49 = vadd.f32 %v2966_v51, %v8311_v1  ;;  %v8698_v34 = vadd.f32 %v3360_v9, %v3012_v28  ;;  %v2844_v39 = vpop.f32.mrf.mxu1  ;;  %v3229_v46 = vpop.f32.mrf.mxu0  ;;  %6256 = vmatmul.mubr.bf16.gmra.mxu1 %v7033_v27  ;;  %6352 = vmatmul.mubr.bf16.gmra.mxu0 %v6999_v57 }
 0x35a   : > { %v2933_v11 = vrot.slane %v2844_v39, 1  ;;  %v3324_v21 = vrot.slane %v3229_v46, 1  ;;  %6259 = vmatprep.mubr.msk.bf16.mxu1 %vm6487_vm0, %v9294_v19  ;;  %6355 = vmatprep.mubr.msk.bf16.mxu0 %vm6487_vm0, %v9294_v19 }
 0x35b   : > { %v6045_v10 = vpop.f32.mrf.mxu1  ;;  %v6141_v30 = vpop.f32.mrf.mxu0 }
 0x35c   : > { %v2965_v1 = vsel %vm2949_vm4, %v2932_v40, %v2933_v11  ;;  %v3359_v28 = vsel %vm2949_vm4, %v3323_v22, %v3324_v21 }
 0x35d   : > { %v3017_v43 = vadd.f32 %v2965_v1, %v8320_v15  ;;  %v8711_v0 = vadd.f32 %v3359_v28, %v3013_v44  ;;  %v2847_v57 = vpop.f32.mrf.mxu1  ;;  %v3232_v58 = vpop.f32.mrf.mxu0  ;;  %v9401_v28 = vld [vmem:[#allocation63_spill] sm:$0xff] }
 0x35e   : > { %v2934_v55 = vrot.slane %v2847_v57, 1  ;;  %v3325_v26 = vrot.slane %v3232_v58, 1 }
 0x35f   : > { %v6046_v29 = vpop.f32.mrf.mxu1  ;;  %v6142_v20 = vpop.f32.mrf.mxu0 }
 0x360   : > { %v2964_v25 = vsel %vm2949_vm4, %v2933_v11, %v2934_v55  ;;  %v3358_v63 = vsel %vm2949_vm4, %v3324_v21, %v3325_v26 }
 0x361   : > { %v3018_v56 = vadd.f32 %v2964_v25, %v8327_v12  ;;  %v8718_v42 = vadd.f32 %v3358_v63, %v3014_v48  ;;  %v2852_v52 = vpop.f32.mrf.mxu1  ;;  %v3237_v15 = vpop.f32.mrf.mxu0  ;;  %6260 = vmatmul.mubr.bf16.gmra.mxu1 %v7062_v53  ;;  %6356 = vmatmul.mubr.bf16.gmra.mxu0 %v7033_v27 }
 0x362   : > { %v2935_v44 = vrot.slane %v2852_v52, 1  ;;  %v3326_v40 = vrot.slane %v3237_v15, 1  ;;  %6263 = vmatprep.mubr.msk.bf16.mxu1 %vm6487_vm0, %v9294_v19  ;;  %6359 = vmatprep.mubr.msk.bf16.mxu0 %vm6487_vm0, %v9294_v19  ;;  %v9402_v52 = vld [vmem:[#allocation26_spill] sm:$0xff] }
 0x363   : > { %v6049_v22 = vpop.f32.mrf.mxu1  ;;  %v6145_v5 = vpop.f32.mrf.mxu0 }
 0x364   : > { %v2963_v12 = vsel %vm2949_vm4, %v2934_v55, %v2935_v44  ;;  %v3357_v48 = vsel %vm2949_vm4, %v3325_v26, %v3326_v40 }
 0x365   : > { %v3019_v51 = vadd.f32 %v2963_v12, %v9400_v6  ;;  %v8731_v9 = vadd.f32 %v3357_v48, %v3015_v35  ;;  %v2855_v27 = vpop.f32.mrf.mxu1  ;;  %v3240_v39 = vpop.f32.mrf.mxu0 }
 0x366   : > { %v2936_v46 = vrot.slane %v2855_v27, 1  ;;  %v3327_v11 = vrot.slane %v3240_v39, 1  ;;  %v9403_v39 = vld [vmem:[#allocation64_spill] sm:$0xff] }
 0x367   : > { %v6050_v21 = vpop.f32.mrf.mxu1  ;;  %v6146_v10 = vpop.f32.mrf.mxu0 }
 0x368   : > { %v2962_v30 = vsel %vm2949_vm4, %v2935_v44, %v2936_v46  ;;  %v3356_v1 = vsel %vm2949_vm4, %v3326_v40, %v3327_v11 }
 0x369   : > { %v3020_v57 = vadd.f32 %v2962_v30, %v9401_v28  ;;  %v8738_v58 = vadd.f32 %v3356_v1, %v3016_v49  ;;  %v2860_v55 = vpop.f32.mrf.mxu1  ;;  %v3245_v26 = vpop.f32.mrf.mxu0  ;;  %6264 = vmatmul.mubr.bf16.gmra.mxu1 %v7086_v32  ;;  %6360 = vmatmul.mubr.bf16.gmra.mxu0 %v7062_v53 }
 0x36a   : > { %v2937_v35 = vrot.slane %v2860_v55, 1  ;;  %v3328_v29 = vrot.slane %v3245_v26, 1  ;;  %6267 = vmatprep.mubr.msk.bf16.mxu1 %vm6487_vm0, %v9294_v19  ;;  %6363 = vmatprep.mubr.msk.bf16.mxu0 %vm6487_vm0, %v9294_v19 }
 0x36b   : > { %v6053_v20 = vpop.f32.mrf.mxu1  ;;  %v6149_v25 = vpop.f32.mrf.mxu0 }
 0x36c   : > { %v2961_v49 = vsel %vm2949_vm4, %v2936_v46, %v2937_v35  ;;  %v3355_v63 = vsel %vm2949_vm4, %v3327_v11, %v3328_v29 }
 0x36d   : > { %v3021_v15 = vadd.f32 %v2961_v49, %v9402_v52  ;;  %v8751_v44 = vadd.f32 %v3355_v63, %v3017_v43  ;;  %v2863_v53 = vpop.f32.mrf.mxu1  ;;  %v3248_v40 = vpop.f32.mrf.mxu0  ;;  %v9404_v43 = vld [vmem:[#allocation43_spill] sm:$0xff] }
 0x36e   : > { %v2938_v22 = vrot.slane %v2863_v53, 1  ;;  %v3329_v5 = vrot.slane %v3248_v40, 1 }
 0x36f   : > { %v6054_v12 = vpop.f32.mrf.mxu1  ;;  %v6150_v48 = vpop.f32.mrf.mxu0 }
 0x370   : > { %v2960_v6 = vsel %vm2949_vm4, %v2937_v35, %v2938_v22  ;;  %v3354_v27 = vsel %vm2949_vm4, %v3328_v29, %v3329_v5  ;;  %v9405_v35 = vld [vmem:[#allocation65_spill] sm:$0xff] }
 0x371   : > { %v3022_v46 = vadd.f32 %v2960_v6, %v9403_v39  ;;  %v8758_v21 = vadd.f32 %v3354_v27, %v3018_v56  ;;  %v2868_v11 = vpop.f32.mrf.mxu1  ;;  %v3253_v10 = vpop.f32.mrf.mxu0  ;;  %6268 = vmatmul.mubr.bf16.gmra.mxu1 %v9404_v43  ;;  %6364 = vmatmul.mubr.bf16.gmra.mxu0 %v7086_v32 }
 0x372   : > { %v2939_v30 = vrot.slane %v2868_v11, 1  ;;  %v3330_v1 = vrot.slane %v3253_v10, 1  ;;  %6271 = vmatprep.mubr.msk.bf16.mxu1 %vm6487_vm0, %v9294_v19  ;;  %6367 = vmatprep.mubr.msk.bf16.mxu0 %vm6487_vm0, %v9294_v19 }
 0x373   : > { %v6057_v28 = vpop.f32.mrf.mxu1  ;;  %v6153_v55 = vpop.f32.mrf.mxu0 }
 0x374   : > { %v2959_v56 = vsel %vm2949_vm4, %v2938_v22, %v2939_v30  ;;  %v3353_v26 = vsel %vm2949_vm4, %v3329_v5, %v3330_v1  ;;  %v9406_v22 = vld [vmem:[#allocation66_spill] sm:$0xff]  ;;  %v9408_v28 = vld [vmem:[#allocation67_spill] sm:$0xff] }
 0x375   : > { %v3023_v29 = vadd.f32 %v2959_v56, %v9405_v35  ;;  %v8771_v20 = vadd.f32 %v3353_v26, %v3019_v51  ;;  %v2871_v32 = vpop.f32.mrf.mxu1  ;;  %v3256_v25 = vpop.f32.mrf.mxu0  ;;  %v9407_v51 = vld [vmem:[#allocation48_spill] sm:$0xff] }
 0x376   : > { %v2940_v49 = vrot.slane %v2871_v32, 1  ;;  %v3331_v63 = vrot.slane %v3256_v25, 1 }
 0x377   : > { %v6058_v52 = vpop.f32.mrf.mxu1  ;;  %v6154_v53 = vpop.f32.mrf.mxu0 }
 0x378   : > { %v2958_v40 = vsel %vm2949_vm4, %v2939_v30, %v2940_v49  ;;  %v3352_v12 = vsel %vm2949_vm4, %v3330_v1, %v3331_v63 }
 0x379   : > { %v3024_v48 = vadd.f32 %v2958_v40, %v9406_v22  ;;  %v8778_v6 = vadd.f32 %v3352_v12, %v3020_v57  ;;  %v2876_v5 = vpop.f32.mrf.mxu1  ;;  %v3261_v27 = vpop.f32.mrf.mxu0  ;;  %6272 = vmatmul.mubr.bf16.gmra.mxu1 %v9407_v51  ;;  %6368 = vmatmul.mubr.bf16.gmra.mxu0 %v9404_v43 }
 0x37a   : > { %v2941_v39 = vrot.slane %v2876_v5, 1  ;;  %v3332_v11 = vrot.slane %v3261_v27, 1  ;;  %6371 = vmatprep.mubr.msk.bf16.mxu0 %vm6487_vm0, %v9294_v19 }
 0x37b   : > { %v6061_v10 = vpop.f32.mrf.mxu1  ;;  %v6157_v30 = vpop.f32.mrf.mxu0 }
 0x37c   : > { %v2957_v1 = vsel %vm2949_vm4, %v2940_v49, %v2941_v39  ;;  %v3351_v57 = vsel %vm2949_vm4, %v3331_v63, %v3332_v11  ;;  %v9409_v49 = vld [vmem:[#allocation51_spill] sm:$0xff] }
 0x37d   : > { %v3025_v55 = vadd.f32 %v2957_v1, %v9408_v28  ;;  %v8789_v56 = vadd.f32 %v3351_v57, %v3021_v15  ;;  %v2879_v26 = vpop.f32.mrf.mxu1  ;;  %v3264_v35 = vpop.f32.mrf.mxu0  ;;  %v9410_v1 = vld [vmem:[#allocation52_spill] sm:$0xff] }
 0x37e   : > { %v2942_v43 = vrot.slane %v2879_v26, 1  ;;  %v3333_v32 = vrot.slane %v3264_v35, 1 }
 0x37f   : > { %v6062_v25 = vpop.f32.mrf.mxu1  ;;  %v6158_v52 = vpop.f32.mrf.mxu0 }
 0x380   : > { %v2956_v19 = vsel %vm2949_vm4, %v2941_v39, %v2942_v43  ;;  %v3350_v53 = vsel %vm2949_vm4, %v3332_v11, %v3333_v32 }
 0x381   : > { %v3026_v40 = vadd.f32 %v2956_v19, %v9409_v49  ;;  %v8796_v12 = vadd.f32 %v3350_v53, %v3022_v46  ;;  %v2884_v63 = vpop.f32.mrf.mxu1  ;;  %v3269_v22 = vpop.f32.mrf.mxu0  ;;  %6372 = vmatmul.mubr.bf16.gmra.mxu0 %v9407_v51 }
 0x382   : > { %v2943_v15 = vrot.slane %v2884_v63, 1  ;;  %v3334_v5 = vrot.slane %v3269_v22, 1 }
 0x383   : > { %v6065_v27 = vpop.f32.mrf.mxu1  ;;  %v6161_v10 = vpop.f32.mrf.mxu0 }
 0x384   : > { %v2955_v30 = vsel %vm2949_vm4, %v2942_v43, %v2943_v15  ;;  %v3349_v39 = vsel %vm2949_vm4, %v3333_v32, %v3334_v5  ;;  %v9411_v43 = vld [vmem:[#allocation6_spill] sm:$0xff] }
 0x385   : > { %v3027_v11 = vadd.f32 %v2955_v30, %v9410_v1  ;;  %v8804_v57 = vadd.f32 %v3349_v39, %v3023_v29  ;;  %v2887_v46 = vpop.f32.mrf.mxu1  ;;  %v3272_v28 = vpop.f32.mrf.mxu0 }
 0x386   : > { %v2944_v26 = vrot.slane %v2887_v46, 1  ;;  %v3335_v35 = vrot.slane %v3272_v28, 1 }
 0x387   : > { %v6066_v25 = vpop.f32.mrf.mxu1  ;;  %v6162_v51 = vpop.f32.mrf.mxu0 }
 0x388   : > { %v2954_v52 = vsel %vm2949_vm4, %v2943_v15, %v2944_v26  ;;  %v3348_v19 = vsel %vm2949_vm4, %v3334_v5, %v3335_v35  ;;  %v9412_v15 = vld [vmem:[#allocation53_spill] sm:$0xff] }
 0x389   : > { %v3028_v53 = vadd.f32 %v2954_v52, %v9411_v43  ;;  %v8811_v49 = vadd.f32 %v3348_v19, %v3024_v48  ;;  %v2892_v32 = vpop.f32.mrf.mxu1  ;;  %v3277_v63 = vpop.f32.mrf.mxu0 }
 0x38a   : > { %v2945_v29 = vrot.slane %v2892_v32, 1  ;;  %v3336_v22 = vrot.slane %v3277_v63, 1 }
 0x38b   : > { %v6069_v27 = vpop.f32.mrf.mxu1  ;;  %v6165_v10 = vpop.f32.mrf.mxu0 }
 0x38c   : > { %v2953_v30 = vsel %vm2949_vm4, %v2944_v26, %v2945_v29  ;;  %v3347_v39 = vsel %vm2949_vm4, %v3335_v35, %v3336_v22  ;;  %v9413_v26 = vld [vmem:[#allocation54_spill] sm:$0xff] }
 0x38d   : > { %v3029_v1 = vadd.f32 %v2953_v30, %v9412_v15  ;;  %v8818_v46 = vadd.f32 %v3347_v39, %v3025_v55  ;;  %v2895_v5 = vpop.f32.mrf.mxu1  ;;  %v3280_v28 = vpop.f32.mrf.mxu0 }
 0x38e   : > { %v2946_v48 = vrot.slane %v2895_v5, 1  ;;  %v3337_v25 = vrot.slane %v3280_v28, 1 }
 0x38f   : > { %v6070_v51 = vpop.f32.mrf.mxu1  ;;  %v6166_v52 = vpop.f32.mrf.mxu0 }
 0x390   : > { %v2952_v19 = vsel %vm2949_vm4, %v2945_v29, %v2946_v48  ;;  %v3346_v43 = vsel %vm2949_vm4, %v3336_v22, %v3337_v25 }
 0x391   : > { %v3030_v32 = vadd.f32 %v2952_v19, %v9413_v26  ;;  %v8825_v63 = vadd.f32 %v3346_v43, %v3026_v40  ;;  %v2900_v35 = vpop.f32.mrf.mxu1  ;;  %v3285_v27 = vpop.f32.mrf.mxu0  ;;  %v3300_v26 = vrot.slane %v8461_v41, 1  ;;  %v9415_v41 = vld [vmem:[#allocation11_spill] sm:$0xff] }
 0x392   : > { %v2947_v55 = vrot.slane %v2900_v35, 1  ;;  %v3338_v10 = vrot.slane %v3285_v27, 1 }
 0x393   : > { %v6073_v30 = vpop.f32.mrf.mxu1  ;;  %v6169_v39 = vpop.f32.mrf.mxu0 }
 0x394   : > { %v2951_v15 = vsel %vm2949_vm4, %v2946_v48, %v2947_v55  ;;  %v3345_v5 = vsel %vm2949_vm4, %v3337_v25, %v3338_v10  ;;  %v9414_v48 = vrot.slane %v8441_v36, 1 }
 0x395   : > { %v3031_v29 = vadd.f32 %v2951_v15, %v8432_v2  ;;  %v8832_v28 = vadd.f32 %v3345_v5, %v3027_v11  ;;  %v2903_v22 = vpop.f32.mrf.mxu1  ;;  %v3288_v51 = vpop.f32.mrf.mxu0  ;;  %v9416_v5 = vrot.slane %v9415_v41, 1 }
 0x396   : > { %v2948_v40 = vrot.slane %v2903_v22, 1  ;;  %v3339_v52 = vrot.slane %v3288_v51, 1 }
 0x397   : > { %v6074_v19 = vpop.f32.mrf.mxu1  ;;  %v6170_v43 = vpop.f32.mrf.mxu0  ;;  %v3382_v36 = vsel %vm2949_vm4, %v3300_v26, %v9416_v5 }
 0x398   : > { %v2950_v35 = vsel %vm2949_vm4, %v2947_v55, %v2948_v40  ;;  %v2991_v25 = vsel %vm2949_vm4, %v2948_v40, %v9414_v48  ;;  %v3344_v2 = vsel %vm2949_vm4, %v3338_v10, %v3339_v52  ;;  %v9417_v19 = vld [vmem:[#allocation55_spill] sm:$0xff] }
 0x399   : > { %v3032_v11 = vadd.f32 %v2950_v35, %v8446_v59  ;;  %v3033_v27 = vadd.f32 %v2991_v25, %v8454_v62  ;;  %v8845_v30 = vadd.f32 %v3344_v2, %v3028_v53  ;;  %v3293_v39 = vpop.f32.mrf.mxu0  ;;  %v8847_v15 = vpop.f32.mrf.mxu1 }
 0x39a   : > { %v3340_v55 = vrot.slane %v3293_v39, 1 }
 0x39b   : > { %v6173_v22 = vpop.f32.mrf.mxu0  ;;  %v6193_v51 = vpop.f32.mrf.mxu1  ;;  %v3424_v40 = vadd.f32 %v3382_v36, %v3032_v11  ;;  %v3425_v10 = vadd.f32 %v9417_v19, %v3033_v27 }
 0x39c   : > { %v3343_v59 = vsel %vm2949_vm4, %v3339_v52, %v3340_v55 }
 0x39d   : > { %v8856_v62 = vadd.f32 %v3343_v59, %v3029_v1  ;;  %v3296_v53 = vpop.f32.mrf.mxu0  ;;  %v3528_v43 = vpop.f32.mrf.mxu1 }
 0x39e   : > { %v3341_v35 = vrot.slane %v3296_v53, 1  ;;  %v3693_v36 = vrot.slane %v3528_v43, 2 }
 0x39f   : > { %v6174_v48 = vpop.f32.mrf.mxu0  ;;  %v6194_v25 = vpop.f32.mrf.mxu1 }
 0x3a0   : > { %v3342_v2 = vsel %vm2949_vm4, %v3340_v55, %v3341_v35  ;;  %v3383_v39 = vsel %vm2949_vm4, %v3341_v35, %v3300_v26  ;;  %v9256_v55 = vrot.slane %v8847_v15, 2 }
 0x3a1   : > { %v8862_v41 = vadd.f32 %v3342_v2, %v3030_v32  ;;  %v8864_v11 = vadd.f32 %v3383_v39, %v3031_v29  ;;  %v3533_v27 = vpop.f32.mrf.mxu1  ;;  %v8866_v5 = vpop.f32.mrf.mxu0 }
 0x3a2   : > { %9420 = vst [vmem:[#allocation58_spill] sm:$0xff] %v8866_v5  ;;  %v3694_v22 = vrot.slane %v3533_v27, 2  ;;  %v3775_v29 = vsel %vm3734_vm5, %v9256_v55, %v3693_v36  ;;  %v9258_v43 = vrot.slane %v8866_v5, 3 }
 0x3a3   : > { %9418 = vst [vmem:[#allocation56_spill] sm:$0xff] %v8862_v41  ;;  %9419 = vst [vmem:[#allocation57_spill] sm:$0xff] %v8864_v11  ;;  %v6197_v1 = vpop.f32.mrf.mxu1  ;;  %v6293_v52 = vpop.f32.mrf.mxu0  ;;  %v3817_v27 = vadd.f32 %v3775_v29, %v3424_v40 }
 0x3a4   : > { %v3774_v53 = vsel %vm3734_vm5, %v3693_v36, %v3694_v22 }
 0x3a5   : > { %v3536_v51 = vpop.f32.mrf.mxu1  ;;  %v3921_v19 = vpop.f32.mrf.mxu0  ;;  %v3818_v1 = vadd.f32 %v3774_v53, %v3425_v10 }
 0x3a6   : > { %v4086_v59 = vrot.slane %v3921_v19, 3  ;;  %v3695_v35 = vrot.slane %v3536_v51, 2 }
 0x3a7   : > { %v6198_v32 = vpop.f32.mrf.mxu1  ;;  %v6294_v26 = vpop.f32.mrf.mxu0 }
 0x3a8   : > { %v4168_v2 = vsel %vm4127_vm6, %v9258_v43, %v4086_v59  ;;  %v3773_v32 = vsel %vm3734_vm5, %v3694_v22, %v3695_v35 }
 0x3a9   : > { %v3541_v48 = vpop.f32.mrf.mxu1  ;;  %v3926_v25 = vpop.f32.mrf.mxu0  ;;  %v8886_v26 = vadd.f32 %v4168_v2, %v3817_v27  ;;  %v3777_v10 = vadd.f32 %v3773_v32, %v8498_v17 }
 0x3aa   : > { %v4087_v39 = vrot.slane %v3926_v25, 3  ;;  %v3696_v36 = vrot.slane %v3541_v48, 2 }
 0x3ab   : > { %v6201_v52 = vpop.f32.mrf.mxu1  ;;  %v6297_v19 = vpop.f32.mrf.mxu0  ;;  %9421 = vst [vmem:[#allocation16_spill] sm:$0xff] %v8886_v26 }
 0x3ac   : > { %v4167_v51 = vsel %vm4127_vm6, %v4086_v59, %v4087_v39  ;;  %v3772_v53 = vsel %vm3734_vm5, %v3695_v35, %v3696_v36  ;;  %v9423_v35 = vld [vmem:[#allocation3_spill] sm:$0xff] }
 0x3ad   : > { %v8888_v55 = vadd.f32 %v4167_v51, %v3818_v1  ;;  %v3544_v5 = vpop.f32.mrf.mxu1  ;;  %v3929_v11 = vpop.f32.mrf.mxu0 }
 0x3ae   : > { %v4088_v40 = vrot.slane %v3929_v11, 3  ;;  %v3697_v48 = vrot.slane %v3544_v5, 2  ;;  %v3778_v11 = vadd.f32 %v3772_v53, %v8511_v24  ;;  %v9424_v24 = vld [vmem:[#allocation5_spill] sm:$0xff] }
 0x3af   : > { %9422 = vst [vmem:[#allocation62_spill] sm:$0xff] %v8888_v55  ;;  %v5172_v22 = vpack.c.bf16 %v8888_v55, %v8886_v26  ;;  %v6202_v59 = vpop.f32.mrf.mxu1  ;;  %v6298_v29 = vpop.f32.mrf.mxu0 }
 0x3b0   : > { %v4166_v25 = vsel %vm4127_vm6, %v4087_v39, %v4088_v40  ;;  %v3771_v32 = vsel %vm3734_vm5, %v3696_v36, %v3697_v48 }
 0x3b1   : > { %5213 = vst [vmem:[%s8895_s29 + $0xa0] sm:$0xff] %v5172_v22   ;;  %v4170_v2 = vadd.f32 %v4166_v25, %v3777_v10  ;;  %v3549_v27 = vpop.f32.mrf.mxu1  ;;  %v3934_v1 = vpop.f32.mrf.mxu0  ;;  %v3779_v25 = vadd.f32 %v3771_v32, %v8518_v38 }
 0x3b2   : > { %v4089_v52 = vrot.slane %v3934_v1, 3  ;;  %v3698_v51 = vrot.slane %v3549_v27, 2 }
 0x3b3   : > { %v6205_v17 = vpop.f32.mrf.mxu1  ;;  %v6301_v19 = vpop.f32.mrf.mxu0  ;;  %v4422_v59 = vmul.f32 %v4170_v2, %v9423_v35 }
 0x3b4   : > { %v4165_v5 = vsel %vm4127_vm6, %v4088_v40, %v4089_v52  ;;  %v3770_v36 = vsel %vm3734_vm5, %v3697_v48, %v3698_v51 }
 0x3b5   : > { %v4171_v39 = vadd.f32 %v4165_v5, %v3778_v11  ;;  %v3552_v22 = vpop.f32.mrf.mxu1  ;;  %v3937_v10 = vpop.f32.mrf.mxu0  ;;  %v4511_v43 = vmul.f32 %v4422_v59, %v4170_v2  ;;  %v3780_v32 = vadd.f32 %v3770_v36, %v8531_v33 }
 0x3b6   : > { %v4090_v29 = vrot.slane %v3937_v10, 3  ;;  %v3699_v27 = vrot.slane %v3552_v22, 2  ;;  %v9471_v50 = vld [vmem:[#allocation62_spill] sm:$0xff] }
 0x3b7   : > { %v5072_v1 = vpack.c.bf16 %v4171_v39, %v4170_v2  ;;  %v4423_v53 = vmul.f32 %v4171_v39, %v9424_v24  ;;  %v6206_v17 = vpop.f32.mrf.mxu1  ;;  %v6302_v19 = vpop.f32.mrf.mxu0 }
 0x3b8   : > { %v4164_v40 = vsel %vm4127_vm6, %v4089_v52, %v4090_v29  ;;  %v9425_v17 = vld [vmem:[#allocation8_spill] sm:$0xff]  ;;  %v3769_v48 = vsel %vm3734_vm5, %v3698_v51, %v3699_v27 }
 0x3b9   : > { %5073 = vst [vmem:[%s8895_s29] sm:$0xff] %v5072_v1   ;;  %v4464_v11 = vadd.f32 %v4423_v53, %v4422_v59  ;;  %v4512_v5 = vmul.f32 %v4423_v53, %v4171_v39  ;;  %v4172_v35 = vadd.f32 %v4164_v40, %v3779_v25  ;;  %v3557_v10 = vpop.f32.mrf.mxu1  ;;  %v3942_v55 = vpop.f32.mrf.mxu0  ;;  %v3781_v33 = vadd.f32 %v3769_v48, %v8538_v37  ;;  %v9427_v48 = vld [vmem:[#allocation13_spill] sm:$0xff] }
 0x3ba   : > { %v4091_v38 = vrot.slane %v3942_v55, 3  ;;  %v3700_v22 = vrot.slane %v3557_v10, 2 }
 0x3bb   : > { %v4553_v24 = vadd.f32 %v4512_v5, %v4511_v43  ;;  %v4424_v19 = vmul.f32 %v4172_v35, %v9425_v17  ;;  %v6209_v26 = vpop.f32.mrf.mxu1  ;;  %v6305_v41 = vpop.f32.mrf.mxu0 }
 0x3bc   : > { %v4163_v2 = vsel %vm4127_vm6, %v4090_v29, %v4091_v38  ;;  %v9426_v26 = vld [vmem:[#allocation7_spill] sm:$0xff]  ;;  %v3768_v51 = vsel %vm3734_vm5, %v3699_v27, %v3700_v22 }
 0x3bd   : > { %v4465_v52 = vadd.f32 %v4464_v11, %v4424_v19  ;;  %v4513_v59 = vmul.f32 %v4424_v19, %v4172_v35  ;;  %v4173_v39 = vadd.f32 %v4163_v2, %v3780_v32  ;;  %v3560_v25 = vpop.f32.mrf.mxu1  ;;  %v3945_v55 = vpop.f32.mrf.mxu0 }
 0x3be   : > { %v4092_v1 = vrot.slane %v3945_v55, 3  ;;  %v3701_v5 = vrot.slane %v3560_v25, 2 }
 0x3bf   : > { %v4554_v43 = vadd.f32 %v4553_v24, %v4513_v59  ;;  %v5077_v53 = vpack.c.bf16 %v4173_v39, %v4172_v35  ;;  %v4425_v41 = vmul.f32 %v4173_v39, %v9426_v26  ;;  %v6210_v36 = vpop.f32.mrf.mxu1  ;;  %v6306_v40 = vpop.f32.mrf.mxu0  ;;  %v3782_v35 = vadd.f32 %v3768_v51, %v8551_v3 }
 0x3c0   : > { %v4162_v29 = vsel %vm4127_vm6, %v4091_v38, %v4092_v1  ;;  %v3767_v27 = vsel %vm3734_vm5, %v3700_v22, %v3701_v5  ;;  %v9428_v40 = vld [vmem:[#allocation12_spill] sm:$0xff] }
 0x3c1   : > { %5194 = vst [vmem:[%s8895_s29 + $0x8] sm:$0xff] %v5077_v53   ;;  %v4466_v11 = vadd.f32 %v4465_v52, %v4425_v41  ;;  %v4514_v10 = vmul.f32 %v4425_v41, %v4173_v39  ;;  %v4174_v32 = vadd.f32 %v4162_v29, %v3781_v33  ;;  %v3565_v17 = vpop.f32.mrf.mxu1  ;;  %v3950_v19 = vpop.f32.mrf.mxu0  ;;  %v3783_v3 = vadd.f32 %v3767_v27, %v8558_v16 }
 0x3c2   : > { %v4093_v37 = vrot.slane %v3950_v19, 3  ;;  %v3702_v25 = vrot.slane %v3565_v17, 2 }
 0x3c3   : > { %v4555_v24 = vadd.f32 %v4554_v43, %v4514_v10  ;;  %v4426_v2 = vmul.f32 %v4174_v32, %v9427_v48  ;;  %v6213_v59 = vpop.f32.mrf.mxu1  ;;  %v6309_v55 = vpop.f32.mrf.mxu0 }
 0x3c4   : > { %v4161_v38 = vsel %vm4127_vm6, %v4092_v1, %v4093_v37  ;;  %v3766_v22 = vsel %vm3734_vm5, %v3701_v5, %v3702_v25  ;;  %v9429_v59 = vld [vmem:[#allocation18_spill] sm:$0xff] }
 0x3c5   : > { %v4467_v52 = vadd.f32 %v4466_v11, %v4426_v2  ;;  %v4515_v39 = vmul.f32 %v4426_v2, %v4174_v32  ;;  %v4175_v33 = vadd.f32 %v4161_v38, %v3782_v35  ;;  %v3568_v53 = vpop.f32.mrf.mxu1  ;;  %v3953_v26 = vpop.f32.mrf.mxu0 }
 0x3c6   : > { %v4094_v41 = vrot.slane %v3953_v26, 3  ;;  %v3703_v17 = vrot.slane %v3568_v53, 2 }
 0x3c7   : > { %v4556_v43 = vadd.f32 %v4555_v24, %v4515_v39  ;;  %v5082_v36 = vpack.c.bf16 %v4175_v33, %v4174_v32  ;;  %v4427_v51 = vmul.f32 %v4175_v33, %v9428_v40  ;;  %v6214_v29 = vpop.f32.mrf.mxu1  ;;  %v6310_v10 = vpop.f32.mrf.mxu0  ;;  %v3784_v32 = vadd.f32 %v3766_v22, %v8571_v23 }
 0x3c8   : > { %v4160_v1 = vsel %vm4127_vm6, %v4093_v37, %v4094_v41  ;;  %v3765_v5 = vsel %vm3734_vm5, %v3702_v25, %v3703_v17 }
 0x3c9   : > { %5195 = vst [vmem:[%s8895_s29 + $0x10] sm:$0xff] %v5082_v36   ;;  %v4468_v11 = vadd.f32 %v4467_v52, %v4427_v51  ;;  %v4516_v19 = vmul.f32 %v4427_v51, %v4175_v33  ;;  %v4176_v35 = vadd.f32 %v4160_v1, %v3783_v3  ;;  %v3573_v48 = vpop.f32.mrf.mxu1  ;;  %v3958_v2 = vpop.f32.mrf.mxu0  ;;  %v3785_v23 = vadd.f32 %v3765_v5, %v8578_v14  ;;  %v9430_v51 = vld [vmem:[#allocation17_spill] sm:$0xff] }
 0x3ca   : > { %v4095_v16 = vrot.slane %v3958_v2, 3  ;;  %v3704_v39 = vrot.slane %v3573_v48, 2 }
 0x3cb   : > { %v4557_v24 = vadd.f32 %v4556_v43, %v4516_v19  ;;  %v4428_v55 = vmul.f32 %v4176_v35, %v9429_v59  ;;  %v6217_v27 = vpop.f32.mrf.mxu1  ;;  %v6313_v38 = vpop.f32.mrf.mxu0  ;;  %v9431_v59 = vld [vmem:[#allocation23_spill] sm:$0xff] }
 0x3cc   : > { %v4159_v37 = vsel %vm4127_vm6, %v4094_v41, %v4095_v16  ;;  %v3764_v25 = vsel %vm3734_vm5, %v3703_v17, %v3704_v39 }
 0x3cd   : > { %v4469_v52 = vadd.f32 %v4468_v11, %v4428_v55  ;;  %v4517_v33 = vmul.f32 %v4428_v55, %v4176_v35  ;;  %v4177_v53 = vadd.f32 %v4159_v37, %v3784_v32  ;;  %v3576_v26 = vpop.f32.mrf.mxu1  ;;  %v3961_v3 = vpop.f32.mrf.mxu0 }
 0x3ce   : > { %v4096_v36 = vrot.slane %v3961_v3, 3  ;;  %v3705_v1 = vrot.slane %v3576_v26, 2 }
 0x3cf   : > { %v4558_v43 = vadd.f32 %v4557_v24, %v4517_v33  ;;  %v5087_v40 = vpack.c.bf16 %v4177_v53, %v4176_v35  ;;  %v4429_v29 = vmul.f32 %v4177_v53, %v9430_v51  ;;  %v6218_v10 = vpop.f32.mrf.mxu1  ;;  %v6314_v22 = vpop.f32.mrf.mxu0  ;;  %v3786_v35 = vadd.f32 %v3764_v25, %v8591_v8 }
 0x3d0   : > { %v4158_v41 = vsel %vm4127_vm6, %v4095_v16, %v4096_v36  ;;  %v3763_v17 = vsel %vm3734_vm5, %v3704_v39, %v3705_v1 }
 0x3d1   : > { %5196 = vst [vmem:[%s8895_s29 + $0x18] sm:$0xff] %v5087_v40   ;;  %v4470_v11 = vadd.f32 %v4469_v52, %v4429_v29  ;;  %v4518_v19 = vmul.f32 %v4429_v29, %v4177_v53  ;;  %v4178_v48 = vadd.f32 %v4158_v41, %v3785_v23  ;;  %v3581_v2 = vpop.f32.mrf.mxu1  ;;  %v3966_v32 = vpop.f32.mrf.mxu0  ;;  %v3787_v8 = vadd.f32 %v3763_v17, %v8598_v54  ;;  %v9432_v40 = vld [vmem:[#allocation22_spill] sm:$0xff] }
 0x3d2   : > { %v4097_v14 = vrot.slane %v3966_v32, 3  ;;  %v3706_v5 = vrot.slane %v3581_v2, 2 }
 0x3d3   : > { %v4559_v24 = vadd.f32 %v4558_v43, %v4518_v19  ;;  %v4430_v55 = vmul.f32 %v4178_v48, %v9431_v59  ;;  %v6221_v27 = vpop.f32.mrf.mxu1  ;;  %v6317_v38 = vpop.f32.mrf.mxu0 }
 0x3d4   : > { %v4157_v16 = vsel %vm4127_vm6, %v4096_v36, %v4097_v14  ;;  %v3762_v39 = vsel %vm3734_vm5, %v3705_v1, %v3706_v5 }
 0x3d5   : > { %v4471_v37 = vadd.f32 %v4470_v11, %v4430_v55  ;;  %v4519_v52 = vmul.f32 %v4430_v55, %v4178_v48  ;;  %v4179_v33 = vadd.f32 %v4157_v16, %v3786_v35  ;;  %v3584_v53 = vpop.f32.mrf.mxu1  ;;  %v3969_v26 = vpop.f32.mrf.mxu0  ;;  %v9433_v35 = vld [vmem:[#allocation28_spill] sm:$0xff] }
 0x3d6   : > { %v4098_v3 = vrot.slane %v3969_v26, 3  ;;  %v3707_v22 = vrot.slane %v3584_v53, 2 }
 0x3d7   : > { %v4560_v23 = vadd.f32 %v4559_v24, %v4519_v52  ;;  %v5092_v43 = vpack.c.bf16 %v4179_v33, %v4178_v48  ;;  %v4431_v51 = vmul.f32 %v4179_v33, %v9432_v40  ;;  %v6222_v29 = vpop.f32.mrf.mxu1  ;;  %v6318_v10 = vpop.f32.mrf.mxu0  ;;  %v3788_v48 = vadd.f32 %v3762_v39, %v8611_v4 }
 0x3d8   : > { %v4156_v36 = vsel %vm4127_vm6, %v4097_v14, %v4098_v3  ;;  %v3761_v1 = vsel %vm3734_vm5, %v3706_v5, %v3707_v22 }
 0x3d9   : > { %5197 = vst [vmem:[%s8895_s29 + $0x20] sm:$0xff] %v5092_v43   ;;  %v4472_v25 = vadd.f32 %v4471_v37, %v4431_v51  ;;  %v4520_v41 = vmul.f32 %v4431_v51, %v4179_v33  ;;  %v4180_v11 = vadd.f32 %v4156_v36, %v3787_v8  ;;  %v3589_v19 = vpop.f32.mrf.mxu1  ;;  %v3974_v2 = vpop.f32.mrf.mxu0  ;;  %v3789_v4 = vadd.f32 %v3761_v1, %v8618_v31  ;;  %v9434_v8 = vld [vmem:[#allocation27_spill] sm:$0xff] }
 0x3da   : > { %v4099_v54 = vrot.slane %v3974_v2, 3  ;;  %v3708_v27 = vrot.slane %v3589_v19, 2  ;;  %v9435_v19 = vld [vmem:[#allocation32_spill] sm:$0xff] }
 0x3db   : > { %v4561_v32 = vadd.f32 %v4560_v23, %v4520_v41  ;;  %v4432_v24 = vmul.f32 %v4180_v11, %v9433_v35  ;;  %v6225_v59 = vpop.f32.mrf.mxu1  ;;  %v6321_v55 = vpop.f32.mrf.mxu0 }
 0x3dc   : > { %v4155_v14 = vsel %vm4127_vm6, %v4098_v3, %v4099_v54  ;;  %v3760_v5 = vsel %vm3734_vm5, %v3707_v22, %v3708_v27 }
 0x3dd   : > { %v4473_v38 = vadd.f32 %v4472_v25, %v4432_v24  ;;  %v4521_v17 = vmul.f32 %v4432_v24, %v4180_v11  ;;  %v4181_v16 = vadd.f32 %v4155_v14, %v3788_v48  ;;  %v3592_v37 = vpop.f32.mrf.mxu1  ;;  %v3977_v52 = vpop.f32.mrf.mxu0  ;;  %v3790_v41 = vadd.f32 %v3760_v5, %v8631_v61 }
 0x3de   : > { %v4100_v33 = vrot.slane %v3977_v52, 3  ;;  %v3709_v51 = vrot.slane %v3592_v37, 2  ;;  %v9436_v37 = vld [vmem:[#allocation31_spill] sm:$0xff] }
 0x3df   : > { %v4562_v53 = vadd.f32 %v4561_v32, %v4521_v17  ;;  %v5097_v26 = vpack.c.bf16 %v4181_v16, %v4180_v11  ;;  %v4433_v23 = vmul.f32 %v4181_v16, %v9434_v8  ;;  %v6226_v43 = vpop.f32.mrf.mxu1  ;;  %v6322_v40 = vpop.f32.mrf.mxu0 }
 0x3e0   : > { %v4154_v3 = vsel %vm4127_vm6, %v4099_v54, %v4100_v33  ;;  %v3759_v22 = vsel %vm3734_vm5, %v3708_v27, %v3709_v51 }
 0x3e1   : > { %5198 = vst [vmem:[%s8895_s29 + $0x28] sm:$0xff] %v5097_v26   ;;  %v4474_v29 = vadd.f32 %v4473_v38, %v4433_v23  ;;  %v4522_v10 = vmul.f32 %v4433_v23, %v4181_v16  ;;  %v4182_v39 = vadd.f32 %v4154_v3, %v3789_v4  ;;  %v3597_v36 = vpop.f32.mrf.mxu1  ;;  %v3982_v25 = vpop.f32.mrf.mxu0  ;;  %v3791_v61 = vadd.f32 %v3759_v22, %v8638_v60 }
 0x3e2   : > { %v4101_v31 = vrot.slane %v3982_v25, 3  ;;  %v3710_v35 = vrot.slane %v3597_v36, 2 }
 0x3e3   : > { %v4563_v11 = vadd.f32 %v4562_v53, %v4522_v10  ;;  %v4434_v2 = vmul.f32 %v4182_v39, %v9435_v19  ;;  %v6229_v48 = vpop.f32.mrf.mxu1  ;;  %v6325_v32 = vpop.f32.mrf.mxu0  ;;  %v9437_v10 = vld [vmem:[#allocation36_spill] sm:$0xff] }
 0x3e4   : > { %v4153_v54 = vsel %vm4127_vm6, %v4100_v33, %v4101_v31  ;;  %v3758_v27 = vsel %vm3734_vm5, %v3709_v51, %v3710_v35 }
 0x3e5   : > { %v4475_v24 = vadd.f32 %v4474_v29, %v4434_v2  ;;  %v4523_v59 = vmul.f32 %v4434_v2, %v4182_v39  ;;  %v4183_v55 = vadd.f32 %v4153_v54, %v3790_v41  ;;  %v3600_v1 = vpop.f32.mrf.mxu1  ;;  %v3985_v14 = vpop.f32.mrf.mxu0  ;;  %v3792_v3 = vadd.f32 %v3758_v27, %v8651_v18 }
 0x3e6   : > { %v4102_v38 = vrot.slane %v3985_v14, 3  ;;  %v3711_v26 = vrot.slane %v3600_v1, 2 }
 0x3e7   : > { %v4564_v17 = vadd.f32 %v4563_v11, %v4523_v59  ;;  %v5102_v16 = vpack.c.bf16 %v4183_v55, %v4182_v39  ;;  %v4435_v52 = vmul.f32 %v4183_v55, %v9436_v37  ;;  %v6230_v4 = vpop.f32.mrf.mxu1  ;;  %v6326_v53 = vpop.f32.mrf.mxu0  ;;  %v9438_v59 = vld [vmem:[#allocation35_spill] sm:$0xff] }
 0x3e8   : > { %v4152_v33 = vsel %vm4127_vm6, %v4101_v31, %v4102_v38  ;;  %v3757_v51 = vsel %vm3734_vm5, %v3710_v35, %v3711_v26 }
 0x3e9   : > { %5199 = vst [vmem:[%s8895_s29 + $0x30] sm:$0xff] %v5102_v16   ;;  %v4476_v8 = vadd.f32 %v4475_v24, %v4435_v52  ;;  %v4524_v23 = vmul.f32 %v4435_v52, %v4183_v55  ;;  %v4184_v43 = vadd.f32 %v4152_v33, %v3791_v61  ;;  %v3605_v40 = vpop.f32.mrf.mxu1  ;;  %v3990_v5 = vpop.f32.mrf.mxu0  ;;  %v3793_v18 = vadd.f32 %v3757_v51, %v8658_v47  ;;  %v9439_v33 = vld [vmem:[#allocation40_spill] sm:$0xff] }
 0x3ea   : > { %v4103_v60 = vrot.slane %v3990_v5, 3  ;;  %v3712_v41 = vrot.slane %v3605_v40, 2 }
 0x3eb   : > { %v4565_v29 = vadd.f32 %v4564_v17, %v4524_v23  ;;  %v4436_v39 = vmul.f32 %v4184_v43, %v9437_v10  ;;  %v6233_v36 = vpop.f32.mrf.mxu1  ;;  %v6329_v25 = vpop.f32.mrf.mxu0 }
 0x3ec   : > { %v4151_v31 = vsel %vm4127_vm6, %v4102_v38, %v4103_v60  ;;  %v3756_v35 = vsel %vm3734_vm5, %v3711_v26, %v3712_v41 }
 0x3ed   : > { %v4477_v11 = vadd.f32 %v4476_v8, %v4436_v39  ;;  %v4525_v19 = vmul.f32 %v4436_v39, %v4184_v43  ;;  %v4185_v2 = vadd.f32 %v4151_v31, %v3792_v3  ;;  %v3608_v48 = vpop.f32.mrf.mxu1  ;;  %v3993_v32 = vpop.f32.mrf.mxu0  ;;  %v3794_v53 = vadd.f32 %v3756_v35, %v8671_v7  ;;  %v9440_v31 = vld [vmem:[#allocation39_spill] sm:$0xff] }
 0x3ee   : > { %v4104_v22 = vrot.slane %v3993_v32, 3  ;;  %v3713_v61 = vrot.slane %v3608_v48, 2 }
 0x3ef   : > { %v4566_v54 = vadd.f32 %v4565_v29, %v4525_v19  ;;  %v5107_v24 = vpack.c.bf16 %v4185_v2, %v4184_v43  ;;  %v4437_v55 = vmul.f32 %v4185_v2, %v9438_v59  ;;  %v6234_v1 = vpop.f32.mrf.mxu1  ;;  %v6330_v14 = vpop.f32.mrf.mxu0 }
 0x3f0   : > { %v4150_v38 = vsel %vm4127_vm6, %v4103_v60, %v4104_v22  ;;  %v3755_v26 = vsel %vm3734_vm5, %v3712_v41, %v3713_v61  ;;  %v9441_v14 = vld [vmem:[#allocation45_spill] sm:$0xff] }
 0x3f1   : > { %5200 = vst [vmem:[%s8895_s29 + $0x38] sm:$0xff] %v5107_v24   ;;  %v4478_v17 = vadd.f32 %v4477_v11, %v4437_v55  ;;  %v4526_v16 = vmul.f32 %v4437_v55, %v4185_v2  ;;  %v4186_v37 = vadd.f32 %v4150_v38, %v3793_v18  ;;  %v3613_v52 = vpop.f32.mrf.mxu1  ;;  %v3998_v4 = vpop.f32.mrf.mxu0  ;;  %v3795_v7 = vadd.f32 %v3755_v26, %v8678_v45 }
 0x3f2   : > { %v4105_v47 = vrot.slane %v3998_v4, 3  ;;  %v3714_v40 = vrot.slane %v3613_v52, 2 }
 0x3f3   : > { %v4567_v27 = vadd.f32 %v4566_v54, %v4526_v16  ;;  %v4438_v8 = vmul.f32 %v4186_v37, %v9439_v33  ;;  %v6237_v23 = vpop.f32.mrf.mxu1  ;;  %v6333_v43 = vpop.f32.mrf.mxu0 }
 0x3f4   : > { %v4149_v5 = vsel %vm4127_vm6, %v4104_v22, %v4105_v47  ;;  %v3754_v41 = vsel %vm3734_vm5, %v3713_v61, %v3714_v40  ;;  %v9442_v43 = vld [vmem:[#allocation44_spill] sm:$0xff] }
 0x3f5   : > { %v4479_v60 = vadd.f32 %v4478_v17, %v4438_v8  ;;  %v4527_v3 = vmul.f32 %v4438_v8, %v4186_v37  ;;  %v4187_v29 = vadd.f32 %v4149_v5, %v3794_v53  ;;  %v3616_v10 = vpop.f32.mrf.mxu1  ;;  %v4001_v39 = vpop.f32.mrf.mxu0  ;;  %v3796_v55 = vadd.f32 %v3754_v41, %v8691_v13 }
 0x3f6   : > { %v4106_v36 = vrot.slane %v4001_v39, 3  ;;  %v3715_v48 = vrot.slane %v3616_v10, 2 }
 0x3f7   : > { %v4568_v25 = vadd.f32 %v4567_v27, %v4527_v3  ;;  %v5112_v51 = vpack.c.bf16 %v4187_v29, %v4186_v37  ;;  %v4439_v11 = vmul.f32 %v4187_v29, %v9440_v31  ;;  %v6238_v19 = vpop.f32.mrf.mxu1  ;;  %v6334_v2 = vpop.f32.mrf.mxu0 }
 0x3f8   : > { %v4148_v32 = vsel %vm4127_vm6, %v4105_v47, %v4106_v36  ;;  %v3753_v61 = vsel %vm3734_vm5, %v3714_v40, %v3715_v48 }
 0x3f9   : > { %5201 = vst [vmem:[%s8895_s29 + $0x40] sm:$0xff] %v5112_v51   ;;  %v4480_v22 = vadd.f32 %v4479_v60, %v4439_v11  ;;  %v4528_v18 = vmul.f32 %v4439_v11, %v4187_v29  ;;  %v4188_v54 = vadd.f32 %v4148_v32, %v3795_v7  ;;  %v3621_v24 = vpop.f32.mrf.mxu1  ;;  %v4006_v59 = vpop.f32.mrf.mxu0  ;;  %v3797_v13 = vadd.f32 %v3753_v61, %v8698_v34  ;;  %v9443_v11 = vld [vmem:[#allocation50_spill] sm:$0xff] }
 0x3fa   : > { %v4107_v45 = vrot.slane %v4006_v59, 3  ;;  %v3716_v16 = vrot.slane %v3621_v24, 2 }
 0x3fb   : > { %v4569_v1 = vadd.f32 %v4568_v25, %v4528_v18  ;;  %v4440_v35 = vmul.f32 %v4188_v54, %v9441_v14  ;;  %v6241_v38 = vpop.f32.mrf.mxu1  ;;  %v6337_v17 = vpop.f32.mrf.mxu0 }
 0x3fc   : > { %v4147_v37 = vsel %vm4127_vm6, %v4106_v36, %v4107_v45  ;;  %v3752_v40 = vsel %vm3734_vm5, %v3715_v48, %v3716_v16 }
 0x3fd   : > { %v4481_v52 = vadd.f32 %v4480_v22, %v4440_v35  ;;  %v4529_v4 = vmul.f32 %v4440_v35, %v4188_v54  ;;  %v4189_v47 = vadd.f32 %v4147_v37, %v3796_v55  ;;  %v3624_v53 = vpop.f32.mrf.mxu1  ;;  %v4009_v27 = vpop.f32.mrf.mxu0  ;;  %v3798_v51 = vadd.f32 %v3752_v40, %v8711_v0  ;;  %v9444_v35 = vld [vmem:[#allocation49_spill] sm:$0xff] }
 0x3fe   : > { %v4108_v33 = vrot.slane %v4009_v27, 3  ;;  %v3717_v3 = vrot.slane %v3624_v53, 2 }
 0x3ff   : > { %v4570_v8 = vadd.f32 %v4569_v1, %v4529_v4  ;;  %v5117_v23 = vpack.c.bf16 %v4189_v47, %v4188_v54  ;;  %v4441_v26 = vmul.f32 %v4189_v47, %v9442_v43  ;;  %v6242_v5 = vpop.f32.mrf.mxu1  ;;  %v6338_v60 = vpop.f32.mrf.mxu0 }
 0x400   : > { %v4146_v29 = vsel %vm4127_vm6, %v4107_v45, %v4108_v33  ;;  %v3751_v48 = vsel %vm3734_vm5, %v3716_v16, %v3717_v3 }
 0x401   : > { %5202 = vst [vmem:[%s8895_s29 + $0x48] sm:$0xff] %v5117_v23   ;;  %v4482_v10 = vadd.f32 %v4481_v52, %v4441_v26  ;;  %v4530_v39 = vmul.f32 %v4441_v26, %v4189_v47  ;;  %v4190_v36 = vadd.f32 %v4146_v29, %v3797_v13  ;;  %v3629_v7 = vpop.f32.mrf.mxu1  ;;  %v4014_v25 = vpop.f32.mrf.mxu0  ;;  %v3799_v0 = vadd.f32 %v3751_v48, %v8718_v42  ;;  %v9445_v23 = vld [vmem:[#allocation2_spill] sm:$0xff] }
 0x402   : > { %v4109_v34 = vrot.slane %v4014_v25, 3  ;;  %v3718_v32 = vrot.slane %v3629_v7, 2 }
 0x403   : > { %v4571_v31 = vadd.f32 %v4570_v8, %v4530_v39  ;;  %v4442_v19 = vmul.f32 %v4190_v36, %v9443_v11  ;;  %v6245_v2 = vpop.f32.mrf.mxu1  ;;  %v6341_v41 = vpop.f32.mrf.mxu0 }
 0x404   : > { %v4145_v22 = vsel %vm4127_vm6, %v4108_v33, %v4109_v34  ;;  %v3750_v16 = vsel %vm3734_vm5, %v3717_v3, %v3718_v32 }
 0x405   : > { %v4483_v18 = vadd.f32 %v4482_v10, %v4442_v19  ;;  %v4531_v54 = vmul.f32 %v4442_v19, %v4190_v36  ;;  %v4191_v24 = vadd.f32 %v4145_v22, %v3798_v51  ;;  %v3632_v59 = vpop.f32.mrf.mxu1  ;;  %v4017_v45 = vpop.f32.mrf.mxu0  ;;  %v3800_v13 = vadd.f32 %v3750_v16, %v8731_v9 }
 0x406   : > { %v4110_v55 = vrot.slane %v4017_v45, 3  ;;  %v3719_v37 = vrot.slane %v3632_v59, 2 }
 0x407   : > { %v4572_v1 = vadd.f32 %v4571_v31, %v4531_v54  ;;  %v5122_v14 = vpack.c.bf16 %v4191_v24, %v4190_v36  ;;  %v4443_v38 = vmul.f32 %v4191_v24, %v9444_v35  ;;  %v6246_v17 = vpop.f32.mrf.mxu1  ;;  %v6342_v61 = vpop.f32.mrf.mxu0  ;;  %v9446_v31 = vld [vmem:[#allocation4_spill] sm:$0xff] }
 0x408   : > { %v4144_v52 = vsel %vm4127_vm6, %v4109_v34, %v4110_v55  ;;  %v3749_v60 = vsel %vm3734_vm5, %v3718_v32, %v3719_v37 }
 0x409   : > { %5203 = vst [vmem:[%s8895_s29 + $0x50] sm:$0xff] %v5122_v14   ;;  %v4484_v4 = vadd.f32 %v4483_v18, %v4443_v38  ;;  %v4532_v47 = vmul.f32 %v4443_v38, %v4191_v24  ;;  %v4192_v53 = vadd.f32 %v4144_v52, %v3799_v0  ;;  %v3637_v27 = vpop.f32.mrf.mxu1  ;;  %v4022_v33 = vpop.f32.mrf.mxu0  ;;  %v3801_v9 = vadd.f32 %v3749_v60, %v8738_v58  ;;  %v9447_v0 = vld [vmem:[#allocation10_spill] sm:$0xff] }
 0x40a   : > { %v4111_v42 = vrot.slane %v4022_v33, 3  ;;  %v3720_v40 = vrot.slane %v3637_v27, 2 }
 0x40b   : > { %v4573_v8 = vadd.f32 %v4572_v1, %v4532_v47  ;;  %v4444_v43 = vmul.f32 %v4192_v53, %v9445_v23  ;;  %v6249_v26 = vpop.f32.mrf.mxu1  ;;  %v6345_v5 = vpop.f32.mrf.mxu0 }
 0x40c   : > { %v4143_v3 = vsel %vm4127_vm6, %v4110_v55, %v4111_v42  ;;  %v3748_v41 = vsel %vm3734_vm5, %v3719_v37, %v3720_v40 }
 0x40d   : > { %v4485_v29 = vadd.f32 %v4484_v4, %v4444_v43  ;;  %v4533_v10 = vmul.f32 %v4444_v43, %v4192_v53  ;;  %v4193_v39 = vadd.f32 %v4143_v3, %v3800_v13  ;;  %v3640_v36 = vpop.f32.mrf.mxu1  ;;  %v4025_v7 = vpop.f32.mrf.mxu0  ;;  %v3802_v45 = vadd.f32 %v3748_v41, %v8751_v44 }
 0x40e   : > { %v4112_v25 = vrot.slane %v4025_v7, 3  ;;  %v3721_v48 = vrot.slane %v3640_v36, 2  ;;  %v9449_v7 = vld [vmem:[#allocation15_spill] sm:$0xff] }
 0x40f   : > { %v4574_v34 = vadd.f32 %v4573_v8, %v4533_v10  ;;  %v5127_v51 = vpack.c.bf16 %v4193_v39, %v4192_v53  ;;  %v4445_v11 = vmul.f32 %v4193_v39, %v9446_v31  ;;  %v6250_v19 = vpop.f32.mrf.mxu1  ;;  %v6346_v2 = vpop.f32.mrf.mxu0 }
 0x410   : > { %v4142_v32 = vsel %vm4127_vm6, %v4111_v42, %v4112_v25  ;;  %v3747_v38 = vsel %vm3734_vm5, %v3720_v40, %v3721_v48  ;;  %v9448_v42 = vld [vmem:[#allocation9_spill] sm:$0xff] }
 0x411   : > { %5204 = vst [vmem:[%s8895_s29 + $0x58] sm:$0xff] %v5127_v51   ;;  %v4486_v22 = vadd.f32 %v4485_v29, %v4445_v11  ;;  %v4534_v18 = vmul.f32 %v4445_v11, %v4193_v39  ;;  %v4194_v54 = vadd.f32 %v4142_v32, %v3801_v9  ;;  %v3645_v24 = vpop.f32.mrf.mxu1  ;;  %v4030_v59 = vpop.f32.mrf.mxu0  ;;  %v3803_v44 = vadd.f32 %v3747_v38, %v8758_v21 }
 0x412   : > { %v4113_v58 = vrot.slane %v4030_v59, 3  ;;  %v3722_v17 = vrot.slane %v3645_v24, 2  ;;  %v9450_v24 = vld [vmem:[#allocation14_spill] sm:$0xff] }
 0x413   : > { %v4575_v55 = vadd.f32 %v4574_v34, %v4534_v18  ;;  %v4446_v1 = vmul.f32 %v4194_v54, %v9447_v0  ;;  %v6253_v14 = vpop.f32.mrf.mxu1  ;;  %v6349_v35 = vpop.f32.mrf.mxu0 }
 0x414   : > { %v4141_v61 = vsel %vm4127_vm6, %v4112_v25, %v4113_v58  ;;  %v3746_v43 = vsel %vm3734_vm5, %v3721_v48, %v3722_v17 }
 0x415   : > { %v4487_v16 = vadd.f32 %v4486_v22, %v4446_v1  ;;  %v4535_v37 = vmul.f32 %v4446_v1, %v4194_v54  ;;  %v4195_v52 = vadd.f32 %v4141_v61, %v3802_v45  ;;  %v3648_v4 = vpop.f32.mrf.mxu1  ;;  %v4033_v47 = vpop.f32.mrf.mxu0  ;;  %v3804_v39 = vadd.f32 %v3746_v43, %v8771_v20 }
 0x416   : > { %v4114_v53 = vrot.slane %v4033_v47, 3  ;;  %v3723_v26 = vrot.slane %v3648_v4, 2 }
 0x417   : > { %v4576_v27 = vadd.f32 %v4575_v55, %v4535_v37  ;;  %v5132_v33 = vpack.c.bf16 %v4195_v52, %v4194_v54  ;;  %v4447_v13 = vmul.f32 %v4195_v52, %v9448_v42  ;;  %v6254_v8 = vpop.f32.mrf.mxu1  ;;  %v6350_v23 = vpop.f32.mrf.mxu0 }
 0x418   : > { %v4140_v5 = vsel %vm4127_vm6, %v4113_v58, %v4114_v53  ;;  %v3745_v51 = vsel %vm3734_vm5, %v3722_v17, %v3723_v26 }
 0x419   : > { %5205 = vst [vmem:[%s8895_s29 + $0x60] sm:$0xff] %v5132_v33   ;;  %v4488_v60 = vadd.f32 %v4487_v16, %v4447_v13  ;;  %v4536_v40 = vmul.f32 %v4447_v13, %v4195_v52  ;;  %v4196_v3 = vadd.f32 %v4140_v5, %v3803_v44  ;;  %v3653_v29 = vpop.f32.mrf.mxu1  ;;  %v4038_v10 = vpop.f32.mrf.mxu0  ;;  %v3805_v20 = vadd.f32 %v3745_v51, %v8778_v6  ;;  %v9451_v52 = vld [vmem:[#allocation20_spill] sm:$0xff] }
 0x41a   : > { %v4115_v21 = vrot.slane %v4038_v10, 3  ;;  %v3724_v31 = vrot.slane %v3653_v29, 2 }
 0x41b   : > { %v4577_v36 = vadd.f32 %v4576_v27, %v4536_v40  ;;  %v4448_v25 = vmul.f32 %v4196_v3, %v9449_v7  ;;  %v6257_v9 = vpop.f32.mrf.mxu1  ;;  %v6353_v34 = vpop.f32.mrf.mxu0  ;;  %v9452_v40 = vld [vmem:[#allocation19_spill] sm:$0xff] }
 0x41c   : > { %v4139_v11 = vsel %vm4127_vm6, %v4114_v53, %v4115_v21  ;;  %v3744_v55 = vsel %vm3734_vm5, %v3723_v26, %v3724_v31 }
 0x41d   : > { %v4489_v19 = vadd.f32 %v4488_v60, %v4448_v25  ;;  %v4537_v2 = vmul.f32 %v4448_v25, %v4196_v3  ;;  %v4197_v41 = vadd.f32 %v4139_v11, %v3804_v39  ;;  %v3656_v48 = vpop.f32.mrf.mxu1  ;;  %v4041_v32 = vpop.f32.mrf.mxu0  ;;  %v3806_v16 = vadd.f32 %v3744_v55, %v8789_v56 }
 0x41e   : > { %v4116_v22 = vrot.slane %v4041_v32, 3  ;;  %v3725_v0 = vrot.slane %v3656_v48, 2 }
 0x41f   : > { %v4578_v18 = vadd.f32 %v4577_v36, %v4537_v2  ;;  %v5137_v54 = vpack.c.bf16 %v4197_v41, %v4196_v3  ;;  %v4449_v59 = vmul.f32 %v4197_v41, %v9450_v24  ;;  %v6258_v58 = vpop.f32.mrf.mxu1  ;;  %v6354_v45 = vpop.f32.mrf.mxu0 }
 0x420   : > { %v4138_v1 = vsel %vm4127_vm6, %v4115_v21, %v4116_v22  ;;  %v3743_v44 = vsel %vm3734_vm5, %v3724_v31, %v3725_v0 }
 0x421   : > { %5206 = vst [vmem:[%s8895_s29 + $0x68] sm:$0xff] %v5137_v54   ;;  %v4490_v14 = vadd.f32 %v4489_v19, %v4449_v59  ;;  %v4538_v35 = vmul.f32 %v4449_v59, %v4197_v41  ;;  %v4198_v38 = vadd.f32 %v4138_v1, %v3805_v20  ;;  %v3661_v17 = vpop.f32.mrf.mxu1  ;;  %v4046_v61 = vpop.f32.mrf.mxu0  ;;  %v3807_v56 = vadd.f32 %v3743_v44, %v8796_v12  ;;  %v9453_v19 = vld [vmem:[#allocation25_spill] sm:$0xff]  ;;  %v9454_v1 = vld [vmem:[#allocation24_spill] sm:$0xff] }
 0x422   : > { %v4117_v6 = vrot.slane %v4046_v61, 3  ;;  %v3726_v27 = vrot.slane %v3661_v17, 2 }
 0x423   : > { %v4579_v37 = vadd.f32 %v4578_v18, %v4538_v35  ;;  %v4450_v4 = vmul.f32 %v4198_v38, %v9451_v52  ;;  %v6261_v47 = vpop.f32.mrf.mxu1  ;;  %v6357_v53 = vpop.f32.mrf.mxu0 }
 0x424   : > { %v4137_v33 = vsel %vm4127_vm6, %v4116_v22, %v4117_v6  ;;  %v3742_v21 = vsel %vm3734_vm5, %v3725_v0, %v3726_v27 }
 0x425   : > { %v4491_v42 = vadd.f32 %v4490_v14, %v4450_v4  ;;  %v4539_v13 = vmul.f32 %v4450_v4, %v4198_v38  ;;  %v4199_v8 = vadd.f32 %v4137_v33, %v3806_v16  ;;  %v3664_v23 = vpop.f32.mrf.mxu1  ;;  %v4049_v43 = vpop.f32.mrf.mxu0  ;;  %v3808_v31 = vadd.f32 %v3742_v21, %v8804_v57  ;;  %v9456_v21 = vld [vmem:[#allocation29_spill] sm:$0xff] }
 0x426   : > { %v4118_v26 = vrot.slane %v4049_v43, 3  ;;  %v3727_v39 = vrot.slane %v3664_v23, 2 }
 0x427   : > { %v4580_v5 = vadd.f32 %v4579_v37, %v4539_v13  ;;  %v5142_v60 = vpack.c.bf16 %v4199_v8, %v4198_v38  ;;  %v4451_v3 = vmul.f32 %v4199_v8, %v9452_v40  ;;  %v6262_v29 = vpop.f32.mrf.mxu1  ;;  %v6358_v10 = vpop.f32.mrf.mxu0 }
 0x428   : > { %v4136_v36 = vsel %vm4127_vm6, %v4117_v6, %v4118_v26  ;;  %v3741_v32 = vsel %vm3734_vm5, %v3726_v27, %v3727_v39  ;;  %v9455_v27 = vld [vmem:[#allocation30_spill] sm:$0xff] }
 0x429   : > { %5207 = vst [vmem:[%s8895_s29 + $0x70] sm:$0xff] %v5142_v60   ;;  %v4492_v7 = vadd.f32 %v4491_v42, %v4451_v3  ;;  %v4540_v25 = vmul.f32 %v4451_v3, %v4199_v8  ;;  %v4200_v9 = vadd.f32 %v4136_v36, %v3807_v56  ;;  %v3669_v34 = vpop.f32.mrf.mxu1  ;;  %v4054_v51 = vpop.f32.mrf.mxu0  ;;  %v3809_v57 = vadd.f32 %v3741_v32, %v8811_v49 }
 0x42a   : > { %v4119_v12 = vrot.slane %v4054_v51, 3  ;;  %v3728_v22 = vrot.slane %v3669_v34, 2 }
 0x42b   : > { %v4581_v11 = vadd.f32 %v4580_v5, %v4540_v25  ;;  %v4452_v2 = vmul.f32 %v4200_v9, %v9453_v19  ;;  %v6265_v41 = vpop.f32.mrf.mxu1  ;;  %v6361_v48 = vpop.f32.mrf.mxu0 }
 0x42c   : > { %v4135_v20 = vsel %vm4127_vm6, %v4118_v26, %v4119_v12  ;;  %v3740_v17 = vsel %vm3734_vm5, %v3727_v39, %v3728_v22  ;;  %v9457_v48 = vld [vmem:[#allocation34_spill] sm:$0xff] }
 0x42d   : > { %v4493_v18 = vadd.f32 %v4492_v7, %v4452_v2  ;;  %v4541_v54 = vmul.f32 %v4452_v2, %v4200_v9  ;;  %v4201_v24 = vadd.f32 %v4135_v20, %v3808_v31  ;;  %v3672_v59 = vpop.f32.mrf.mxu1  ;;  %v4057_v58 = vpop.f32.mrf.mxu0  ;;  %v3810_v53 = vadd.f32 %v3740_v17, %v8818_v46 }
 0x42e   : > { %v4120_v45 = vrot.slane %v4057_v58, 3  ;;  %v3729_v61 = vrot.slane %v3672_v59, 2 }
 0x42f   : > { %v4582_v55 = vadd.f32 %v4581_v11, %v4541_v54  ;;  %v5147_v0 = vpack.c.bf16 %v4201_v24, %v4200_v9  ;;  %v4453_v14 = vmul.f32 %v4201_v24, %v9454_v1  ;;  %v6266_v35 = vpop.f32.mrf.mxu1  ;;  %v6362_v38 = vpop.f32.mrf.mxu0 }
 0x430   : > { %v4134_v6 = vsel %vm4127_vm6, %v4119_v12, %v4120_v45  ;;  %v3739_v8 = vsel %vm3734_vm5, %v3728_v22, %v3729_v61 }
 0x431   : > { %5208 = vst [vmem:[%s8895_s29 + $0x78] sm:$0xff] %v5147_v0   ;;  %v4494_v16 = vadd.f32 %v4493_v18, %v4453_v14  ;;  %v4542_v37 = vmul.f32 %v4453_v14, %v4201_v24  ;;  %v4202_v52 = vadd.f32 %v4134_v6, %v3809_v57  ;;  %v3677_v4 = vpop.f32.mrf.mxu1  ;;  %v4062_v47 = vpop.f32.mrf.mxu0  ;;  %v3811_v46 = vadd.f32 %v3739_v8, %v8825_v63  ;;  %v9458_v14 = vld [vmem:[#allocation33_spill] sm:$0xff]  ;;  %v9460_v8 = vld [vmem:[#allocation38_spill] sm:$0xff] }
 0x432   : > { %v4121_v49 = vrot.slane %v4062_v47, 3  ;;  %v3730_v23 = vrot.slane %v3677_v4, 2 }
 0x433   : > { %v4583_v44 = vadd.f32 %v4582_v55, %v4542_v37  ;;  %v4454_v33 = vmul.f32 %v4202_v52, %v9455_v27  ;;  %v6269_v42 = vpop.f32.mrf.mxu1  ;;  %v6365_v13 = vpop.f32.mrf.mxu0 }
 0x434   : > { %v4133_v43 = vsel %vm4127_vm6, %v4120_v45, %v4121_v49  ;;  %v3738_v25 = vsel %vm3734_vm5, %v3729_v61, %v3730_v23  ;;  %v9459_v42 = vrot.slane %v8847_v15, 2  ;;  %v9463_v15 = vld [vmem:[#allocation37_spill] sm:$0xff] }
 0x435   : > { %v4495_v26 = vadd.f32 %v4494_v16, %v4454_v33  ;;  %v4543_v56 = vmul.f32 %v4454_v33, %v4202_v52  ;;  %v4203_v5 = vadd.f32 %v4133_v43, %v3810_v53  ;;  %v3680_v60 = vpop.f32.mrf.mxu1  ;;  %v4065_v40 = vpop.f32.mrf.mxu0  ;;  %v3812_v2 = vadd.f32 %v3738_v25, %v8832_v28  ;;  %v9464_v25 = vld [vmem:[#allocation58_spill] sm:$0xff] }
 0x436   : > { %v4122_v3 = vrot.slane %v4065_v40, 3  ;;  %v3731_v12 = vrot.slane %v3680_v60, 2  ;;  %v9461_v40 = vld [vmem:[#allocation56_spill] sm:$0xff] }
 0x437   : > { %v4584_v29 = vadd.f32 %v4583_v44, %v4543_v56  ;;  %v5152_v10 = vpack.c.bf16 %v4203_v5, %v4202_v52  ;;  %v4455_v39 = vmul.f32 %v4203_v5, %v9456_v21  ;;  %v6270_v36 = vpop.f32.mrf.mxu1  ;;  %v6366_v7 = vpop.f32.mrf.mxu0 }
 0x438   : > { %v4132_v9 = vsel %vm4127_vm6, %v4121_v49, %v4122_v3  ;;  %v3737_v24 = vsel %vm3734_vm5, %v3730_v23, %v3731_v12 }
 0x439   : > { %5209 = vst [vmem:[%s8895_s29 + $0x80] sm:$0xff] %v5152_v10   ;;  %v4496_v34 = vadd.f32 %v4495_v26, %v4455_v39  ;;  %v4544_v51 = vmul.f32 %v4455_v39, %v4203_v5  ;;  %v4204_v31 = vadd.f32 %v4132_v9, %v3811_v46  ;;  %v3685_v11 = vpop.f32.mrf.mxu1  ;;  %v4070_v19 = vpop.f32.mrf.mxu0  ;;  %v3813_v61 = vadd.f32 %v3737_v24, %v8845_v30  ;;  %v9462_v46 = vld [vmem:[#allocation57_spill] sm:$0xff] }
 0x43a   : > { %v4123_v63 = vrot.slane %v4070_v19, 3  ;;  %v3732_v18 = vrot.slane %v3685_v11, 2  ;;  %v9465_v9 = vrot.slane %v9464_v25, 3 }
 0x43b   : > { %v4585_v41 = vadd.f32 %v4584_v29, %v4544_v51  ;;  %v4456_v32 = vmul.f32 %v4204_v31, %v9457_v48  ;;  %v6273_v22 = vpop.f32.mrf.mxu1  ;;  %v6369_v20 = vpop.f32.mrf.mxu0  ;;  %v9467_v48 = vld [vmem:[#allocation41_spill] sm:$0xff] }
 0x43c   : > { %v4131_v54 = vsel %vm4127_vm6, %v4122_v3, %v4123_v63  ;;  %v3736_v6 = vsel %vm3734_vm5, %v3731_v12, %v3732_v18  ;;  %v9468_v22 = vld [vmem:[#allocation47_spill] sm:$0xff]  ;;  %v9469_v20 = vld [vmem:[#allocation16_spill] sm:$0xff] }
 0x43d   : > { %v4497_v59 = vadd.f32 %v4496_v34, %v4456_v32  ;;  %v4545_v58 = vmul.f32 %v4456_v32, %v4204_v31  ;;  %v4205_v45 = vadd.f32 %v4131_v54, %v3812_v2  ;;  %v3688_v57 = vpop.f32.mrf.mxu1  ;;  %v4073_v55 = vpop.f32.mrf.mxu0  ;;  %v3814_v44 = vadd.f32 %v3736_v6, %v8856_v62  ;;  %v9466_v2 = vld [vmem:[#allocation42_spill] sm:$0xff] }
 0x43e   : > { %v4124_v0 = vrot.slane %v4073_v55, 3  ;;  %v3733_v16 = vrot.slane %v3688_v57, 2 }
 0x43f   : > { %v4586_v28 = vadd.f32 %v4585_v41, %v4545_v58  ;;  %v5157_v1 = vpack.c.bf16 %v4205_v45, %v4204_v31  ;;  %v4457_v35 = vmul.f32 %v4205_v45, %v9458_v14  ;;  %v6274_v38 = vpop.f32.mrf.mxu1  ;;  %v6370_v17 = vpop.f32.mrf.mxu0 }
 0x440   : > { %v4130_v37 = vsel %vm4127_vm6, %v4123_v63, %v4124_v0  ;;  %v3735_v30 = vsel %vm3734_vm5, %v3732_v18, %v3733_v16  ;;  %v3776_v13 = vsel %vm3734_vm5, %v3733_v16, %v9459_v42  ;;  %v4462_v18 = vmul.f32 %v9469_v20, %v9468_v22 }
 0x441   : > { %5210 = vst [vmem:[%s8895_s29 + $0x88] sm:$0xff] %v5157_v1   ;;  %v4498_v52 = vadd.f32 %v4497_v59, %v4457_v35  ;;  %v4546_v4 = vmul.f32 %v4457_v35, %v4205_v45  ;;  %v4078_v47 = vpop.f32.mrf.mxu0  ;;  %v4206_v49 = vadd.f32 %v4130_v37, %v3813_v61  ;;  %v3815_v3 = vadd.f32 %v3735_v30, %v9461_v40  ;;  %v9470_v59 = vld [vmem:[#allocation46_spill] sm:$0xff] }
 0x442   : > { %v4125_v53 = vrot.slane %v4078_v47, 3  ;;  %v3816_v29 = vadd.f32 %v3776_v13, %v9462_v46  ;;  %v4463_v58 = vmul.f32 %v9471_v50, %v9470_v59 }
 0x443   : > { %v4587_v27 = vadd.f32 %v4586_v28, %v4546_v4  ;;  %v6373_v33 = vpop.f32.mrf.mxu0  ;;  %v4458_v23 = vmul.f32 %v4206_v49, %v9460_v8 }
 0x444   : > { %v4129_v43 = vsel %vm4127_vm6, %v4124_v0, %v4125_v53  ;;  %v4551_v0 = vmul.f32 %v4462_v18, %v9469_v20  ;;  %v4552_v14 = vmul.f32 %v4463_v58, %v9471_v50 }
 0x445   : > { %v4207_v26 = vadd.f32 %v4129_v43, %v3814_v44  ;;  %v4081_v56 = vpop.f32.mrf.mxu0  ;;  %v4499_v5 = vadd.f32 %v4498_v52, %v4458_v23  ;;  %v4547_v62 = vmul.f32 %v4458_v23, %v4206_v49 }
 0x446   : > { %v4126_v60 = vrot.slane %v4081_v56, 3 }
 0x447   : > { %v5162_v10 = vpack.c.bf16 %v4207_v26, %v4206_v49  ;;  %v4459_v21 = vmul.f32 %v4207_v26, %v9463_v15  ;;  %v6374_v39 = vpop.f32.mrf.mxu0  ;;  %v4588_v36 = vadd.f32 %v4587_v27, %v4547_v62 }
 0x448   : > { %v4128_v7 = vsel %vm4127_vm6, %v4125_v53, %v4126_v60  ;;  %v4169_v34 = vsel %vm4127_vm6, %v4126_v60, %v9465_v9 }
 0x449   : > { %5211 = vst [vmem:[%s8895_s29 + $0x90] sm:$0xff] %v5162_v10   ;;  %v4500_v51 = vadd.f32 %v4499_v5, %v4459_v21  ;;  %v4548_v12 = vmul.f32 %v4459_v21, %v4207_v26  ;;  %v4208_v31 = vadd.f32 %v4128_v7, %v3815_v3  ;;  %v4209_v11 = vadd.f32 %v4169_v34, %v3816_v29 }
 0x44b   : > { %v4589_v19 = vadd.f32 %v4588_v36, %v4548_v12  ;;  %v5167_v63 = vpack.c.bf16 %v4209_v11, %v4208_v31  ;;  %v4460_v41 = vmul.f32 %v4208_v31, %v9466_v2  ;;  %v4461_v32 = vmul.f32 %v4209_v11, %v9467_v48 }
 0x44d   : > { %5212 = vst [vmem:[%s8895_s29 + $0x98] sm:$0xff] %v5167_v63   ;;  %v4501_v54 = vadd.f32 %v4500_v51, %v4460_v41  ;;  %v4549_v24 = vmul.f32 %v4460_v41, %v4208_v31  ;;  %v4550_v57 = vmul.f32 %v4461_v32, %v4209_v11 }
 0x44f   : > { %v4502_v45 = vadd.f32 %v4501_v54, %v4461_v32  ;;  %v4590_v55 = vadd.f32 %v4589_v19, %v4549_v24 }
 0x451   : > { %v4503_v28 = vadd.f32 %v4502_v45, %v4462_v18  ;;  %v4591_v1 = vadd.f32 %v4590_v55, %v4550_v57 }
 0x453   : > { %v4504_v35 = vadd.f32 %v4503_v28, %v4463_v58  ;;  %v4592_v38 = vadd.f32 %v4591_v1, %v4551_v0 }
 0x455   : > { %v4505_v17 = vrot.slane %v4504_v35, 4  ;;  %v4593_v61 = vadd.f32 %v4592_v38, %v4552_v14 }
 0x457   : > { %v4506_v6 = vadd.f32 %v4505_v17, %v4504_v35  ;;  %v4594_v16 = vrot.slane %v4593_v61, 4 }
 0x459   : > { %v4507_v37 = vrot.slane %v4506_v6, 2  ;;  %v4595_v52 = vadd.f32 %v4594_v16, %v4593_v61 }
 0x45b   : > { %v4508_v4 = vadd.f32 %v4507_v37, %v4506_v6  ;;  %v4596_v47 = vrot.slane %v4595_v52, 2 }
 0x45d   : > { %v4509_v49 = vrot.slane %v4508_v4, 1  ;;  %v4597_v53 = vadd.f32 %v4596_v47, %v4595_v52 }
 0x45f   : > { %v4598_v44 = vrot.slane %v4597_v53, 1  ;;  %v4510_v27 = vadd.f32 %v4509_v49, %v4508_v4 }
 0x461   : > { %v4599_v33 = vadd.f32 %v4598_v44, %v4597_v53 }
 0x463   : > { %v4601_v30 = vsel %vm4600_vm7, %v4510_v27, %v4599_v33 }
 0x464   : > { %4602 = vst [vmem:[%s262_s9] sm:$0x3] %v4601_v30 }
 0x465 PF: > { %s17_s21 = sadd.s32 1, %s6483_s21  }
 0x466   : > { %p14_p4 = scmp.ge.s32.totalorder %s17_s21, 4  }
 0x468   :  { %16 = sbr.rel (!%p14_p4) target bundleno = 1 (0x1), region = 90 }

</bundles_post_ra>
